<compile_context>
chip_gen: v7x
topology: tpu7x:2x2x1
jax: 0.10.0
libtpu: 0.0.40
codegen_flags: <defaults>
</compile_context>

<pallas_src>
import functools

import jax
import jax.numpy as jnp
from jax.experimental import pallas as pl
from jax.experimental.pallas import tpu as pltpu


# ------------------------------ Pallas kernels ------------------------------


def _conv_pool_kernel(p_ref, w_ref, b_ref, o_ref):
    """Fused conv-as-matmul + bias + ReLU + 2x2 max-pool.

    p_ref: (4, TM, K) bf16 -- im2col rows; leading axis = the 4 members of each
           2x2 pooling window, TM pooled-output rows per member.
    w_ref: (K, C) bf16, b_ref: (1, C) f32, o_ref: (TM, C) bf16.
    """
    w = w_ref[...]
    b = b_ref[...]

    def win(q):
        y = jnp.dot(p_ref[q], w, preferred_element_type=jnp.float32)
        return jnp.maximum(y + b, 0.0)

    pooled = jnp.maximum(jnp.maximum(win(0), win(1)),
                         jnp.maximum(win(2), win(3)))
    o_ref[...] = pooled.astype(o_ref.dtype)


def _conv2_pool_fc_kernel(p_ref, w2_ref, b2_ref, wf1_ref, bf1_ref,
                          wf2_ref, bf2_ref, wf3_ref, bf3_ref, o_ref, *, n):
    """conv2 + bias + ReLU + 2x2 max-pool + fc1 + fc2 + fc3, fully VMEM-resident.

    p_ref: (25, 4, N, 150) bf16 -- conv2 im2col rows indexed by
           (pooled output position p, pool-window member q, image n).
    Torch's (c, h, w) flatten is folded into wf1's (25, 16, 120) layout, so fc1
    is an accumulation over the 25 pooled positions (only 2-D dots, no in-kernel
    reshape/transpose/unaligned slicing).
    """
    w2 = w2_ref[...]
    b2 = b2_ref[...]
    acc = jnp.zeros((n, wf1_ref.shape[2]), jnp.float32)

    for p in range(25):
        def win(q, _p=p):
            y = jnp.dot(p_ref[_p, q], w2, preferred_element_type=jnp.float32)
            return jnp.maximum(y + b2, 0.0)

        pooled_p = jnp.maximum(jnp.maximum(win(0), win(1)),
                               jnp.maximum(win(2), win(3)))          # (N, 16)
        acc = acc + jnp.dot(pooled_p.astype(jnp.bfloat16), wf1_ref[p],
                            preferred_element_type=jnp.float32)

    h1 = jnp.maximum(acc + bf1_ref[...], 0.0).astype(jnp.bfloat16)
    h2 = jnp.dot(h1, wf2_ref[...], preferred_element_type=jnp.float32)
    h2 = jnp.maximum(h2 + bf2_ref[...], 0.0).astype(jnp.bfloat16)
    out = jnp.dot(h2, wf3_ref[...], preferred_element_type=jnp.float32)
    o_ref[...] = out + bf3_ref[...]


# ------------------------------ kernel wrappers ------------------------------


def _pick_row_tile(m, cap):
    """Largest 8-multiple divisor of m that is <= cap (else the full m)."""
    if m <= cap:
        return m
    for cand in range(cap - cap % 8, 7, -8):
        if m % cand == 0:
            return cand
    return m


def conv_pool_stage(p, w, b, *, tile_rows=512):
    """p: (4, M, K) pool-ordered patches, w: (K, C), b: (1, C) -> (M, C) bf16."""
    _, m, k = p.shape
    c = w.shape[1]
    tm = _pick_row_tile(m, tile_rows)
    return pl.pallas_call(
        _conv_pool_kernel,
        out_shape=jax.ShapeDtypeStruct((m, c), jnp.bfloat16),
        grid=(m // tm,),
        in_specs=[
            pl.BlockSpec((4, tm, k), lambda i: (0, i, 0)),
            pl.BlockSpec((k, c), lambda i: (0, 0)),
            pl.BlockSpec((1, c), lambda i: (0, 0)),
        ],
        out_specs=pl.BlockSpec((tm, c), lambda i: (i, 0)),
        compiler_params=pltpu.CompilerParams(
            dimension_semantics=("parallel",)),
    )(p, w, b)


def conv2_pool_fc_stage(p2, w2, b2, wf1, bf1, wf2, bf2, wf3, bf3):
    n = p2.shape[2]
    n_out = wf3.shape[1]

    def full_spec(a):
        nd = a.ndim
        return pl.BlockSpec(a.shape, lambda i, _nd=nd: (0,) * _nd)

    kernel = functools.partial(_conv2_pool_fc_kernel, n=n)
    return pl.pallas_call(
        kernel,
        out_shape=jax.ShapeDtypeStruct((n, n_out), jnp.float32),
        grid=(1,),
        in_specs=[full_spec(a) for a in
                  (p2, w2, b2, wf1, bf1, wf2, bf2, wf3, bf3)],
        out_specs=pl.BlockSpec((n, n_out), lambda i: (0, 0)),
        compiler_params=pltpu.CompilerParams(
            dimension_semantics=("arbitrary",)),
    )(p2, w2, b2, wf1, bf1, wf2, bf2, wf3, bf3)


# ------------------------------ XLA glue (jitted) ----------------------------


def _im2col_nhwc(x, k):
    """x: (n, h, w, c) -> (n, oh, ow, k*k*c), feature order (kh, kw, c)."""
    n, h, w, c = x.shape
    oh, ow = h - k + 1, w - k + 1
    cols = [x[:, i:i + oh, j:j + ow, :] for i in range(k) for j in range(k)]
    return jnp.concatenate(cols, axis=-1)


def _pool_ordered_patches_stage1(x_nhwc, k):
    """(4, n*oh2*ow2, K): leading axis = the 4 members of each 2x2 pool window,
    rows ordered (n, h2, w2)."""
    n = x_nhwc.shape[0]
    p = _im2col_nhwc(x_nhwc, k)                        # (n, oh, ow, K)
    _, oh, ow, K = p.shape
    p = p.reshape(n, oh // 2, 2, ow // 2, 2, K)        # (n, h2, di, w2, dj, K)
    p = p.transpose(2, 4, 0, 1, 3, 5)                  # (di, dj, n, h2, w2, K)
    return p.reshape(4, n * (oh // 2) * (ow // 2), K)


def _pool_ordered_patches_stage2(x_nhwc, k):
    """(oh2*ow2, 4, n, K): pooled output position, window member, image."""
    n = x_nhwc.shape[0]
    p = _im2col_nhwc(x_nhwc, k)                        # (n, oh, ow, K)
    _, oh, ow, K = p.shape
    p = p.reshape(n, oh // 2, 2, ow // 2, 2, K)        # (n, h2, di, w2, dj, K)
    p = p.transpose(1, 3, 2, 4, 0, 5)                  # (h2, w2, di, dj, n, K)
    return p.reshape((oh // 2) * (ow // 2), 4, n, K)


# ------------------------------ params / model -------------------------------


def init_params(key):
    ks = jax.random.split(key, 10)

    def u(k, shape, fan_in):
        bound = 1.0 / (fan_in ** 0.5)
        return jax.random.uniform(k, shape, jnp.float32, -bound, bound)

    return {
        # PyTorch conv weight layout: (out_c, in_c, kh, kw)
        "conv1_w": u(ks[0], (6, 3, 5, 5), 3 * 5 * 5),
        "conv1_b": u(ks[1], (6,), 3 * 5 * 5),
        "conv2_w": u(ks[2], (16, 6, 5, 5), 6 * 5 * 5),
        "conv2_b": u(ks[3], (16,), 6 * 5 * 5),
        # PyTorch linear weight layout: (out_features, in_features)
        "fc1_w": u(ks[4], (120, 16 * 5 * 5), 16 * 5 * 5),
        "fc1_b": u(ks[5], (120,), 16 * 5 * 5),
        "fc2_w": u(ks[6], (84, 120), 120),
        "fc2_b": u(ks[7], (84,), 120),
        "fc3_w": u(ks[8], (10, 84), 84),
        "fc3_b": u(ks[9], (10,), 84),
    }


def prepare_params(params):
    """One-time weight relayout (hoisted out of the per-forward path)."""
    bf16, f32 = jnp.bfloat16, jnp.float32
    w1 = params["conv1_w"].transpose(2, 3, 1, 0).reshape(75, 6).astype(bf16)
    w2 = params["conv2_w"].transpose(2, 3, 1, 0).reshape(150, 16).astype(bf16)
    # Fold torch's x.view(-1, 400) flatten order (c, h, w) into fc1's layout:
    # wf1[p, c, j] = fc1_w[j, c*25 + p] with p = h2*5 + w2.
    wf1 = params["fc1_w"].reshape(120, 16, 25).transpose(2, 1, 0).astype(bf16)
    wf2 = params["fc2_w"].T.astype(bf16)
    wf3 = params["fc3_w"].T.astype(bf16)
    return {
        "w1": w1, "b1": params["conv1_b"].reshape(1, 6).astype(f32),
        "w2": w2, "b2": params["conv2_b"].reshape(1, 16).astype(f32),
        "wf1": wf1, "bf1": params["fc1_b"].reshape(1, 120).astype(f32),
        "wf2": wf2, "bf2": params["fc2_b"].reshape(1, 84).astype(f32),
        "wf3": wf3, "bf3": params["fc3_b"].reshape(1, 10).astype(f32),
    }


def convnet_forward(x_nchw, prep):
    n = x_nchw.shape[0]
    x = jnp.transpose(x_nchw, (0, 2, 3, 1)).astype(jnp.bfloat16)  # NCHW -> NHWC

    # stage 1: conv1(3->6, k=5) + bias + ReLU + 2x2 max-pool (one fused kernel)
    p1 = _pool_ordered_patches_stage1(x, 5)                 # (4, n*14*14, 75)
    pooled1 = conv_pool_stage(p1, prep["w1"], prep["b1"])   # (n*196, 6) bf16

    # stage 2: conv2(6->16, k=5) + bias + ReLU + pool + fc1 + fc2 + fc3 (one kernel)
    y1 = pooled1.reshape(n, 14, 14, 6)
    p2 = _pool_ordered_patches_stage2(y1, 5)                # (25, 4, n, 150)
    return conv2_pool_fc_stage(p2, prep["w2"], prep["b2"],
                               prep["wf1"], prep["bf1"],
                               prep["wf2"], prep["bf2"],
                               prep["wf3"], prep["bf3"])


# ------------------------------ pure-XLA reference ---------------------------


def reference_forward(x, params):
    dn = ("NCHW", "OIHW", "NCHW")
    y = jax.lax.conv_general_dilated(x, params["conv1_w"], (1, 1), "VALID",
                                     dimension_numbers=dn)
    y = jax.nn.relu(y + params["conv1_b"][None, :, None, None])
    y = jax.lax.reduce_window(y, -jnp.inf, jax.lax.max,
                              (1, 1, 2, 2), (1, 1, 2, 2), "VALID")
    y = jax.lax.conv_general_dilated(y, params["conv2_w"], (1, 1), "VALID",
                                     dimension_numbers=dn)
    y = jax.nn.relu(y + params["conv2_b"][None, :, None, None])
    y = jax.lax.reduce_window(y, -jnp.inf, jax.lax.max,
                              (1, 1, 2, 2), (1, 1, 2, 2), "VALID")
    f = y.reshape(y.shape[0], -1)
    h1 = jax.nn.relu(f @ params["fc1_w"].T + params["fc1_b"])
    h2 = jax.nn.relu(h1 @ params["fc2_w"].T + params["fc2_b"])
    return h2 @ params["fc3_w"].T + params["fc3_b"]


if __name__ == "__main__":
    key = jax.random.PRNGKey(0)
    k_x, k_p = jax.random.split(key)
    # Input shape implied by fc1 = Linear(16*5*5, 120): (N, 3, 32, 32); batch=2.
    x = jax.random.normal(k_x, (2, 3, 32, 32), jnp.float32)
    params = init_params(k_p)
    prep = prepare_params(params)

    fwd = jax.jit(convnet_forward)
    logits = jax.block_until_ready(fwd(x, prep))
    assert logits.shape == (2, 10), logits.shape
    assert bool(jnp.isfinite(logits).all())

    # Loose check vs a pure-XLA reference (kernel matmuls use bf16 operands).
    ref = reference_forward(x, params)
    err = float(jnp.max(jnp.abs(logits - ref)))
    assert err < 1e-1, f"max |pallas - reference| = {err}"
    print("KERNEL_OK")
</pallas_src>

<mosaic_0001>
module attributes {stable_mosaic.version = 11 : i64} {
  func.func @_conv_pool_kernel(%arg0: i32, %arg1: memref<4x392x75xbf16, #tpu.memory_space<vmem>>, %arg2: memref<75x6xbf16, #tpu.memory_space<vmem>>, %arg3: memref<1x6xf32, #tpu.memory_space<vmem>>, %arg4: memref<392x6xbf16, #tpu.memory_space<vmem>>) attributes {dimension_semantics = [#tpu.dimension_semantics<parallel>], iteration_bounds = array<i64: 1>, scalar_prefetch = 0 : i64, scratch_operands = 0 : i64, tpu.core_type = #tpu.core_type<tc>, window_params = [{transform_indices = @transform_0, window_bounds = array<i64: 4, 392, 75>}, {pipeline_mode = #tpu.pipeline_mode<synchronous>, transform_indices = @transform_1, window_bounds = array<i64: 75, 6>}, {pipeline_mode = #tpu.pipeline_mode<synchronous>, transform_indices = @transform_2, window_bounds = array<i64: 1, 6>}, {transform_indices = @transform_3, window_bounds = array<i64: 392, 6>}]} {
    %c0 = arith.constant 0 : index
    %c0_0 = arith.constant 0 : index
    %0 = vector.load %arg2[%c0, %c0_0] : memref<75x6xbf16, #tpu.memory_space<vmem>>, vector<75x6xbf16>
    %c0_1 = arith.constant 0 : index
    %c0_2 = arith.constant 0 : index
    %1 = vector.load %arg3[%c0_1, %c0_2] : memref<1x6xf32, #tpu.memory_space<vmem>>, vector<1x6xf32>
    %c0_3 = arith.constant 0 : index
    %c0_4 = arith.constant 0 : index
    %c0_5 = arith.constant 0 : index
    %2 = vector.load %arg1[%c0_3, %c0_4, %c0_5] : memref<4x392x75xbf16, #tpu.memory_space<vmem>>, vector<1x392x75xbf16>
    %3 = vector.shape_cast %2 : vector<1x392x75xbf16> to vector<392x75xbf16>
    %cst = arith.constant dense<0.000000e+00> : vector<392x6xf32>
    %4 = tpu.matmul %3, %0, %cst {dimension_numbers = #tpu.dot_dimension_numbers<[1], [0], [0], [1], [0, 0, 1, 1], [], []>} : vector<392x75xbf16>, vector<75x6xbf16>, vector<392x6xf32> -> vector<392x6xf32>
    %5 = vector.broadcast %1 : vector<1x6xf32> to vector<392x6xf32>
    %6 = arith.addf %4, %5 : vector<392x6xf32>
    %cst_6 = arith.constant 0.000000e+00 : f32
    %7 = vector.broadcast %cst_6 : f32 to vector<392x6xf32>
    %8 = arith.maximumf %6, %7 : vector<392x6xf32>
    %c1 = arith.constant 1 : index
    %c0_7 = arith.constant 0 : index
    %c0_8 = arith.constant 0 : index
    %9 = vector.load %arg1[%c1, %c0_7, %c0_8] : memref<4x392x75xbf16, #tpu.memory_space<vmem>>, vector<1x392x75xbf16>
    %10 = vector.shape_cast %9 : vector<1x392x75xbf16> to vector<392x75xbf16>
    %cst_9 = arith.constant dense<0.000000e+00> : vector<392x6xf32>
    %11 = tpu.matmul %10, %0, %cst_9 {dimension_numbers = #tpu.dot_dimension_numbers<[1], [0], [0], [1], [0, 0, 1, 1], [], []>} : vector<392x75xbf16>, vector<75x6xbf16>, vector<392x6xf32> -> vector<392x6xf32>
    %12 = vector.broadcast %1 : vector<1x6xf32> to vector<392x6xf32>
    %13 = arith.addf %11, %12 : vector<392x6xf32>
    %cst_10 = arith.constant 0.000000e+00 : f32
    %14 = vector.broadcast %cst_10 : f32 to vector<392x6xf32>
    %15 = arith.maximumf %13, %14 : vector<392x6xf32>
    %16 = arith.maximumf %8, %15 : vector<392x6xf32>
    %c2 = arith.constant 2 : index
    %c0_11 = arith.constant 0 : index
    %c0_12 = arith.constant 0 : index
    %17 = vector.load %arg1[%c2, %c0_11, %c0_12] : memref<4x392x75xbf16, #tpu.memory_space<vmem>>, vector<1x392x75xbf16>
    %18 = vector.shape_cast %17 : vector<1x392x75xbf16> to vector<392x75xbf16>
    %cst_13 = arith.constant dense<0.000000e+00> : vector<392x6xf32>
    %19 = tpu.matmul %18, %0, %cst_13 {dimension_numbers = #tpu.dot_dimension_numbers<[1], [0], [0], [1], [0, 0, 1, 1], [], []>} : vector<392x75xbf16>, vector<75x6xbf16>, vector<392x6xf32> -> vector<392x6xf32>
    %20 = vector.broadcast %1 : vector<1x6xf32> to vector<392x6xf32>
    %21 = arith.addf %19, %20 : vector<392x6xf32>
    %cst_14 = arith.constant 0.000000e+00 : f32
    %22 = vector.broadcast %cst_14 : f32 to vector<392x6xf32>
    %23 = arith.maximumf %21, %22 : vector<392x6xf32>
    %c3 = arith.constant 3 : index
    %c0_15 = arith.constant 0 : index
    %c0_16 = arith.constant 0 : index
    %24 = vector.load %arg1[%c3, %c0_15, %c0_16] : memref<4x392x75xbf16, #tpu.memory_space<vmem>>, vector<1x392x75xbf16>
    %25 = vector.shape_cast %24 : vector<1x392x75xbf16> to vector<392x75xbf16>
    %cst_17 = arith.constant dense<0.000000e+00> : vector<392x6xf32>
    %26 = tpu.matmul %25, %0, %cst_17 {dimension_numbers = #tpu.dot_dimension_numbers<[1], [0], [0], [1], [0, 0, 1, 1], [], []>} : vector<392x75xbf16>, vector<75x6xbf16>, vector<392x6xf32> -> vector<392x6xf32>
    %27 = vector.broadcast %1 : vector<1x6xf32> to vector<392x6xf32>
    %28 = arith.addf %26, %27 : vector<392x6xf32>
    %cst_18 = arith.constant 0.000000e+00 : f32
    %29 = vector.broadcast %cst_18 : f32 to vector<392x6xf32>
    %30 = arith.maximumf %28, %29 : vector<392x6xf32>
    %31 = arith.maximumf %23, %30 : vector<392x6xf32>
    %32 = arith.maximumf %16, %31 : vector<392x6xf32>
    %33 = arith.truncf %32 : vector<392x6xf32> to vector<392x6xbf16>
    %c0_19 = arith.constant 0 : index
    %c0_20 = arith.constant 0 : index
    %34 = vector.load %arg4[%c0_19, %c0_20] : memref<392x6xbf16, #tpu.memory_space<vmem>>, vector<392x6xbf16>
    tpu.vector_store %arg4[%c0_19, %c0_20], %33 {strides = array<i32>} : memref<392x6xbf16, #tpu.memory_space<vmem>>, vector<392x6xbf16>,
    return
  }
  func.func @transform_0(%arg0: i32) -> (i32, i32, i32) {
    %c0_i32 = arith.constant 0 : i32
    %c0_i32_0 = arith.constant 0 : i32
    %c0_i32_1 = arith.constant 0 : i32
    return %c0_i32, %arg0, %c0_i32_0 : i32, i32, i32
  }
  func.func @transform_1(%arg0: i32) -> (i32, i32) {
    %c0_i32 = arith.constant 0 : i32
    %c0_i32_0 = arith.constant 0 : i32
    %c0_i32_1 = arith.constant 0 : i32
    return %c0_i32, %c0_i32_0 : i32, i32
  }
  func.func @transform_2(%arg0: i32) -> (i32, i32) {
    %c0_i32 = arith.constant 0 : i32
    %c0_i32_0 = arith.constant 0 : i32
    %c0_i32_1 = arith.constant 0 : i32
    return %c0_i32, %c0_i32_0 : i32, i32
  }
  func.func @transform_3(%arg0: i32) -> (i32, i32) {
    %c0_i32 = arith.constant 0 : i32
    %c0_i32_0 = arith.constant 0 : i32
    return %arg0, %c0_i32 : i32, i32
  }
}

module attributes {stable_mosaic.version = 11 : i64} {
  func.func @_conv2_pool_fc_kernel(%arg0: i32, %arg1: memref<25x4x2x150xbf16, #tpu.memory_space<vmem>>, %arg2: memref<150x16xbf16, #tpu.memory_space<vmem>>, %arg3: memref<1x16xf32, #tpu.memory_space<vmem>>, %arg4: memref<25x16x120xbf16, #tpu.memory_space<vmem>>, %arg5: memref<1x120xf32, #tpu.memory_space<vmem>>, %arg6: memref<120x84xbf16, #tpu.memory_space<vmem>>, %arg7: memref<1x84xf32, #tpu.memory_space<vmem>>, %arg8: memref<84x10xbf16, #tpu.memory_space<vmem>>, %arg9: memref<1x10xf32, #tpu.memory_space<vmem>>, %arg10: memref<2x10xf32, #tpu.memory_space<vmem>>) attributes {dimension_semantics = [#tpu.dimension_semantics<arbitrary>], iteration_bounds = array<i64: 1>, scalar_prefetch = 0 : i64, scratch_operands = 0 : i64, tpu.core_type = #tpu.core_type<tc>, window_params = [{pipeline_mode = #tpu.pipeline_mode<synchronous>, transform_indices = @transform_0, window_bounds = array<i64: 25, 4, 2, 150>}, {pipeline_mode = #tpu.pipeline_mode<synchronous>, transform_indices = @transform_1, window_bounds = array<i64: 150, 16>}, {pipeline_mode = #tpu.pipeline_mode<synchronous>, transform_indices = @transform_2, window_bounds = array<i64: 1, 16>}, {pipeline_mode = #tpu.pipeline_mode<synchronous>, transform_indices = @transform_3, window_bounds = array<i64: 25, 16, 120>}, {pipeline_mode = #tpu.pipeline_mode<synchronous>, transform_indices = @transform_4, window_bounds = array<i64: 1, 120>}, {pipeline_mode = #tpu.pipeline_mode<synchronous>, transform_indices = @transform_5, window_bounds = array<i64: 120, 84>}, {pipeline_mode = #tpu.pipeline_mode<synchronous>, transform_indices = @transform_6, window_bounds = array<i64: 1, 84>}, {pipeline_mode = #tpu.pipeline_mode<synchronous>, transform_indices = @transform_7, window_bounds = array<i64: 84, 10>}, {pipeline_mode = #tpu.pipeline_mode<synchronous>, transform_indices = @transform_8, window_bounds = array<i64: 1, 10>}, {pipeline_mode = #tpu.pipeline_mode<synchronous>, transform_indices = @transform_9, window_bounds = array<i64: 2, 10>}]} {
    %c0 = arith.constant 0 : index
    %c0_0 = arith.constant 0 : index
    %0 = vector.load %arg2[%c0, %c0_0] : memref<150x16xbf16, #tpu.memory_space<vmem>>, vector<150x16xbf16>
    %c0_1 = arith.constant 0 : index
    %c0_2 = arith.constant 0 : index
    %1 = vector.load %arg3[%c0_1, %c0_2] : memref<1x16xf32, #tpu.memory_space<vmem>>, vector<1x16xf32>
    %cst = arith.constant 0.000000e+00 : f32
    %2 = vector.broadcast %cst : f32 to vector<2x120xf32>
    %c0_3 = arith.constant 0 : index
    %c0_4 = arith.constant 0 : index
    %c0_5 = arith.constant 0 : index
    %c0_6 = arith.constant 0 : index
    %3 = vector.load %arg1[%c0_3, %c0_4, %c0_5, %c0_6] : memref<25x4x2x150xbf16, #tpu.memory_space<vmem>>, vector<1x1x2x150xbf16>
    %4 = vector.shape_cast %3 : vector<1x1x2x150xbf16> to vector<2x150xbf16>
    %cst_7 = arith.constant dense<0.000000e+00> : vector<2x16xf32>
    %5 = tpu.matmul %4, %0, %cst_7 {dimension_numbers = #tpu.dot_dimension_numbers<[1], [0], [0], [1], [0, 0, 1, 1], [], []>} : vector<2x150xbf16>, vector<150x16xbf16>, vector<2x16xf32> -> vector<2x16xf32>
    %6 = vector.broadcast %1 : vector<1x16xf32> to vector<2x16xf32>
    %7 = arith.addf %5, %6 : vector<2x16xf32>
    %cst_8 = arith.constant 0.000000e+00 : f32
    %8 = vector.broadcast %cst_8 : f32 to vector<2x16xf32>
    %9 = arith.maximumf %7, %8 : vector<2x16xf32>
    %c0_9 = arith.constant 0 : index
    %c1 = arith.constant 1 : index
    %c0_10 = arith.constant 0 : index
    %c0_11 = arith.constant 0 : index
    %10 = vector.load %arg1[%c0_9, %c1, %c0_10, %c0_11] : memref<25x4x2x150xbf16, #tpu.memory_space<vmem>>, vector<1x1x2x150xbf16>
    %11 = vector.shape_cast %10 : vector<1x1x2x150xbf16> to vector<2x150xbf16>
    %cst_12 = arith.constant dense<0.000000e+00> : vector<2x16xf32>
    %12 = tpu.matmul %11, %0, %cst_12 {dimension_numbers = #tpu.dot_dimension_numbers<[1], [0], [0], [1], [0, 0, 1, 1], [], []>} : vector<2x150xbf16>, vector<150x16xbf16>, vector<2x16xf32> -> vector<2x16xf32>
    %13 = vector.broadcast %1 : vector<1x16xf32> to vector<2x16xf32>
    %14 = arith.addf %12, %13 : vector<2x16xf32>
    %cst_13 = arith.constant 0.000000e+00 : f32
    %15 = vector.broadcast %cst_13 : f32 to vector<2x16xf32>
    %16 = arith.maximumf %14, %15 : vector<2x16xf32>
    %17 = arith.maximumf %9, %16 : vector<2x16xf32>
    %c0_14 = arith.constant 0 : index
    %c2 = arith.constant 2 : index
    %c0_15 = arith.constant 0 : index
    %c0_16 = arith.constant 0 : index
    %18 = vector.load %arg1[%c0_14, %c2, %c0_15, %c0_16] : memref<25x4x2x150xbf16, #tpu.memory_space<vmem>>, vector<1x1x2x150xbf16>
    %19 = vector.shape_cast %18 : vector<1x1x2x150xbf16> to vector<2x150xbf16>
    %cst_17 = arith.constant dense<0.000000e+00> : vector<2x16xf32>
    %20 = tpu.matmul %19, %0, %cst_17 {dimension_numbers = #tpu.dot_dimension_numbers<[1], [0], [0], [1], [0, 0, 1, 1], [], []>} : vector<2x150xbf16>, vector<150x16xbf16>, vector<2x16xf32> -> vector<2x16xf32>
    %21 = vector.broadcast %1 : vector<1x16xf32> to vector<2x16xf32>
    %22 = arith.addf %20, %21 : vector<2x16xf32>
    %cst_18 = arith.constant 0.000000e+00 : f32
    %23 = vector.broadcast %cst_18 : f32 to vector<2x16xf32>
    %24 = arith.maximumf %22, %23 : vector<2x16xf32>
    %c0_19 = arith.constant 0 : index
    %c3 = arith.constant 3 : index
    %c0_20 = arith.constant 0 : index
    %c0_21 = arith.constant 0 : index
    %25 = vector.load %arg1[%c0_19, %c3, %c0_20, %c0_21] : memref<25x4x2x150xbf16, #tpu.memory_space<vmem>>, vector<1x1x2x150xbf16>
    %26 = vector.shape_cast %25 : vector<1x1x2x150xbf16> to vector<2x150xbf16>
    %cst_22 = arith.constant dense<0.000000e+00> : vector<2x16xf32>
    %27 = tpu.matmul %26, %0, %cst_22 {dimension_numbers = #tpu.dot_dimension_numbers<[1], [0], [0], [1], [0, 0, 1, 1], [], []>} : vector<2x150xbf16>, vector<150x16xbf16>, vector<2x16xf32> -> vector<2x16xf32>
    %28 = vector.broadcast %1 : vector<1x16xf32> to vector<2x16xf32>
    %29 = arith.addf %27, %28 : vector<2x16xf32>
    %cst_23 = arith.constant 0.000000e+00 : f32
    %30 = vector.broadcast %cst_23 : f32 to vector<2x16xf32>
    %31 = arith.maximumf %29, %30 : vector<2x16xf32>
    %32 = arith.maximumf %24, %31 : vector<2x16xf32>
    %33 = arith.maximumf %17, %32 : vector<2x16xf32>
    %34 = arith.truncf %33 : vector<2x16xf32> to vector<2x16xbf16>
    %c0_24 = arith.constant 0 : index
    %c0_25 = arith.constant 0 : index
    %c0_26 = arith.constant 0 : index
    %35 = vector.load %arg4[%c0_24, %c0_25, %c0_26] : memref<25x16x120xbf16, #tpu.memory_space<vmem>>, vector<1x16x120xbf16>
    %36 = vector.shape_cast %35 : vector<1x16x120xbf16> to vector<16x120xbf16>
    %cst_27 = arith.constant dense<0.000000e+00> : vector<2x120xf32>
    %37 = tpu.matmul %34, %36, %cst_27 {dimension_numbers = #tpu.dot_dimension_numbers<[1], [0], [0], [1], [0, 0, 1, 1], [], []>} : vector<2x16xbf16>, vector<16x120xbf16>, vector<2x120xf32> -> vector<2x120xf32>
    %38 = arith.addf %2, %37 : vector<2x120xf32>
    %c1_28 = arith.constant 1 : index
    %c0_29 = arith.constant 0 : index
    %c0_30 = arith.constant 0 : index
    %c0_31 = arith.constant 0 : index
    %39 = vector.load %arg1[%c1_28, %c0_29, %c0_30, %c0_31] : memref<25x4x2x150xbf16, #tpu.memory_space<vmem>>, vector<1x1x2x150xbf16>
    %40 = vector.shape_cast %39 : vector<1x1x2x150xbf16> to vector<2x150xbf16>
    %cst_32 = arith.constant dense<0.000000e+00> : vector<2x16xf32>
    %41 = tpu.matmul %40, %0, %cst_32 {dimension_numbers = #tpu.dot_dimension_numbers<[1], [0], [0], [1], [0, 0, 1, 1], [], []>} : vector<2x150xbf16>, vector<150x16xbf16>, vector<2x16xf32> -> vector<2x16xf32>
    %42 = vector.broadcast %1 : vector<1x16xf32> to vector<2x16xf32>
    %43 = arith.addf %41, %42 : vector<2x16xf32>
    %cst_33 = arith.constant 0.000000e+00 : f32
    %44 = vector.broadcast %cst_33 : f32 to vector<2x16xf32>
    %45 = arith.maximumf %43, %44 : vector<2x16xf32>
    %c1_34 = arith.constant 1 : index
    %c1_35 = arith.constant 1 : index
    %c0_36 = arith.constant 0 : index
    %c0_37 = arith.constant 0 : index
    %46 = vector.load %arg1[%c1_34, %c1_35, %c0_36, %c0_37] : memref<25x4x2x150xbf16, #tpu.memory_space<vmem>>, vector<1x1x2x150xbf16>
    %47 = vector.shape_cast %46 : vector<1x1x2x150xbf16> to vector<2x150xbf16>
    %cst_38 = arith.constant dense<0.000000e+00> : vector<2x16xf32>
    %48 = tpu.matmul %47, %0, %cst_38 {dimension_numbers = #tpu.dot_dimension_numbers<[1], [0], [0], [1], [0, 0, 1, 1], [], []>} : vector<2x150xbf16>, vector<150x16xbf16>, vector<2x16xf32> -> vector<2x16xf32>
    %49 = vector.broadcast %1 : vector<1x16xf32> to vector<2x16xf32>
    %50 = arith.addf %48, %49 : vector<2x16xf32>
    %cst_39 = arith.constant 0.000000e+00 : f32
    %51 = vector.broadcast %cst_39 : f32 to vector<2x16xf32>
    %52 = arith.maximumf %50, %51 : vector<2x16xf32>
    %53 = arith.maximumf %45, %52 : vector<2x16xf32>
    %c1_40 = arith.constant 1 : index
    %c2_41 = arith.constant 2 : index
    %c0_42 = arith.constant 0 : index
    %c0_43 = arith.constant 0 : index
    %54 = vector.load %arg1[%c1_40, %c2_41, %c0_42, %c0_43] : memref<25x4x2x150xbf16, #tpu.memory_space<vmem>>, vector<1x1x2x150xbf16>
    %55 = vector.shape_cast %54 : vector<1x1x2x150xbf16> to vector<2x150xbf16>
    %cst_44 = arith.constant dense<0.000000e+00> : vector<2x16xf32>
    %56 = tpu.matmul %55, %0, %cst_44 {dimension_numbers = #tpu.dot_dimension_numbers<[1], [0], [0], [1], [0, 0, 1, 1], [], []>} : vector<2x150xbf16>, vector<150x16xbf16>, vector<2x16xf32> -> vector<2x16xf32>
    %57 = vector.broadcast %1 : vector<1x16xf32> to vector<2x16xf32>
    %58 = arith.addf %56, %57 : vector<2x16xf32>
    %cst_45 = arith.constant 0.000000e+00 : f32
    %59 = vector.broadcast %cst_45 : f32 to vector<2x16xf32>
    %60 = arith.maximumf %58, %59 : vector<2x16xf32>
    %c1_46 = arith.constant 1 : index
    %c3_47 = arith.constant 3 : index
    %c0_48 = arith.constant 0 : index
    %c0_49 = arith.constant 0 : index
    %61 = vector.load %arg1[%c1_46, %c3_47, %c0_48, %c0_49] : memref<25x4x2x150xbf16, #tpu.memory_space<vmem>>, vector<1x1x2x150xbf16>
    %62 = vector.shape_cast %61 : vector<1x1x2x150xbf16> to vector<2x150xbf16>
    %cst_50 = arith.constant dense<0.000000e+00> : vector<2x16xf32>
    %63 = tpu.matmul %62, %0, %cst_50 {dimension_numbers = #tpu.dot_dimension_numbers<[1], [0], [0], [1], [0, 0, 1, 1], [], []>} : vector<2x150xbf16>, vector<150x16xbf16>, vector<2x16xf32> -> vector<2x16xf32>
    %64 = vector.broadcast %1 : vector<1x16xf32> to vector<2x16xf32>
    %65 = arith.addf %63, %64 : vector<2x16xf32>
    %cst_51 = arith.constant 0.000000e+00 : f32
    %66 = vector.broadcast %cst_51 : f32 to vector<2x16xf32>
    %67 = arith.maximumf %65, %66 : vector<2x16xf32>
    %68 = arith.maximumf %60, %67 : vector<2x16xf32>
    %69 = arith.maximumf %53, %68 : vector<2x16xf32>
    %70 = arith.truncf %69 : vector<2x16xf32> to vector<2x16xbf16>
    %c1_52 = arith.constant 1 : index
    %c0_53 = arith.constant 0 : index
    %c0_54 = arith.constant 0 : index
    %71 = vector.load %arg4[%c1_52, %c0_53, %c0_54] : memref<25x16x120xbf16, #tpu.memory_space<vmem>>, vector<1x16x120xbf16>
    %72 = vector.shape_cast %71 : vector<1x16x120xbf16> to vector<16x120xbf16>
    %cst_55 = arith.constant dense<0.000000e+00> : vector<2x120xf32>
    %73 = tpu.matmul %70, %72, %cst_55 {dimension_numbers = #tpu.dot_dimension_numbers<[1], [0], [0], [1], [0, 0, 1, 1], [], []>} : vector<2x16xbf16>, vector<16x120xbf16>, vector<2x120xf32> -> vector<2x120xf32>
    %74 = arith.addf %38, %73 : vector<2x120xf32>
    %c2_56 = arith.constant 2 : index
    %c0_57 = arith.constant 0 : index
    %c0_58 = arith.constant 0 : index
    %c0_59 = arith.constant 0 : index
    %75 = vector.load %arg1[%c2_56, %c0_57, %c0_58, %c0_59] : memref<25x4x2x150xbf16, #tpu.memory_space<vmem>>, vector<1x1x2x150xbf16>
    %76 = vector.shape_cast %75 : vector<1x1x2x150xbf16> to vector<2x150xbf16>
    %cst_60 = arith.constant dense<0.000000e+00> : vector<2x16xf32>
    %77 = tpu.matmul %76, %0, %cst_60 {dimension_numbers = #tpu.dot_dimension_numbers<[1], [0], [0], [1], [0, 0, 1, 1], [], []>} : vector<2x150xbf16>, vector<150x16xbf16>, vector<2x16xf32> -> vector<2x16xf32>
    %78 = vector.broadcast %1 : vector<1x16xf32> to vector<2x16xf32>
    %79 = arith.addf %77, %78 : vector<2x16xf32>
    %cst_61 = arith.constant 0.000000e+00 : f32
    %80 = vector.broadcast %cst_61 : f32 to vector<2x16xf32>
    %81 = arith.maximumf %79, %80 : vector<2x16xf32>
    %c2_62 = arith.constant 2 : index
    %c1_63 = arith.constant 1 : index
    %c0_64 = arith.constant 0 : index
    %c0_65 = arith.constant 0 : index
    %82 = vector.load %arg1[%c2_62, %c1_63, %c0_64, %c0_65] : memref<25x4x2x150xbf16, #tpu.memory_space<vmem>>, vector<1x1x2x150xbf16>
    %83 = vector.shape_cast %82 : vector<1x1x2x150xbf16> to vector<2x150xbf16>
    %cst_66 = arith.constant dense<0.000000e+00> : vector<2x16xf32>
    %84 = tpu.matmul %83, %0, %cst_66 {dimension_numbers = #tpu.dot_dimension_numbers<[1], [0], [0], [1], [0, 0, 1, 1], [], []>} : vector<2x150xbf16>, vector<150x16xbf16>, vector<2x16xf32> -> vector<2x16xf32>
    %85 = vector.broadcast %1 : vector<1x16xf32> to vector<2x16xf32>
    %86 = arith.addf %84, %85 : vector<2x16xf32>
    %cst_67 = arith.constant 0.000000e+00 : f32
    %87 = vector.broadcast %cst_67 : f32 to vector<2x16xf32>
    %88 = arith.maximumf %86, %87 : vector<2x16xf32>
    %89 = arith.maximumf %81, %88 : vector<2x16xf32>
    %c2_68 = arith.constant 2 : index
    %c2_69 = arith.constant 2 : index
    %c0_70 = arith.constant 0 : index
    %c0_71 = arith.constant 0 : index
    %90 = vector.load %arg1[%c2_68, %c2_69, %c0_70, %c0_71] : memref<25x4x2x150xbf16, #tpu.memory_space<vmem>>, vector<1x1x2x150xbf16>
    %91 = vector.shape_cast %90 : vector<1x1x2x150xbf16> to vector<2x150xbf16>
    %cst_72 = arith.constant dense<0.000000e+00> : vector<2x16xf32>
    %92 = tpu.matmul %91, %0, %cst_72 {dimension_numbers = #tpu.dot_dimension_numbers<[1], [0], [0], [1], [0, 0, 1, 1], [], []>} : vector<2x150xbf16>, vector<150x16xbf16>, vector<2x16xf32> -> vector<2x16xf32>
    %93 = vector.broadcast %1 : vector<1x16xf32> to vector<2x16xf32>
    %94 = arith.addf %92, %93 : vector<2x16xf32>
    %cst_73 = arith.constant 0.000000e+00 : f32
    %95 = vector.broadcast %cst_73 : f32 to vector<2x16xf32>
    %96 = arith.maximumf %94, %95 : vector<2x16xf32>
    %c2_74 = arith.constant 2 : index
    %c3_75 = arith.constant 3 : index
    %c0_76 = arith.constant 0 : index
    %c0_77 = arith.constant 0 : index
    %97 = vector.load %arg1[%c2_74, %c3_75, %c0_76, %c0_77] : memref<25x4x2x150xbf16, #tpu.memory_space<vmem>>, vector<1x1x2x150xbf16>
    %98 = vector.shape_cast %97 : vector<1x1x2x150xbf16> to vector<2x150xbf16>
    %cst_78 = arith.constant dense<0.000000e+00> : vector<2x16xf32>
    %99 = tpu.matmul %98, %0, %cst_78 {dimension_numbers = #tpu.dot_dimension_numbers<[1], [0], [0], [1], [0, 0, 1, 1], [], []>} : vector<2x150xbf16>, vector<150x16xbf16>, vector<2x16xf32> -> vector<2x16xf32>
    %100 = vector.broadcast %1 : vector<1x16xf32> to vector<2x16xf32>
    %101 = arith.addf %99, %100 : vector<2x16xf32>
    %cst_79 = arith.constant 0.000000e+00 : f32
    %102 = vector.broadcast %cst_79 : f32 to vector<2x16xf32>
    %103 = arith.maximumf %101, %102 : vector<2x16xf32>
    %104 = arith.maximumf %96, %103 : vector<2x16xf32>
    %105 = arith.maximumf %89, %104 : vector<2x16xf32>
    %106 = arith.truncf %105 : vector<2x16xf32> to vector<2x16xbf16>
    %c2_80 = arith.constant 2 : index
    %c0_81 = arith.constant 0 : index
    %c0_82 = arith.constant 0 : index
    %107 = vector.load %arg4[%c2_80, %c0_81, %c0_82] : memref<25x16x120xbf16, #tpu.memory_space<vmem>>, vector<1x16x120xbf16>
    %108 = vector.shape_cast %107 : vector<1x16x120xbf16> to vector<16x120xbf16>
    %cst_83 = arith.constant dense<0.000000e+00> : vector<2x120xf32>
    %109 = tpu.matmul %106, %108, %cst_83 {dimension_numbers = #tpu.dot_dimension_numbers<[1], [0], [0], [1], [0, 0, 1, 1], [], []>} : vector<2x16xbf16>, vector<16x120xbf16>, vector<2x120xf32> -> vector<2x120xf32>
    %110 = arith.addf %74, %109 : vector<2x120xf32>
    %c3_84 = arith.constant 3 : index
    %c0_85 = arith.constant 0 : index
    %c0_86 = arith.constant 0 : index
    %c0_87 = arith.constant 0 : index
    %111 = vector.load %arg1[%c3_84, %c0_85, %c0_86, %c0_87] : memref<25x4x2x150xbf16, #tpu.memory_space<vmem>>, vector<1x1x2x150xbf16>
    %112 = vector.shape_cast %111 : vector<1x1x2x150xbf16> to vector<2x150xbf16>
    %cst_88 = arith.constant dense<0.000000e+00> : vector<2x16xf32>
    %113 = tpu.matmul %112, %0, %cst_88 {dimension_numbers = #tpu.dot_dimension_numbers<[1], [0], [0], [1], [0, 0, 1, 1], [], []>} : vector<2x150xbf16>, vector<150x16xbf16>, vector<2x16xf32> -> vector<2x16xf32>
    %114 = vector.broadcast %1 : vector<1x16xf32> to vector<2x16xf32>
    %115 = arith.addf %113, %114 : vector<2x16xf32>
    %cst_89 = arith.constant 0.000000e+00 : f32
    %116 = vector.broadcast %cst_89 : f32 to vector<2x16xf32>
    %117 = arith.maximumf %115, %116 : vector<2x16xf32>
    %c3_90 = arith.constant 3 : index
    %c1_91 = arith.constant 1 : index
    %c0_92 = arith.constant 0 : index
    %c0_93 = arith.constant 0 : index
    %118 = vector.load %arg1[%c3_90, %c1_91, %c0_92, %c0_93] : memref<25x4x2x150xbf16, #tpu.memory_space<vmem>>, vector<1x1x2x150xbf16>
    %119 = vector.shape_cast %118 : vector<1x1x2x150xbf16> to vector<2x150xbf16>
    %cst_94 = arith.constant dense<0.000000e+00> : vector<2x16xf32>
    %120 = tpu.matmul %119, %0, %cst_94 {dimension_numbers = #tpu.dot_dimension_numbers<[1], [0], [0], [1], [0, 0, 1, 1], [], []>} : vector<2x150xbf16>, vector<150x16xbf16>, vector<2x16xf32> -> vector<2x16xf32>
    %121 = vector.broadcast %1 : vector<1x16xf32> to vector<2x16xf32>
    %122 = arith.addf %120, %121 : vector<2x16xf32>
    %cst_95 = arith.constant 0.000000e+00 : f32
    %123 = vector.broadcast %cst_95 : f32 to vector<2x16xf32>
    %124 = arith.maximumf %122, %123 : vector<2x16xf32>
    %125 = arith.maximumf %117, %124 : vector<2x16xf32>
    %c3_96 = arith.constant 3 : index
    %c2_97 = arith.constant 2 : index
    %c0_98 = arith.constant 0 : index
    %c0_99 = arith.constant 0 : index
    %126 = vector.load %arg1[%c3_96, %c2_97, %c0_98, %c0_99] : memref<25x4x2x150xbf16, #tpu.memory_space<vmem>>, vector<1x1x2x150xbf16>
    %127 = vector.shape_cast %126 : vector<1x1x2x150xbf16> to vector<2x150xbf16>
    %cst_100 = arith.constant dense<0.000000e+00> : vector<2x16xf32>
    %128 = tpu.matmul %127, %0, %cst_100 {dimension_numbers = #tpu.dot_dimension_numbers<[1], [0], [0], [1], [0, 0, 1, 1], [], []>} : vector<2x150xbf16>, vector<150x16xbf16>, vector<2x16xf32> -> vector<2x16xf32>
    %129 = vector.broadcast %1 : vector<1x16xf32> to vector<2x16xf32>
    %130 = arith.addf %128, %129 : vector<2x16xf32>
    %cst_101 = arith.constant 0.000000e+00 : f32
    %131 = vector.broadcast %cst_101 : f32 to vector<2x16xf32>
    %132 = arith.maximumf %130, %131 : vector<2x16xf32>
    %c3_102 = arith.constant 3 : index
    %c3_103 = arith.constant 3 : index
    %c0_104 = arith.constant 0 : index
    %c0_105 = arith.constant 0 : index
    %133 = vector.load %arg1[%c3_102, %c3_103, %c0_104, %c0_105] : memref<25x4x2x150xbf16, #tpu.memory_space<vmem>>, vector<1x1x2x150xbf16>
    %134 = vector.shape_cast %133 : vector<1x1x2x150xbf16> to vector<2x150xbf16>
    %cst_106 = arith.constant dense<0.000000e+00> : vector<2x16xf32>
    %135 = tpu.matmul %134, %0, %cst_106 {dimension_numbers = #tpu.dot_dimension_numbers<[1], [0], [0], [1], [0, 0, 1, 1], [], []>} : vector<2x150xbf16>, vector<150x16xbf16>, vector<2x16xf32> -> vector<2x16xf32>
    %136 = vector.broadcast %1 : vector<1x16xf32> to vector<2x16xf32>
    %137 = arith.addf %135, %136 : vector<2x16xf32>
    %cst_107 = arith.constant 0.000000e+00 : f32
    %138 = vector.broadcast %cst_107 : f32 to vector<2x16xf32>
    %139 = arith.maximumf %137, %138 : vector<2x16xf32>
    %140 = arith.maximumf %132, %139 : vector<2x16xf32>
    %141 = arith.maximumf %125, %140 : vector<2x16xf32>
    %142 = arith.truncf %141 : vector<2x16xf32> to vector<2x16xbf16>
    %c3_108 = arith.constant 3 : index
    %c0_109 = arith.constant 0 : index
    %c0_110 = arith.constant 0 : index
    %143 = vector.load %arg4[%c3_108, %c0_109, %c0_110] : memref<25x16x120xbf16, #tpu.memory_space<vmem>>, vector<1x16x120xbf16>
    %144 = vector.shape_cast %143 : vector<1x16x120xbf16> to vector<16x120xbf16>
    %cst_111 = arith.constant dense<0.000000e+00> : vector<2x120xf32>
    %145 = tpu.matmul %142, %144, %cst_111 {dimension_numbers = #tpu.dot_dimension_numbers<[1], [0], [0], [1], [0, 0, 1, 1], [], []>} : vector<2x16xbf16>, vector<16x120xbf16>, vector<2x120xf32> -> vector<2x120xf32>
    %146 = arith.addf %110, %145 : vector<2x120xf32>
    %c4 = arith.constant 4 : index
    %c0_112 = arith.constant 0 : index
    %c0_113 = arith.constant 0 : index
    %c0_114 = arith.constant 0 : index
    %147 = vector.load %arg1[%c4, %c0_112, %c0_113, %c0_114] : memref<25x4x2x150xbf16, #tpu.memory_space<vmem>>, vector<1x1x2x150xbf16>
    %148 = vector.shape_cast %147 : vector<1x1x2x150xbf16> to vector<2x150xbf16>
    %cst_115 = arith.constant dense<0.000000e+00> : vector<2x16xf32>
    %149 = tpu.matmul %148, %0, %cst_115 {dimension_numbers = #tpu.dot_dimension_numbers<[1], [0], [0], [1], [0, 0, 1, 1], [], []>} : vector<2x150xbf16>, vector<150x16xbf16>, vector<2x16xf32> -> vector<2x16xf32>
    %150 = vector.broadcast %1 : vector<1x16xf32> to vector<2x16xf32>
    %151 = arith.addf %149, %150 : vector<2x16xf32>
    %cst_116 = arith.constant 0.000000e+00 : f32
    %152 = vector.broadcast %cst_116 : f32 to vector<2x16xf32>
    %153 = arith.maximumf %151, %152 : vector<2x16xf32>
    %c4_117 = arith.constant 4 : index
    %c1_118 = arith.constant 1 : index
    %c0_119 = arith.constant 0 : index
    %c0_120 = arith.constant 0 : index
    %154 = vector.load %arg1[%c4_117, %c1_118, %c0_119, %c0_120] : memref<25x4x2x150xbf16, #tpu.memory_space<vmem>>, vector<1x1x2x150xbf16>
    %155 = vector.shape_cast %154 : vector<1x1x2x150xbf16> to vector<2x150xbf16>
    %cst_121 = arith.constant dense<0.000000e+00> : vector<2x16xf32>
    %156 = tpu.matmul %155, %0, %cst_121 {dimension_numbers = #tpu.dot_dimension_numbers<[1], [0], [0], [1], [0, 0, 1, 1], [], []>} : vector<2x150xbf16>, vector<150x16xbf16>, vector<2x16xf32> -> vector<2x16xf32>
    %157 = vector.broadcast %1 : vector<1x16xf32> to vector<2x16xf32>
    %158 = arith.addf %156, %157 : vector<2x16xf32>
    %cst_122 = arith.constant 0.000000e+00 : f32
    %159 = vector.broadcast %cst_122 : f32 to vector<2x16xf32>
    %160 = arith.maximumf %158, %159 : vector<2x16xf32>
    %161 = arith.maximumf %153, %160 : vector<2x16xf32>
    %c4_123 = arith.constant 4 : index
    %c2_124 = arith.constant 2 : index
    %c0_125 = arith.constant 0 : index
    %c0_126 = arith.constant 0 : index
    %162 = vector.load %arg1[%c4_123, %c2_124, %c0_125, %c0_126] : memref<25x4x2x150xbf16, #tpu.memory_space<vmem>>, vector<1x1x2x150xbf16>
    %163 = vector.shape_cast %162 : vector<1x1x2x150xbf16> to vector<2x150xbf16>
    %cst_127 = arith.constant dense<0.000000e+00> : vector<2x16xf32>
    %164 = tpu.matmul %163, %0, %cst_127 {dimension_numbers = #tpu.dot_dimension_numbers<[1], [0], [0], [1], [0, 0, 1, 1], [], []>} : vector<2x150xbf16>, vector<150x16xbf16>, vector<2x16xf32> -> vector<2x16xf32>
    %165 = vector.broadcast %1 : vector<1x16xf32> to vector<2x16xf32>
    %166 = arith.addf %164, %165 : vector<2x16xf32>
    %cst_128 = arith.constant 0.000000e+00 : f32
    %167 = vector.broadcast %cst_128 : f32 to vector<2x16xf32>
    %168 = arith.maximumf %166, %167 : vector<2x16xf32>
    %c4_129 = arith.constant 4 : index
    %c3_130 = arith.constant 3 : index
    %c0_131 = arith.constant 0 : index
    %c0_132 = arith.constant 0 : index
    %169 = vector.load %arg1[%c4_129, %c3_130, %c0_131, %c0_132] : memref<25x4x2x150xbf16, #tpu.memory_space<vmem>>, vector<1x1x2x150xbf16>
    %170 = vector.shape_cast %169 : vector<1x1x2x150xbf16> to vector<2x150xbf16>
    %cst_133 = arith.constant dense<0.000000e+00> : vector<2x16xf32>
    %171 = tpu.matmul %170, %0, %cst_133 {dimension_numbers = #tpu.dot_dimension_numbers<[1], [0], [0], [1], [0, 0, 1, 1], [], []>} : vector<2x150xbf16>, vector<150x16xbf16>, vector<2x16xf32> -> vector<2x16xf32>
    %172 = vector.broadcast %1 : vector<1x16xf32> to vector<2x16xf32>
    %173 = arith.addf %171, %172 : vector<2x16xf32>
    %cst_134 = arith.constant 0.000000e+00 : f32
    %174 = vector.broadcast %cst_134 : f32 to vector<2x16xf32>
    %175 = arith.maximumf %173, %174 : vector<2x16xf32>
    %176 = arith.maximumf %168, %175 : vector<2x16xf32>
    %177 = arith.maximumf %161, %176 : vector<2x16xf32>
    %178 = arith.truncf %177 : vector<2x16xf32> to vector<2x16xbf16>
    %c4_135 = arith.constant 4 : index
    %c0_136 = arith.constant 0 : index
    %c0_137 = arith.constant 0 : index
    %179 = vector.load %arg4[%c4_135, %c0_136, %c0_137] : memref<25x16x120xbf16, #tpu.memory_space<vmem>>, vector<1x16x120xbf16>
    %180 = vector.shape_cast %179 : vector<1x16x120xbf16> to vector<16x120xbf16>
    %cst_138 = arith.constant dense<0.000000e+00> : vector<2x120xf32>
    %181 = tpu.matmul %178, %180, %cst_138 {dimension_numbers = #tpu.dot_dimension_numbers<[1], [0], [0], [1], [0, 0, 1, 1], [], []>} : vector<2x16xbf16>, vector<16x120xbf16>, vector<2x120xf32> -> vector<2x120xf32>
    %182 = arith.addf %146, %181 : vector<2x120xf32>
    %c5 = arith.constant 5 : index
    %c0_139 = arith.constant 0 : index
    %c0_140 = arith.constant 0 : index
    %c0_141 = arith.constant 0 : index
    %183 = vector.load %arg1[%c5, %c0_139, %c0_140, %c0_141] : memref<25x4x2x150xbf16, #tpu.memory_space<vmem>>, vector<1x1x2x150xbf16>
    %184 = vector.shape_cast %183 : vector<1x1x2x150xbf16> to vector<2x150xbf16>
    %cst_142 = arith.constant dense<0.000000e+00> : vector<2x16xf32>
    %185 = tpu.matmul %184, %0, %cst_142 {dimension_numbers = #tpu.dot_dimension_numbers<[1], [0], [0], [1], [0, 0, 1, 1], [], []>} : vector<2x150xbf16>, vector<150x16xbf16>, vector<2x16xf32> -> vector<2x16xf32>
    %186 = vector.broadcast %1 : vector<1x16xf32> to vector<2x16xf32>
    %187 = arith.addf %185, %186 : vector<2x16xf32>
    %cst_143 = arith.constant 0.000000e+00 : f32
    %188 = vector.broadcast %cst_143 : f32 to vector<2x16xf32>
    %189 = arith.maximumf %187, %188 : vector<2x16xf32>
    %c5_144 = arith.constant 5 : index
    %c1_145 = arith.constant 1 : index
    %c0_146 = arith.constant 0 : index
    %c0_147 = arith.constant 0 : index
    %190 = vector.load %arg1[%c5_144, %c1_145, %c0_146, %c0_147] : memref<25x4x2x150xbf16, #tpu.memory_space<vmem>>, vector<1x1x2x150xbf16>
    %191 = vector.shape_cast %190 : vector<1x1x2x150xbf16> to vector<2x150xbf16>
    %cst_148 = arith.constant dense<0.000000e+00> : vector<2x16xf32>
    %192 = tpu.matmul %191, %0, %cst_148 {dimension_numbers = #tpu.dot_dimension_numbers<[1], [0], [0], [1], [0, 0, 1, 1], [], []>} : vector<2x150xbf16>, vector<150x16xbf16>, vector<2x16xf32> -> vector<2x16xf32>
    %193 = vector.broadcast %1 : vector<1x16xf32> to vector<2x16xf32>
    %194 = arith.addf %192, %193 : vector<2x16xf32>
    %cst_149 = arith.constant 0.000000e+00 : f32
    %195 = vector.broadcast %cst_149 : f32 to vector<2x16xf32>
    %196 = arith.maximumf %194, %195 : vector<2x16xf32>
    %197 = arith.maximumf %189, %196 : vector<2x16xf32>
    %c5_150 = arith.constant 5 : index
    %c2_151 = arith.constant 2 : index
    %c0_152 = arith.constant 0 : index
    %c0_153 = arith.constant 0 : index
    %198 = vector.load %arg1[%c5_150, %c2_151, %c0_152, %c0_153] : memref<25x4x2x150xbf16, #tpu.memory_space<vmem>>, vector<1x1x2x150xbf16>
    %199 = vector.shape_cast %198 : vector<1x1x2x150xbf16> to vector<2x150xbf16>
    %cst_154 = arith.constant dense<0.000000e+00> : vector<2x16xf32>
    %200 = tpu.matmul %199, %0, %cst_154 {dimension_numbers = #tpu.dot_dimension_numbers<[1], [0], [0], [1], [0, 0, 1, 1], [], []>} : vector<2x150xbf16>, vector<150x16xbf16>, vector<2x16xf32> -> vector<2x16xf32>
    %201 = vector.broadcast %1 : vector<1x16xf32> to vector<2x16xf32>
    %202 = arith.addf %200, %201 : vector<2x16xf32>
    %cst_155 = arith.constant 0.000000e+00 : f32
    %203 = vector.broadcast %cst_155 : f32 to vector<2x16xf32>
    %204 = arith.maximumf %202, %203 : vector<2x16xf32>
    %c5_156 = arith.constant 5 : index
    %c3_157 = arith.constant 3 : index
    %c0_158 = arith.constant 0 : index
    %c0_159 = arith.constant 0 : index
    %205 = vector.load %arg1[%c5_156, %c3_157, %c0_158, %c0_159] : memref<25x4x2x150xbf16, #tpu.memory_space<vmem>>, vector<1x1x2x150xbf16>
    %206 = vector.shape_cast %205 : vector<1x1x2x150xbf16> to vector<2x150xbf16>
    %cst_160 = arith.constant dense<0.000000e+00> : vector<2x16xf32>
    %207 = tpu.matmul %206, %0, %cst_160 {dimension_numbers = #tpu.dot_dimension_numbers<[1], [0], [0], [1], [0, 0, 1, 1], [], []>} : vector<2x150xbf16>, vector<150x16xbf16>, vector<2x16xf32> -> vector<2x16xf32>
    %208 = vector.broadcast %1 : vector<1x16xf32> to vector<2x16xf32>
    %209 = arith.addf %207, %208 : vector<2x16xf32>
    %cst_161 = arith.constant 0.000000e+00 : f32
    %210 = vector.broadcast %cst_161 : f32 to vector<2x16xf32>
    %211 = arith.maximumf %209, %210 : vector<2x16xf32>
    %212 = arith.maximumf %204, %211 : vector<2x16xf32>
    %213 = arith.maximumf %197, %212 : vector<2x16xf32>
    %214 = arith.truncf %213 : vector<2x16xf32> to vector<2x16xbf16>
    %c5_162 = arith.constant 5 : index
    %c0_163 = arith.constant 0 : index
    %c0_164 = arith.constant 0 : index
    %215 = vector.load %arg4[%c5_162, %c0_163, %c0_164] : memref<25x16x120xbf16, #tpu.memory_space<vmem>>, vector<1x16x120xbf16>
    %216 = vector.shape_cast %215 : vector<1x16x120xbf16> to vector<16x120xbf16>
    %cst_165 = arith.constant dense<0.000000e+00> : vector<2x120xf32>
    %217 = tpu.matmul %214, %216, %cst_165 {dimension_numbers = #tpu.dot_dimension_numbers<[1], [0], [0], [1], [0, 0, 1, 1], [], []>} : vector<2x16xbf16>, vector<16x120xbf16>, vector<2x120xf32> -> vector<2x120xf32>
    %218 = arith.addf %182, %217 : vector<2x120xf32>
    %c6 = arith.constant 6 : index
    %c0_166 = arith.constant 0 : index
    %c0_167 = arith.constant 0 : index
    %c0_168 = arith.constant 0 : index
    %219 = vector.load %arg1[%c6, %c0_166, %c0_167, %c0_168] : memref<25x4x2x150xbf16, #tpu.memory_space<vmem>>, vector<1x1x2x150xbf16>
    %220 = vector.shape_cast %219 : vector<1x1x2x150xbf16> to vector<2x150xbf16>
    %cst_169 = arith.constant dense<0.000000e+00> : vector<2x16xf32>
    %221 = tpu.matmul %220, %0, %cst_169 {dimension_numbers = #tpu.dot_dimension_numbers<[1], [0], [0], [1], [0, 0, 1, 1], [], []>} : vector<2x150xbf16>, vector<150x16xbf16>, vector<2x16xf32> -> vector<2x16xf32>
    %222 = vector.broadcast %1 : vector<1x16xf32> to vector<2x16xf32>
    %223 = arith.addf %221, %222 : vector<2x16xf32>
    %cst_170 = arith.constant 0.000000e+00 : f32
    %224 = vector.broadcast %cst_170 : f32 to vector<2x16xf32>
    %225 = arith.maximumf %223, %224 : vector<2x16xf32>
    %c6_171 = arith.constant 6 : index
    %c1_172 = arith.constant 1 : index
    %c0_173 = arith.constant 0 : index
    %c0_174 = arith.constant 0 : index
    %226 = vector.load %arg1[%c6_171, %c1_172, %c0_173, %c0_174] : memref<25x4x2x150xbf16, #tpu.memory_space<vmem>>, vector<1x1x2x150xbf16>
    %227 = vector.shape_cast %226 : vector<1x1x2x150xbf16> to vector<2x150xbf16>
    %cst_175 = arith.constant dense<0.000000e+00> : vector<2x16xf32>
    %228 = tpu.matmul %227, %0, %cst_175 {dimension_numbers = #tpu.dot_dimension_numbers<[1], [0], [0], [1], [0, 0, 1, 1], [], []>} : vector<2x150xbf16>, vector<150x16xbf16>, vector<2x16xf32> -> vector<2x16xf32>
    %229 = vector.broadcast %1 : vector<1x16xf32> to vector<2x16xf32>
    %230 = arith.addf %228, %229 : vector<2x16xf32>
    %cst_176 = arith.constant 0.000000e+00 : f32
    %231 = vector.broadcast %cst_176 : f32 to vector<2x16xf32>
    %232 = arith.maximumf %230, %231 : vector<2x16xf32>
    %233 = arith.maximumf %225, %232 : vector<2x16xf32>
    %c6_177 = arith.constant 6 : index
    %c2_178 = arith.constant 2 : index
    %c0_179 = arith.constant 0 : index
    %c0_180 = arith.constant 0 : index
    %234 = vector.load %arg1[%c6_177, %c2_178, %c0_179, %c0_180] : memref<25x4x2x150xbf16, #tpu.memory_space<vmem>>, vector<1x1x2x150xbf16>
    %235 = vector.shape_cast %234 : vector<1x1x2x150xbf16> to vector<2x150xbf16>
    %cst_181 = arith.constant dense<0.000000e+00> : vector<2x16xf32>
    %236 = tpu.matmul %235, %0, %cst_181 {dimension_numbers = #tpu.dot_dimension_numbers<[1], [0], [0], [1], [0, 0, 1, 1], [], []>} : vector<2x150xbf16>, vector<150x16xbf16>, vector<2x16xf32> -> vector<2x16xf32>
    %237 = vector.broadcast %1 : vector<1x16xf32> to vector<2x16xf32>
    %238 = arith.addf %236, %237 : vector<2x16xf32>
    %cst_182 = arith.constant 0.000000e+00 : f32
    %239 = vector.broadcast %cst_182 : f32 to vector<2x16xf32>
    %240 = arith.maximumf %238, %239 : vector<2x16xf32>
    %c6_183 = arith.constant 6 : index
    %c3_184 = arith.constant 3 : index
    %c0_185 = arith.constant 0 : index
    %c0_186 = arith.constant 0 : index
    %241 = vector.load %arg1[%c6_183, %c3_184, %c0_185, %c0_186] : memref<25x4x2x150xbf16, #tpu.memory_space<vmem>>, vector<1x1x2x150xbf16>
    %242 = vector.shape_cast %241 : vector<1x1x2x150xbf16> to vector<2x150xbf16>
    %cst_187 = arith.constant dense<0.000000e+00> : vector<2x16xf32>
    %243 = tpu.matmul %242, %0, %cst_187 {dimension_numbers = #tpu.dot_dimension_numbers<[1], [0], [0], [1], [0, 0, 1, 1], [], []>} : vector<2x150xbf16>, vector<150x16xbf16>, vector<2x16xf32> -> vector<2x16xf32>
    %244 = vector.broadcast %1 : vector<1x16xf32> to vector<2x16xf32>
    %245 = arith.addf %243, %244 : vector<2x16xf32>
    %cst_188 = arith.constant 0.000000e+00 : f32
    %246 = vector.broadcast %cst_188 : f32 to vector<2x16xf32>
    %247 = arith.maximumf %245, %246 : vector<2x16xf32>
    %248 = arith.maximumf %240, %247 : vector<2x16xf32>
    %249 = arith.maximumf %233, %248 : vector<2x16xf32>
    %250 = arith.truncf %249 : vector<2x16xf32> to vector<2x16xbf16>
    %c6_189 = arith.constant 6 : index
    %c0_190 = arith.constant 0 : index
    %c0_191 = arith.constant 0 : index
    %251 = vector.load %arg4[%c6_189, %c0_190, %c0_191] : memref<25x16x120xbf16, #tpu.memory_space<vmem>>, vector<1x16x120xbf16>
    %252 = vector.shape_cast %251 : vector<1x16x120xbf16> to vector<16x120xbf16>
    %cst_192 = arith.constant dense<0.000000e+00> : vector<2x120xf32>
    %253 = tpu.matmul %250, %252, %cst_192 {dimension_numbers = #tpu.dot_dimension_numbers<[1], [0], [0], [1], [0, 0, 1, 1], [], []>} : vector<2x16xbf16>, vector<16x120xbf16>, vector<2x120xf32> -> vector<2x120xf32>
    %254 = arith.addf %218, %253 : vector<2x120xf32>
    %c7 = arith.constant 7 : index
    %c0_193 = arith.constant 0 : index
    %c0_194 = arith.constant 0 : index
    %c0_195 = arith.constant 0 : index
    %255 = vector.load %arg1[%c7, %c0_193, %c0_194, %c0_195] : memref<25x4x2x150xbf16, #tpu.memory_space<vmem>>, vector<1x1x2x150xbf16>
    %256 = vector.shape_cast %255 : vector<1x1x2x150xbf16> to vector<2x150xbf16>
    %cst_196 = arith.constant dense<0.000000e+00> : vector<2x16xf32>
    %257 = tpu.matmul %256, %0, %cst_196 {dimension_numbers = #tpu.dot_dimension_numbers<[1], [0], [0], [1], [0, 0, 1, 1], [], []>} : vector<2x150xbf16>, vector<150x16xbf16>, vector<2x16xf32> -> vector<2x16xf32>
    %258 = vector.broadcast %1 : vector<1x16xf32> to vector<2x16xf32>
    %259 = arith.addf %257, %258 : vector<2x16xf32>
    %cst_197 = arith.constant 0.000000e+00 : f32
    %260 = vector.broadcast %cst_197 : f32 to vector<2x16xf32>
    %261 = arith.maximumf %259, %260 : vector<2x16xf32>
    %c7_198 = arith.constant 7 : index
    %c1_199 = arith.constant 1 : index
    %c0_200 = arith.constant 0 : index
    %c0_201 = arith.constant 0 : index
    %262 = vector.load %arg1[%c7_198, %c1_199, %c0_200, %c0_201] : memref<25x4x2x150xbf16, #tpu.memory_space<vmem>>, vector<1x1x2x150xbf16>
    %263 = vector.shape_cast %262 : vector<1x1x2x150xbf16> to vector<2x150xbf16>
    %cst_202 = arith.constant dense<0.000000e+00> : vector<2x16xf32>
    %264 = tpu.matmul %263, %0, %cst_202 {dimension_numbers = #tpu.dot_dimension_numbers<[1], [0], [0], [1], [0, 0, 1, 1], [], []>} : vector<2x150xbf16>, vector<150x16xbf16>, vector<2x16xf32> -> vector<2x16xf32>
    %265 = vector.broadcast %1 : vector<1x16xf32> to vector<2x16xf32>
    %266 = arith.addf %264, %265 : vector<2x16xf32>
    %cst_203 = arith.constant 0.000000e+00 : f32
    %267 = vector.broadcast %cst_203 : f32 to vector<2x16xf32>
    %268 = arith.maximumf %266, %267 : vector<2x16xf32>
    %269 = arith.maximumf %261, %268 : vector<2x16xf32>
    %c7_204 = arith.constant 7 : index
    %c2_205 = arith.constant 2 : index
    %c0_206 = arith.constant 0 : index
    %c0_207 = arith.constant 0 : index
    %270 = vector.load %arg1[%c7_204, %c2_205, %c0_206, %c0_207] : memref<25x4x2x150xbf16, #tpu.memory_space<vmem>>, vector<1x1x2x150xbf16>
    %271 = vector.shape_cast %270 : vector<1x1x2x150xbf16> to vector<2x150xbf16>
    %cst_208 = arith.constant dense<0.000000e+00> : vector<2x16xf32>
    %272 = tpu.matmul %271, %0, %cst_208 {dimension_numbers = #tpu.dot_dimension_numbers<[1], [0], [0], [1], [0, 0, 1, 1], [], []>} : vector<2x150xbf16>, vector<150x16xbf16>, vector<2x16xf32> -> vector<2x16xf32>
    %273 = vector.broadcast %1 : vector<1x16xf32> to vector<2x16xf32>
    %274 = arith.addf %272, %273 : vector<2x16xf32>
    %cst_209 = arith.constant 0.000000e+00 : f32
    %275 = vector.broadcast %cst_209 : f32 to vector<2x16xf32>
    %276 = arith.maximumf %274, %275 : vector<2x16xf32>
    %c7_210 = arith.constant 7 : index
    %c3_211 = arith.constant 3 : index
    %c0_212 = arith.constant 0 : index
    %c0_213 = arith.constant 0 : index
    %277 = vector.load %arg1[%c7_210, %c3_211, %c0_212, %c0_213] : memref<25x4x2x150xbf16, #tpu.memory_space<vmem>>, vector<1x1x2x150xbf16>
    %278 = vector.shape_cast %277 : vector<1x1x2x150xbf16> to vector<2x150xbf16>
    %cst_214 = arith.constant dense<0.000000e+00> : vector<2x16xf32>
    %279 = tpu.matmul %278, %0, %cst_214 {dimension_numbers = #tpu.dot_dimension_numbers<[1], [0], [0], [1], [0, 0, 1, 1], [], []>} : vector<2x150xbf16>, vector<150x16xbf16>, vector<2x16xf32> -> vector<2x16xf32>
    %280 = vector.broadcast %1 : vector<1x16xf32> to vector<2x16xf32>
    %281 = arith.addf %279, %280 : vector<2x16xf32>
    %cst_215 = arith.constant 0.000000e+00 : f32
    %282 = vector.broadcast %cst_215 : f32 to vector<2x16xf32>
    %283 = arith.maximumf %281, %282 : vector<2x16xf32>
    %284 = arith.maximumf %276, %283 : vector<2x16xf32>
    %285 = arith.maximumf %269, %284 : vector<2x16xf32>
    %286 = arith.truncf %285 : vector<2x16xf32> to vector<2x16xbf16>
    %c7_216 = arith.constant 7 : index
    %c0_217 = arith.constant 0 : index
    %c0_218 = arith.constant 0 : index
    %287 = vector.load %arg4[%c7_216, %c0_217, %c0_218] : memref<25x16x120xbf16, #tpu.memory_space<vmem>>, vector<1x16x120xbf16>
    %288 = vector.shape_cast %287 : vector<1x16x120xbf16> to vector<16x120xbf16>
    %cst_219 = arith.constant dense<0.000000e+00> : vector<2x120xf32>
    %289 = tpu.matmul %286, %288, %cst_219 {dimension_numbers = #tpu.dot_dimension_numbers<[1], [0], [0], [1], [0, 0, 1, 1], [], []>} : vector<2x16xbf16>, vector<16x120xbf16>, vector<2x120xf32> -> vector<2x120xf32>
    %290 = arith.addf %254, %289 : vector<2x120xf32>
    %c8 = arith.constant 8 : index
    %c0_220 = arith.constant 0 : index
    %c0_221 = arith.constant 0 : index
    %c0_222 = arith.constant 0 : index
    %291 = vector.load %arg1[%c8, %c0_220, %c0_221, %c0_222] : memref<25x4x2x150xbf16, #tpu.memory_space<vmem>>, vector<1x1x2x150xbf16>
    %292 = vector.shape_cast %291 : vector<1x1x2x150xbf16> to vector<2x150xbf16>
    %cst_223 = arith.constant dense<0.000000e+00> : vector<2x16xf32>
    %293 = tpu.matmul %292, %0, %cst_223 {dimension_numbers = #tpu.dot_dimension_numbers<[1], [0], [0], [1], [0, 0, 1, 1], [], []>} : vector<2x150xbf16>, vector<150x16xbf16>, vector<2x16xf32> -> vector<2x16xf32>
    %294 = vector.broadcast %1 : vector<1x16xf32> to vector<2x16xf32>
    %295 = arith.addf %293, %294 : vector<2x16xf32>
    %cst_224 = arith.constant 0.000000e+00 : f32
    %296 = vector.broadcast %cst_224 : f32 to vector<2x16xf32>
    %297 = arith.maximumf %295, %296 : vector<2x16xf32>
    %c8_225 = arith.constant 8 : index
    %c1_226 = arith.constant 1 : index
    %c0_227 = arith.constant 0 : index
    %c0_228 = arith.constant 0 : index
    %298 = vector.load %arg1[%c8_225, %c1_226, %c0_227, %c0_228] : memref<25x4x2x150xbf16, #tpu.memory_space<vmem>>, vector<1x1x2x150xbf16>
    %299 = vector.shape_cast %298 : vector<1x1x2x150xbf16> to vector<2x150xbf16>
    %cst_229 = arith.constant dense<0.000000e+00> : vector<2x16xf32>
    %300 = tpu.matmul %299, %0, %cst_229 {dimension_numbers = #tpu.dot_dimension_numbers<[1], [0], [0], [1], [0, 0, 1, 1], [], []>} : vector<2x150xbf16>, vector<150x16xbf16>, vector<2x16xf32> -> vector<2x16xf32>
    %301 = vector.broadcast %1 : vector<1x16xf32> to vector<2x16xf32>
    %302 = arith.addf %300, %301 : vector<2x16xf32>
    %cst_230 = arith.constant 0.000000e+00 : f32
    %303 = vector.broadcast %cst_230 : f32 to vector<2x16xf32>
    %304 = arith.maximumf %302, %303 : vector<2x16xf32>
    %305 = arith.maximumf %297, %304 : vector<2x16xf32>
    %c8_231 = arith.constant 8 : index
    %c2_232 = arith.constant 2 : index
    %c0_233 = arith.constant 0 : index
    %c0_234 = arith.constant 0 : index
    %306 = vector.load %arg1[%c8_231, %c2_232, %c0_233, %c0_234] : memref<25x4x2x150xbf16, #tpu.memory_space<vmem>>, vector<1x1x2x150xbf16>
    %307 = vector.shape_cast %306 : vector<1x1x2x150xbf16> to vector<2x150xbf16>
    %cst_235 = arith.constant dense<0.000000e+00> : vector<2x16xf32>
    %308 = tpu.matmul %307, %0, %cst_235 {dimension_numbers = #tpu.dot_dimension_numbers<[1], [0], [0], [1], [0, 0, 1, 1], [], []>} : vector<2x150xbf16>, vector<150x16xbf16>, vector<2x16xf32> -> vector<2x16xf32>
    %309 = vector.broadcast %1 : vector<1x16xf32> to vector<2x16xf32>
    %310 = arith.addf %308, %309 : vector<2x16xf32>
    %cst_236 = arith.constant 0.000000e+00 : f32
    %311 = vector.broadcast %cst_236 : f32 to vector<2x16xf32>
    %312 = arith.maximumf %310, %311 : vector<2x16xf32>
    %c8_237 = arith.constant 8 : index
    %c3_238 = arith.constant 3 : index
    %c0_239 = arith.constant 0 : index
    %c0_240 = arith.constant 0 : index
    %313 = vector.load %arg1[%c8_237, %c3_238, %c0_239, %c0_240] : memref<25x4x2x150xbf16, #tpu.memory_space<vmem>>, vector<1x1x2x150xbf16>
    %314 = vector.shape_cast %313 : vector<1x1x2x150xbf16> to vector<2x150xbf16>
    %cst_241 = arith.constant dense<0.000000e+00> : vector<2x16xf32>
    %315 = tpu.matmul %314, %0, %cst_241 {dimension_numbers = #tpu.dot_dimension_numbers<[1], [0], [0], [1], [0, 0, 1, 1], [], []>} : vector<2x150xbf16>, vector<150x16xbf16>, vector<2x16xf32> -> vector<2x16xf32>
    %316 = vector.broadcast %1 : vector<1x16xf32> to vector<2x16xf32>
    %317 = arith.addf %315, %316 : vector<2x16xf32>
    %cst_242 = arith.constant 0.000000e+00 : f32
    %318 = vector.broadcast %cst_242 : f32 to vector<2x16xf32>
    %319 = arith.maximumf %317, %318 : vector<2x16xf32>
    %320 = arith.maximumf %312, %319 : vector<2x16xf32>
    %321 = arith.maximumf %305, %320 : vector<2x16xf32>
    %322 = arith.truncf %321 : vector<2x16xf32> to vector<2x16xbf16>
    %c8_243 = arith.constant 8 : index
    %c0_244 = arith.constant 0 : index
    %c0_245 = arith.constant 0 : index
    %323 = vector.load %arg4[%c8_243, %c0_244, %c0_245] : memref<25x16x120xbf16, #tpu.memory_space<vmem>>, vector<1x16x120xbf16>
    %324 = vector.shape_cast %323 : vector<1x16x120xbf16> to vector<16x120xbf16>
    %cst_246 = arith.constant dense<0.000000e+00> : vector<2x120xf32>
    %325 = tpu.matmul %322, %324, %cst_246 {dimension_numbers = #tpu.dot_dimension_numbers<[1], [0], [0], [1], [0, 0, 1, 1], [], []>} : vector<2x16xbf16>, vector<16x120xbf16>, vector<2x120xf32> -> vector<2x120xf32>
    %326 = arith.addf %290, %325 : vector<2x120xf32>
    %c9 = arith.constant 9 : index
    %c0_247 = arith.constant 0 : index
    %c0_248 = arith.constant 0 : index
    %c0_249 = arith.constant 0 : index
    %327 = vector.load %arg1[%c9, %c0_247, %c0_248, %c0_249] : memref<25x4x2x150xbf16, #tpu.memory_space<vmem>>, vector<1x1x2x150xbf16>
    %328 = vector.shape_cast %327 : vector<1x1x2x150xbf16> to vector<2x150xbf16>
    %cst_250 = arith.constant dense<0.000000e+00> : vector<2x16xf32>
    %329 = tpu.matmul %328, %0, %cst_250 {dimension_numbers = #tpu.dot_dimension_numbers<[1], [0], [0], [1], [0, 0, 1, 1], [], []>} : vector<2x150xbf16>, vector<150x16xbf16>, vector<2x16xf32> -> vector<2x16xf32>
    %330 = vector.broadcast %1 : vector<1x16xf32> to vector<2x16xf32>
    %331 = arith.addf %329, %330 : vector<2x16xf32>
    %cst_251 = arith.constant 0.000000e+00 : f32
    %332 = vector.broadcast %cst_251 : f32 to vector<2x16xf32>
    %333 = arith.maximumf %331, %332 : vector<2x16xf32>
    %c9_252 = arith.constant 9 : index
    %c1_253 = arith.constant 1 : index
    %c0_254 = arith.constant 0 : index
    %c0_255 = arith.constant 0 : index
    %334 = vector.load %arg1[%c9_252, %c1_253, %c0_254, %c0_255] : memref<25x4x2x150xbf16, #tpu.memory_space<vmem>>, vector<1x1x2x150xbf16>
    %335 = vector.shape_cast %334 : vector<1x1x2x150xbf16> to vector<2x150xbf16>
    %cst_256 = arith.constant dense<0.000000e+00> : vector<2x16xf32>
    %336 = tpu.matmul %335, %0, %cst_256 {dimension_numbers = #tpu.dot_dimension_numbers<[1], [0], [0], [1], [0, 0, 1, 1], [], []>} : vector<2x150xbf16>, vector<150x16xbf16>, vector<2x16xf32> -> vector<2x16xf32>
    %337 = vector.broadcast %1 : vector<1x16xf32> to vector<2x16xf32>
    %338 = arith.addf %336, %337 : vector<2x16xf32>
    %cst_257 = arith.constant 0.000000e+00 : f32
    %339 = vector.broadcast %cst_257 : f32 to vector<2x16xf32>
    %340 = arith.maximumf %338, %339 : vector<2x16xf32>
    %341 = arith.maximumf %333, %340 : vector<2x16xf32>
    %c9_258 = arith.constant 9 : index
    %c2_259 = arith.constant 2 : index
    %c0_260 = arith.constant 0 : index
    %c0_261 = arith.constant 0 : index
    %342 = vector.load %arg1[%c9_258, %c2_259, %c0_260, %c0_261] : memref<25x4x2x150xbf16, #tpu.memory_space<vmem>>, vector<1x1x2x150xbf16>
    %343 = vector.shape_cast %342 : vector<1x1x2x150xbf16> to vector<2x150xbf16>
    %cst_262 = arith.constant dense<0.000000e+00> : vector<2x16xf32>
    %344 = tpu.matmul %343, %0, %cst_262 {dimension_numbers = #tpu.dot_dimension_numbers<[1], [0], [0], [1], [0, 0, 1, 1], [], []>} : vector<2x150xbf16>, vector<150x16xbf16>, vector<2x16xf32> -> vector<2x16xf32>
    %345 = vector.broadcast %1 : vector<1x16xf32> to vector<2x16xf32>
    %346 = arith.addf %344, %345 : vector<2x16xf32>
    %cst_263 = arith.constant 0.000000e+00 : f32
    %347 = vector.broadcast %cst_263 : f32 to vector<2x16xf32>
    %348 = arith.maximumf %346, %347 : vector<2x16xf32>
    %c9_264 = arith.constant 9 : index
    %c3_265 = arith.constant 3 : index
    %c0_266 = arith.constant 0 : index
    %c0_267 = arith.constant 0 : index
    %349 = vector.load %arg1[%c9_264, %c3_265, %c0_266, %c0_267] : memref<25x4x2x150xbf16, #tpu.memory_space<vmem>>, vector<1x1x2x150xbf16>
    %350 = vector.shape_cast %349 : vector<1x1x2x150xbf16> to vector<2x150xbf16>
    %cst_268 = arith.constant dense<0.000000e+00> : vector<2x16xf32>
    %351 = tpu.matmul %350, %0, %cst_268 {dimension_numbers = #tpu.dot_dimension_numbers<[1], [0], [0], [1], [0, 0, 1, 1], [], []>} : vector<2x150xbf16>, vector<150x16xbf16>, vector<2x16xf32> -> vector<2x16xf32>
    %352 = vector.broadcast %1 : vector<1x16xf32> to vector<2x16xf32>
    %353 = arith.addf %351, %352 : vector<2x16xf32>
    %cst_269 = arith.constant 0.000000e+00 : f32
    %354 = vector.broadcast %cst_269 : f32 to vector<2x16xf32>
    %355 = arith.maximumf %353, %354 : vector<2x16xf32>
    %356 = arith.maximumf %348, %355 : vector<2x16xf32>
    %357 = arith.maximumf %341, %356 : vector<2x16xf32>
    %358 = arith.truncf %357 : vector<2x16xf32> to vector<2x16xbf16>
    %c9_270 = arith.constant 9 : index
    %c0_271 = arith.constant 0 : index
    %c0_272 = arith.constant 0 : index
    %359 = vector.load %arg4[%c9_270, %c0_271, %c0_272] : memref<25x16x120xbf16, #tpu.memory_space<vmem>>, vector<1x16x120xbf16>
    %360 = vector.shape_cast %359 : vector<1x16x120xbf16> to vector<16x120xbf16>
    %cst_273 = arith.constant dense<0.000000e+00> : vector<2x120xf32>
    %361 = tpu.matmul %358, %360, %cst_273 {dimension_numbers = #tpu.dot_dimension_numbers<[1], [0], [0], [1], [0, 0, 1, 1], [], []>} : vector<2x16xbf16>, vector<16x120xbf16>, vector<2x120xf32> -> vector<2x120xf32>
    %362 = arith.addf %326, %361 : vector<2x120xf32>
    %c10 = arith.constant 10 : index
    %c0_274 = arith.constant 0 : index
    %c0_275 = arith.constant 0 : index
    %c0_276 = arith.constant 0 : index
    %363 = vector.load %arg1[%c10, %c0_274, %c0_275, %c0_276] : memref<25x4x2x150xbf16, #tpu.memory_space<vmem>>, vector<1x1x2x150xbf16>
    %364 = vector.shape_cast %363 : vector<1x1x2x150xbf16> to vector<2x150xbf16>
    %cst_277 = arith.constant dense<0.000000e+00> : vector<2x16xf32>
    %365 = tpu.matmul %364, %0, %cst_277 {dimension_numbers = #tpu.dot_dimension_numbers<[1], [0], [0], [1], [0, 0, 1, 1], [], []>} : vector<2x150xbf16>, vector<150x16xbf16>, vector<2x16xf32> -> vector<2x16xf32>
    %366 = vector.broadcast %1 : vector<1x16xf32> to vector<2x16xf32>
    %367 = arith.addf %365, %366 : vector<2x16xf32>
    %cst_278 = arith.constant 0.000000e+00 : f32
    %368 = vector.broadcast %cst_278 : f32 to vector<2x16xf32>
    %369 = arith.maximumf %367, %368 : vector<2x16xf32>
    %c10_279 = arith.constant 10 : index
    %c1_280 = arith.constant 1 : index
    %c0_281 = arith.constant 0 : index
    %c0_282 = arith.constant 0 : index
    %370 = vector.load %arg1[%c10_279, %c1_280, %c0_281, %c0_282] : memref<25x4x2x150xbf16, #tpu.memory_space<vmem>>, vector<1x1x2x150xbf16>
    %371 = vector.shape_cast %370 : vector<1x1x2x150xbf16> to vector<2x150xbf16>
    %cst_283 = arith.constant dense<0.000000e+00> : vector<2x16xf32>
    %372 = tpu.matmul %371, %0, %cst_283 {dimension_numbers = #tpu.dot_dimension_numbers<[1], [0], [0], [1], [0, 0, 1, 1], [], []>} : vector<2x150xbf16>, vector<150x16xbf16>, vector<2x16xf32> -> vector<2x16xf32>
    %373 = vector.broadcast %1 : vector<1x16xf32> to vector<2x16xf32>
    %374 = arith.addf %372, %373 : vector<2x16xf32>
    %cst_284 = arith.constant 0.000000e+00 : f32
    %375 = vector.broadcast %cst_284 : f32 to vector<2x16xf32>
    %376 = arith.maximumf %374, %375 : vector<2x16xf32>
    %377 = arith.maximumf %369, %376 : vector<2x16xf32>
    %c10_285 = arith.constant 10 : index
    %c2_286 = arith.constant 2 : index
    %c0_287 = arith.constant 0 : index
    %c0_288 = arith.constant 0 : index
    %378 = vector.load %arg1[%c10_285, %c2_286, %c0_287, %c0_288] : memref<25x4x2x150xbf16, #tpu.memory_space<vmem>>, vector<1x1x2x150xbf16>
    %379 = vector.shape_cast %378 : vector<1x1x2x150xbf16> to vector<2x150xbf16>
    %cst_289 = arith.constant dense<0.000000e+00> : vector<2x16xf32>
    %380 = tpu.matmul %379, %0, %cst_289 {dimension_numbers = #tpu.dot_dimension_numbers<[1], [0], [0], [1], [0, 0, 1, 1], [], []>} : vector<2x150xbf16>, vector<150x16xbf16>, vector<2x16xf32> -> vector<2x16xf32>
    %381 = vector.broadcast %1 : vector<1x16xf32> to vector<2x16xf32>
    %382 = arith.addf %380, %381 : vector<2x16xf32>
    %cst_290 = arith.constant 0.000000e+00 : f32
    %383 = vector.broadcast %cst_290 : f32 to vector<2x16xf32>
    %384 = arith.maximumf %382, %383 : vector<2x16xf32>
    %c10_291 = arith.constant 10 : index
    %c3_292 = arith.constant 3 : index
    %c0_293 = arith.constant 0 : index
    %c0_294 = arith.constant 0 : index
    %385 = vector.load %arg1[%c10_291, %c3_292, %c0_293, %c0_294] : memref<25x4x2x150xbf16, #tpu.memory_space<vmem>>, vector<1x1x2x150xbf16>
    %386 = vector.shape_cast %385 : vector<1x1x2x150xbf16> to vector<2x150xbf16>
    %cst_295 = arith.constant dense<0.000000e+00> : vector<2x16xf32>
    %387 = tpu.matmul %386, %0, %cst_295 {dimension_numbers = #tpu.dot_dimension_numbers<[1], [0], [0], [1], [0, 0, 1, 1], [], []>} : vector<2x150xbf16>, vector<150x16xbf16>, vector<2x16xf32> -> vector<2x16xf32>
    %388 = vector.broadcast %1 : vector<1x16xf32> to vector<2x16xf32>
    %389 = arith.addf %387, %388 : vector<2x16xf32>
    %cst_296 = arith.constant 0.000000e+00 : f32
    %390 = vector.broadcast %cst_296 : f32 to vector<2x16xf32>
    %391 = arith.maximumf %389, %390 : vector<2x16xf32>
    %392 = arith.maximumf %384, %391 : vector<2x16xf32>
    %393 = arith.maximumf %377, %392 : vector<2x16xf32>
    %394 = arith.truncf %393 : vector<2x16xf32> to vector<2x16xbf16>
    %c10_297 = arith.constant 10 : index
    %c0_298 = arith.constant 0 : index
    %c0_299 = arith.constant 0 : index
    %395 = vector.load %arg4[%c10_297, %c0_298, %c0_299] : memref<25x16x120xbf16, #tpu.memory_space<vmem>>, vector<1x16x120xbf16>
    %396 = vector.shape_cast %395 : vector<1x16x120xbf16> to vector<16x120xbf16>
    %cst_300 = arith.constant dense<0.000000e+00> : vector<2x120xf32>
    %397 = tpu.matmul %394, %396, %cst_300 {dimension_numbers = #tpu.dot_dimension_numbers<[1], [0], [0], [1], [0, 0, 1, 1], [], []>} : vector<2x16xbf16>, vector<16x120xbf16>, vector<2x120xf32> -> vector<2x120xf32>
    %398 = arith.addf %362, %397 : vector<2x120xf32>
    %c11 = arith.constant 11 : index
    %c0_301 = arith.constant 0 : index
    %c0_302 = arith.constant 0 : index
    %c0_303 = arith.constant 0 : index
    %399 = vector.load %arg1[%c11, %c0_301, %c0_302, %c0_303] : memref<25x4x2x150xbf16, #tpu.memory_space<vmem>>, vector<1x1x2x150xbf16>
    %400 = vector.shape_cast %399 : vector<1x1x2x150xbf16> to vector<2x150xbf16>
    %cst_304 = arith.constant dense<0.000000e+00> : vector<2x16xf32>
    %401 = tpu.matmul %400, %0, %cst_304 {dimension_numbers = #tpu.dot_dimension_numbers<[1], [0], [0], [1], [0, 0, 1, 1], [], []>} : vector<2x150xbf16>, vector<150x16xbf16>, vector<2x16xf32> -> vector<2x16xf32>
    %402 = vector.broadcast %1 : vector<1x16xf32> to vector<2x16xf32>
    %403 = arith.addf %401, %402 : vector<2x16xf32>
    %cst_305 = arith.constant 0.000000e+00 : f32
    %404 = vector.broadcast %cst_305 : f32 to vector<2x16xf32>
    %405 = arith.maximumf %403, %404 : vector<2x16xf32>
    %c11_306 = arith.constant 11 : index
    %c1_307 = arith.constant 1 : index
    %c0_308 = arith.constant 0 : index
    %c0_309 = arith.constant 0 : index
    %406 = vector.load %arg1[%c11_306, %c1_307, %c0_308, %c0_309] : memref<25x4x2x150xbf16, #tpu.memory_space<vmem>>, vector<1x1x2x150xbf16>
    %407 = vector.shape_cast %406 : vector<1x1x2x150xbf16> to vector<2x150xbf16>
    %cst_310 = arith.constant dense<0.000000e+00> : vector<2x16xf32>
    %408 = tpu.matmul %407, %0, %cst_310 {dimension_numbers = #tpu.dot_dimension_numbers<[1], [0], [0], [1], [0, 0, 1, 1], [], []>} : vector<2x150xbf16>, vector<150x16xbf16>, vector<2x16xf32> -> vector<2x16xf32>
    %409 = vector.broadcast %1 : vector<1x16xf32> to vector<2x16xf32>
    %410 = arith.addf %408, %409 : vector<2x16xf32>
    %cst_311 = arith.constant 0.000000e+00 : f32
    %411 = vector.broadcast %cst_311 : f32 to vector<2x16xf32>
    %412 = arith.maximumf %410, %411 : vector<2x16xf32>
    %413 = arith.maximumf %405, %412 : vector<2x16xf32>
    %c11_312 = arith.constant 11 : index
    %c2_313 = arith.constant 2 : index
    %c0_314 = arith.constant 0 : index
    %c0_315 = arith.constant 0 : index
    %414 = vector.load %arg1[%c11_312, %c2_313, %c0_314, %c0_315] : memref<25x4x2x150xbf16, #tpu.memory_space<vmem>>, vector<1x1x2x150xbf16>
    %415 = vector.shape_cast %414 : vector<1x1x2x150xbf16> to vector<2x150xbf16>
    %cst_316 = arith.constant dense<0.000000e+00> : vector<2x16xf32>
    %416 = tpu.matmul %415, %0, %cst_316 {dimension_numbers = #tpu.dot_dimension_numbers<[1], [0], [0], [1], [0, 0, 1, 1], [], []>} : vector<2x150xbf16>, vector<150x16xbf16>, vector<2x16xf32> -> vector<2x16xf32>
    %417 = vector.broadcast %1 : vector<1x16xf32> to vector<2x16xf32>
    %418 = arith.addf %416, %417 : vector<2x16xf32>
    %cst_317 = arith.constant 0.000000e+00 : f32
    %419 = vector.broadcast %cst_317 : f32 to vector<2x16xf32>
    %420 = arith.maximumf %418, %419 : vector<2x16xf32>
    %c11_318 = arith.constant 11 : index
    %c3_319 = arith.constant 3 : index
    %c0_320 = arith.constant 0 : index
    %c0_321 = arith.constant 0 : index
    %421 = vector.load %arg1[%c11_318, %c3_319, %c0_320, %c0_321] : memref<25x4x2x150xbf16, #tpu.memory_space<vmem>>, vector<1x1x2x150xbf16>
    %422 = vector.shape_cast %421 : vector<1x1x2x150xbf16> to vector<2x150xbf16>
    %cst_322 = arith.constant dense<0.000000e+00> : vector<2x16xf32>
    %423 = tpu.matmul %422, %0, %cst_322 {dimension_numbers = #tpu.dot_dimension_numbers<[1], [0], [0], [1], [0, 0, 1, 1], [], []>} : vector<2x150xbf16>, vector<150x16xbf16>, vector<2x16xf32> -> vector<2x16xf32>
    %424 = vector.broadcast %1 : vector<1x16xf32> to vector<2x16xf32>
    %425 = arith.addf %423, %424 : vector<2x16xf32>
    %cst_323 = arith.constant 0.000000e+00 : f32
    %426 = vector.broadcast %cst_323 : f32 to vector<2x16xf32>
    %427 = arith.maximumf %425, %426 : vector<2x16xf32>
    %428 = arith.maximumf %420, %427 : vector<2x16xf32>
    %429 = arith.maximumf %413, %428 : vector<2x16xf32>
    %430 = arith.truncf %429 : vector<2x16xf32> to vector<2x16xbf16>
    %c11_324 = arith.constant 11 : index
    %c0_325 = arith.constant 0 : index
    %c0_326 = arith.constant 0 : index
    %431 = vector.load %arg4[%c11_324, %c0_325, %c0_326] : memref<25x16x120xbf16, #tpu.memory_space<vmem>>, vector<1x16x120xbf16>
    %432 = vector.shape_cast %431 : vector<1x16x120xbf16> to vector<16x120xbf16>
    %cst_327 = arith.constant dense<0.000000e+00> : vector<2x120xf32>
    %433 = tpu.matmul %430, %432, %cst_327 {dimension_numbers = #tpu.dot_dimension_numbers<[1], [0], [0], [1], [0, 0, 1, 1], [], []>} : vector<2x16xbf16>, vector<16x120xbf16>, vector<2x120xf32> -> vector<2x120xf32>
    %434 = arith.addf %398, %433 : vector<2x120xf32>
    %c12 = arith.constant 12 : index
    %c0_328 = arith.constant 0 : index
    %c0_329 = arith.constant 0 : index
    %c0_330 = arith.constant 0 : index
    %435 = vector.load %arg1[%c12, %c0_328, %c0_329, %c0_330] : memref<25x4x2x150xbf16, #tpu.memory_space<vmem>>, vector<1x1x2x150xbf16>
    %436 = vector.shape_cast %435 : vector<1x1x2x150xbf16> to vector<2x150xbf16>
    %cst_331 = arith.constant dense<0.000000e+00> : vector<2x16xf32>
    %437 = tpu.matmul %436, %0, %cst_331 {dimension_numbers = #tpu.dot_dimension_numbers<[1], [0], [0], [1], [0, 0, 1, 1], [], []>} : vector<2x150xbf16>, vector<150x16xbf16>, vector<2x16xf32> -> vector<2x16xf32>
    %438 = vector.broadcast %1 : vector<1x16xf32> to vector<2x16xf32>
    %439 = arith.addf %437, %438 : vector<2x16xf32>
    %cst_332 = arith.constant 0.000000e+00 : f32
    %440 = vector.broadcast %cst_332 : f32 to vector<2x16xf32>
    %441 = arith.maximumf %439, %440 : vector<2x16xf32>
    %c12_333 = arith.constant 12 : index
    %c1_334 = arith.constant 1 : index
    %c0_335 = arith.constant 0 : index
    %c0_336 = arith.constant 0 : index
    %442 = vector.load %arg1[%c12_333, %c1_334, %c0_335, %c0_336] : memref<25x4x2x150xbf16, #tpu.memory_space<vmem>>, vector<1x1x2x150xbf16>
    %443 = vector.shape_cast %442 : vector<1x1x2x150xbf16> to vector<2x150xbf16>
    %cst_337 = arith.constant dense<0.000000e+00> : vector<2x16xf32>
    %444 = tpu.matmul %443, %0, %cst_337 {dimension_numbers = #tpu.dot_dimension_numbers<[1], [0], [0], [1], [0, 0, 1, 1], [], []>} : vector<2x150xbf16>, vector<150x16xbf16>, vector<2x16xf32> -> vector<2x16xf32>
    %445 = vector.broadcast %1 : vector<1x16xf32> to vector<2x16xf32>
    %446 = arith.addf %444, %445 : vector<2x16xf32>
    %cst_338 = arith.constant 0.000000e+00 : f32
    %447 = vector.broadcast %cst_338 : f32 to vector<2x16xf32>
    %448 = arith.maximumf %446, %447 : vector<2x16xf32>
    %449 = arith.maximumf %441, %448 : vector<2x16xf32>
    %c12_339 = arith.constant 12 : index
    %c2_340 = arith.constant 2 : index
    %c0_341 = arith.constant 0 : index
    %c0_342 = arith.constant 0 : index
    %450 = vector.load %arg1[%c12_339, %c2_340, %c0_341, %c0_342] : memref<25x4x2x150xbf16, #tpu.memory_space<vmem>>, vector<1x1x2x150xbf16>
    %451 = vector.shape_cast %450 : vector<1x1x2x150xbf16> to vector<2x150xbf16>
    %cst_343 = arith.constant dense<0.000000e+00> : vector<2x16xf32>
    %452 = tpu.matmul %451, %0, %cst_343 {dimension_numbers = #tpu.dot_dimension_numbers<[1], [0], [0], [1], [0, 0, 1, 1], [], []>} : vector<2x150xbf16>, vector<150x16xbf16>, vector<2x16xf32> -> vector<2x16xf32>
    %453 = vector.broadcast %1 : vector<1x16xf32> to vector<2x16xf32>
    %454 = arith.addf %452, %453 : vector<2x16xf32>
    %cst_344 = arith.constant 0.000000e+00 : f32
    %455 = vector.broadcast %cst_344 : f32 to vector<2x16xf32>
    %456 = arith.maximumf %454, %455 : vector<2x16xf32>
    %c12_345 = arith.constant 12 : index
    %c3_346 = arith.constant 3 : index
    %c0_347 = arith.constant 0 : index
    %c0_348 = arith.constant 0 : index
    %457 = vector.load %arg1[%c12_345, %c3_346, %c0_347, %c0_348] : memref<25x4x2x150xbf16, #tpu.memory_space<vmem>>, vector<1x1x2x150xbf16>
    %458 = vector.shape_cast %457 : vector<1x1x2x150xbf16> to vector<2x150xbf16>
    %cst_349 = arith.constant dense<0.000000e+00> : vector<2x16xf32>
    %459 = tpu.matmul %458, %0, %cst_349 {dimension_numbers = #tpu.dot_dimension_numbers<[1], [0], [0], [1], [0, 0, 1, 1], [], []>} : vector<2x150xbf16>, vector<150x16xbf16>, vector<2x16xf32> -> vector<2x16xf32>
    %460 = vector.broadcast %1 : vector<1x16xf32> to vector<2x16xf32>
    %461 = arith.addf %459, %460 : vector<2x16xf32>
    %cst_350 = arith.constant 0.000000e+00 : f32
    %462 = vector.broadcast %cst_350 : f32 to vector<2x16xf32>
    %463 = arith.maximumf %461, %462 : vector<2x16xf32>
    %464 = arith.maximumf %456, %463 : vector<2x16xf32>
    %465 = arith.maximumf %449, %464 : vector<2x16xf32>
    %466 = arith.truncf %465 : vector<2x16xf32> to vector<2x16xbf16>
    %c12_351 = arith.constant 12 : index
    %c0_352 = arith.constant 0 : index
    %c0_353 = arith.constant 0 : index
    %467 = vector.load %arg4[%c12_351, %c0_352, %c0_353] : memref<25x16x120xbf16, #tpu.memory_space<vmem>>, vector<1x16x120xbf16>
    %468 = vector.shape_cast %467 : vector<1x16x120xbf16> to vector<16x120xbf16>
    %cst_354 = arith.constant dense<0.000000e+00> : vector<2x120xf32>
    %469 = tpu.matmul %466, %468, %cst_354 {dimension_numbers = #tpu.dot_dimension_numbers<[1], [0], [0], [1], [0, 0, 1, 1], [], []>} : vector<2x16xbf16>, vector<16x120xbf16>, vector<2x120xf32> -> vector<2x120xf32>
    %470 = arith.addf %434, %469 : vector<2x120xf32>
    %c13 = arith.constant 13 : index
    %c0_355 = arith.constant 0 : index
    %c0_356 = arith.constant 0 : index
    %c0_357 = arith.constant 0 : index
    %471 = vector.load %arg1[%c13, %c0_355, %c0_356, %c0_357] : memref<25x4x2x150xbf16, #tpu.memory_space<vmem>>, vector<1x1x2x150xbf16>
    %472 = vector.shape_cast %471 : vector<1x1x2x150xbf16> to vector<2x150xbf16>
    %cst_358 = arith.constant dense<0.000000e+00> : vector<2x16xf32>
    %473 = tpu.matmul %472, %0, %cst_358 {dimension_numbers = #tpu.dot_dimension_numbers<[1], [0], [0], [1], [0, 0, 1, 1], [], []>} : vector<2x150xbf16>, vector<150x16xbf16>, vector<2x16xf32> -> vector<2x16xf32>
    %474 = vector.broadcast %1 : vector<1x16xf32> to vector<2x16xf32>
    %475 = arith.addf %473, %474 : vector<2x16xf32>
    %cst_359 = arith.constant 0.000000e+00 : f32
    %476 = vector.broadcast %cst_359 : f32 to vector<2x16xf32>
    %477 = arith.maximumf %475, %476 : vector<2x16xf32>
    %c13_360 = arith.constant 13 : index
    %c1_361 = arith.constant 1 : index
    %c0_362 = arith.constant 0 : index
    %c0_363 = arith.constant 0 : index
    %478 = vector.load %arg1[%c13_360, %c1_361, %c0_362, %c0_363] : memref<25x4x2x150xbf16, #tpu.memory_space<vmem>>, vector<1x1x2x150xbf16>
    %479 = vector.shape_cast %478 : vector<1x1x2x150xbf16> to vector<2x150xbf16>
    %cst_364 = arith.constant dense<0.000000e+00> : vector<2x16xf32>
    %480 = tpu.matmul %479, %0, %cst_364 {dimension_numbers = #tpu.dot_dimension_numbers<[1], [0], [0], [1], [0, 0, 1, 1], [], []>} : vector<2x150xbf16>, vector<150x16xbf16>, vector<2x16xf32> -> vector<2x16xf32>
    %481 = vector.broadcast %1 : vector<1x16xf32> to vector<2x16xf32>
    %482 = arith.addf %480, %481 : vector<2x16xf32>
    %cst_365 = arith.constant 0.000000e+00 : f32
    %483 = vector.broadcast %cst_365 : f32 to vector<2x16xf32>
    %484 = arith.maximumf %482, %483 : vector<2x16xf32>
    %485 = arith.maximumf %477, %484 : vector<2x16xf32>
    %c13_366 = arith.constant 13 : index
    %c2_367 = arith.constant 2 : index
    %c0_368 = arith.constant 0 : index
    %c0_369 = arith.constant 0 : index
    %486 = vector.load %arg1[%c13_366, %c2_367, %c0_368, %c0_369] : memref<25x4x2x150xbf16, #tpu.memory_space<vmem>>, vector<1x1x2x150xbf16>
    %487 = vector.shape_cast %486 : vector<1x1x2x150xbf16> to vector<2x150xbf16>
    %cst_370 = arith.constant dense<0.000000e+00> : vector<2x16xf32>
    %488 = tpu.matmul %487, %0, %cst_370 {dimension_numbers = #tpu.dot_dimension_numbers<[1], [0], [0], [1], [0, 0, 1, 1], [], []>} : vector<2x150xbf16>, vector<150x16xbf16>, vector<2x16xf32> -> vector<2x16xf32>
    %489 = vector.broadcast %1 : vector<1x16xf32> to vector<2x16xf32>
    %490 = arith.addf %488, %489 : vector<2x16xf32>
    %cst_371 = arith.constant 0.000000e+00 : f32
    %491 = vector.broadcast %cst_371 : f32 to vector<2x16xf32>
    %492 = arith.maximumf %490, %491 : vector<2x16xf32>
    %c13_372 = arith.constant 13 : index
    %c3_373 = arith.constant 3 : index
    %c0_374 = arith.constant 0 : index
    %c0_375 = arith.constant 0 : index
    %493 = vector.load %arg1[%c13_372, %c3_373, %c0_374, %c0_375] : memref<25x4x2x150xbf16, #tpu.memory_space<vmem>>, vector<1x1x2x150xbf16>
    %494 = vector.shape_cast %493 : vector<1x1x2x150xbf16> to vector<2x150xbf16>
    %cst_376 = arith.constant dense<0.000000e+00> : vector<2x16xf32>
    %495 = tpu.matmul %494, %0, %cst_376 {dimension_numbers = #tpu.dot_dimension_numbers<[1], [0], [0], [1], [0, 0, 1, 1], [], []>} : vector<2x150xbf16>, vector<150x16xbf16>, vector<2x16xf32> -> vector<2x16xf32>
    %496 = vector.broadcast %1 : vector<1x16xf32> to vector<2x16xf32>
    %497 = arith.addf %495, %496 : vector<2x16xf32>
    %cst_377 = arith.constant 0.000000e+00 : f32
    %498 = vector.broadcast %cst_377 : f32 to vector<2x16xf32>
    %499 = arith.maximumf %497, %498 : vector<2x16xf32>
    %500 = arith.maximumf %492, %499 : vector<2x16xf32>
    %501 = arith.maximumf %485, %500 : vector<2x16xf32>
    %502 = arith.truncf %501 : vector<2x16xf32> to vector<2x16xbf16>
    %c13_378 = arith.constant 13 : index
    %c0_379 = arith.constant 0 : index
    %c0_380 = arith.constant 0 : index
    %503 = vector.load %arg4[%c13_378, %c0_379, %c0_380] : memref<25x16x120xbf16, #tpu.memory_space<vmem>>, vector<1x16x120xbf16>
    %504 = vector.shape_cast %503 : vector<1x16x120xbf16> to vector<16x120xbf16>
    %cst_381 = arith.constant dense<0.000000e+00> : vector<2x120xf32>
    %505 = tpu.matmul %502, %504, %cst_381 {dimension_numbers = #tpu.dot_dimension_numbers<[1], [0], [0], [1], [0, 0, 1, 1], [], []>} : vector<2x16xbf16>, vector<16x120xbf16>, vector<2x120xf32> -> vector<2x120xf32>
    %506 = arith.addf %470, %505 : vector<2x120xf32>
    %c14 = arith.constant 14 : index
    %c0_382 = arith.constant 0 : index
    %c0_383 = arith.constant 0 : index
    %c0_384 = arith.constant 0 : index
    %507 = vector.load %arg1[%c14, %c0_382, %c0_383, %c0_384] : memref<25x4x2x150xbf16, #tpu.memory_space<vmem>>, vector<1x1x2x150xbf16>
    %508 = vector.shape_cast %507 : vector<1x1x2x150xbf16> to vector<2x150xbf16>
    %cst_385 = arith.constant dense<0.000000e+00> : vector<2x16xf32>
    %509 = tpu.matmul %508, %0, %cst_385 {dimension_numbers = #tpu.dot_dimension_numbers<[1], [0], [0], [1], [0, 0, 1, 1], [], []>} : vector<2x150xbf16>, vector<150x16xbf16>, vector<2x16xf32> -> vector<2x16xf32>
    %510 = vector.broadcast %1 : vector<1x16xf32> to vector<2x16xf32>
    %511 = arith.addf %509, %510 : vector<2x16xf32>
    %cst_386 = arith.constant 0.000000e+00 : f32
    %512 = vector.broadcast %cst_386 : f32 to vector<2x16xf32>
    %513 = arith.maximumf %511, %512 : vector<2x16xf32>
    %c14_387 = arith.constant 14 : index
    %c1_388 = arith.constant 1 : index
    %c0_389 = arith.constant 0 : index
    %c0_390 = arith.constant 0 : index
    %514 = vector.load %arg1[%c14_387, %c1_388, %c0_389, %c0_390] : memref<25x4x2x150xbf16, #tpu.memory_space<vmem>>, vector<1x1x2x150xbf16>
    %515 = vector.shape_cast %514 : vector<1x1x2x150xbf16> to vector<2x150xbf16>
    %cst_391 = arith.constant dense<0.000000e+00> : vector<2x16xf32>
    %516 = tpu.matmul %515, %0, %cst_391 {dimension_numbers = #tpu.dot_dimension_numbers<[1], [0], [0], [1], [0, 0, 1, 1], [], []>} : vector<2x150xbf16>, vector<150x16xbf16>, vector<2x16xf32> -> vector<2x16xf32>
    %517 = vector.broadcast %1 : vector<1x16xf32> to vector<2x16xf32>
    %518 = arith.addf %516, %517 : vector<2x16xf32>
    %cst_392 = arith.constant 0.000000e+00 : f32
    %519 = vector.broadcast %cst_392 : f32 to vector<2x16xf32>
    %520 = arith.maximumf %518, %519 : vector<2x16xf32>
    %521 = arith.maximumf %513, %520 : vector<2x16xf32>
    %c14_393 = arith.constant 14 : index
    %c2_394 = arith.constant 2 : index
    %c0_395 = arith.constant 0 : index
    %c0_396 = arith.constant 0 : index
    %522 = vector.load %arg1[%c14_393, %c2_394, %c0_395, %c0_396] : memref<25x4x2x150xbf16, #tpu.memory_space<vmem>>, vector<1x1x2x150xbf16>
    %523 = vector.shape_cast %522 : vector<1x1x2x150xbf16> to vector<2x150xbf16>
    %cst_397 = arith.constant dense<0.000000e+00> : vector<2x16xf32>
    %524 = tpu.matmul %523, %0, %cst_397 {dimension_numbers = #tpu.dot_dimension_numbers<[1], [0], [0], [1], [0, 0, 1, 1], [], []>} : vector<2x150xbf16>, vector<150x16xbf16>, vector<2x16xf32> -> vector<2x16xf32>
    %525 = vector.broadcast %1 : vector<1x16xf32> to vector<2x16xf32>
    %526 = arith.addf %524, %525 : vector<2x16xf32>
    %cst_398 = arith.constant 0.000000e+00 : f32
    %527 = vector.broadcast %cst_398 : f32 to vector<2x16xf32>
    %528 = arith.maximumf %526, %527 : vector<2x16xf32>
    %c14_399 = arith.constant 14 : index
    %c3_400 = arith.constant 3 : index
    %c0_401 = arith.constant 0 : index
    %c0_402 = arith.constant 0 : index
    %529 = vector.load %arg1[%c14_399, %c3_400, %c0_401, %c0_402] : memref<25x4x2x150xbf16, #tpu.memory_space<vmem>>, vector<1x1x2x150xbf16>
    %530 = vector.shape_cast %529 : vector<1x1x2x150xbf16> to vector<2x150xbf16>
    %cst_403 = arith.constant dense<0.000000e+00> : vector<2x16xf32>
    %531 = tpu.matmul %530, %0, %cst_403 {dimension_numbers = #tpu.dot_dimension_numbers<[1], [0], [0], [1], [0, 0, 1, 1], [], []>} : vector<2x150xbf16>, vector<150x16xbf16>, vector<2x16xf32> -> vector<2x16xf32>
    %532 = vector.broadcast %1 : vector<1x16xf32> to vector<2x16xf32>
    %533 = arith.addf %531, %532 : vector<2x16xf32>
    %cst_404 = arith.constant 0.000000e+00 : f32
    %534 = vector.broadcast %cst_404 : f32 to vector<2x16xf32>
    %535 = arith.maximumf %533, %534 : vector<2x16xf32>
    %536 = arith.maximumf %528, %535 : vector<2x16xf32>
    %537 = arith.maximumf %521, %536 : vector<2x16xf32>
    %538 = arith.truncf %537 : vector<2x16xf32> to vector<2x16xbf16>
    %c14_405 = arith.constant 14 : index
    %c0_406 = arith.constant 0 : index
    %c0_407 = arith.constant 0 : index
    %539 = vector.load %arg4[%c14_405, %c0_406, %c0_407] : memref<25x16x120xbf16, #tpu.memory_space<vmem>>, vector<1x16x120xbf16>
    %540 = vector.shape_cast %539 : vector<1x16x120xbf16> to vector<16x120xbf16>
    %cst_408 = arith.constant dense<0.000000e+00> : vector<2x120xf32>
    %541 = tpu.matmul %538, %540, %cst_408 {dimension_numbers = #tpu.dot_dimension_numbers<[1], [0], [0], [1], [0, 0, 1, 1], [], []>} : vector<2x16xbf16>, vector<16x120xbf16>, vector<2x120xf32> -> vector<2x120xf32>
    %542 = arith.addf %506, %541 : vector<2x120xf32>
    %c15 = arith.constant 15 : index
    %c0_409 = arith.constant 0 : index
    %c0_410 = arith.constant 0 : index
    %c0_411 = arith.constant 0 : index
    %543 = vector.load %arg1[%c15, %c0_409, %c0_410, %c0_411] : memref<25x4x2x150xbf16, #tpu.memory_space<vmem>>, vector<1x1x2x150xbf16>
    %544 = vector.shape_cast %543 : vector<1x1x2x150xbf16> to vector<2x150xbf16>
    %cst_412 = arith.constant dense<0.000000e+00> : vector<2x16xf32>
    %545 = tpu.matmul %544, %0, %cst_412 {dimension_numbers = #tpu.dot_dimension_numbers<[1], [0], [0], [1], [0, 0, 1, 1], [], []>} : vector<2x150xbf16>, vector<150x16xbf16>, vector<2x16xf32> -> vector<2x16xf32>
    %546 = vector.broadcast %1 : vector<1x16xf32> to vector<2x16xf32>
    %547 = arith.addf %545, %546 : vector<2x16xf32>
    %cst_413 = arith.constant 0.000000e+00 : f32
    %548 = vector.broadcast %cst_413 : f32 to vector<2x16xf32>
    %549 = arith.maximumf %547, %548 : vector<2x16xf32>
    %c15_414 = arith.constant 15 : index
    %c1_415 = arith.constant 1 : index
    %c0_416 = arith.constant 0 : index
    %c0_417 = arith.constant 0 : index
    %550 = vector.load %arg1[%c15_414, %c1_415, %c0_416, %c0_417] : memref<25x4x2x150xbf16, #tpu.memory_space<vmem>>, vector<1x1x2x150xbf16>
    %551 = vector.shape_cast %550 : vector<1x1x2x150xbf16> to vector<2x150xbf16>
    %cst_418 = arith.constant dense<0.000000e+00> : vector<2x16xf32>
    %552 = tpu.matmul %551, %0, %cst_418 {dimension_numbers = #tpu.dot_dimension_numbers<[1], [0], [0], [1], [0, 0, 1, 1], [], []>} : vector<2x150xbf16>, vector<150x16xbf16>, vector<2x16xf32> -> vector<2x16xf32>
    %553 = vector.broadcast %1 : vector<1x16xf32> to vector<2x16xf32>
    %554 = arith.addf %552, %553 : vector<2x16xf32>
    %cst_419 = arith.constant 0.000000e+00 : f32
    %555 = vector.broadcast %cst_419 : f32 to vector<2x16xf32>
    %556 = arith.maximumf %554, %555 : vector<2x16xf32>
    %557 = arith.maximumf %549, %556 : vector<2x16xf32>
    %c15_420 = arith.constant 15 : index
    %c2_421 = arith.constant 2 : index
    %c0_422 = arith.constant 0 : index
    %c0_423 = arith.constant 0 : index
    %558 = vector.load %arg1[%c15_420, %c2_421, %c0_422, %c0_423] : memref<25x4x2x150xbf16, #tpu.memory_space<vmem>>, vector<1x1x2x150xbf16>
    %559 = vector.shape_cast %558 : vector<1x1x2x150xbf16> to vector<2x150xbf16>
    %cst_424 = arith.constant dense<0.000000e+00> : vector<2x16xf32>
    %560 = tpu.matmul %559, %0, %cst_424 {dimension_numbers = #tpu.dot_dimension_numbers<[1], [0], [0], [1], [0, 0, 1, 1], [], []>} : vector<2x150xbf16>, vector<150x16xbf16>, vector<2x16xf32> -> vector<2x16xf32>
    %561 = vector.broadcast %1 : vector<1x16xf32> to vector<2x16xf32>
    %562 = arith.addf %560, %561 : vector<2x16xf32>
    %cst_425 = arith.constant 0.000000e+00 : f32
    %563 = vector.broadcast %cst_425 : f32 to vector<2x16xf32>
    %564 = arith.maximumf %562, %563 : vector<2x16xf32>
    %c15_426 = arith.constant 15 : index
    %c3_427 = arith.constant 3 : index
    %c0_428 = arith.constant 0 : index
    %c0_429 = arith.constant 0 : index
    %565 = vector.load %arg1[%c15_426, %c3_427, %c0_428, %c0_429] : memref<25x4x2x150xbf16, #tpu.memory_space<vmem>>, vector<1x1x2x150xbf16>
    %566 = vector.shape_cast %565 : vector<1x1x2x150xbf16> to vector<2x150xbf16>
    %cst_430 = arith.constant dense<0.000000e+00> : vector<2x16xf32>
    %567 = tpu.matmul %566, %0, %cst_430 {dimension_numbers = #tpu.dot_dimension_numbers<[1], [0], [0], [1], [0, 0, 1, 1], [], []>} : vector<2x150xbf16>, vector<150x16xbf16>, vector<2x16xf32> -> vector<2x16xf32>
    %568 = vector.broadcast %1 : vector<1x16xf32> to vector<2x16xf32>
    %569 = arith.addf %567, %568 : vector<2x16xf32>
    %cst_431 = arith.constant 0.000000e+00 : f32
    %570 = vector.broadcast %cst_431 : f32 to vector<2x16xf32>
    %571 = arith.maximumf %569, %570 : vector<2x16xf32>
    %572 = arith.maximumf %564, %571 : vector<2x16xf32>
    %573 = arith.maximumf %557, %572 : vector<2x16xf32>
    %574 = arith.truncf %573 : vector<2x16xf32> to vector<2x16xbf16>
    %c15_432 = arith.constant 15 : index
    %c0_433 = arith.constant 0 : index
    %c0_434 = arith.constant 0 : index
    %575 = vector.load %arg4[%c15_432, %c0_433, %c0_434] : memref<25x16x120xbf16, #tpu.memory_space<vmem>>, vector<1x16x120xbf16>
    %576 = vector.shape_cast %575 : vector<1x16x120xbf16> to vector<16x120xbf16>
    %cst_435 = arith.constant dense<0.000000e+00> : vector<2x120xf32>
    %577 = tpu.matmul %574, %576, %cst_435 {dimension_numbers = #tpu.dot_dimension_numbers<[1], [0], [0], [1], [0, 0, 1, 1], [], []>} : vector<2x16xbf16>, vector<16x120xbf16>, vector<2x120xf32> -> vector<2x120xf32>
    %578 = arith.addf %542, %577 : vector<2x120xf32>
    %c16 = arith.constant 16 : index
    %c0_436 = arith.constant 0 : index
    %c0_437 = arith.constant 0 : index
    %c0_438 = arith.constant 0 : index
    %579 = vector.load %arg1[%c16, %c0_436, %c0_437, %c0_438] : memref<25x4x2x150xbf16, #tpu.memory_space<vmem>>, vector<1x1x2x150xbf16>
    %580 = vector.shape_cast %579 : vector<1x1x2x150xbf16> to vector<2x150xbf16>
    %cst_439 = arith.constant dense<0.000000e+00> : vector<2x16xf32>
    %581 = tpu.matmul %580, %0, %cst_439 {dimension_numbers = #tpu.dot_dimension_numbers<[1], [0], [0], [1], [0, 0, 1, 1], [], []>} : vector<2x150xbf16>, vector<150x16xbf16>, vector<2x16xf32> -> vector<2x16xf32>
    %582 = vector.broadcast %1 : vector<1x16xf32> to vector<2x16xf32>
    %583 = arith.addf %581, %582 : vector<2x16xf32>
    %cst_440 = arith.constant 0.000000e+00 : f32
    %584 = vector.broadcast %cst_440 : f32 to vector<2x16xf32>
    %585 = arith.maximumf %583, %584 : vector<2x16xf32>
    %c16_441 = arith.constant 16 : index
    %c1_442 = arith.constant 1 : index
    %c0_443 = arith.constant 0 : index
    %c0_444 = arith.constant 0 : index
    %586 = vector.load %arg1[%c16_441, %c1_442, %c0_443, %c0_444] : memref<25x4x2x150xbf16, #tpu.memory_space<vmem>>, vector<1x1x2x150xbf16>
    %587 = vector.shape_cast %586 : vector<1x1x2x150xbf16> to vector<2x150xbf16>
    %cst_445 = arith.constant dense<0.000000e+00> : vector<2x16xf32>
    %588 = tpu.matmul %587, %0, %cst_445 {dimension_numbers = #tpu.dot_dimension_numbers<[1], [0], [0], [1], [0, 0, 1, 1], [], []>} : vector<2x150xbf16>, vector<150x16xbf16>, vector<2x16xf32> -> vector<2x16xf32>
    %589 = vector.broadcast %1 : vector<1x16xf32> to vector<2x16xf32>
    %590 = arith.addf %588, %589 : vector<2x16xf32>
    %cst_446 = arith.constant 0.000000e+00 : f32
    %591 = vector.broadcast %cst_446 : f32 to vector<2x16xf32>
    %592 = arith.maximumf %590, %591 : vector<2x16xf32>
    %593 = arith.maximumf %585, %592 : vector<2x16xf32>
    %c16_447 = arith.constant 16 : index
    %c2_448 = arith.constant 2 : index
    %c0_449 = arith.constant 0 : index
    %c0_450 = arith.constant 0 : index
    %594 = vector.load %arg1[%c16_447, %c2_448, %c0_449, %c0_450] : memref<25x4x2x150xbf16, #tpu.memory_space<vmem>>, vector<1x1x2x150xbf16>
    %595 = vector.shape_cast %594 : vector<1x1x2x150xbf16> to vector<2x150xbf16>
    %cst_451 = arith.constant dense<0.000000e+00> : vector<2x16xf32>
    %596 = tpu.matmul %595, %0, %cst_451 {dimension_numbers = #tpu.dot_dimension_numbers<[1], [0], [0], [1], [0, 0, 1, 1], [], []>} : vector<2x150xbf16>, vector<150x16xbf16>, vector<2x16xf32> -> vector<2x16xf32>
    %597 = vector.broadcast %1 : vector<1x16xf32> to vector<2x16xf32>
    %598 = arith.addf %596, %597 : vector<2x16xf32>
    %cst_452 = arith.constant 0.000000e+00 : f32
    %599 = vector.broadcast %cst_452 : f32 to vector<2x16xf32>
    %600 = arith.maximumf %598, %599 : vector<2x16xf32>
    %c16_453 = arith.constant 16 : index
    %c3_454 = arith.constant 3 : index
    %c0_455 = arith.constant 0 : index
    %c0_456 = arith.constant 0 : index
    %601 = vector.load %arg1[%c16_453, %c3_454, %c0_455, %c0_456] : memref<25x4x2x150xbf16, #tpu.memory_space<vmem>>, vector<1x1x2x150xbf16>
    %602 = vector.shape_cast %601 : vector<1x1x2x150xbf16> to vector<2x150xbf16>
    %cst_457 = arith.constant dense<0.000000e+00> : vector<2x16xf32>
    %603 = tpu.matmul %602, %0, %cst_457 {dimension_numbers = #tpu.dot_dimension_numbers<[1], [0], [0], [1], [0, 0, 1, 1], [], []>} : vector<2x150xbf16>, vector<150x16xbf16>, vector<2x16xf32> -> vector<2x16xf32>
    %604 = vector.broadcast %1 : vector<1x16xf32> to vector<2x16xf32>
    %605 = arith.addf %603, %604 : vector<2x16xf32>
    %cst_458 = arith.constant 0.000000e+00 : f32
    %606 = vector.broadcast %cst_458 : f32 to vector<2x16xf32>
    %607 = arith.maximumf %605, %606 : vector<2x16xf32>
    %608 = arith.maximumf %600, %607 : vector<2x16xf32>
    %609 = arith.maximumf %593, %608 : vector<2x16xf32>
    %610 = arith.truncf %609 : vector<2x16xf32> to vector<2x16xbf16>
    %c16_459 = arith.constant 16 : index
    %c0_460 = arith.constant 0 : index
    %c0_461 = arith.constant 0 : index
    %611 = vector.load %arg4[%c16_459, %c0_460, %c0_461] : memref<25x16x120xbf16, #tpu.memory_space<vmem>>, vector<1x16x120xbf16>
    %612 = vector.shape_cast %611 : vector<1x16x120xbf16> to vector<16x120xbf16>
    %cst_462 = arith.constant dense<0.000000e+00> : vector<2x120xf32>
    %613 = tpu.matmul %610, %612, %cst_462 {dimension_numbers = #tpu.dot_dimension_numbers<[1], [0], [0], [1], [0, 0, 1, 1], [], []>} : vector<2x16xbf16>, vector<16x120xbf16>, vector<2x120xf32> -> vector<2x120xf32>
    %614 = arith.addf %578, %613 : vector<2x120xf32>
    %c17 = arith.constant 17 : index
    %c0_463 = arith.constant 0 : index
    %c0_464 = arith.constant 0 : index
    %c0_465 = arith.constant 0 : index
    %615 = vector.load %arg1[%c17, %c0_463, %c0_464, %c0_465] : memref<25x4x2x150xbf16, #tpu.memory_space<vmem>>, vector<1x1x2x150xbf16>
    %616 = vector.shape_cast %615 : vector<1x1x2x150xbf16> to vector<2x150xbf16>
    %cst_466 = arith.constant dense<0.000000e+00> : vector<2x16xf32>
    %617 = tpu.matmul %616, %0, %cst_466 {dimension_numbers = #tpu.dot_dimension_numbers<[1], [0], [0], [1], [0, 0, 1, 1], [], []>} : vector<2x150xbf16>, vector<150x16xbf16>, vector<2x16xf32> -> vector<2x16xf32>
    %618 = vector.broadcast %1 : vector<1x16xf32> to vector<2x16xf32>
    %619 = arith.addf %617, %618 : vector<2x16xf32>
    %cst_467 = arith.constant 0.000000e+00 : f32
    %620 = vector.broadcast %cst_467 : f32 to vector<2x16xf32>
    %621 = arith.maximumf %619, %620 : vector<2x16xf32>
    %c17_468 = arith.constant 17 : index
    %c1_469 = arith.constant 1 : index
    %c0_470 = arith.constant 0 : index
    %c0_471 = arith.constant 0 : index
    %622 = vector.load %arg1[%c17_468, %c1_469, %c0_470, %c0_471] : memref<25x4x2x150xbf16, #tpu.memory_space<vmem>>, vector<1x1x2x150xbf16>
    %623 = vector.shape_cast %622 : vector<1x1x2x150xbf16> to vector<2x150xbf16>
    %cst_472 = arith.constant dense<0.000000e+00> : vector<2x16xf32>
    %624 = tpu.matmul %623, %0, %cst_472 {dimension_numbers = #tpu.dot_dimension_numbers<[1], [0], [0], [1], [0, 0, 1, 1], [], []>} : vector<2x150xbf16>, vector<150x16xbf16>, vector<2x16xf32> -> vector<2x16xf32>
    %625 = vector.broadcast %1 : vector<1x16xf32> to vector<2x16xf32>
    %626 = arith.addf %624, %625 : vector<2x16xf32>
    %cst_473 = arith.constant 0.000000e+00 : f32
    %627 = vector.broadcast %cst_473 : f32 to vector<2x16xf32>
    %628 = arith.maximumf %626, %627 : vector<2x16xf32>
    %629 = arith.maximumf %621, %628 : vector<2x16xf32>
    %c17_474 = arith.constant 17 : index
    %c2_475 = arith.constant 2 : index
    %c0_476 = arith.constant 0 : index
    %c0_477 = arith.constant 0 : index
    %630 = vector.load %arg1[%c17_474, %c2_475, %c0_476, %c0_477] : memref<25x4x2x150xbf16, #tpu.memory_space<vmem>>, vector<1x1x2x150xbf16>
    %631 = vector.shape_cast %630 : vector<1x1x2x150xbf16> to vector<2x150xbf16>
    %cst_478 = arith.constant dense<0.000000e+00> : vector<2x16xf32>
    %632 = tpu.matmul %631, %0, %cst_478 {dimension_numbers = #tpu.dot_dimension_numbers<[1], [0], [0], [1], [0, 0, 1, 1], [], []>} : vector<2x150xbf16>, vector<150x16xbf16>, vector<2x16xf32> -> vector<2x16xf32>
    %633 = vector.broadcast %1 : vector<1x16xf32> to vector<2x16xf32>
    %634 = arith.addf %632, %633 : vector<2x16xf32>
    %cst_479 = arith.constant 0.000000e+00 : f32
    %635 = vector.broadcast %cst_479 : f32 to vector<2x16xf32>
    %636 = arith.maximumf %634, %635 : vector<2x16xf32>
    %c17_480 = arith.constant 17 : index
    %c3_481 = arith.constant 3 : index
    %c0_482 = arith.constant 0 : index
    %c0_483 = arith.constant 0 : index
    %637 = vector.load %arg1[%c17_480, %c3_481, %c0_482, %c0_483] : memref<25x4x2x150xbf16, #tpu.memory_space<vmem>>, vector<1x1x2x150xbf16>
    %638 = vector.shape_cast %637 : vector<1x1x2x150xbf16> to vector<2x150xbf16>
    %cst_484 = arith.constant dense<0.000000e+00> : vector<2x16xf32>
    %639 = tpu.matmul %638, %0, %cst_484 {dimension_numbers = #tpu.dot_dimension_numbers<[1], [0], [0], [1], [0, 0, 1, 1], [], []>} : vector<2x150xbf16>, vector<150x16xbf16>, vector<2x16xf32> -> vector<2x16xf32>
    %640 = vector.broadcast %1 : vector<1x16xf32> to vector<2x16xf32>
    %641 = arith.addf %639, %640 : vector<2x16xf32>
    %cst_485 = arith.constant 0.000000e+00 : f32
    %642 = vector.broadcast %cst_485 : f32 to vector<2x16xf32>
    %643 = arith.maximumf %641, %642 : vector<2x16xf32>
    %644 = arith.maximumf %636, %643 : vector<2x16xf32>
    %645 = arith.maximumf %629, %644 : vector<2x16xf32>
    %646 = arith.truncf %645 : vector<2x16xf32> to vector<2x16xbf16>
    %c17_486 = arith.constant 17 : index
    %c0_487 = arith.constant 0 : index
    %c0_488 = arith.constant 0 : index
    %647 = vector.load %arg4[%c17_486, %c0_487, %c0_488] : memref<25x16x120xbf16, #tpu.memory_space<vmem>>, vector<1x16x120xbf16>
    %648 = vector.shape_cast %647 : vector<1x16x120xbf16> to vector<16x120xbf16>
    %cst_489 = arith.constant dense<0.000000e+00> : vector<2x120xf32>
    %649 = tpu.matmul %646, %648, %cst_489 {dimension_numbers = #tpu.dot_dimension_numbers<[1], [0], [0], [1], [0, 0, 1, 1], [], []>} : vector<2x16xbf16>, vector<16x120xbf16>, vector<2x120xf32> -> vector<2x120xf32>
    %650 = arith.addf %614, %649 : vector<2x120xf32>
    %c18 = arith.constant 18 : index
    %c0_490 = arith.constant 0 : index
    %c0_491 = arith.constant 0 : index
    %c0_492 = arith.constant 0 : index
    %651 = vector.load %arg1[%c18, %c0_490, %c0_491, %c0_492] : memref<25x4x2x150xbf16, #tpu.memory_space<vmem>>, vector<1x1x2x150xbf16>
    %652 = vector.shape_cast %651 : vector<1x1x2x150xbf16> to vector<2x150xbf16>
    %cst_493 = arith.constant dense<0.000000e+00> : vector<2x16xf32>
    %653 = tpu.matmul %652, %0, %cst_493 {dimension_numbers = #tpu.dot_dimension_numbers<[1], [0], [0], [1], [0, 0, 1, 1], [], []>} : vector<2x150xbf16>, vector<150x16xbf16>, vector<2x16xf32> -> vector<2x16xf32>
    %654 = vector.broadcast %1 : vector<1x16xf32> to vector<2x16xf32>
    %655 = arith.addf %653, %654 : vector<2x16xf32>
    %cst_494 = arith.constant 0.000000e+00 : f32
    %656 = vector.broadcast %cst_494 : f32 to vector<2x16xf32>
    %657 = arith.maximumf %655, %656 : vector<2x16xf32>
    %c18_495 = arith.constant 18 : index
    %c1_496 = arith.constant 1 : index
    %c0_497 = arith.constant 0 : index
    %c0_498 = arith.constant 0 : index
    %658 = vector.load %arg1[%c18_495, %c1_496, %c0_497, %c0_498] : memref<25x4x2x150xbf16, #tpu.memory_space<vmem>>, vector<1x1x2x150xbf16>
    %659 = vector.shape_cast %658 : vector<1x1x2x150xbf16> to vector<2x150xbf16>
    %cst_499 = arith.constant dense<0.000000e+00> : vector<2x16xf32>
    %660 = tpu.matmul %659, %0, %cst_499 {dimension_numbers = #tpu.dot_dimension_numbers<[1], [0], [0], [1], [0, 0, 1, 1], [], []>} : vector<2x150xbf16>, vector<150x16xbf16>, vector<2x16xf32> -> vector<2x16xf32>
    %661 = vector.broadcast %1 : vector<1x16xf32> to vector<2x16xf32>
    %662 = arith.addf %660, %661 : vector<2x16xf32>
    %cst_500 = arith.constant 0.000000e+00 : f32
    %663 = vector.broadcast %cst_500 : f32 to vector<2x16xf32>
    %664 = arith.maximumf %662, %663 : vector<2x16xf32>
    %665 = arith.maximumf %657, %664 : vector<2x16xf32>
    %c18_501 = arith.constant 18 : index
    %c2_502 = arith.constant 2 : index
    %c0_503 = arith.constant 0 : index
    %c0_504 = arith.constant 0 : index
    %666 = vector.load %arg1[%c18_501, %c2_502, %c0_503, %c0_504] : memref<25x4x2x150xbf16, #tpu.memory_space<vmem>>, vector<1x1x2x150xbf16>
    %667 = vector.shape_cast %666 : vector<1x1x2x150xbf16> to vector<2x150xbf16>
    %cst_505 = arith.constant dense<0.000000e+00> : vector<2x16xf32>
    %668 = tpu.matmul %667, %0, %cst_505 {dimension_numbers = #tpu.dot_dimension_numbers<[1], [0], [0], [1], [0, 0, 1, 1], [], []>} : vector<2x150xbf16>, vector<150x16xbf16>, vector<2x16xf32> -> vector<2x16xf32>
    %669 = vector.broadcast %1 : vector<1x16xf32> to vector<2x16xf32>
    %670 = arith.addf %668, %669 : vector<2x16xf32>
    %cst_506 = arith.constant 0.000000e+00 : f32
    %671 = vector.broadcast %cst_506 : f32 to vector<2x16xf32>
    %672 = arith.maximumf %670, %671 : vector<2x16xf32>
    %c18_507 = arith.constant 18 : index
    %c3_508 = arith.constant 3 : index
    %c0_509 = arith.constant 0 : index
    %c0_510 = arith.constant 0 : index
    %673 = vector.load %arg1[%c18_507, %c3_508, %c0_509, %c0_510] : memref<25x4x2x150xbf16, #tpu.memory_space<vmem>>, vector<1x1x2x150xbf16>
    %674 = vector.shape_cast %673 : vector<1x1x2x150xbf16> to vector<2x150xbf16>
    %cst_511 = arith.constant dense<0.000000e+00> : vector<2x16xf32>
    %675 = tpu.matmul %674, %0, %cst_511 {dimension_numbers = #tpu.dot_dimension_numbers<[1], [0], [0], [1], [0, 0, 1, 1], [], []>} : vector<2x150xbf16>, vector<150x16xbf16>, vector<2x16xf32> -> vector<2x16xf32>
    %676 = vector.broadcast %1 : vector<1x16xf32> to vector<2x16xf32>
    %677 = arith.addf %675, %676 : vector<2x16xf32>
    %cst_512 = arith.constant 0.000000e+00 : f32
    %678 = vector.broadcast %cst_512 : f32 to vector<2x16xf32>
    %679 = arith.maximumf %677, %678 : vector<2x16xf32>
    %680 = arith.maximumf %672, %679 : vector<2x16xf32>
    %681 = arith.maximumf %665, %680 : vector<2x16xf32>
    %682 = arith.truncf %681 : vector<2x16xf32> to vector<2x16xbf16>
    %c18_513 = arith.constant 18 : index
    %c0_514 = arith.constant 0 : index
    %c0_515 = arith.constant 0 : index
    %683 = vector.load %arg4[%c18_513, %c0_514, %c0_515] : memref<25x16x120xbf16, #tpu.memory_space<vmem>>, vector<1x16x120xbf16>
    %684 = vector.shape_cast %683 : vector<1x16x120xbf16> to vector<16x120xbf16>
    %cst_516 = arith.constant dense<0.000000e+00> : vector<2x120xf32>
    %685 = tpu.matmul %682, %684, %cst_516 {dimension_numbers = #tpu.dot_dimension_numbers<[1], [0], [0], [1], [0, 0, 1, 1], [], []>} : vector<2x16xbf16>, vector<16x120xbf16>, vector<2x120xf32> -> vector<2x120xf32>
    %686 = arith.addf %650, %685 : vector<2x120xf32>
    %c19 = arith.constant 19 : index
    %c0_517 = arith.constant 0 : index
    %c0_518 = arith.constant 0 : index
    %c0_519 = arith.constant 0 : index
    %687 = vector.load %arg1[%c19, %c0_517, %c0_518, %c0_519] : memref<25x4x2x150xbf16, #tpu.memory_space<vmem>>, vector<1x1x2x150xbf16>
    %688 = vector.shape_cast %687 : vector<1x1x2x150xbf16> to vector<2x150xbf16>
    %cst_520 = arith.constant dense<0.000000e+00> : vector<2x16xf32>
    %689 = tpu.matmul %688, %0, %cst_520 {dimension_numbers = #tpu.dot_dimension_numbers<[1], [0], [0], [1], [0, 0, 1, 1], [], []>} : vector<2x150xbf16>, vector<150x16xbf16>, vector<2x16xf32> -> vector<2x16xf32>
    %690 = vector.broadcast %1 : vector<1x16xf32> to vector<2x16xf32>
    %691 = arith.addf %689, %690 : vector<2x16xf32>
    %cst_521 = arith.constant 0.000000e+00 : f32
    %692 = vector.broadcast %cst_521 : f32 to vector<2x16xf32>
    %693 = arith.maximumf %691, %692 : vector<2x16xf32>
    %c19_522 = arith.constant 19 : index
    %c1_523 = arith.constant 1 : index
    %c0_524 = arith.constant 0 : index
    %c0_525 = arith.constant 0 : index
    %694 = vector.load %arg1[%c19_522, %c1_523, %c0_524, %c0_525] : memref<25x4x2x150xbf16, #tpu.memory_space<vmem>>, vector<1x1x2x150xbf16>
    %695 = vector.shape_cast %694 : vector<1x1x2x150xbf16> to vector<2x150xbf16>
    %cst_526 = arith.constant dense<0.000000e+00> : vector<2x16xf32>
    %696 = tpu.matmul %695, %0, %cst_526 {dimension_numbers = #tpu.dot_dimension_numbers<[1], [0], [0], [1], [0, 0, 1, 1], [], []>} : vector<2x150xbf16>, vector<150x16xbf16>, vector<2x16xf32> -> vector<2x16xf32>
    %697 = vector.broadcast %1 : vector<1x16xf32> to vector<2x16xf32>
    %698 = arith.addf %696, %697 : vector<2x16xf32>
    %cst_527 = arith.constant 0.000000e+00 : f32
    %699 = vector.broadcast %cst_527 : f32 to vector<2x16xf32>
    %700 = arith.maximumf %698, %699 : vector<2x16xf32>
    %701 = arith.maximumf %693, %700 : vector<2x16xf32>
    %c19_528 = arith.constant 19 : index
    %c2_529 = arith.constant 2 : index
    %c0_530 = arith.constant 0 : index
    %c0_531 = arith.constant 0 : index
    %702 = vector.load %arg1[%c19_528, %c2_529, %c0_530, %c0_531] : memref<25x4x2x150xbf16, #tpu.memory_space<vmem>>, vector<1x1x2x150xbf16>
    %703 = vector.shape_cast %702 : vector<1x1x2x150xbf16> to vector<2x150xbf16>
    %cst_532 = arith.constant dense<0.000000e+00> : vector<2x16xf32>
    %704 = tpu.matmul %703, %0, %cst_532 {dimension_numbers = #tpu.dot_dimension_numbers<[1], [0], [0], [1], [0, 0, 1, 1], [], []>} : vector<2x150xbf16>, vector<150x16xbf16>, vector<2x16xf32> -> vector<2x16xf32>
    %705 = vector.broadcast %1 : vector<1x16xf32> to vector<2x16xf32>
    %706 = arith.addf %704, %705 : vector<2x16xf32>
    %cst_533 = arith.constant 0.000000e+00 : f32
    %707 = vector.broadcast %cst_533 : f32 to vector<2x16xf32>
    %708 = arith.maximumf %706, %707 : vector<2x16xf32>
    %c19_534 = arith.constant 19 : index
    %c3_535 = arith.constant 3 : index
    %c0_536 = arith.constant 0 : index
    %c0_537 = arith.constant 0 : index
    %709 = vector.load %arg1[%c19_534, %c3_535, %c0_536, %c0_537] : memref<25x4x2x150xbf16, #tpu.memory_space<vmem>>, vector<1x1x2x150xbf16>
    %710 = vector.shape_cast %709 : vector<1x1x2x150xbf16> to vector<2x150xbf16>
    %cst_538 = arith.constant dense<0.000000e+00> : vector<2x16xf32>
    %711 = tpu.matmul %710, %0, %cst_538 {dimension_numbers = #tpu.dot_dimension_numbers<[1], [0], [0], [1], [0, 0, 1, 1], [], []>} : vector<2x150xbf16>, vector<150x16xbf16>, vector<2x16xf32> -> vector<2x16xf32>
    %712 = vector.broadcast %1 : vector<1x16xf32> to vector<2x16xf32>
    %713 = arith.addf %711, %712 : vector<2x16xf32>
    %cst_539 = arith.constant 0.000000e+00 : f32
    %714 = vector.broadcast %cst_539 : f32 to vector<2x16xf32>
    %715 = arith.maximumf %713, %714 : vector<2x16xf32>
    %716 = arith.maximumf %708, %715 : vector<2x16xf32>
    %717 = arith.maximumf %701, %716 : vector<2x16xf32>
    %718 = arith.truncf %717 : vector<2x16xf32> to vector<2x16xbf16>
    %c19_540 = arith.constant 19 : index
    %c0_541 = arith.constant 0 : index
    %c0_542 = arith.constant 0 : index
    %719 = vector.load %arg4[%c19_540, %c0_541, %c0_542] : memref<25x16x120xbf16, #tpu.memory_space<vmem>>, vector<1x16x120xbf16>
    %720 = vector.shape_cast %719 : vector<1x16x120xbf16> to vector<16x120xbf16>
    %cst_543 = arith.constant dense<0.000000e+00> : vector<2x120xf32>
    %721 = tpu.matmul %718, %720, %cst_543 {dimension_numbers = #tpu.dot_dimension_numbers<[1], [0], [0], [1], [0, 0, 1, 1], [], []>} : vector<2x16xbf16>, vector<16x120xbf16>, vector<2x120xf32> -> vector<2x120xf32>
    %722 = arith.addf %686, %721 : vector<2x120xf32>
    %c20 = arith.constant 20 : index
    %c0_544 = arith.constant 0 : index
    %c0_545 = arith.constant 0 : index
    %c0_546 = arith.constant 0 : index
    %723 = vector.load %arg1[%c20, %c0_544, %c0_545, %c0_546] : memref<25x4x2x150xbf16, #tpu.memory_space<vmem>>, vector<1x1x2x150xbf16>
    %724 = vector.shape_cast %723 : vector<1x1x2x150xbf16> to vector<2x150xbf16>
    %cst_547 = arith.constant dense<0.000000e+00> : vector<2x16xf32>
    %725 = tpu.matmul %724, %0, %cst_547 {dimension_numbers = #tpu.dot_dimension_numbers<[1], [0], [0], [1], [0, 0, 1, 1], [], []>} : vector<2x150xbf16>, vector<150x16xbf16>, vector<2x16xf32> -> vector<2x16xf32>
    %726 = vector.broadcast %1 : vector<1x16xf32> to vector<2x16xf32>
    %727 = arith.addf %725, %726 : vector<2x16xf32>
    %cst_548 = arith.constant 0.000000e+00 : f32
    %728 = vector.broadcast %cst_548 : f32 to vector<2x16xf32>
    %729 = arith.maximumf %727, %728 : vector<2x16xf32>
    %c20_549 = arith.constant 20 : index
    %c1_550 = arith.constant 1 : index
    %c0_551 = arith.constant 0 : index
    %c0_552 = arith.constant 0 : index
    %730 = vector.load %arg1[%c20_549, %c1_550, %c0_551, %c0_552] : memref<25x4x2x150xbf16, #tpu.memory_space<vmem>>, vector<1x1x2x150xbf16>
    %731 = vector.shape_cast %730 : vector<1x1x2x150xbf16> to vector<2x150xbf16>
    %cst_553 = arith.constant dense<0.000000e+00> : vector<2x16xf32>
    %732 = tpu.matmul %731, %0, %cst_553 {dimension_numbers = #tpu.dot_dimension_numbers<[1], [0], [0], [1], [0, 0, 1, 1], [], []>} : vector<2x150xbf16>, vector<150x16xbf16>, vector<2x16xf32> -> vector<2x16xf32>
    %733 = vector.broadcast %1 : vector<1x16xf32> to vector<2x16xf32>
    %734 = arith.addf %732, %733 : vector<2x16xf32>
    %cst_554 = arith.constant 0.000000e+00 : f32
    %735 = vector.broadcast %cst_554 : f32 to vector<2x16xf32>
    %736 = arith.maximumf %734, %735 : vector<2x16xf32>
    %737 = arith.maximumf %729, %736 : vector<2x16xf32>
    %c20_555 = arith.constant 20 : index
    %c2_556 = arith.constant 2 : index
    %c0_557 = arith.constant 0 : index
    %c0_558 = arith.constant 0 : index
    %738 = vector.load %arg1[%c20_555, %c2_556, %c0_557, %c0_558] : memref<25x4x2x150xbf16, #tpu.memory_space<vmem>>, vector<1x1x2x150xbf16>
    %739 = vector.shape_cast %738 : vector<1x1x2x150xbf16> to vector<2x150xbf16>
    %cst_559 = arith.constant dense<0.000000e+00> : vector<2x16xf32>
    %740 = tpu.matmul %739, %0, %cst_559 {dimension_numbers = #tpu.dot_dimension_numbers<[1], [0], [0], [1], [0, 0, 1, 1], [], []>} : vector<2x150xbf16>, vector<150x16xbf16>, vector<2x16xf32> -> vector<2x16xf32>
    %741 = vector.broadcast %1 : vector<1x16xf32> to vector<2x16xf32>
    %742 = arith.addf %740, %741 : vector<2x16xf32>
    %cst_560 = arith.constant 0.000000e+00 : f32
    %743 = vector.broadcast %cst_560 : f32 to vector<2x16xf32>
    %744 = arith.maximumf %742, %743 : vector<2x16xf32>
    %c20_561 = arith.constant 20 : index
    %c3_562 = arith.constant 3 : index
    %c0_563 = arith.constant 0 : index
    %c0_564 = arith.constant 0 : index
    %745 = vector.load %arg1[%c20_561, %c3_562, %c0_563, %c0_564] : memref<25x4x2x150xbf16, #tpu.memory_space<vmem>>, vector<1x1x2x150xbf16>
    %746 = vector.shape_cast %745 : vector<1x1x2x150xbf16> to vector<2x150xbf16>
    %cst_565 = arith.constant dense<0.000000e+00> : vector<2x16xf32>
    %747 = tpu.matmul %746, %0, %cst_565 {dimension_numbers = #tpu.dot_dimension_numbers<[1], [0], [0], [1], [0, 0, 1, 1], [], []>} : vector<2x150xbf16>, vector<150x16xbf16>, vector<2x16xf32> -> vector<2x16xf32>
    %748 = vector.broadcast %1 : vector<1x16xf32> to vector<2x16xf32>
    %749 = arith.addf %747, %748 : vector<2x16xf32>
    %cst_566 = arith.constant 0.000000e+00 : f32
    %750 = vector.broadcast %cst_566 : f32 to vector<2x16xf32>
    %751 = arith.maximumf %749, %750 : vector<2x16xf32>
    %752 = arith.maximumf %744, %751 : vector<2x16xf32>
    %753 = arith.maximumf %737, %752 : vector<2x16xf32>
    %754 = arith.truncf %753 : vector<2x16xf32> to vector<2x16xbf16>
    %c20_567 = arith.constant 20 : index
    %c0_568 = arith.constant 0 : index
    %c0_569 = arith.constant 0 : index
    %755 = vector.load %arg4[%c20_567, %c0_568, %c0_569] : memref<25x16x120xbf16, #tpu.memory_space<vmem>>, vector<1x16x120xbf16>
    %756 = vector.shape_cast %755 : vector<1x16x120xbf16> to vector<16x120xbf16>
    %cst_570 = arith.constant dense<0.000000e+00> : vector<2x120xf32>
    %757 = tpu.matmul %754, %756, %cst_570 {dimension_numbers = #tpu.dot_dimension_numbers<[1], [0], [0], [1], [0, 0, 1, 1], [], []>} : vector<2x16xbf16>, vector<16x120xbf16>, vector<2x120xf32> -> vector<2x120xf32>
    %758 = arith.addf %722, %757 : vector<2x120xf32>
    %c21 = arith.constant 21 : index
    %c0_571 = arith.constant 0 : index
    %c0_572 = arith.constant 0 : index
    %c0_573 = arith.constant 0 : index
    %759 = vector.load %arg1[%c21, %c0_571, %c0_572, %c0_573] : memref<25x4x2x150xbf16, #tpu.memory_space<vmem>>, vector<1x1x2x150xbf16>
    %760 = vector.shape_cast %759 : vector<1x1x2x150xbf16> to vector<2x150xbf16>
    %cst_574 = arith.constant dense<0.000000e+00> : vector<2x16xf32>
    %761 = tpu.matmul %760, %0, %cst_574 {dimension_numbers = #tpu.dot_dimension_numbers<[1], [0], [0], [1], [0, 0, 1, 1], [], []>} : vector<2x150xbf16>, vector<150x16xbf16>, vector<2x16xf32> -> vector<2x16xf32>
    %762 = vector.broadcast %1 : vector<1x16xf32> to vector<2x16xf32>
    %763 = arith.addf %761, %762 : vector<2x16xf32>
    %cst_575 = arith.constant 0.000000e+00 : f32
    %764 = vector.broadcast %cst_575 : f32 to vector<2x16xf32>
    %765 = arith.maximumf %763, %764 : vector<2x16xf32>
    %c21_576 = arith.constant 21 : index
    %c1_577 = arith.constant 1 : index
    %c0_578 = arith.constant 0 : index
    %c0_579 = arith.constant 0 : index
    %766 = vector.load %arg1[%c21_576, %c1_577, %c0_578, %c0_579] : memref<25x4x2x150xbf16, #tpu.memory_space<vmem>>, vector<1x1x2x150xbf16>
    %767 = vector.shape_cast %766 : vector<1x1x2x150xbf16> to vector<2x150xbf16>
    %cst_580 = arith.constant dense<0.000000e+00> : vector<2x16xf32>
    %768 = tpu.matmul %767, %0, %cst_580 {dimension_numbers = #tpu.dot_dimension_numbers<[1], [0], [0], [1], [0, 0, 1, 1], [], []>} : vector<2x150xbf16>, vector<150x16xbf16>, vector<2x16xf32> -> vector<2x16xf32>
    %769 = vector.broadcast %1 : vector<1x16xf32> to vector<2x16xf32>
    %770 = arith.addf %768, %769 : vector<2x16xf32>
    %cst_581 = arith.constant 0.000000e+00 : f32
    %771 = vector.broadcast %cst_581 : f32 to vector<2x16xf32>
    %772 = arith.maximumf %770, %771 : vector<2x16xf32>
    %773 = arith.maximumf %765, %772 : vector<2x16xf32>
    %c21_582 = arith.constant 21 : index
    %c2_583 = arith.constant 2 : index
    %c0_584 = arith.constant 0 : index
    %c0_585 = arith.constant 0 : index
    %774 = vector.load %arg1[%c21_582, %c2_583, %c0_584, %c0_585] : memref<25x4x2x150xbf16, #tpu.memory_space<vmem>>, vector<1x1x2x150xbf16>
    %775 = vector.shape_cast %774 : vector<1x1x2x150xbf16> to vector<2x150xbf16>
    %cst_586 = arith.constant dense<0.000000e+00> : vector<2x16xf32>
    %776 = tpu.matmul %775, %0, %cst_586 {dimension_numbers = #tpu.dot_dimension_numbers<[1], [0], [0], [1], [0, 0, 1, 1], [], []>} : vector<2x150xbf16>, vector<150x16xbf16>, vector<2x16xf32> -> vector<2x16xf32>
    %777 = vector.broadcast %1 : vector<1x16xf32> to vector<2x16xf32>
    %778 = arith.addf %776, %777 : vector<2x16xf32>
    %cst_587 = arith.constant 0.000000e+00 : f32
    %779 = vector.broadcast %cst_587 : f32 to vector<2x16xf32>
    %780 = arith.maximumf %778, %779 : vector<2x16xf32>
    %c21_588 = arith.constant 21 : index
    %c3_589 = arith.constant 3 : index
    %c0_590 = arith.constant 0 : index
    %c0_591 = arith.constant 0 : index
    %781 = vector.load %arg1[%c21_588, %c3_589, %c0_590, %c0_591] : memref<25x4x2x150xbf16, #tpu.memory_space<vmem>>, vector<1x1x2x150xbf16>
    %782 = vector.shape_cast %781 : vector<1x1x2x150xbf16> to vector<2x150xbf16>
    %cst_592 = arith.constant dense<0.000000e+00> : vector<2x16xf32>
    %783 = tpu.matmul %782, %0, %cst_592 {dimension_numbers = #tpu.dot_dimension_numbers<[1], [0], [0], [1], [0, 0, 1, 1], [], []>} : vector<2x150xbf16>, vector<150x16xbf16>, vector<2x16xf32> -> vector<2x16xf32>
    %784 = vector.broadcast %1 : vector<1x16xf32> to vector<2x16xf32>
    %785 = arith.addf %783, %784 : vector<2x16xf32>
    %cst_593 = arith.constant 0.000000e+00 : f32
    %786 = vector.broadcast %cst_593 : f32 to vector<2x16xf32>
    %787 = arith.maximumf %785, %786 : vector<2x16xf32>
    %788 = arith.maximumf %780, %787 : vector<2x16xf32>
    %789 = arith.maximumf %773, %788 : vector<2x16xf32>
    %790 = arith.truncf %789 : vector<2x16xf32> to vector<2x16xbf16>
    %c21_594 = arith.constant 21 : index
    %c0_595 = arith.constant 0 : index
    %c0_596 = arith.constant 0 : index
    %791 = vector.load %arg4[%c21_594, %c0_595, %c0_596] : memref<25x16x120xbf16, #tpu.memory_space<vmem>>, vector<1x16x120xbf16>
    %792 = vector.shape_cast %791 : vector<1x16x120xbf16> to vector<16x120xbf16>
    %cst_597 = arith.constant dense<0.000000e+00> : vector<2x120xf32>
    %793 = tpu.matmul %790, %792, %cst_597 {dimension_numbers = #tpu.dot_dimension_numbers<[1], [0], [0], [1], [0, 0, 1, 1], [], []>} : vector<2x16xbf16>, vector<16x120xbf16>, vector<2x120xf32> -> vector<2x120xf32>
    %794 = arith.addf %758, %793 : vector<2x120xf32>
    %c22 = arith.constant 22 : index
    %c0_598 = arith.constant 0 : index
    %c0_599 = arith.constant 0 : index
    %c0_600 = arith.constant 0 : index
    %795 = vector.load %arg1[%c22, %c0_598, %c0_599, %c0_600] : memref<25x4x2x150xbf16, #tpu.memory_space<vmem>>, vector<1x1x2x150xbf16>
    %796 = vector.shape_cast %795 : vector<1x1x2x150xbf16> to vector<2x150xbf16>
    %cst_601 = arith.constant dense<0.000000e+00> : vector<2x16xf32>
    %797 = tpu.matmul %796, %0, %cst_601 {dimension_numbers = #tpu.dot_dimension_numbers<[1], [0], [0], [1], [0, 0, 1, 1], [], []>} : vector<2x150xbf16>, vector<150x16xbf16>, vector<2x16xf32> -> vector<2x16xf32>
    %798 = vector.broadcast %1 : vector<1x16xf32> to vector<2x16xf32>
    %799 = arith.addf %797, %798 : vector<2x16xf32>
    %cst_602 = arith.constant 0.000000e+00 : f32
    %800 = vector.broadcast %cst_602 : f32 to vector<2x16xf32>
    %801 = arith.maximumf %799, %800 : vector<2x16xf32>
    %c22_603 = arith.constant 22 : index
    %c1_604 = arith.constant 1 : index
    %c0_605 = arith.constant 0 : index
    %c0_606 = arith.constant 0 : index
    %802 = vector.load %arg1[%c22_603, %c1_604, %c0_605, %c0_606] : memref<25x4x2x150xbf16, #tpu.memory_space<vmem>>, vector<1x1x2x150xbf16>
    %803 = vector.shape_cast %802 : vector<1x1x2x150xbf16> to vector<2x150xbf16>
    %cst_607 = arith.constant dense<0.000000e+00> : vector<2x16xf32>
    %804 = tpu.matmul %803, %0, %cst_607 {dimension_numbers = #tpu.dot_dimension_numbers<[1], [0], [0], [1], [0, 0, 1, 1], [], []>} : vector<2x150xbf16>, vector<150x16xbf16>, vector<2x16xf32> -> vector<2x16xf32>
    %805 = vector.broadcast %1 : vector<1x16xf32> to vector<2x16xf32>
    %806 = arith.addf %804, %805 : vector<2x16xf32>
    %cst_608 = arith.constant 0.000000e+00 : f32
    %807 = vector.broadcast %cst_608 : f32 to vector<2x16xf32>
    %808 = arith.maximumf %806, %807 : vector<2x16xf32>
    %809 = arith.maximumf %801, %808 : vector<2x16xf32>
    %c22_609 = arith.constant 22 : index
    %c2_610 = arith.constant 2 : index
    %c0_611 = arith.constant 0 : index
    %c0_612 = arith.constant 0 : index
    %810 = vector.load %arg1[%c22_609, %c2_610, %c0_611, %c0_612] : memref<25x4x2x150xbf16, #tpu.memory_space<vmem>>, vector<1x1x2x150xbf16>
    %811 = vector.shape_cast %810 : vector<1x1x2x150xbf16> to vector<2x150xbf16>
    %cst_613 = arith.constant dense<0.000000e+00> : vector<2x16xf32>
    %812 = tpu.matmul %811, %0, %cst_613 {dimension_numbers = #tpu.dot_dimension_numbers<[1], [0], [0], [1], [0, 0, 1, 1], [], []>} : vector<2x150xbf16>, vector<150x16xbf16>, vector<2x16xf32> -> vector<2x16xf32>
    %813 = vector.broadcast %1 : vector<1x16xf32> to vector<2x16xf32>
    %814 = arith.addf %812, %813 : vector<2x16xf32>
    %cst_614 = arith.constant 0.000000e+00 : f32
    %815 = vector.broadcast %cst_614 : f32 to vector<2x16xf32>
    %816 = arith.maximumf %814, %815 : vector<2x16xf32>
    %c22_615 = arith.constant 22 : index
    %c3_616 = arith.constant 3 : index
    %c0_617 = arith.constant 0 : index
    %c0_618 = arith.constant 0 : index
    %817 = vector.load %arg1[%c22_615, %c3_616, %c0_617, %c0_618] : memref<25x4x2x150xbf16, #tpu.memory_space<vmem>>, vector<1x1x2x150xbf16>
    %818 = vector.shape_cast %817 : vector<1x1x2x150xbf16> to vector<2x150xbf16>
    %cst_619 = arith.constant dense<0.000000e+00> : vector<2x16xf32>
    %819 = tpu.matmul %818, %0, %cst_619 {dimension_numbers = #tpu.dot_dimension_numbers<[1], [0], [0], [1], [0, 0, 1, 1], [], []>} : vector<2x150xbf16>, vector<150x16xbf16>, vector<2x16xf32> -> vector<2x16xf32>
    %820 = vector.broadcast %1 : vector<1x16xf32> to vector<2x16xf32>
    %821 = arith.addf %819, %820 : vector<2x16xf32>
    %cst_620 = arith.constant 0.000000e+00 : f32
    %822 = vector.broadcast %cst_620 : f32 to vector<2x16xf32>
    %823 = arith.maximumf %821, %822 : vector<2x16xf32>
    %824 = arith.maximumf %816, %823 : vector<2x16xf32>
    %825 = arith.maximumf %809, %824 : vector<2x16xf32>
    %826 = arith.truncf %825 : vector<2x16xf32> to vector<2x16xbf16>
    %c22_621 = arith.constant 22 : index
    %c0_622 = arith.constant 0 : index
    %c0_623 = arith.constant 0 : index
    %827 = vector.load %arg4[%c22_621, %c0_622, %c0_623] : memref<25x16x120xbf16, #tpu.memory_space<vmem>>, vector<1x16x120xbf16>
    %828 = vector.shape_cast %827 : vector<1x16x120xbf16> to vector<16x120xbf16>
    %cst_624 = arith.constant dense<0.000000e+00> : vector<2x120xf32>
    %829 = tpu.matmul %826, %828, %cst_624 {dimension_numbers = #tpu.dot_dimension_numbers<[1], [0], [0], [1], [0, 0, 1, 1], [], []>} : vector<2x16xbf16>, vector<16x120xbf16>, vector<2x120xf32> -> vector<2x120xf32>
    %830 = arith.addf %794, %829 : vector<2x120xf32>
    %c23 = arith.constant 23 : index
    %c0_625 = arith.constant 0 : index
    %c0_626 = arith.constant 0 : index
    %c0_627 = arith.constant 0 : index
    %831 = vector.load %arg1[%c23, %c0_625, %c0_626, %c0_627] : memref<25x4x2x150xbf16, #tpu.memory_space<vmem>>, vector<1x1x2x150xbf16>
    %832 = vector.shape_cast %831 : vector<1x1x2x150xbf16> to vector<2x150xbf16>
    %cst_628 = arith.constant dense<0.000000e+00> : vector<2x16xf32>
    %833 = tpu.matmul %832, %0, %cst_628 {dimension_numbers = #tpu.dot_dimension_numbers<[1], [0], [0], [1], [0, 0, 1, 1], [], []>} : vector<2x150xbf16>, vector<150x16xbf16>, vector<2x16xf32> -> vector<2x16xf32>
    %834 = vector.broadcast %1 : vector<1x16xf32> to vector<2x16xf32>
    %835 = arith.addf %833, %834 : vector<2x16xf32>
    %cst_629 = arith.constant 0.000000e+00 : f32
    %836 = vector.broadcast %cst_629 : f32 to vector<2x16xf32>
    %837 = arith.maximumf %835, %836 : vector<2x16xf32>
    %c23_630 = arith.constant 23 : index
    %c1_631 = arith.constant 1 : index
    %c0_632 = arith.constant 0 : index
    %c0_633 = arith.constant 0 : index
    %838 = vector.load %arg1[%c23_630, %c1_631, %c0_632, %c0_633] : memref<25x4x2x150xbf16, #tpu.memory_space<vmem>>, vector<1x1x2x150xbf16>
    %839 = vector.shape_cast %838 : vector<1x1x2x150xbf16> to vector<2x150xbf16>
    %cst_634 = arith.constant dense<0.000000e+00> : vector<2x16xf32>
    %840 = tpu.matmul %839, %0, %cst_634 {dimension_numbers = #tpu.dot_dimension_numbers<[1], [0], [0], [1], [0, 0, 1, 1], [], []>} : vector<2x150xbf16>, vector<150x16xbf16>, vector<2x16xf32> -> vector<2x16xf32>
    %841 = vector.broadcast %1 : vector<1x16xf32> to vector<2x16xf32>
    %842 = arith.addf %840, %841 : vector<2x16xf32>
    %cst_635 = arith.constant 0.000000e+00 : f32
    %843 = vector.broadcast %cst_635 : f32 to vector<2x16xf32>
    %844 = arith.maximumf %842, %843 : vector<2x16xf32>
    %845 = arith.maximumf %837, %844 : vector<2x16xf32>
    %c23_636 = arith.constant 23 : index
    %c2_637 = arith.constant 2 : index
    %c0_638 = arith.constant 0 : index
    %c0_639 = arith.constant 0 : index
    %846 = vector.load %arg1[%c23_636, %c2_637, %c0_638, %c0_639] : memref<25x4x2x150xbf16, #tpu.memory_space<vmem>>, vector<1x1x2x150xbf16>
    %847 = vector.shape_cast %846 : vector<1x1x2x150xbf16> to vector<2x150xbf16>
    %cst_640 = arith.constant dense<0.000000e+00> : vector<2x16xf32>
    %848 = tpu.matmul %847, %0, %cst_640 {dimension_numbers = #tpu.dot_dimension_numbers<[1], [0], [0], [1], [0, 0, 1, 1], [], []>} : vector<2x150xbf16>, vector<150x16xbf16>, vector<2x16xf32> -> vector<2x16xf32>
    %849 = vector.broadcast %1 : vector<1x16xf32> to vector<2x16xf32>
    %850 = arith.addf %848, %849 : vector<2x16xf32>
    %cst_641 = arith.constant 0.000000e+00 : f32
    %851 = vector.broadcast %cst_641 : f32 to vector<2x16xf32>
    %852 = arith.maximumf %850, %851 : vector<2x16xf32>
    %c23_642 = arith.constant 23 : index
    %c3_643 = arith.constant 3 : index
    %c0_644 = arith.constant 0 : index
    %c0_645 = arith.constant 0 : index
    %853 = vector.load %arg1[%c23_642, %c3_643, %c0_644, %c0_645] : memref<25x4x2x150xbf16, #tpu.memory_space<vmem>>, vector<1x1x2x150xbf16>
    %854 = vector.shape_cast %853 : vector<1x1x2x150xbf16> to vector<2x150xbf16>
    %cst_646 = arith.constant dense<0.000000e+00> : vector<2x16xf32>
    %855 = tpu.matmul %854, %0, %cst_646 {dimension_numbers = #tpu.dot_dimension_numbers<[1], [0], [0], [1], [0, 0, 1, 1], [], []>} : vector<2x150xbf16>, vector<150x16xbf16>, vector<2x16xf32> -> vector<2x16xf32>
    %856 = vector.broadcast %1 : vector<1x16xf32> to vector<2x16xf32>
    %857 = arith.addf %855, %856 : vector<2x16xf32>
    %cst_647 = arith.constant 0.000000e+00 : f32
    %858 = vector.broadcast %cst_647 : f32 to vector<2x16xf32>
    %859 = arith.maximumf %857, %858 : vector<2x16xf32>
    %860 = arith.maximumf %852, %859 : vector<2x16xf32>
    %861 = arith.maximumf %845, %860 : vector<2x16xf32>
    %862 = arith.truncf %861 : vector<2x16xf32> to vector<2x16xbf16>
    %c23_648 = arith.constant 23 : index
    %c0_649 = arith.constant 0 : index
    %c0_650 = arith.constant 0 : index
    %863 = vector.load %arg4[%c23_648, %c0_649, %c0_650] : memref<25x16x120xbf16, #tpu.memory_space<vmem>>, vector<1x16x120xbf16>
    %864 = vector.shape_cast %863 : vector<1x16x120xbf16> to vector<16x120xbf16>
    %cst_651 = arith.constant dense<0.000000e+00> : vector<2x120xf32>
    %865 = tpu.matmul %862, %864, %cst_651 {dimension_numbers = #tpu.dot_dimension_numbers<[1], [0], [0], [1], [0, 0, 1, 1], [], []>} : vector<2x16xbf16>, vector<16x120xbf16>, vector<2x120xf32> -> vector<2x120xf32>
    %866 = arith.addf %830, %865 : vector<2x120xf32>
    %c24 = arith.constant 24 : index
    %c0_652 = arith.constant 0 : index
    %c0_653 = arith.constant 0 : index
    %c0_654 = arith.constant 0 : index
    %867 = vector.load %arg1[%c24, %c0_652, %c0_653, %c0_654] : memref<25x4x2x150xbf16, #tpu.memory_space<vmem>>, vector<1x1x2x150xbf16>
    %868 = vector.shape_cast %867 : vector<1x1x2x150xbf16> to vector<2x150xbf16>
    %cst_655 = arith.constant dense<0.000000e+00> : vector<2x16xf32>
    %869 = tpu.matmul %868, %0, %cst_655 {dimension_numbers = #tpu.dot_dimension_numbers<[1], [0], [0], [1], [0, 0, 1, 1], [], []>} : vector<2x150xbf16>, vector<150x16xbf16>, vector<2x16xf32> -> vector<2x16xf32>
    %870 = vector.broadcast %1 : vector<1x16xf32> to vector<2x16xf32>
    %871 = arith.addf %869, %870 : vector<2x16xf32>
    %cst_656 = arith.constant 0.000000e+00 : f32
    %872 = vector.broadcast %cst_656 : f32 to vector<2x16xf32>
    %873 = arith.maximumf %871, %872 : vector<2x16xf32>
    %c24_657 = arith.constant 24 : index
    %c1_658 = arith.constant 1 : index
    %c0_659 = arith.constant 0 : index
    %c0_660 = arith.constant 0 : index
    %874 = vector.load %arg1[%c24_657, %c1_658, %c0_659, %c0_660] : memref<25x4x2x150xbf16, #tpu.memory_space<vmem>>, vector<1x1x2x150xbf16>
    %875 = vector.shape_cast %874 : vector<1x1x2x150xbf16> to vector<2x150xbf16>
    %cst_661 = arith.constant dense<0.000000e+00> : vector<2x16xf32>
    %876 = tpu.matmul %875, %0, %cst_661 {dimension_numbers = #tpu.dot_dimension_numbers<[1], [0], [0], [1], [0, 0, 1, 1], [], []>} : vector<2x150xbf16>, vector<150x16xbf16>, vector<2x16xf32> -> vector<2x16xf32>
    %877 = vector.broadcast %1 : vector<1x16xf32> to vector<2x16xf32>
    %878 = arith.addf %876, %877 : vector<2x16xf32>
    %cst_662 = arith.constant 0.000000e+00 : f32
    %879 = vector.broadcast %cst_662 : f32 to vector<2x16xf32>
    %880 = arith.maximumf %878, %879 : vector<2x16xf32>
    %881 = arith.maximumf %873, %880 : vector<2x16xf32>
    %c24_663 = arith.constant 24 : index
    %c2_664 = arith.constant 2 : index
    %c0_665 = arith.constant 0 : index
    %c0_666 = arith.constant 0 : index
    %882 = vector.load %arg1[%c24_663, %c2_664, %c0_665, %c0_666] : memref<25x4x2x150xbf16, #tpu.memory_space<vmem>>, vector<1x1x2x150xbf16>
    %883 = vector.shape_cast %882 : vector<1x1x2x150xbf16> to vector<2x150xbf16>
    %cst_667 = arith.constant dense<0.000000e+00> : vector<2x16xf32>
    %884 = tpu.matmul %883, %0, %cst_667 {dimension_numbers = #tpu.dot_dimension_numbers<[1], [0], [0], [1], [0, 0, 1, 1], [], []>} : vector<2x150xbf16>, vector<150x16xbf16>, vector<2x16xf32> -> vector<2x16xf32>
    %885 = vector.broadcast %1 : vector<1x16xf32> to vector<2x16xf32>
    %886 = arith.addf %884, %885 : vector<2x16xf32>
    %cst_668 = arith.constant 0.000000e+00 : f32
    %887 = vector.broadcast %cst_668 : f32 to vector<2x16xf32>
    %888 = arith.maximumf %886, %887 : vector<2x16xf32>
    %c24_669 = arith.constant 24 : index
    %c3_670 = arith.constant 3 : index
    %c0_671 = arith.constant 0 : index
    %c0_672 = arith.constant 0 : index
    %889 = vector.load %arg1[%c24_669, %c3_670, %c0_671, %c0_672] : memref<25x4x2x150xbf16, #tpu.memory_space<vmem>>, vector<1x1x2x150xbf16>
    %890 = vector.shape_cast %889 : vector<1x1x2x150xbf16> to vector<2x150xbf16>
    %cst_673 = arith.constant dense<0.000000e+00> : vector<2x16xf32>
    %891 = tpu.matmul %890, %0, %cst_673 {dimension_numbers = #tpu.dot_dimension_numbers<[1], [0], [0], [1], [0, 0, 1, 1], [], []>} : vector<2x150xbf16>, vector<150x16xbf16>, vector<2x16xf32> -> vector<2x16xf32>
    %892 = vector.broadcast %1 : vector<1x16xf32> to vector<2x16xf32>
    %893 = arith.addf %891, %892 : vector<2x16xf32>
    %cst_674 = arith.constant 0.000000e+00 : f32
    %894 = vector.broadcast %cst_674 : f32 to vector<2x16xf32>
    %895 = arith.maximumf %893, %894 : vector<2x16xf32>
    %896 = arith.maximumf %888, %895 : vector<2x16xf32>
    %897 = arith.maximumf %881, %896 : vector<2x16xf32>
    %898 = arith.truncf %897 : vector<2x16xf32> to vector<2x16xbf16>
    %c24_675 = arith.constant 24 : index
    %c0_676 = arith.constant 0 : index
    %c0_677 = arith.constant 0 : index
    %899 = vector.load %arg4[%c24_675, %c0_676, %c0_677] : memref<25x16x120xbf16, #tpu.memory_space<vmem>>, vector<1x16x120xbf16>
    %900 = vector.shape_cast %899 : vector<1x16x120xbf16> to vector<16x120xbf16>
    %cst_678 = arith.constant dense<0.000000e+00> : vector<2x120xf32>
    %901 = tpu.matmul %898, %900, %cst_678 {dimension_numbers = #tpu.dot_dimension_numbers<[1], [0], [0], [1], [0, 0, 1, 1], [], []>} : vector<2x16xbf16>, vector<16x120xbf16>, vector<2x120xf32> -> vector<2x120xf32>
    %902 = arith.addf %866, %901 : vector<2x120xf32>
    %c0_679 = arith.constant 0 : index
    %c0_680 = arith.constant 0 : index
    %903 = vector.load %arg5[%c0_679, %c0_680] : memref<1x120xf32, #tpu.memory_space<vmem>>, vector<1x120xf32>
    %904 = vector.broadcast %903 : vector<1x120xf32> to vector<2x120xf32>
    %905 = arith.addf %902, %904 : vector<2x120xf32>
    %cst_681 = arith.constant 0.000000e+00 : f32
    %906 = vector.broadcast %cst_681 : f32 to vector<2x120xf32>
    %907 = arith.maximumf %905, %906 : vector<2x120xf32>
    %908 = arith.truncf %907 : vector<2x120xf32> to vector<2x120xbf16>
    %c0_682 = arith.constant 0 : index
    %c0_683 = arith.constant 0 : index
    %909 = vector.load %arg6[%c0_682, %c0_683] : memref<120x84xbf16, #tpu.memory_space<vmem>>, vector<120x84xbf16>
    %cst_684 = arith.constant dense<0.000000e+00> : vector<2x84xf32>
    %910 = tpu.matmul %908, %909, %cst_684 {dimension_numbers = #tpu.dot_dimension_numbers<[1], [0], [0], [1], [0, 0, 1, 1], [], []>} : vector<2x120xbf16>, vector<120x84xbf16>, vector<2x84xf32> -> vector<2x84xf32>
    %c0_685 = arith.constant 0 : index
    %c0_686 = arith.constant 0 : index
    %911 = vector.load %arg7[%c0_685, %c0_686] : memref<1x84xf32, #tpu.memory_space<vmem>>, vector<1x84xf32>
    %912 = vector.broadcast %911 : vector<1x84xf32> to vector<2x84xf32>
    %913 = arith.addf %910, %912 : vector<2x84xf32>
    %cst_687 = arith.constant 0.000000e+00 : f32
    %914 = vector.broadcast %cst_687 : f32 to vector<2x84xf32>
    %915 = arith.maximumf %913, %914 : vector<2x84xf32>
    %916 = arith.truncf %915 : vector<2x84xf32> to vector<2x84xbf16>
    %c0_688 = arith.constant 0 : index
    %c0_689 = arith.constant 0 : index
    %917 = vector.load %arg8[%c0_688, %c0_689] : memref<84x10xbf16, #tpu.memory_space<vmem>>, vector<84x10xbf16>
    %cst_690 = arith.constant dense<0.000000e+00> : vector<2x10xf32>
    %918 = tpu.matmul %916, %917, %cst_690 {dimension_numbers = #tpu.dot_dimension_numbers<[1], [0], [0], [1], [0, 0, 1, 1], [], []>} : vector<2x84xbf16>, vector<84x10xbf16>, vector<2x10xf32> -> vector<2x10xf32>
    %c0_691 = arith.constant 0 : index
    %c0_692 = arith.constant 0 : index
    %919 = vector.load %arg9[%c0_691, %c0_692] : memref<1x10xf32, #tpu.memory_space<vmem>>, vector<1x10xf32>
    %920 = vector.broadcast %919 : vector<1x10xf32> to vector<2x10xf32>
    %921 = arith.addf %918, %920 : vector<2x10xf32>
    %c0_693 = arith.constant 0 : index
    %c0_694 = arith.constant 0 : index
    %922 = vector.load %arg10[%c0_693, %c0_694] : memref<2x10xf32, #tpu.memory_space<vmem>>, vector<2x10xf32>
    tpu.vector_store %arg10[%c0_693, %c0_694], %921 {strides = array<i32>} : memref<2x10xf32, #tpu.memory_space<vmem>>, vector<2x10xf32>,
    return
  }
  func.func @transform_0(%arg0: i32) -> (i32, i32, i32, i32) {
    %c0_i32 = arith.constant 0 : i32
    %c0_i32_0 = arith.constant 0 : i32
    %c0_i32_1 = arith.constant 0 : i32
    %c0_i32_2 = arith.constant 0 : i32
    %c0_i32_3 = arith.constant 0 : i32
    return %c0_i32, %c0_i32_0, %c0_i32_1, %c0_i32_2 : i32, i32, i32, i32
  }
  func.func @transform_1(%arg0: i32) -> (i32, i32) {
    %c0_i32 = arith.constant 0 : i32
    %c0_i32_0 = arith.constant 0 : i32
    %c0_i32_1 = arith.constant 0 : i32
    return %c0_i32, %c0_i32_0 : i32, i32
  }
  func.func @transform_2(%arg0: i32) -> (i32, i32) {
    %c0_i32 = arith.constant 0 : i32
    %c0_i32_0 = arith.constant 0 : i32
    %c0_i32_1 = arith.constant 0 : i32
    return %c0_i32, %c0_i32_0 : i32, i32
  }
  func.func @transform_3(%arg0: i32) -> (i32, i32, i32) {
    %c0_i32 = arith.constant 0 : i32
    %c0_i32_0 = arith.constant 0 : i32
    %c0_i32_1 = arith.constant 0 : i32
    %c0_i32_2 = arith.constant 0 : i32
    return %c0_i32, %c0_i32_0, %c0_i32_1 : i32, i32, i32
  }
  func.func @transform_4(%arg0: i32) -> (i32, i32) {
    %c0_i32 = arith.constant 0 : i32
    %c0_i32_0 = arith.constant 0 : i32
    %c0_i32_1 = arith.constant 0 : i32
    return %c0_i32, %c0_i32_0 : i32, i32
  }
  func.func @transform_5(%arg0: i32) -> (i32, i32) {
    %c0_i32 = arith.constant 0 : i32
    %c0_i32_0 = arith.constant 0 : i32
    %c0_i32_1 = arith.constant 0 : i32
    return %c0_i32, %c0_i32_0 : i32, i32
  }
  func.func @transform_6(%arg0: i32) -> (i32, i32) {
    %c0_i32 = arith.constant 0 : i32
    %c0_i32_0 = arith.constant 0 : i32
    %c0_i32_1 = arith.constant 0 : i32
    return %c0_i32, %c0_i32_0 : i32, i32
  }
  func.func @transform_7(%arg0: i32) -> (i32, i32) {
    %c0_i32 = arith.constant 0 : i32
    %c0_i32_0 = arith.constant 0 : i32
    %c0_i32_1 = arith.constant 0 : i32
    return %c0_i32, %c0_i32_0 : i32, i32
  }
  func.func @transform_8(%arg0: i32) -> (i32, i32) {
    %c0_i32 = arith.constant 0 : i32
    %c0_i32_0 = arith.constant 0 : i32
    %c0_i32_1 = arith.constant 0 : i32
    return %c0_i32, %c0_i32_0 : i32, i32
  }
  func.func @transform_9(%arg0: i32) -> (i32, i32) {
    %c0_i32 = arith.constant 0 : i32
    %c0_i32_0 = arith.constant 0 : i32
    %c0_i32_1 = arith.constant 0 : i32
    return %c0_i32, %c0_i32_0 : i32, i32
  }
}

</mosaic_0001>

<bundles_post_ra>
// kernel: convnet_forward.2
= control target key start
LH: loop header
LB: loop body
LE: loop exit
PB: predicated region body
PF: predicated region fallthrough
CT: control target
= control target key end

     0   :  { %v3703_v0 = vmov 0.0   ;;  %vm3704_vm0 = vmmov 0   ;;  %vm309_vm1 = vcmask 1044480   ;;  %vm310_vm2 = vcmask 1045504   ;;  %s4915_s1 = inlined_call_operand.vmem [shape: bf16[75,6], index: 1, kind: input, shape index: {}]   ;;  %s4916_s0 = inlined_call_operand.vmem [shape: bf16[4,392,75], index: 0, kind: input, shape index: {}]   ;;  %s4917_s2 = inlined_call_operand.vmem [shape: f32[1,6], index: 2, kind: input, shape index: {}]   ;;  %s4918_s3 = inlined_call_operand.vmem [shape: bf16[392,6], index: 3, kind: output, shape index: {}]  }
   0x1   :  { %3153 = vmatprep.subr.bf16.mxu0 %v3703_v0  ;;  %3263 = vmatprep.subr.bf16.mxu1 %v3703_v0  ;;  %v3596_v1 = vld [vmem:[%s4915_s1] sm:$0xff]   ;;  %v3597_v2 = vld [vmem:[%s4915_s1 + $0x8] sm:$0xff]   ;;  %v3598_v3 = vld [vmem:[%s4915_s1 + $0x10] sm:$0xff]   ;;  %v3705_v4 = vmov 65535   ;;  %vm233_vm3 = vcmask 613376   ;;  %vm2528_vm4 = vcmask 44032  }
   0x2   :  { %3154 = vmatpush3.bf16.msra.mxu0 %v3596_v1  ;;  %3264 = vmatpush3.bf16.msra.mxu1 %v3596_v1  ;;  %v311_v5 = vsel %vm309_vm1, 4294967295, %v3705_v4  ;;  %v3599_v6 = vld [vmem:[%s4915_s1 + $0x18] sm:$0xff]   ;;  %v3600_v7 = vld [vmem:[%s4915_s1 + $0x20] sm:$0x3f]   ;;  %v3603_v12 = vld [vmem:[%s4916_s0 + $0x8] sm:$0xff]  }
   0x3   :  { %3155 = vmatprep.subr.bf16.mxu0 %v3703_v0  ;;  %3265 = vmatprep.subr.bf16.mxu1 %v3703_v0  ;;  %v312_v8 = vsel %vm310_vm2, %v311_v5, 0  ;;  %v3601_v10 = vld [vmem:[%s4916_s0] sm:$0xff]   ;;  %v3604_v13 = vld [vmem:[%s4916_s0 + $0xcc] sm:$0xff]   ;;  %v3606_v15 = vld [vmem:[%s4916_s0 + $0xd4] sm:$0xff]  }
   0x4   :  { %3163 = vmatprep.mubr.msk.bf16.mxu0 %vm3704_vm0, %v3703_v0  ;;  %3273 = vmatprep.mubr.msk.bf16.mxu1 %vm3704_vm0, %v3703_v0  ;;  %v314_v9 = vand.u32 %v3600_v7, %v312_v8  ;;  %v3602_v11 = vld [vmem:[%s4916_s0 + $0xc4] sm:$0xff]   ;;  %v3605_v14 = vld [vmem:[%s4916_s0 + $0x10] sm:$0xff]   ;;  %v3607_v16 = vld [vmem:[%s4916_s0 + $0x18] sm:$0xff]  }
   0x5   :  { %v3608_v17 = vld [vmem:[%s4916_s0 + $0xdc] sm:$0xff]   ;;  %v3610_v19 = vld [vmem:[%s4916_s0 + $0xe4] sm:$0xff]   ;;  %v3612_v21 = vld [vmem:[%s4916_s0 + $0xec] sm:$0xff]  }
   0x6   :  { %3156 = vmatpush3.bf16.msra.mxu0 %v3597_v2  ;;  %3266 = vmatpush3.bf16.msra.mxu1 %v3597_v2  ;;  %v3609_v18 = vld [vmem:[%s4916_s0 + $0x20] sm:$0xff]   ;;  %v3611_v20 = vld [vmem:[%s4916_s0 + $0x28] sm:$0xff]   ;;  %v3613_v22 = vld [vmem:[%s4916_s0 + $0x30] sm:$0xff]  }
   0x7   :  { %3157 = vmatprep.subr.bf16.mxu0 %v3703_v0  ;;  %3267 = vmatprep.subr.bf16.mxu1 %v3703_v0  ;;  %v3614_v23 = vld [vmem:[%s4916_s0 + $0xf4] sm:$0xff]   ;;  %v3616_v25 = vld [vmem:[%s4916_s0 + $0xfc] sm:$0xff]   ;;  %v3618_v27 = vld [vmem:[%s4916_s0 + $0x104] sm:$0xff]  }
   0x8   :  { %v3615_v24 = vld [vmem:[%s4916_s0 + $0x38] sm:$0xff]   ;;  %v3617_v26 = vld [vmem:[%s4916_s0 + $0x40] sm:$0xff]   ;;  %v3619_v28 = vld [vmem:[%s4916_s0 + $0x48] sm:$0xff]  }
   0x9   :  { %v3620_v29 = vld [vmem:[%s4916_s0 + $0x10c] sm:$0xff]   ;;  %v3622_v31 = vld [vmem:[%s4916_s0 + $0x114] sm:$0xff]   ;;  %v3624_v33 = vld [vmem:[%s4916_s0 + $0x11c] sm:$0xff]  }
   0xa   :  { %3158 = vmatpush3.bf16.msra.mxu0 %v3598_v3  ;;  %3268 = vmatpush3.bf16.msra.mxu1 %v3598_v3  ;;  %v3621_v30 = vld [vmem:[%s4916_s0 + $0x50] sm:$0xff]   ;;  %v3623_v32 = vld [vmem:[%s4916_s0 + $0x58] sm:$0xff]   ;;  %v3625_v34 = vld [vmem:[%s4916_s0 + $0x60] sm:$0xff]  }
   0xb   :  { %3159 = vmatprep.subr.bf16.mxu0 %v3703_v0  ;;  %3269 = vmatprep.subr.bf16.mxu1 %v3703_v0  ;;  %v3626_v35 = vld [vmem:[%s4916_s0 + $0x124] sm:$0xff]   ;;  %v3628_v37 = vld [vmem:[%s4916_s0 + $0x12c] sm:$0xff]   ;;  %v3630_v39 = vld [vmem:[%s4916_s0 + $0x134] sm:$0xff]  }
   0xc   :  { %v3627_v36 = vld [vmem:[%s4916_s0 + $0x68] sm:$0xff]   ;;  %v3629_v38 = vld [vmem:[%s4916_s0 + $0x70] sm:$0xff]   ;;  %v3631_v40 = vld [vmem:[%s4916_s0 + $0x78] sm:$0xff]  }
   0xd   :  { %v3632_v41 = vld [vmem:[%s4916_s0 + $0x13c] sm:$0xff]   ;;  %v3634_v43 = vld [vmem:[%s4916_s0 + $0x144] sm:$0xff]   ;;  %v3636_v45 = vld [vmem:[%s4916_s0 + $0x14c] sm:$0xff]  }
   0xe   :  { %3160 = vmatpush3.bf16.msra.mxu0 %v3599_v6  ;;  %3270 = vmatpush3.bf16.msra.mxu1 %v3599_v6  ;;  %v3633_v42 = vld [vmem:[%s4916_s0 + $0x80] sm:$0xff]   ;;  %v3635_v44 = vld [vmem:[%s4916_s0 + $0x88] sm:$0xff]   ;;  %v3637_v46 = vld [vmem:[%s4916_s0 + $0x90] sm:$0xff]  }
   0xf   :  { %3161 = vmatprep.subr.bf16.mxu0 %v3703_v0  ;;  %3271 = vmatprep.subr.bf16.mxu1 %v3703_v0  ;;  %v3638_v47 = vld [vmem:[%s4916_s0 + $0x154] sm:$0xff]   ;;  %v3640_v49 = vld [vmem:[%s4916_s0 + $0x15c] sm:$0xff]   ;;  %v3642_v51 = vld [vmem:[%s4916_s0 + $0x164] sm:$0xff]  }
  0x10   :  { %v3639_v48 = vld [vmem:[%s4916_s0 + $0x98] sm:$0xff]   ;;  %v3641_v50 = vld [vmem:[%s4916_s0 + $0xa0] sm:$0xff]   ;;  %v3643_v52 = vld [vmem:[%s4916_s0 + $0xa8] sm:$0xff]  }
  0x11   :  { %v3644_v53 = vld [vmem:[%s4916_s0 + $0x16c] sm:$0xff]   ;;  %v3646_v55 = vld [vmem:[%s4916_s0 + $0x174] sm:$0xff]   ;;  %v3648_v57 = vld [vmem:[%s4916_s0 + $0x17c] sm:$0xff]  }
  0x12   :  { %3162 = vmatpush3.bf16.msra.mxu0 %v314_v9  ;;  %3272 = vmatpush3.bf16.msra.mxu1 %v314_v9  ;;  %v3645_v54 = vld [vmem:[%s4916_s0 + $0xb0] sm:$0xff]   ;;  %v3647_v56 = vld [vmem:[%s4916_s0 + $0xb8] sm:$0xff]   ;;  %v3649_v58 = vld [vmem:[%s4916_s0 + $0xc0] ss:$0 sps:$4 sm:$0xff]  }
  0x13   :  { %3373 = vmatprep.subr.bf16.mxu0 %v3703_v0  ;;  %3483 = vmatprep.subr.bf16.mxu1 %v3703_v0  ;;  %v3650_v59 = vld [vmem:[%s4916_s0 + $0x184] ss:$0 sps:$4 sm:$0xff]   ;;  %v3651_v60 = vld [vmem:[%s4916_s0 + $0x188] sm:$0xff]   ;;  %v3653_v62 = vld [vmem:[%s4916_s0 + $0x190] sm:$0xff]  }
  0x14   :  { %v3652_v61 = vld [vmem:[%s4916_s0 + $0x24c] sm:$0xff]   ;;  %v3654_v63 = vld [vmem:[%s4916_s0 + $0x254] sm:$0xff]  }
  0x15   :  { %3164 = vmatmul.mubr.msk.bf16.vlgmr.msra.gmra.mrb[0].mxu0 %vm233_vm3, %v3601_v10  ;;  %3274 = vmatmul.mubr.msk.bf16.vlgmr.msra.gmra.mrb[0].mxu1 %vm233_vm3, %v3602_v11  ;;  %v3655_v8 = vld [vmem:[%s4916_s0 + $0x198] sm:$0xff]  }
  0x16   :  { %3374 = vmatpush3.bf16.msra.mxu0 %v3596_v1  ;;  %3484 = vmatpush3.bf16.msra.mxu1 %v3596_v1  ;;  %v4088_v1 = vld [vmem:[%s4917_s2] ss:$0 sm:$0xff] }
  0x17   :  { %3167 = vmatprep.mubr.msk.bf16.mxu0 %vm3704_vm0, %v3703_v0  ;;  %3277 = vmatprep.mubr.msk.bf16.mxu1 %vm3704_vm0, %v3703_v0 }
  0x18   :  { %3375 = vmatprep.subr.bf16.mxu0 %v3703_v0  ;;  %3485 = vmatprep.subr.bf16.mxu1 %v3703_v0 }
  0x1a   :  { %3376 = vmatpush3.bf16.msra.mxu0 %v3597_v2  ;;  %3486 = vmatpush3.bf16.msra.mxu1 %v3597_v2 }
  0x1b   :  { %3377 = vmatprep.subr.bf16.mxu0 %v3703_v0  ;;  %3487 = vmatprep.subr.bf16.mxu1 %v3703_v0 }
  0x1d   :  { %3168 = vmatmul.mubr.msk.bf16.gmra.mrb[4].mxu0 %vm233_vm3, %v3603_v12  ;;  %3278 = vmatmul.mubr.msk.bf16.gmra.mrb[4].mxu1 %vm233_vm3, %v3604_v13 }
  0x1e   :  { %3171 = vmatprep.mubr.msk.bf16.mxu0 %vm3704_vm0, %v3703_v0  ;;  %3281 = vmatprep.mubr.msk.bf16.mxu1 %vm3704_vm0, %v3703_v0 }
  0x1f   :  { %3378 = vmatpush3.bf16.msra.mxu0 %v3598_v3  ;;  %3488 = vmatpush3.bf16.msra.mxu1 %v3598_v3 }
  0x20   :  { %3379 = vmatprep.subr.bf16.mxu0 %v3703_v0  ;;  %3489 = vmatprep.subr.bf16.mxu1 %v3703_v0 }
  0x23   :  { %3380 = vmatpush3.bf16.msra.mxu0 %v3599_v6  ;;  %3490 = vmatpush3.bf16.msra.mxu1 %v3599_v6 }
  0x24   :  { %3381 = vmatprep.subr.bf16.mxu0 %v3703_v0  ;;  %3491 = vmatprep.subr.bf16.mxu1 %v3703_v0 }
  0x25   :  { %3172 = vmatmul.mubr.msk.bf16.gmra.mrb[8].mxu0 %vm233_vm3, %v3605_v14  ;;  %3282 = vmatmul.mubr.msk.bf16.gmra.mrb[8].mxu1 %vm233_vm3, %v3606_v15 }
  0x26   :  { %3175 = vmatprep.mubr.msk.bf16.mxu0 %vm3704_vm0, %v3703_v0  ;;  %3285 = vmatprep.mubr.msk.bf16.mxu1 %vm3704_vm0, %v3703_v0 }
  0x27   :  { %3382 = vmatpush3.bf16.msra.mxu0 %v314_v9  ;;  %3492 = vmatpush3.bf16.msra.mxu1 %v314_v9  ;;  %v3656_v9 = vld [vmem:[%s4916_s0 + $0x25c] sm:$0xff]  }
  0x2d   :  { %3176 = vmatmul.mubr.msk.bf16.gmra.mrb[12].mxu0 %vm233_vm3, %v3607_v16  ;;  %3286 = vmatmul.mubr.msk.bf16.gmra.mrb[12].mxu1 %vm233_vm3, %v3608_v17 }
  0x2e   :  { %3179 = vmatprep.mubr.msk.bf16.mxu0 %vm3704_vm0, %v3703_v0  ;;  %3289 = vmatprep.mubr.msk.bf16.mxu1 %vm3704_vm0, %v3703_v0 }
  0x35   :  { %3180 = vmatmul.mubr.msk.bf16.gmra.mrb[16].mxu0 %vm233_vm3, %v3609_v18  ;;  %3290 = vmatmul.mubr.msk.bf16.gmra.mrb[16].mxu1 %vm233_vm3, %v3610_v19 }
  0x36   :  { %3183 = vmatprep.mubr.msk.bf16.mxu0 %vm3704_vm0, %v3703_v0  ;;  %3293 = vmatprep.mubr.msk.bf16.mxu1 %vm3704_vm0, %v3703_v0 }
  0x3d   :  { %3184 = vmatmul.mubr.msk.bf16.gmra.mrb[20].mxu0 %vm233_vm3, %v3611_v20  ;;  %3294 = vmatmul.mubr.msk.bf16.gmra.mrb[20].mxu1 %vm233_vm3, %v3612_v21 }
  0x3e   :  { %3187 = vmatprep.mubr.msk.bf16.mxu0 %vm3704_vm0, %v3703_v0  ;;  %3297 = vmatprep.mubr.msk.bf16.mxu1 %vm3704_vm0, %v3703_v0 }
  0x45   :  { %3188 = vmatmul.mubr.msk.bf16.gmra.mrb[24].mxu0 %vm233_vm3, %v3613_v22  ;;  %3298 = vmatmul.mubr.msk.bf16.gmra.mrb[24].mxu1 %vm233_vm3, %v3614_v23 }
  0x46   :  { %3191 = vmatprep.mubr.msk.bf16.mxu0 %vm3704_vm0, %v3703_v0  ;;  %3301 = vmatprep.mubr.msk.bf16.mxu1 %vm3704_vm0, %v3703_v0 }
  0x4d   :  { %3192 = vmatmul.mubr.msk.bf16.gmra.mrb[28].mxu0 %vm233_vm3, %v3615_v24  ;;  %3302 = vmatmul.mubr.msk.bf16.gmra.mrb[28].mxu1 %vm233_vm3, %v3616_v25 }
  0x4e   :  { %3195 = vmatprep.mubr.msk.bf16.mxu0 %vm3704_vm0, %v3703_v0  ;;  %3305 = vmatprep.mubr.msk.bf16.mxu1 %vm3704_vm0, %v3703_v0 }
  0x55   :  { %3196 = vmatmul.mubr.msk.bf16.gmra.mrb[32].mxu0 %vm233_vm3, %v3617_v26  ;;  %3306 = vmatmul.mubr.msk.bf16.gmra.mrb[32].mxu1 %vm233_vm3, %v3618_v27 }
  0x56   :  { %3199 = vmatprep.mubr.msk.bf16.mxu0 %vm3704_vm0, %v3703_v0  ;;  %3309 = vmatprep.mubr.msk.bf16.mxu1 %vm3704_vm0, %v3703_v0 }
  0x5d   :  { %3200 = vmatmul.mubr.msk.bf16.gmra.mrb[36].mxu0 %vm233_vm3, %v3619_v28  ;;  %3310 = vmatmul.mubr.msk.bf16.gmra.mrb[36].mxu1 %vm233_vm3, %v3620_v29  ;;  %v3657_v28 = vld [vmem:[%s4916_s0 + $0x1a0] sm:$0xff]  }
  0x5e   :  { %3203 = vmatprep.mubr.msk.bf16.mxu0 %vm3704_vm0, %v3703_v0  ;;  %3313 = vmatprep.mubr.msk.bf16.mxu1 %vm3704_vm0, %v3703_v0  ;;  %v3658_v29 = vld [vmem:[%s4916_s0 + $0x264] sm:$0xff]  }
  0x65   :  { %3204 = vmatmul.mubr.msk.bf16.gmra.mrb[40].mxu0 %vm233_vm3, %v3621_v30  ;;  %3314 = vmatmul.mubr.msk.bf16.gmra.mrb[40].mxu1 %vm233_vm3, %v3622_v31 }
  0x66   :  { %3207 = vmatprep.mubr.msk.bf16.mxu0 %vm3704_vm0, %v3703_v0  ;;  %3317 = vmatprep.mubr.msk.bf16.mxu1 %vm3704_vm0, %v3703_v0 }
  0x6d   :  { %3208 = vmatmul.mubr.msk.bf16.gmra.mrb[44].mxu0 %vm233_vm3, %v3623_v32  ;;  %3318 = vmatmul.mubr.msk.bf16.gmra.mrb[44].mxu1 %vm233_vm3, %v3624_v33 }
  0x6e   :  { %3211 = vmatprep.mubr.msk.bf16.mxu0 %vm3704_vm0, %v3703_v0  ;;  %3321 = vmatprep.mubr.msk.bf16.mxu1 %vm3704_vm0, %v3703_v0 }
  0x75   :  { %3212 = vmatmul.mubr.msk.bf16.gmra.mrb[48].mxu0 %vm233_vm3, %v3625_v34  ;;  %3322 = vmatmul.mubr.msk.bf16.gmra.mrb[48].mxu1 %vm233_vm3, %v3626_v35 }
  0x76   :  { %3215 = vmatprep.mubr.msk.bf16.mxu0 %vm3704_vm0, %v3703_v0  ;;  %3325 = vmatprep.mubr.msk.bf16.mxu1 %vm3704_vm0, %v3703_v0 }
  0x7d   :  { %3216 = vmatmul.mubr.msk.bf16.gmra.mrb[52].mxu0 %vm233_vm3, %v3627_v36  ;;  %3326 = vmatmul.mubr.msk.bf16.gmra.mrb[52].mxu1 %vm233_vm3, %v3628_v37 }
  0x7e   :  { %3219 = vmatprep.mubr.msk.bf16.mxu0 %vm3704_vm0, %v3703_v0  ;;  %3329 = vmatprep.mubr.msk.bf16.mxu1 %vm3704_vm0, %v3703_v0 }
  0x85   :  { %3220 = vmatmul.mubr.msk.bf16.gmra.mrb[56].mxu0 %vm233_vm3, %v3629_v38  ;;  %3330 = vmatmul.mubr.msk.bf16.gmra.mrb[56].mxu1 %vm233_vm3, %v3630_v39 }
  0x86   :  { %3223 = vmatprep.mubr.msk.bf16.mxu0 %vm3704_vm0, %v3703_v0  ;;  %3333 = vmatprep.mubr.msk.bf16.mxu1 %vm3704_vm0, %v3703_v0 }
  0x8d   :  { %3224 = vmatmul.mubr.msk.bf16.gmra.mrb[60].mxu0 %vm233_vm3, %v3631_v40  ;;  %3334 = vmatmul.mubr.msk.bf16.gmra.mrb[60].mxu1 %vm233_vm3, %v3632_v41 }
  0x8e   :  { %3227 = vmatprep.mubr.msk.bf16.mxu0 %vm3704_vm0, %v3703_v0  ;;  %3337 = vmatprep.mubr.msk.bf16.mxu1 %vm3704_vm0, %v3703_v0 }
  0x95   :  { %3228 = vmatmul.mubr.msk.bf16.gmra.mrb[64].mxu0 %vm233_vm3, %v3633_v42  ;;  %3338 = vmatmul.mubr.msk.bf16.gmra.mrb[64].mxu1 %vm233_vm3, %v3634_v43 }
  0x96   :  { %3231 = vmatprep.mubr.msk.bf16.mxu0 %vm3704_vm0, %v3703_v0  ;;  %3341 = vmatprep.mubr.msk.bf16.mxu1 %vm3704_vm0, %v3703_v0 }
  0x9d   :  { %3232 = vmatmul.mubr.msk.bf16.gmra.mrb[68].mxu0 %vm233_vm3, %v3635_v44  ;;  %3342 = vmatmul.mubr.msk.bf16.gmra.mrb[68].mxu1 %vm233_vm3, %v3636_v45 }
  0x9e   :  { %3235 = vmatprep.mubr.msk.bf16.mxu0 %vm3704_vm0, %v3703_v0  ;;  %3345 = vmatprep.mubr.msk.bf16.mxu1 %vm3704_vm0, %v3703_v0 }
  0xa5   :  { %3236 = vmatmul.mubr.msk.bf16.gmra.mrb[72].mxu0 %vm233_vm3, %v3637_v46  ;;  %3346 = vmatmul.mubr.msk.bf16.gmra.mrb[72].mxu1 %vm233_vm3, %v3638_v47 }
  0xa6   :  { %3239 = vmatprep.mubr.msk.bf16.mxu0 %vm3704_vm0, %v3703_v0  ;;  %3349 = vmatprep.mubr.msk.bf16.mxu1 %vm3704_vm0, %v3703_v0 }
  0xad   :  { %3240 = vmatmul.mubr.msk.bf16.gmra.mrb[76].mxu0 %vm233_vm3, %v3639_v48  ;;  %3350 = vmatmul.mubr.msk.bf16.gmra.mrb[76].mxu1 %vm233_vm3, %v3640_v49  ;;  %v3659_v48 = vld [vmem:[%s4916_s0 + $0x1a8] sm:$0xff]  }
  0xae   :  { %3243 = vmatprep.mubr.msk.bf16.mxu0 %vm3704_vm0, %v3703_v0  ;;  %3353 = vmatprep.mubr.msk.bf16.mxu1 %vm3704_vm0, %v3703_v0  ;;  %v3660_v49 = vld [vmem:[%s4916_s0 + $0x26c] sm:$0xff]  }
  0xb5   :  { %3244 = vmatmul.mubr.msk.bf16.gmra.mrb[80].mxu0 %vm233_vm3, %v3641_v50  ;;  %3354 = vmatmul.mubr.msk.bf16.gmra.mrb[80].mxu1 %vm233_vm3, %v3642_v51 }
  0xb6   :  { %3247 = vmatprep.mubr.msk.bf16.mxu0 %vm3704_vm0, %v3703_v0  ;;  %3357 = vmatprep.mubr.msk.bf16.mxu1 %vm3704_vm0, %v3703_v0 }
  0xbd   :  { %3248 = vmatmul.mubr.msk.bf16.gmra.mrb[84].mxu0 %vm233_vm3, %v3643_v52  ;;  %3358 = vmatmul.mubr.msk.bf16.gmra.mrb[84].mxu1 %vm233_vm3, %v3644_v53 }
  0xbe   :  { %3251 = vmatprep.mubr.msk.bf16.mxu0 %vm3704_vm0, %v3703_v0  ;;  %3361 = vmatprep.mubr.msk.bf16.mxu1 %vm3704_vm0, %v3703_v0 }
  0xc5   :  { %3252 = vmatmul.mubr.msk.bf16.gmra.mrb[88].mxu0 %vm233_vm3, %v3645_v54  ;;  %3362 = vmatmul.mubr.msk.bf16.gmra.mrb[88].mxu1 %vm233_vm3, %v3646_v55 }
  0xc6   :  { %3255 = vmatprep.mubr.msk.bf16.mxu0 %vm3704_vm0, %v3703_v0  ;;  %3365 = vmatprep.mubr.msk.bf16.mxu1 %vm3704_vm0, %v3703_v0 }
  0xcd   :  { %3256 = vmatmul.mubr.msk.bf16.gmra.mrb[92].mxu0 %vm233_vm3, %v3647_v56  ;;  %3366 = vmatmul.mubr.msk.bf16.gmra.mrb[92].mxu1 %vm233_vm3, %v3648_v57 }
  0xce   :  { %3259 = vmatprep.mubr.msk.bf16.mxu0 %vm3704_vm0, %v3703_v0  ;;  %3369 = vmatprep.mubr.msk.bf16.mxu1 %vm3704_vm0, %v3703_v0 }
  0xd5   :  { %3260 = vmatmul.mubr.msk.bf16.gmra.mrb[96].mxu0 %vm233_vm3, %v3649_v58  ;;  %3370 = vmatmul.mubr.msk.bf16.gmra.mrb[96].mxu1 %vm233_vm3, %v3650_v59 }
  0xd6   :  { %3383 = vmatprep.mubr.msk.bf16.mxu0 %vm3704_vm0, %v3703_v0  ;;  %3493 = vmatprep.mubr.msk.bf16.mxu1 %vm3704_vm0, %v3703_v0 }
  0xdd   :  { %3384 = vmatmul.mubr.msk.bf16.vlgmr.msra.gmra.mrb[100].mxu0 %vm233_vm3, %v3651_v60  ;;  %3494 = vmatmul.mubr.msk.bf16.vlgmr.msra.gmra.mrb[100].mxu1 %vm233_vm3, %v3652_v61 }
  0xde   :  { %3387 = vmatprep.mubr.msk.bf16.mxu0 %vm3704_vm0, %v3703_v0  ;;  %3497 = vmatprep.mubr.msk.bf16.mxu1 %vm3704_vm0, %v3703_v0 }
  0xe5   :  { %3388 = vmatmul.mubr.msk.bf16.gmra.mrb[104].mxu0 %vm233_vm3, %v3653_v62  ;;  %3498 = vmatmul.mubr.msk.bf16.gmra.mrb[104].mxu1 %vm233_vm3, %v3654_v63 }
  0xe6   :  { %3391 = vmatprep.mubr.msk.bf16.mxu0 %vm3704_vm0, %v3703_v0  ;;  %3501 = vmatprep.mubr.msk.bf16.mxu1 %vm3704_vm0, %v3703_v0 }
  0xe8   :  { %v350_v2 = vpop.f32.mrb[0].mxu0  ;;  %v879_v3 = vpop.f32.mrb[0].mxu1 }
  0xe9   :  { %v351_v4 = vadd.f32 %v4088_v1, %v350_v2  ;;  %v880_v5 = vadd.f32 %v4088_v1, %v879_v3  ;;  %v3165_v6 = vpop.f32.mrb[1].mxu0  ;;  %v3275_v7 = vpop.f32.mrb[1].mxu1 }
  0xea   :  { %v353_v10 = vpop.f32.mrb[2].mxu0  ;;  %v882_v11 = vpop.f32.mrb[2].mxu1  ;;  %v3661_v6 = vld [vmem:[%s4916_s0 + $0x1b0] sm:$0xff]  }
  0xeb   :  { %v548_v12 = vmax.f32 %v351_v4, 0.0  ;;  %v1077_v13 = vmax.f32 %v880_v5, 0.0  ;;  %v354_v14 = vadd.f32 %v4088_v1, %v353_v10  ;;  %v883_v15 = vadd.f32 %v4088_v1, %v882_v11  ;;  %v3166_v16 = vpop.f32.mrb[3].mxu0  ;;  %v3276_v17 = vpop.f32.mrb[3].mxu1  ;;  %v3662_v7 = vld [vmem:[%s4916_s0 + $0x274] sm:$0xff]  }
  0xed   :  { %v4104_v18 = vmax.f32 %v548_v12, %v1077_v13  ;;  %v549_v19 = vmax.f32 %v354_v14, 0.0  ;;  %v1078_v20 = vmax.f32 %v883_v15, 0.0  ;;  %3392 = vmatmul.mubr.msk.bf16.gmra.mrb[108].mxu0 %vm233_vm3, %v3655_v8  ;;  %3502 = vmatmul.mubr.msk.bf16.gmra.mrb[108].mxu1 %vm233_vm3, %v3656_v9 }
  0xee   :  { %3395 = vmatprep.mubr.msk.bf16.mxu0 %vm3704_vm0, %v3703_v0  ;;  %3505 = vmatprep.mubr.msk.bf16.mxu1 %vm3704_vm0, %v3703_v0 }
  0xef   :  { %v4112_v21 = vmax.f32 %v549_v19, %v1078_v20 }
  0xf0   :  { %v358_v22 = vpop.f32.mrb[4].mxu0  ;;  %v887_v23 = vpop.f32.mrb[4].mxu1 }
  0xf1   :  { %v359_v24 = vadd.f32 %v4088_v1, %v358_v22  ;;  %v888_v25 = vadd.f32 %v4088_v1, %v887_v23  ;;  %v3169_v26 = vpop.f32.mrb[5].mxu0  ;;  %v3279_v27 = vpop.f32.mrb[5].mxu1 }
  0xf2   :  { %v361_v30 = vpop.f32.mrb[6].mxu0  ;;  %v890_v31 = vpop.f32.mrb[6].mxu1 }
  0xf3   :  { %v550_v32 = vmax.f32 %v359_v24, 0.0  ;;  %v1079_v33 = vmax.f32 %v888_v25, 0.0  ;;  %v362_v34 = vadd.f32 %v4088_v1, %v361_v30  ;;  %v891_v35 = vadd.f32 %v4088_v1, %v890_v31  ;;  %v3170_v36 = vpop.f32.mrb[7].mxu0  ;;  %v3280_v37 = vpop.f32.mrb[7].mxu1 }
  0xf5   :  { %v4124_v38 = vmax.f32 %v550_v32, %v1079_v33  ;;  %v551_v39 = vmax.f32 %v362_v34, 0.0  ;;  %v1080_v40 = vmax.f32 %v891_v35, 0.0  ;;  %3396 = vmatmul.mubr.msk.bf16.gmra.mrb[112].mxu0 %vm233_vm3, %v3657_v28  ;;  %3506 = vmatmul.mubr.msk.bf16.gmra.mrb[112].mxu1 %vm233_vm3, %v3658_v29  ;;  %v3663_v28 = vld [vmem:[%s4916_s0 + $0x1b8] sm:$0xff]  }
  0xf6   :  { %3399 = vmatprep.mubr.msk.bf16.mxu0 %vm3704_vm0, %v3703_v0  ;;  %3509 = vmatprep.mubr.msk.bf16.mxu1 %vm3704_vm0, %v3703_v0  ;;  %v3664_v29 = vld [vmem:[%s4916_s0 + $0x27c] sm:$0xff]  }
  0xf7   :  { %v4132_v41 = vmax.f32 %v551_v39, %v1080_v40 }
  0xf8   :  { %v366_v42 = vpop.f32.mrb[8].mxu0  ;;  %v895_v43 = vpop.f32.mrb[8].mxu1 }
  0xf9   :  { %v367_v44 = vadd.f32 %v4088_v1, %v366_v42  ;;  %v896_v45 = vadd.f32 %v4088_v1, %v895_v43  ;;  %v3173_v46 = vpop.f32.mrb[9].mxu0  ;;  %v3283_v47 = vpop.f32.mrb[9].mxu1 }
  0xfa   :  { %v369_v50 = vpop.f32.mrb[10].mxu0  ;;  %v898_v51 = vpop.f32.mrb[10].mxu1 }
  0xfb   :  { %v552_v52 = vmax.f32 %v367_v44, 0.0  ;;  %v1081_v53 = vmax.f32 %v896_v45, 0.0  ;;  %v370_v54 = vadd.f32 %v4088_v1, %v369_v50  ;;  %v899_v55 = vadd.f32 %v4088_v1, %v898_v51  ;;  %v3174_v56 = vpop.f32.mrb[11].mxu0  ;;  %v3284_v57 = vpop.f32.mrb[11].mxu1  ;;  %v3665_v50 = vld [vmem:[%s4916_s0 + $0x1c0] sm:$0xff]  }
  0xfc   :  { %v3666_v51 = vld [vmem:[%s4916_s0 + $0x284] sm:$0xff]  }
  0xfd   :  { %v4144_v58 = vmax.f32 %v552_v52, %v1081_v53  ;;  %v553_v59 = vmax.f32 %v370_v54, 0.0  ;;  %v1082_v60 = vmax.f32 %v899_v55, 0.0  ;;  %3400 = vmatmul.mubr.msk.bf16.gmra.mrb[116].mxu0 %vm233_vm3, %v3659_v48  ;;  %3510 = vmatmul.mubr.msk.bf16.gmra.mrb[116].mxu1 %vm233_vm3, %v3660_v49 }
  0xfe   :  { %3403 = vmatprep.mubr.msk.bf16.mxu0 %vm3704_vm0, %v3703_v0  ;;  %3513 = vmatprep.mubr.msk.bf16.mxu1 %vm3704_vm0, %v3703_v0 }
  0xff   :  { %v4152_v61 = vmax.f32 %v553_v59, %v1082_v60 }
 0x100   :  { %v374_v62 = vpop.f32.mrb[12].mxu0  ;;  %v903_v63 = vpop.f32.mrb[12].mxu1 }
 0x101   :  { %v375_v2 = vadd.f32 %v4088_v1, %v374_v62  ;;  %v904_v3 = vadd.f32 %v4088_v1, %v903_v63  ;;  %v3177_v4 = vpop.f32.mrb[13].mxu0  ;;  %v3287_v5 = vpop.f32.mrb[13].mxu1 }
 0x102   :  { %v377_v8 = vpop.f32.mrb[14].mxu0  ;;  %v906_v9 = vpop.f32.mrb[14].mxu1 }
 0x103   :  { %v554_v10 = vmax.f32 %v375_v2, 0.0  ;;  %v1083_v11 = vmax.f32 %v904_v3, 0.0  ;;  %v378_v12 = vadd.f32 %v4088_v1, %v377_v8  ;;  %v907_v13 = vadd.f32 %v4088_v1, %v906_v9  ;;  %v3178_v14 = vpop.f32.mrb[15].mxu0  ;;  %v3288_v15 = vpop.f32.mrb[15].mxu1 }
 0x105   :  { %v4164_v16 = vmax.f32 %v554_v10, %v1083_v11  ;;  %v555_v17 = vmax.f32 %v378_v12, 0.0  ;;  %v1084_v19 = vmax.f32 %v907_v13, 0.0  ;;  %3404 = vmatmul.mubr.msk.bf16.gmra.mrb[120].mxu0 %vm233_vm3, %v3661_v6  ;;  %3514 = vmatmul.mubr.msk.bf16.gmra.mrb[120].mxu1 %vm233_vm3, %v3662_v7  ;;  %v3667_v10 = vld [vmem:[%s4916_s0 + $0x1c8] sm:$0xff]  }
 0x106   :  { %3407 = vmatprep.mubr.msk.bf16.mxu0 %vm3704_vm0, %v3703_v0  ;;  %3517 = vmatprep.mubr.msk.bf16.mxu1 %vm3704_vm0, %v3703_v0  ;;  %v3668_v11 = vld [vmem:[%s4916_s0 + $0x28c] sm:$0xff]  }
 0x107   :  { %v4172_v20 = vmax.f32 %v555_v17, %v1084_v19 }
 0x108   :  { %v382_v22 = vpop.f32.mrb[16].mxu0  ;;  %v911_v23 = vpop.f32.mrb[16].mxu1 }
 0x109   :  { %v383_v24 = vadd.f32 %v4088_v1, %v382_v22  ;;  %v912_v25 = vadd.f32 %v4088_v1, %v911_v23  ;;  %v3181_v26 = vpop.f32.mrb[17].mxu0  ;;  %v3291_v27 = vpop.f32.mrb[17].mxu1 }
 0x10a   :  { %v385_v30 = vpop.f32.mrb[18].mxu0  ;;  %v914_v31 = vpop.f32.mrb[18].mxu1 }
 0x10b   :  { %v556_v32 = vmax.f32 %v383_v24, 0.0  ;;  %v1085_v33 = vmax.f32 %v912_v25, 0.0  ;;  %v386_v34 = vadd.f32 %v4088_v1, %v385_v30  ;;  %v915_v35 = vadd.f32 %v4088_v1, %v914_v31  ;;  %v3182_v36 = vpop.f32.mrb[19].mxu0  ;;  %v3292_v37 = vpop.f32.mrb[19].mxu1 }
 0x10d   :  { %v4184_v39 = vmax.f32 %v556_v32, %v1085_v33  ;;  %v557_v40 = vmax.f32 %v386_v34, 0.0  ;;  %v1086_v42 = vmax.f32 %v915_v35, 0.0  ;;  %3408 = vmatmul.mubr.msk.bf16.gmra.mrb[124].mxu0 %vm233_vm3, %v3663_v28  ;;  %3518 = vmatmul.mubr.msk.bf16.gmra.mrb[124].mxu1 %vm233_vm3, %v3664_v29  ;;  %v3669_v34 = vld [vmem:[%s4916_s0 + $0x1d0] sm:$0xff]  }
 0x10e   :  { %3411 = vmatprep.mubr.msk.bf16.mxu0 %vm3704_vm0, %v3703_v0  ;;  %3521 = vmatprep.mubr.msk.bf16.mxu1 %vm3704_vm0, %v3703_v0  ;;  %v3670_v35 = vld [vmem:[%s4916_s0 + $0x294] sm:$0xff]  }
 0x10f   :  { %v4192_v43 = vmax.f32 %v557_v40, %v1086_v42 }
 0x110   :  { %v390_v44 = vpop.f32.mrb[20].mxu0  ;;  %v919_v45 = vpop.f32.mrb[20].mxu1 }
 0x111   :  { %v391_v46 = vadd.f32 %v4088_v1, %v390_v44  ;;  %v920_v47 = vadd.f32 %v4088_v1, %v919_v45  ;;  %v3185_v48 = vpop.f32.mrb[21].mxu0  ;;  %v3295_v49 = vpop.f32.mrb[21].mxu1 }
 0x112   :  { %v393_v52 = vpop.f32.mrb[22].mxu0  ;;  %v922_v53 = vpop.f32.mrb[22].mxu1 }
 0x113   :  { %v558_v54 = vmax.f32 %v391_v46, 0.0  ;;  %v1087_v55 = vmax.f32 %v920_v47, 0.0  ;;  %v394_v56 = vadd.f32 %v4088_v1, %v393_v52  ;;  %v923_v57 = vadd.f32 %v4088_v1, %v922_v53  ;;  %v3186_v59 = vpop.f32.mrb[23].mxu0  ;;  %v3296_v60 = vpop.f32.mrb[23].mxu1 }
 0x114   :  { %v3671_v59 = vld [vmem:[%s4916_s0 + $0x1d8] sm:$0xff]  }
 0x115   :  { %v4204_v62 = vmax.f32 %v558_v54, %v1087_v55  ;;  %v559_v63 = vmax.f32 %v394_v56, 0.0  ;;  %v1088_v2 = vmax.f32 %v923_v57, 0.0  ;;  %3412 = vmatmul.mubr.msk.bf16.gmra.mrb[128].mxu0 %vm233_vm3, %v3665_v50  ;;  %3522 = vmatmul.mubr.msk.bf16.gmra.mrb[128].mxu1 %vm233_vm3, %v3666_v51  ;;  %v3672_v60 = vld [vmem:[%s4916_s0 + $0x29c] sm:$0xff]  }
 0x116   :  { %3415 = vmatprep.mubr.msk.bf16.mxu0 %vm3704_vm0, %v3703_v0  ;;  %3525 = vmatprep.mubr.msk.bf16.mxu1 %vm3704_vm0, %v3703_v0 }
 0x117   :  { %v4212_v3 = vmax.f32 %v559_v63, %v1088_v2 }
 0x118   :  { %v398_v4 = vpop.f32.mrb[24].mxu0  ;;  %v927_v5 = vpop.f32.mrb[24].mxu1 }
 0x119   :  { %v399_v6 = vadd.f32 %v4088_v1, %v398_v4  ;;  %v928_v7 = vadd.f32 %v4088_v1, %v927_v5  ;;  %v3189_v8 = vpop.f32.mrb[25].mxu0  ;;  %v3299_v9 = vpop.f32.mrb[25].mxu1 }
 0x11a   :  { %v401_v12 = vpop.f32.mrb[26].mxu0  ;;  %v930_v13 = vpop.f32.mrb[26].mxu1 }
 0x11b   :  { %v560_v14 = vmax.f32 %v399_v6, 0.0  ;;  %v1089_v15 = vmax.f32 %v928_v7, 0.0  ;;  %v402_v17 = vadd.f32 %v4088_v1, %v401_v12  ;;  %v931_v19 = vadd.f32 %v4088_v1, %v930_v13  ;;  %v3190_v22 = vpop.f32.mrb[27].mxu0  ;;  %v3300_v23 = vpop.f32.mrb[27].mxu1 }
 0x11d   :  { %v4224_v24 = vmax.f32 %v560_v14, %v1089_v15  ;;  %v561_v25 = vmax.f32 %v402_v17, 0.0  ;;  %v1090_v26 = vmax.f32 %v931_v19, 0.0  ;;  %3416 = vmatmul.mubr.msk.bf16.gmra.mrb[132].mxu0 %vm233_vm3, %v3667_v10  ;;  %3526 = vmatmul.mubr.msk.bf16.gmra.mrb[132].mxu1 %vm233_vm3, %v3668_v11 }
 0x11e   :  { %3419 = vmatprep.mubr.msk.bf16.mxu0 %vm3704_vm0, %v3703_v0  ;;  %3529 = vmatprep.mubr.msk.bf16.mxu1 %vm3704_vm0, %v3703_v0 }
 0x11f   :  { %v4232_v27 = vmax.f32 %v561_v25, %v1090_v26  ;;  %v3673_v25 = vld [vmem:[%s4916_s0 + $0x1e0] sm:$0xff]  }
 0x120   :  { %v406_v28 = vpop.f32.mrb[28].mxu0  ;;  %v935_v29 = vpop.f32.mrb[28].mxu1  ;;  %v3674_v26 = vld [vmem:[%s4916_s0 + $0x2a4] sm:$0xff]  }
 0x121   :  { %v407_v30 = vadd.f32 %v4088_v1, %v406_v28  ;;  %v936_v31 = vadd.f32 %v4088_v1, %v935_v29  ;;  %v3193_v32 = vpop.f32.mrb[29].mxu0  ;;  %v3303_v33 = vpop.f32.mrb[29].mxu1 }
 0x122   :  { %v409_v36 = vpop.f32.mrb[30].mxu0  ;;  %v938_v37 = vpop.f32.mrb[30].mxu1 }
 0x123   :  { %v562_v40 = vmax.f32 %v407_v30, 0.0  ;;  %v1091_v42 = vmax.f32 %v936_v31, 0.0  ;;  %v410_v44 = vadd.f32 %v4088_v1, %v409_v36  ;;  %v939_v45 = vadd.f32 %v4088_v1, %v938_v37  ;;  %v3194_v46 = vpop.f32.mrb[31].mxu0  ;;  %v3304_v47 = vpop.f32.mrb[31].mxu1 }
 0x125   :  { %v4244_v48 = vmax.f32 %v562_v40, %v1091_v42  ;;  %v563_v49 = vmax.f32 %v410_v44, 0.0  ;;  %v1092_v50 = vmax.f32 %v939_v45, 0.0  ;;  %3420 = vmatmul.mubr.msk.bf16.gmra.mrb[136].mxu0 %vm233_vm3, %v3669_v34  ;;  %3530 = vmatmul.mubr.msk.bf16.gmra.mrb[136].mxu1 %vm233_vm3, %v3670_v35 }
 0x126   :  { %3423 = vmatprep.mubr.msk.bf16.mxu0 %vm3704_vm0, %v3703_v0  ;;  %3533 = vmatprep.mubr.msk.bf16.mxu1 %vm3704_vm0, %v3703_v0 }
 0x127   :  { %v4252_v51 = vmax.f32 %v563_v49, %v1092_v50 }
 0x128   :  { %v414_v52 = vpop.f32.mrb[32].mxu0  ;;  %v943_v53 = vpop.f32.mrb[32].mxu1 }
 0x129   :  { %v415_v54 = vadd.f32 %v4088_v1, %v414_v52  ;;  %v944_v55 = vadd.f32 %v4088_v1, %v943_v53  ;;  %v3197_v56 = vpop.f32.mrb[33].mxu0  ;;  %v3307_v57 = vpop.f32.mrb[33].mxu1  ;;  %v3675_v52 = vld [vmem:[%s4916_s0 + $0x1e8] sm:$0xff]  }
 0x12a   :  { %v417_v63 = vpop.f32.mrb[34].mxu0  ;;  %v946_v2 = vpop.f32.mrb[34].mxu1  ;;  %v3676_v53 = vld [vmem:[%s4916_s0 + $0x2ac] sm:$0xff]  }
 0x12b   :  { %v564_v4 = vmax.f32 %v415_v54, 0.0  ;;  %v1093_v5 = vmax.f32 %v944_v55, 0.0  ;;  %v418_v6 = vadd.f32 %v4088_v1, %v417_v63  ;;  %v947_v7 = vadd.f32 %v4088_v1, %v946_v2  ;;  %v3198_v8 = vpop.f32.mrb[35].mxu0  ;;  %v3308_v9 = vpop.f32.mrb[35].mxu1 }
 0x12d   :  { %v4264_v10 = vmax.f32 %v564_v4, %v1093_v5  ;;  %v565_v11 = vmax.f32 %v418_v6, 0.0  ;;  %v1094_v12 = vmax.f32 %v947_v7, 0.0  ;;  %3424 = vmatmul.mubr.msk.bf16.gmra.mrb[140].mxu0 %vm233_vm3, %v3671_v59  ;;  %3534 = vmatmul.mubr.msk.bf16.gmra.mrb[140].mxu1 %vm233_vm3, %v3672_v60 }
 0x12e   :  { %3427 = vmatprep.mubr.msk.bf16.mxu0 %vm3704_vm0, %v3703_v0  ;;  %3537 = vmatprep.mubr.msk.bf16.mxu1 %vm3704_vm0, %v3703_v0 }
 0x12f   :  { %v4272_v13 = vmax.f32 %v565_v11, %v1094_v12 }
 0x130   :  { %v422_v14 = vpop.f32.mrb[36].mxu0  ;;  %v951_v15 = vpop.f32.mrb[36].mxu1 }
 0x131   :  { %v423_v17 = vadd.f32 %v4088_v1, %v422_v14  ;;  %v952_v19 = vadd.f32 %v4088_v1, %v951_v15  ;;  %v3201_v22 = vpop.f32.mrb[37].mxu0  ;;  %v3311_v23 = vpop.f32.mrb[37].mxu1 }
 0x132   :  { %v425_v28 = vpop.f32.mrb[38].mxu0  ;;  %v954_v29 = vpop.f32.mrb[38].mxu1 }
 0x133   :  { %v566_v30 = vmax.f32 %v423_v17, 0.0  ;;  %v1095_v31 = vmax.f32 %v952_v19, 0.0  ;;  %v426_v32 = vadd.f32 %v4088_v1, %v425_v28  ;;  %v955_v33 = vadd.f32 %v4088_v1, %v954_v29  ;;  %v3202_v34 = vpop.f32.mrb[39].mxu0  ;;  %v3312_v35 = vpop.f32.mrb[39].mxu1  ;;  %v3677_v17 = vld [vmem:[%s4916_s0 + $0x1f0] sm:$0xff]  }
 0x134   :  { %v3678_v19 = vld [vmem:[%s4916_s0 + $0x2b4] sm:$0xff]  }
 0x135   :  { %v4284_v36 = vmax.f32 %v566_v30, %v1095_v31  ;;  %v567_v37 = vmax.f32 %v426_v32, 0.0  ;;  %v1096_v40 = vmax.f32 %v955_v33, 0.0  ;;  %3428 = vmatmul.mubr.msk.bf16.gmra.mrb[144].mxu0 %vm233_vm3, %v3673_v25  ;;  %3538 = vmatmul.mubr.msk.bf16.gmra.mrb[144].mxu1 %vm233_vm3, %v3674_v26 }
 0x136   :  { %3431 = vmatprep.mubr.msk.bf16.mxu0 %vm3704_vm0, %v3703_v0  ;;  %3541 = vmatprep.mubr.msk.bf16.mxu1 %vm3704_vm0, %v3703_v0 }
 0x137   :  { %v4292_v42 = vmax.f32 %v567_v37, %v1096_v40 }
 0x138   :  { %v430_v44 = vpop.f32.mrb[40].mxu0  ;;  %v959_v45 = vpop.f32.mrb[40].mxu1 }
 0x139   :  { %v431_v46 = vadd.f32 %v4088_v1, %v430_v44  ;;  %v960_v47 = vadd.f32 %v4088_v1, %v959_v45  ;;  %v3205_v49 = vpop.f32.mrb[41].mxu0  ;;  %v3315_v50 = vpop.f32.mrb[41].mxu1 }
 0x13a   :  { %v433_v54 = vpop.f32.mrb[42].mxu0  ;;  %v962_v55 = vpop.f32.mrb[42].mxu1  ;;  %v3679_v49 = vld [vmem:[%s4916_s0 + $0x1f8] sm:$0xff]  }
 0x13b   :  { %v568_v56 = vmax.f32 %v431_v46, 0.0  ;;  %v1097_v57 = vmax.f32 %v960_v47, 0.0  ;;  %v434_v59 = vadd.f32 %v4088_v1, %v433_v54  ;;  %v963_v60 = vadd.f32 %v4088_v1, %v962_v55  ;;  %v3206_v63 = vpop.f32.mrb[43].mxu0  ;;  %v3316_v2 = vpop.f32.mrb[43].mxu1  ;;  %v3680_v50 = vld [vmem:[%s4916_s0 + $0x2bc] sm:$0xff]  }
 0x13d   :  { %v4304_v4 = vmax.f32 %v568_v56, %v1097_v57  ;;  %v569_v5 = vmax.f32 %v434_v59, 0.0  ;;  %v1098_v6 = vmax.f32 %v963_v60, 0.0  ;;  %3432 = vmatmul.mubr.msk.bf16.gmra.mrb[148].mxu0 %vm233_vm3, %v3675_v52  ;;  %3542 = vmatmul.mubr.msk.bf16.gmra.mrb[148].mxu1 %vm233_vm3, %v3676_v53 }
 0x13e   :  { %3435 = vmatprep.mubr.msk.bf16.mxu0 %vm3704_vm0, %v3703_v0  ;;  %3545 = vmatprep.mubr.msk.bf16.mxu1 %vm3704_vm0, %v3703_v0 }
 0x13f   :  { %v4312_v7 = vmax.f32 %v569_v5, %v1098_v6 }
 0x140   :  { %v438_v8 = vpop.f32.mrb[44].mxu0  ;;  %v967_v9 = vpop.f32.mrb[44].mxu1 }
 0x141   :  { %v439_v11 = vadd.f32 %v4088_v1, %v438_v8  ;;  %v968_v12 = vadd.f32 %v4088_v1, %v967_v9  ;;  %v3209_v14 = vpop.f32.mrb[45].mxu0  ;;  %v3319_v15 = vpop.f32.mrb[45].mxu1 }
 0x142   :  { %v441_v22 = vpop.f32.mrb[46].mxu0  ;;  %v970_v23 = vpop.f32.mrb[46].mxu1 }
 0x143   :  { %v570_v25 = vmax.f32 %v439_v11, 0.0  ;;  %v1099_v26 = vmax.f32 %v968_v12, 0.0  ;;  %v442_v28 = vadd.f32 %v4088_v1, %v441_v22  ;;  %v971_v29 = vadd.f32 %v4088_v1, %v970_v23  ;;  %v3210_v30 = vpop.f32.mrb[47].mxu0  ;;  %v3320_v31 = vpop.f32.mrb[47].mxu1 }
 0x145   :  { %v4324_v32 = vmax.f32 %v570_v25, %v1099_v26  ;;  %v571_v33 = vmax.f32 %v442_v28, 0.0  ;;  %v1100_v34 = vmax.f32 %v971_v29, 0.0  ;;  %3436 = vmatmul.mubr.msk.bf16.gmra.mrb[152].mxu0 %vm233_vm3, %v3677_v17  ;;  %3546 = vmatmul.mubr.msk.bf16.gmra.mrb[152].mxu1 %vm233_vm3, %v3678_v19  ;;  %v3681_v17 = vld [vmem:[%s4916_s0 + $0x200] sm:$0xff]  }
 0x146   :  { %3439 = vmatprep.mubr.msk.bf16.mxu0 %vm3704_vm0, %v3703_v0  ;;  %3549 = vmatprep.mubr.msk.bf16.mxu1 %vm3704_vm0, %v3703_v0  ;;  %v3682_v19 = vld [vmem:[%s4916_s0 + $0x2c4] sm:$0xff]  }
 0x147   :  { %v4332_v35 = vmax.f32 %v571_v33, %v1100_v34 }
 0x148   :  { %v446_v37 = vpop.f32.mrb[48].mxu0  ;;  %v975_v40 = vpop.f32.mrb[48].mxu1 }
 0x149   :  { %v447_v44 = vadd.f32 %v4088_v1, %v446_v37  ;;  %v976_v45 = vadd.f32 %v4088_v1, %v975_v40  ;;  %v3213_v46 = vpop.f32.mrb[49].mxu0  ;;  %v3323_v47 = vpop.f32.mrb[49].mxu1 }
 0x14a   :  { %v449_v52 = vpop.f32.mrb[50].mxu0  ;;  %v978_v53 = vpop.f32.mrb[50].mxu1 }
 0x14b   :  { %v572_v54 = vmax.f32 %v447_v44, 0.0  ;;  %v1101_v55 = vmax.f32 %v976_v45, 0.0  ;;  %v450_v56 = vadd.f32 %v4088_v1, %v449_v52  ;;  %v979_v57 = vadd.f32 %v4088_v1, %v978_v53  ;;  %v3214_v59 = vpop.f32.mrb[51].mxu0  ;;  %v3324_v60 = vpop.f32.mrb[51].mxu1  ;;  %v3683_v52 = vld [vmem:[%s4916_s0 + $0x208] sm:$0xff]  }
 0x14c   :  { %v3684_v53 = vld [vmem:[%s4916_s0 + $0x2cc] sm:$0xff]  }
 0x14d   :  { %v4344_v63 = vmax.f32 %v572_v54, %v1101_v55  ;;  %v573_v2 = vmax.f32 %v450_v56, 0.0  ;;  %v1102_v5 = vmax.f32 %v979_v57, 0.0  ;;  %3440 = vmatmul.mubr.msk.bf16.gmra.mrb[156].mxu0 %vm233_vm3, %v3679_v49  ;;  %3550 = vmatmul.mubr.msk.bf16.gmra.mrb[156].mxu1 %vm233_vm3, %v3680_v50 }
 0x14e   :  { %3443 = vmatprep.mubr.msk.bf16.mxu0 %vm3704_vm0, %v3703_v0  ;;  %3553 = vmatprep.mubr.msk.bf16.mxu1 %vm3704_vm0, %v3703_v0 }
 0x14f   :  { %v4352_v6 = vmax.f32 %v573_v2, %v1102_v5 }
 0x150   :  { %v454_v8 = vpop.f32.mrb[52].mxu0  ;;  %v983_v9 = vpop.f32.mrb[52].mxu1 }
 0x151   :  { %v455_v11 = vadd.f32 %v4088_v1, %v454_v8  ;;  %v984_v12 = vadd.f32 %v4088_v1, %v983_v9  ;;  %v3217_v14 = vpop.f32.mrb[53].mxu0  ;;  %v3327_v15 = vpop.f32.mrb[53].mxu1 }
 0x152   :  { %v457_v22 = vpop.f32.mrb[54].mxu0  ;;  %v986_v23 = vpop.f32.mrb[54].mxu1 }
 0x153   :  { %v574_v25 = vmax.f32 %v455_v11, 0.0  ;;  %v1103_v26 = vmax.f32 %v984_v12, 0.0  ;;  %v458_v28 = vadd.f32 %v4088_v1, %v457_v22  ;;  %v987_v29 = vadd.f32 %v4088_v1, %v986_v23  ;;  %v3218_v30 = vpop.f32.mrb[55].mxu0  ;;  %v3328_v31 = vpop.f32.mrb[55].mxu1 }
 0x155   :  { %v4364_v33 = vmax.f32 %v574_v25, %v1103_v26  ;;  %v575_v34 = vmax.f32 %v458_v28, 0.0  ;;  %v1104_v37 = vmax.f32 %v987_v29, 0.0  ;;  %3444 = vmatmul.mubr.msk.bf16.gmra.mrb[160].mxu0 %vm233_vm3, %v3681_v17  ;;  %3554 = vmatmul.mubr.msk.bf16.gmra.mrb[160].mxu1 %vm233_vm3, %v3682_v19  ;;  %v3685_v25 = vld [vmem:[%s4916_s0 + $0x210] sm:$0xff]  }
 0x156   :  { %3447 = vmatprep.mubr.msk.bf16.mxu0 %vm3704_vm0, %v3703_v0  ;;  %3557 = vmatprep.mubr.msk.bf16.mxu1 %vm3704_vm0, %v3703_v0  ;;  %v3686_v26 = vld [vmem:[%s4916_s0 + $0x2d4] sm:$0xff]  }
 0x157   :  { %v4372_v40 = vmax.f32 %v575_v34, %v1104_v37 }
 0x158   :  { %v462_v44 = vpop.f32.mrb[56].mxu0  ;;  %v991_v45 = vpop.f32.mrb[56].mxu1 }
 0x159   :  { %v463_v46 = vadd.f32 %v4088_v1, %v462_v44  ;;  %v992_v47 = vadd.f32 %v4088_v1, %v991_v45  ;;  %v3221_v49 = vpop.f32.mrb[57].mxu0  ;;  %v3331_v50 = vpop.f32.mrb[57].mxu1 }
 0x15a   :  { %v465_v54 = vpop.f32.mrb[58].mxu0  ;;  %v994_v55 = vpop.f32.mrb[58].mxu1 }
 0x15b   :  { %v576_v56 = vmax.f32 %v463_v46, 0.0  ;;  %v1105_v57 = vmax.f32 %v992_v47, 0.0  ;;  %v466_v59 = vadd.f32 %v4088_v1, %v465_v54  ;;  %v995_v60 = vadd.f32 %v4088_v1, %v994_v55  ;;  %v3222_v2 = vpop.f32.mrb[59].mxu0  ;;  %v3332_v5 = vpop.f32.mrb[59].mxu1 }
 0x15d   :  { %v4384_v8 = vmax.f32 %v576_v56, %v1105_v57  ;;  %v577_v9 = vmax.f32 %v466_v59, 0.0  ;;  %v1106_v11 = vmax.f32 %v995_v60, 0.0  ;;  %3448 = vmatmul.mubr.msk.bf16.gmra.mrb[164].mxu0 %vm233_vm3, %v3683_v52  ;;  %3558 = vmatmul.mubr.msk.bf16.gmra.mrb[164].mxu1 %vm233_vm3, %v3684_v53  ;;  %v3687_v59 = vld [vmem:[%s4916_s0 + $0x218] sm:$0xff]  }
 0x15e   :  { %3451 = vmatprep.mubr.msk.bf16.mxu0 %vm3704_vm0, %v3703_v0  ;;  %3561 = vmatprep.mubr.msk.bf16.mxu1 %vm3704_vm0, %v3703_v0  ;;  %v3688_v60 = vld [vmem:[%s4916_s0 + $0x2dc] sm:$0xff]  }
 0x15f   :  { %v4392_v12 = vmax.f32 %v577_v9, %v1106_v11 }
 0x160   :  { %v470_v14 = vpop.f32.mrb[60].mxu0  ;;  %v999_v15 = vpop.f32.mrb[60].mxu1 }
 0x161   :  { %v471_v17 = vadd.f32 %v4088_v1, %v470_v14  ;;  %v1000_v19 = vadd.f32 %v4088_v1, %v999_v15  ;;  %v3225_v22 = vpop.f32.mrb[61].mxu0  ;;  %v3335_v23 = vpop.f32.mrb[61].mxu1 }
 0x162   :  { %v473_v28 = vpop.f32.mrb[62].mxu0  ;;  %v1002_v29 = vpop.f32.mrb[62].mxu1 }
 0x163   :  { %v578_v30 = vmax.f32 %v471_v17, 0.0  ;;  %v1107_v31 = vmax.f32 %v1000_v19, 0.0  ;;  %v474_v34 = vadd.f32 %v4088_v1, %v473_v28  ;;  %v1003_v37 = vadd.f32 %v4088_v1, %v1002_v29  ;;  %v3226_v44 = vpop.f32.mrb[63].mxu0  ;;  %v3336_v45 = vpop.f32.mrb[63].mxu1 }
 0x164   :  { %v3689_v44 = vld [vmem:[%s4916_s0 + $0x220] sm:$0xff]  }
 0x165   :  { %v4404_v46 = vmax.f32 %v578_v30, %v1107_v31  ;;  %v579_v47 = vmax.f32 %v474_v34, 0.0  ;;  %v1108_v49 = vmax.f32 %v1003_v37, 0.0  ;;  %3452 = vmatmul.mubr.msk.bf16.gmra.mrb[168].mxu0 %vm233_vm3, %v3685_v25  ;;  %3562 = vmatmul.mubr.msk.bf16.gmra.mrb[168].mxu1 %vm233_vm3, %v3686_v26  ;;  %v3690_v45 = vld [vmem:[%s4916_s0 + $0x2e4] sm:$0xff]  }
 0x166   :  { %3455 = vmatprep.mubr.msk.bf16.mxu0 %vm3704_vm0, %v3703_v0  ;;  %3565 = vmatprep.mubr.msk.bf16.mxu1 %vm3704_vm0, %v3703_v0 }
 0x167   :  { %v4412_v50 = vmax.f32 %v579_v47, %v1108_v49 }
 0x168   :  { %v478_v52 = vpop.f32.mrb[64].mxu0  ;;  %v1007_v53 = vpop.f32.mrb[64].mxu1 }
 0x169   :  { %v479_v54 = vadd.f32 %v4088_v1, %v478_v52  ;;  %v1008_v55 = vadd.f32 %v4088_v1, %v1007_v53  ;;  %v3229_v56 = vpop.f32.mrb[65].mxu0  ;;  %v3339_v57 = vpop.f32.mrb[65].mxu1 }
 0x16a   :  { %v481_v2 = vpop.f32.mrb[66].mxu0  ;;  %v1010_v5 = vpop.f32.mrb[66].mxu1 }
 0x16b   :  { %v580_v9 = vmax.f32 %v479_v54, 0.0  ;;  %v1109_v11 = vmax.f32 %v1008_v55, 0.0  ;;  %v482_v14 = vadd.f32 %v4088_v1, %v481_v2  ;;  %v1011_v15 = vadd.f32 %v4088_v1, %v1010_v5  ;;  %v3230_v17 = vpop.f32.mrb[67].mxu0  ;;  %v3340_v19 = vpop.f32.mrb[67].mxu1 }
 0x16d   :  { %v4424_v22 = vmax.f32 %v580_v9, %v1109_v11  ;;  %v581_v23 = vmax.f32 %v482_v14, 0.0  ;;  %v1110_v25 = vmax.f32 %v1011_v15, 0.0  ;;  %3456 = vmatmul.mubr.msk.bf16.gmra.mrb[172].mxu0 %vm233_vm3, %v3687_v59  ;;  %3566 = vmatmul.mubr.msk.bf16.gmra.mrb[172].mxu1 %vm233_vm3, %v3688_v60 }
 0x16e   :  { %3459 = vmatprep.mubr.msk.bf16.mxu0 %vm3704_vm0, %v3703_v0  ;;  %3569 = vmatprep.mubr.msk.bf16.mxu1 %vm3704_vm0, %v3703_v0 }
 0x16f   :  { %v4432_v26 = vmax.f32 %v581_v23, %v1110_v25  ;;  %v3691_v23 = vld [vmem:[%s4916_s0 + $0x228] sm:$0xff]  }
 0x170   :  { %v486_v28 = vpop.f32.mrb[68].mxu0  ;;  %v1015_v29 = vpop.f32.mrb[68].mxu1  ;;  %v3692_v25 = vld [vmem:[%s4916_s0 + $0x2ec] sm:$0xff]  }
 0x171   :  { %v487_v30 = vadd.f32 %v4088_v1, %v486_v28  ;;  %v1016_v31 = vadd.f32 %v4088_v1, %v1015_v29  ;;  %v3233_v34 = vpop.f32.mrb[69].mxu0  ;;  %v3343_v37 = vpop.f32.mrb[69].mxu1 }
 0x172   :  { %v489_v47 = vpop.f32.mrb[70].mxu0  ;;  %v1018_v49 = vpop.f32.mrb[70].mxu1 }
 0x173   :  { %v582_v52 = vmax.f32 %v487_v30, 0.0  ;;  %v1111_v53 = vmax.f32 %v1016_v31, 0.0  ;;  %v490_v54 = vadd.f32 %v4088_v1, %v489_v47  ;;  %v1019_v55 = vadd.f32 %v4088_v1, %v1018_v49  ;;  %v3234_v56 = vpop.f32.mrb[71].mxu0  ;;  %v3344_v57 = vpop.f32.mrb[71].mxu1 }
 0x175   :  { %v4444_v59 = vmax.f32 %v582_v52, %v1111_v53  ;;  %v583_v60 = vmax.f32 %v490_v54, 0.0  ;;  %v1112_v2 = vmax.f32 %v1019_v55, 0.0  ;;  %3460 = vmatmul.mubr.msk.bf16.gmra.mrb[176].mxu0 %vm233_vm3, %v3689_v44  ;;  %3570 = vmatmul.mubr.msk.bf16.gmra.mrb[176].mxu1 %vm233_vm3, %v3690_v45 }
 0x176   :  { %3463 = vmatprep.mubr.msk.bf16.mxu0 %vm3704_vm0, %v3703_v0  ;;  %3573 = vmatprep.mubr.msk.bf16.mxu1 %vm3704_vm0, %v3703_v0 }
 0x177   :  { %v4452_v5 = vmax.f32 %v583_v60, %v1112_v2 }
 0x178   :  { %v494_v9 = vpop.f32.mrb[72].mxu0  ;;  %v1023_v11 = vpop.f32.mrb[72].mxu1 }
 0x179   :  { %v495_v14 = vadd.f32 %v4088_v1, %v494_v9  ;;  %v1024_v15 = vadd.f32 %v4088_v1, %v1023_v11  ;;  %v3237_v17 = vpop.f32.mrb[73].mxu0  ;;  %v3347_v19 = vpop.f32.mrb[73].mxu1  ;;  %v3693_v9 = vld [vmem:[%s4916_s0 + $0x230] sm:$0xff]  }
 0x17a   :  { %v497_v28 = vpop.f32.mrb[74].mxu0  ;;  %v1026_v29 = vpop.f32.mrb[74].mxu1  ;;  %v3694_v11 = vld [vmem:[%s4916_s0 + $0x2f4] sm:$0xff]  }
 0x17b   :  { %v584_v30 = vmax.f32 %v495_v14, 0.0  ;;  %v1113_v31 = vmax.f32 %v1024_v15, 0.0  ;;  %v498_v34 = vadd.f32 %v4088_v1, %v497_v28  ;;  %v1027_v37 = vadd.f32 %v4088_v1, %v1026_v29  ;;  %v3238_v44 = vpop.f32.mrb[75].mxu0  ;;  %v3348_v45 = vpop.f32.mrb[75].mxu1 }
 0x17d   :  { %v4464_v47 = vmax.f32 %v584_v30, %v1113_v31  ;;  %v585_v49 = vmax.f32 %v498_v34, 0.0  ;;  %v1114_v52 = vmax.f32 %v1027_v37, 0.0  ;;  %3464 = vmatmul.mubr.msk.bf16.gmra.mrb[180].mxu0 %vm233_vm3, %v3691_v23  ;;  %3574 = vmatmul.mubr.msk.bf16.gmra.mrb[180].mxu1 %vm233_vm3, %v3692_v25 }
 0x17e   :  { %3467 = vmatprep.mubr.msk.bf16.mxu0 %vm3704_vm0, %v3703_v0  ;;  %3577 = vmatprep.mubr.msk.bf16.mxu1 %vm3704_vm0, %v3703_v0 }
 0x17f   :  { %v4472_v53 = vmax.f32 %v585_v49, %v1114_v52 }
 0x180   :  { %v502_v54 = vpop.f32.mrb[76].mxu0  ;;  %v1031_v55 = vpop.f32.mrb[76].mxu1 }
 0x181   :  { %v503_v56 = vadd.f32 %v4088_v1, %v502_v54  ;;  %v1032_v57 = vadd.f32 %v4088_v1, %v1031_v55  ;;  %v3241_v60 = vpop.f32.mrb[77].mxu0  ;;  %v3351_v2 = vpop.f32.mrb[77].mxu1 }
 0x182   :  { %v505_v14 = vpop.f32.mrb[78].mxu0  ;;  %v1034_v15 = vpop.f32.mrb[78].mxu1 }
 0x183   :  { %v586_v17 = vmax.f32 %v503_v56, 0.0  ;;  %v1115_v19 = vmax.f32 %v1032_v57, 0.0  ;;  %v506_v23 = vadd.f32 %v4088_v1, %v505_v14  ;;  %v1035_v25 = vadd.f32 %v4088_v1, %v1034_v15  ;;  %v3242_v28 = vpop.f32.mrb[79].mxu0  ;;  %v3352_v29 = vpop.f32.mrb[79].mxu1  ;;  %v3695_v56 = vld [vmem:[%s4916_s0 + $0x238] sm:$0xff]  }
 0x184   :  { %v3696_v57 = vld [vmem:[%s4916_s0 + $0x2fc] sm:$0xff]  }
 0x185   :  { %v4484_v30 = vmax.f32 %v586_v17, %v1115_v19  ;;  %v587_v31 = vmax.f32 %v506_v23, 0.0  ;;  %v1116_v34 = vmax.f32 %v1035_v25, 0.0  ;;  %3468 = vmatmul.mubr.msk.bf16.gmra.mrb[184].mxu0 %vm233_vm3, %v3693_v9  ;;  %3578 = vmatmul.mubr.msk.bf16.gmra.mrb[184].mxu1 %vm233_vm3, %v3694_v11 }
 0x186   :  { %3471 = vmatprep.mubr.msk.bf16.mxu0 %vm3704_vm0, %v3703_v0  ;;  %3581 = vmatprep.mubr.msk.bf16.mxu1 %vm3704_vm0, %v3703_v0 }
 0x187   :  { %v4492_v37 = vmax.f32 %v587_v31, %v1116_v34 }
 0x188   :  { %v510_v44 = vpop.f32.mrb[80].mxu0  ;;  %v1039_v45 = vpop.f32.mrb[80].mxu1 }
 0x189   :  { %v511_v49 = vadd.f32 %v4088_v1, %v510_v44  ;;  %v1040_v52 = vadd.f32 %v4088_v1, %v1039_v45  ;;  %v3245_v54 = vpop.f32.mrb[81].mxu0  ;;  %v3355_v55 = vpop.f32.mrb[81].mxu1 }
 0x18a   :  { %v513_v60 = vpop.f32.mrb[82].mxu0  ;;  %v1042_v2 = vpop.f32.mrb[82].mxu1  ;;  %v3697_v54 = vld [vmem:[%s4916_s0 + $0x240] sm:$0xff]  }
 0x18b   :  { %v588_v9 = vmax.f32 %v511_v49, 0.0  ;;  %v1117_v11 = vmax.f32 %v1040_v52, 0.0  ;;  %v514_v14 = vadd.f32 %v4088_v1, %v513_v60  ;;  %v1043_v15 = vadd.f32 %v4088_v1, %v1042_v2  ;;  %v3246_v17 = vpop.f32.mrb[83].mxu0  ;;  %v3356_v19 = vpop.f32.mrb[83].mxu1  ;;  %v3698_v55 = vld [vmem:[%s4916_s0 + $0x304] sm:$0xff]  }
 0x18d   :  { %v4504_v23 = vmax.f32 %v588_v9, %v1117_v11  ;;  %v589_v25 = vmax.f32 %v514_v14, 0.0  ;;  %v1118_v28 = vmax.f32 %v1043_v15, 0.0  ;;  %3472 = vmatmul.mubr.msk.bf16.gmra.mrb[188].mxu0 %vm233_vm3, %v3695_v56  ;;  %3582 = vmatmul.mubr.msk.bf16.gmra.mrb[188].mxu1 %vm233_vm3, %v3696_v57  ;;  %v4525_v9 = vld [vmem:[%s4917_s2] ss:$0 sm:$0xff] }
 0x18e   :  { %3475 = vmatprep.mubr.msk.bf16.mxu0 %vm3704_vm0, %v3703_v0  ;;  %3585 = vmatprep.mubr.msk.bf16.mxu1 %vm3704_vm0, %v3703_v0 }
 0x18f   :  { %v4512_v29 = vmax.f32 %v589_v25, %v1118_v28 }
 0x190   :  { %v518_v31 = vpop.f32.mrb[84].mxu0  ;;  %v1047_v34 = vpop.f32.mrb[84].mxu1 }
 0x191   :  { %v519_v44 = vadd.f32 %v4088_v1, %v518_v31  ;;  %v1048_v45 = vadd.f32 %v4088_v1, %v1047_v34  ;;  %v3249_v49 = vpop.f32.mrb[85].mxu0  ;;  %v3359_v52 = vpop.f32.mrb[85].mxu1 }
 0x192   :  { %v521_v56 = vpop.f32.mrb[86].mxu0  ;;  %v1050_v57 = vpop.f32.mrb[86].mxu1 }
 0x193   :  { %v590_v60 = vmax.f32 %v519_v44, 0.0  ;;  %v1119_v2 = vmax.f32 %v1048_v45, 0.0  ;;  %v522_v1 = vadd.f32 %v4525_v9, %v521_v56  ;;  %v1051_v11 = vadd.f32 %v4525_v9, %v1050_v57  ;;  %v3250_v14 = vpop.f32.mrb[87].mxu0  ;;  %v3360_v15 = vpop.f32.mrb[87].mxu1 }
 0x195   :  { %v4529_v17 = vmax.f32 %v590_v60, %v1119_v2  ;;  %v591_v19 = vmax.f32 %v522_v1, 0.0  ;;  %v1120_v25 = vmax.f32 %v1051_v11, 0.0  ;;  %3476 = vmatmul.mubr.msk.bf16.gmra.mrb[192].mxu0 %vm233_vm3, %v3697_v54  ;;  %3586 = vmatmul.mubr.msk.bf16.gmra.mrb[192].mxu1 %vm233_vm3, %v3698_v55  ;;  %v3699_v54 = vld [vmem:[%s4916_s0 + $0x248] ss:$0 sps:$4 sm:$0xff]   ;;  %v3700_v55 = vld [vmem:[%s4916_s0 + $0x30c] ss:$0 sps:$4 sm:$0xff]  }
 0x196   :  { %3479 = vmatprep.mubr.msk.bf16.mxu0 %vm3704_vm0, %v3703_v0  ;;  %3589 = vmatprep.mubr.msk.bf16.mxu1 %vm3704_vm0, %v3703_v0 }
 0x197   :  { %v4537_v28 = vmax.f32 %v591_v19, %v1120_v25 }
 0x198   :  { %v526_v31 = vpop.f32.mrb[88].mxu0  ;;  %v1055_v34 = vpop.f32.mrb[88].mxu1 }
 0x199   :  { %4919 = vst [vmem:[#allocation2_spill] sm:$0xff] %v4537_v28  ;;  %v527_v44 = vadd.f32 %v4525_v9, %v526_v31  ;;  %v1056_v45 = vadd.f32 %v4525_v9, %v1055_v34  ;;  %v3253_v49 = vpop.f32.mrb[89].mxu0  ;;  %v3363_v52 = vpop.f32.mrb[89].mxu1 }
 0x19a   :  { %v529_v56 = vpop.f32.mrb[90].mxu0  ;;  %v1058_v0 = vpop.f32.mrb[90].mxu1 }
 0x19b   :  { %v592_v57 = vmax.f32 %v527_v44, 0.0  ;;  %v1121_v60 = vmax.f32 %v1056_v45, 0.0  ;;  %v530_v2 = vadd.f32 %v4525_v9, %v529_v56  ;;  %v1059_v1 = vadd.f32 %v4525_v9, %v1058_v0  ;;  %v3254_v11 = vpop.f32.mrb[91].mxu0  ;;  %v3364_v14 = vpop.f32.mrb[91].mxu1 }
 0x19d   :  { %v4549_v15 = vmax.f32 %v592_v57, %v1121_v60  ;;  %v593_v19 = vmax.f32 %v530_v2, 0.0  ;;  %v1122_v25 = vmax.f32 %v1059_v1, 0.0  ;;  %3480 = vmatmul.mubr.msk.bf16.gmra.mrb[196].mxu0 %vm233_vm3, %v3699_v54  ;;  %3590 = vmatmul.mubr.msk.bf16.gmra.mrb[196].mxu1 %vm233_vm3, %v3700_v55 }
 0x19f   :  { %4920 = vst [vmem:[#allocation3_spill] sm:$0xff] %v4549_v15  ;;  %v4553_v31 = vmax.f32 %v593_v19, %v1122_v25 }
 0x1a0   :  { %v534_v34 = vpop.f32.mrb[92].mxu0  ;;  %v1063_v49 = vpop.f32.mrb[92].mxu1 }
 0x1a1   :  { %4921 = vst [vmem:[#allocation4_spill] sm:$0xff] %v4553_v31  ;;  %v535_v44 = vadd.f32 %v4525_v9, %v534_v34  ;;  %v1064_v45 = vadd.f32 %v4525_v9, %v1063_v49  ;;  %v3257_v52 = vpop.f32.mrb[93].mxu0  ;;  %v3367_v56 = vpop.f32.mrb[93].mxu1 }
 0x1a2   :  { %v537_v0 = vpop.f32.mrb[94].mxu0  ;;  %v1066_v11 = vpop.f32.mrb[94].mxu1 }
 0x1a3   :  { %v594_v57 = vmax.f32 %v535_v44, 0.0  ;;  %v1123_v60 = vmax.f32 %v1064_v45, 0.0  ;;  %v538_v2 = vadd.f32 %v4525_v9, %v537_v0  ;;  %v1067_v54 = vadd.f32 %v4525_v9, %v1066_v11  ;;  %v3258_v1 = vpop.f32.mrb[95].mxu0  ;;  %v3368_v55 = vpop.f32.mrb[95].mxu1 }
 0x1a5   :  { %v4559_v14 = vmax.f32 %v594_v57, %v1123_v60  ;;  %v595_v19 = vmax.f32 %v538_v2, 0.0  ;;  %v1124_v25 = vmax.f32 %v1067_v54, 0.0 }
 0x1a7   :  { %v4561_v31 = vmax.f32 %v595_v19, %v1124_v25 }
 0x1a8   :  { %v542_v34 = vpop.f32.mrb[96].mxu0  ;;  %v1071_v49 = vpop.f32.mrb[96].mxu1 }
 0x1a9   :  { %4922 = vst [vmem:[#allocation5_spill] sm:$0xff] %v4561_v31  ;;  %v543_v52 = vadd.f32 %v4525_v9, %v542_v34  ;;  %v1072_v56 = vadd.f32 %v4525_v9, %v1071_v49  ;;  %v3261_v44 = vpop.f32.mrb[97].mxu0  ;;  %v3371_v45 = vpop.f32.mrb[97].mxu1 }
 0x1aa   :  { %v545_v15 = vpop.f32.mrb[98].mxu0  ;;  %v1074_v0 = vpop.f32.mrb[98].mxu1 }
 0x1ab   :  { %v596_v28 = vmax.f32 %v543_v52, 0.0  ;;  %v1125_v11 = vmax.f32 %v1072_v56, 0.0  ;;  %v3262_v1 = vpop.f32.mrb[99].mxu0  ;;  %v3372_v55 = vpop.f32.mrb[99].mxu1 }
 0x1ad   :  { %v4565_v57 = vmax.f32 %v596_v28, %v1125_v11 }
 0x1af   :  { %4923 = vst [vmem:[#allocation6_spill] sm:$0xff] %v4565_v57 }
 0x1b0   :  { %v1457_v60 = vpop.f32.mrb[100].mxu0  ;;  %v1986_v2 = vpop.f32.mrb[100].mxu1 }
 0x1b1   :  { %v1458_v54 = vadd.f32 %v4525_v9, %v1457_v60  ;;  %v1987_v19 = vadd.f32 %v4525_v9, %v1986_v2  ;;  %v3385_v25 = vpop.f32.mrb[101].mxu0  ;;  %v3495_v34 = vpop.f32.mrb[101].mxu1 }
 0x1b2   :  { %v1460_v31 = vpop.f32.mrb[102].mxu0  ;;  %v1989_v49 = vpop.f32.mrb[102].mxu1 }
 0x1b3   :  { %v1655_v44 = vmax.f32 %v1458_v54, 0.0  ;;  %v2184_v45 = vmax.f32 %v1987_v19, 0.0  ;;  %v1461_v15 = vadd.f32 %v4525_v9, %v1460_v31  ;;  %v1990_v52 = vadd.f32 %v4525_v9, %v1989_v49  ;;  %v3386_v56 = vpop.f32.mrb[103].mxu0  ;;  %v3496_v0 = vpop.f32.mrb[103].mxu1 }
 0x1b5   :  { %v2233_v28 = vmax.f32 %v1655_v44, %v2184_v45  ;;  %v1656_v11 = vmax.f32 %v1461_v15, 0.0  ;;  %v2185_v1 = vmax.f32 %v1990_v52, 0.0 }
 0x1b7   :  { %v2282_v55 = vmax.f32 %v4104_v18, %v2233_v28  ;;  %v2234_v60 = vmax.f32 %v1656_v11, %v2185_v1 }
 0x1b8   :  { %v1465_v2 = vpop.f32.mrb[104].mxu0  ;;  %v1994_v25 = vpop.f32.mrb[104].mxu1 }
 0x1b9   :  { %v2984_v34 = vpack.c.bf16 %v2282_v55, %v2282_v55  ;;  %v2283_v57 = vmax.f32 %v4112_v21, %v2234_v60  ;;  %v1466_v54 = vadd.f32 %v4525_v9, %v1465_v2  ;;  %v1995_v31 = vadd.f32 %v4525_v9, %v1994_v25  ;;  %v3389_v19 = vpop.f32.mrb[105].mxu0  ;;  %v3499_v49 = vpop.f32.mrb[105].mxu1 }
 0x1ba   :  { %v1468_v56 = vpop.f32.mrb[106].mxu0  ;;  %v1997_v0 = vpop.f32.mrb[106].mxu1 }
 0x1bb   :  { %2529 = vst.msk [vmem:[%s4918_s3] sm:$0xf] %vm2528_vm4, %v2984_v34  ;;  %v2985_v18 = vpack.c.bf16 %v2283_v57, %v2283_v57  ;;  %v1657_v44 = vmax.f32 %v1466_v54, 0.0  ;;  %v2186_v45 = vmax.f32 %v1995_v31, 0.0  ;;  %v1469_v15 = vadd.f32 %v4525_v9, %v1468_v56  ;;  %v3390_v52 = vpop.f32.mrb[107].mxu0  ;;  %v3500_v21 = vpop.f32.mrb[107].mxu1 }
 0x1bc   :  { %v1998_v28 = vadd.f32 %v4525_v9, %v1997_v0 }
 0x1bd   :  { %2530 = vst.msk [vmem:[%s4918_s3 + $0x4] sm:$0xf] %vm2528_vm4, %v2985_v18  ;;  %v2235_v11 = vmax.f32 %v1657_v44, %v2186_v45  ;;  %v1658_v1 = vmax.f32 %v1469_v15, 0.0 }
 0x1be   :  { %v2187_v55 = vmax.f32 %v1998_v28, 0.0 }
 0x1bf   :  { %v2284_v60 = vmax.f32 %v4124_v38, %v2235_v11 }
 0x1c0   :  { %v2236_v2 = vmax.f32 %v1658_v1, %v2187_v55  ;;  %v1473_v57 = vpop.f32.mrb[108].mxu0  ;;  %v2002_v25 = vpop.f32.mrb[108].mxu1 }
 0x1c1   :  { %v2986_v34 = vpack.c.bf16 %v2284_v60, %v2284_v60  ;;  %v1474_v54 = vadd.f32 %v4525_v9, %v1473_v57  ;;  %v2003_v31 = vadd.f32 %v4525_v9, %v2002_v25  ;;  %v3393_v19 = vpop.f32.mrb[109].mxu0  ;;  %v3503_v49 = vpop.f32.mrb[109].mxu1 }
 0x1c2   :  { %v2285_v56 = vmax.f32 %v4132_v41, %v2236_v2  ;;  %v1476_v0 = vpop.f32.mrb[110].mxu0  ;;  %v2005_v52 = vpop.f32.mrb[110].mxu1 }
 0x1c3   :  { %2531 = vst.msk [vmem:[%s4918_s3 + $0x8] sm:$0xf] %vm2528_vm4, %v2986_v34  ;;  %v1659_v38 = vmax.f32 %v1474_v54, 0.0  ;;  %v2188_v18 = vmax.f32 %v2003_v31, 0.0  ;;  %v1477_v44 = vadd.f32 %v4525_v9, %v1476_v0  ;;  %v2006_v45 = vadd.f32 %v4525_v9, %v2005_v52  ;;  %v3394_v15 = vpop.f32.mrb[111].mxu0  ;;  %v3504_v21 = vpop.f32.mrb[111].mxu1 }
 0x1c4   :  { %v2987_v28 = vpack.c.bf16 %v2285_v56, %v2285_v56 }
 0x1c5   :  { %v2237_v11 = vmax.f32 %v1659_v38, %v2188_v18  ;;  %v1660_v1 = vmax.f32 %v1477_v44, 0.0  ;;  %v2189_v55 = vmax.f32 %v2006_v45, 0.0 }
 0x1c6   :  { %2532 = vst.msk [vmem:[%s4918_s3 + $0xc] sm:$0xf] %vm2528_vm4, %v2987_v28 }
 0x1c7   :  { %v2286_v41 = vmax.f32 %v4144_v58, %v2237_v11  ;;  %v2238_v60 = vmax.f32 %v1660_v1, %v2189_v55 }
 0x1c8   :  { %v1481_v2 = vpop.f32.mrb[112].mxu0  ;;  %v2010_v57 = vpop.f32.mrb[112].mxu1 }
 0x1c9   :  { %v2988_v25 = vpack.c.bf16 %v2286_v41, %v2286_v41  ;;  %v2287_v34 = vmax.f32 %v4152_v61, %v2238_v60  ;;  %v1482_v54 = vadd.f32 %v4525_v9, %v1481_v2  ;;  %v2011_v31 = vadd.f32 %v4525_v9, %v2010_v57  ;;  %v3397_v19 = vpop.f32.mrb[113].mxu0  ;;  %v3507_v49 = vpop.f32.mrb[113].mxu1 }
 0x1ca   :  { %v1484_v56 = vpop.f32.mrb[114].mxu0  ;;  %v2013_v0 = vpop.f32.mrb[114].mxu1 }
 0x1cb   :  { %2533 = vst.msk [vmem:[%s4918_s3 + $0x10] sm:$0xf] %vm2528_vm4, %v2988_v25  ;;  %v2989_v58 = vpack.c.bf16 %v2287_v34, %v2287_v34  ;;  %v1661_v52 = vmax.f32 %v1482_v54, 0.0  ;;  %v2190_v38 = vmax.f32 %v2011_v31, 0.0  ;;  %v1485_v18 = vadd.f32 %v4525_v9, %v1484_v56  ;;  %v3398_v44 = vpop.f32.mrb[115].mxu0  ;;  %v3508_v61 = vpop.f32.mrb[115].mxu1 }
 0x1cc   :  { %v2014_v45 = vadd.f32 %v4525_v9, %v2013_v0 }
 0x1cd   :  { %2534 = vst.msk [vmem:[%s4918_s3 + $0x14] sm:$0xf] %vm2528_vm4, %v2989_v58  ;;  %v2239_v15 = vmax.f32 %v1661_v52, %v2190_v38  ;;  %v1662_v21 = vmax.f32 %v1485_v18, 0.0 }
 0x1ce   :  { %v2191_v28 = vmax.f32 %v2014_v45, 0.0 }
 0x1cf   :  { %v2288_v11 = vmax.f32 %v4164_v16, %v2239_v15 }
 0x1d0   :  { %v2240_v1 = vmax.f32 %v1662_v21, %v2191_v28  ;;  %v1489_v55 = vpop.f32.mrb[116].mxu0  ;;  %v2018_v41 = vpop.f32.mrb[116].mxu1 }
 0x1d1   :  { %v2990_v60 = vpack.c.bf16 %v2288_v11, %v2288_v11  ;;  %v1490_v2 = vadd.f32 %v4525_v9, %v1489_v55  ;;  %v2019_v57 = vadd.f32 %v4525_v9, %v2018_v41  ;;  %v3401_v25 = vpop.f32.mrb[117].mxu0  ;;  %v3511_v34 = vpop.f32.mrb[117].mxu1 }
 0x1d2   :  { %v2289_v54 = vmax.f32 %v4172_v20, %v2240_v1  ;;  %v1492_v31 = vpop.f32.mrb[118].mxu0  ;;  %v2021_v19 = vpop.f32.mrb[118].mxu1 }
 0x1d3   :  { %2535 = vst.msk [vmem:[%s4918_s3 + $0x18] sm:$0xf] %vm2528_vm4, %v2990_v60  ;;  %v1663_v16 = vmax.f32 %v1490_v2, 0.0  ;;  %v2192_v49 = vmax.f32 %v2019_v57, 0.0  ;;  %v1493_v56 = vadd.f32 %v4525_v9, %v1492_v31  ;;  %v2022_v0 = vadd.f32 %v4525_v9, %v2021_v19  ;;  %v3402_v58 = vpop.f32.mrb[119].mxu0  ;;  %v3512_v52 = vpop.f32.mrb[119].mxu1 }
 0x1d4   :  { %v2991_v38 = vpack.c.bf16 %v2289_v54, %v2289_v54 }
 0x1d5   :  { %v2241_v18 = vmax.f32 %v1663_v16, %v2192_v49  ;;  %v1664_v44 = vmax.f32 %v1493_v56, 0.0  ;;  %v2193_v61 = vmax.f32 %v2022_v0, 0.0 }
 0x1d6   :  { %2536 = vst.msk [vmem:[%s4918_s3 + $0x1c] sm:$0xf] %vm2528_vm4, %v2991_v38 }
 0x1d7   :  { %v2290_v20 = vmax.f32 %v4184_v39, %v2241_v18  ;;  %v2242_v45 = vmax.f32 %v1664_v44, %v2193_v61 }
 0x1d8   :  { %v1497_v15 = vpop.f32.mrb[120].mxu0  ;;  %v2026_v21 = vpop.f32.mrb[120].mxu1 }
 0x1d9   :  { %v2992_v28 = vpack.c.bf16 %v2290_v20, %v2290_v20  ;;  %v2291_v11 = vmax.f32 %v4192_v43, %v2242_v45  ;;  %v1498_v1 = vadd.f32 %v4525_v9, %v1497_v15  ;;  %v2027_v55 = vadd.f32 %v4525_v9, %v2026_v21  ;;  %v3405_v41 = vpop.f32.mrb[121].mxu0  ;;  %v3515_v60 = vpop.f32.mrb[121].mxu1 }
 0x1da   :  { %v1500_v2 = vpop.f32.mrb[122].mxu0  ;;  %v2029_v57 = vpop.f32.mrb[122].mxu1 }
 0x1db   :  { %2537 = vst.msk [vmem:[%s4918_s3 + $0x20] sm:$0xf] %vm2528_vm4, %v2992_v28  ;;  %v2993_v39 = vpack.c.bf16 %v2291_v11, %v2291_v11  ;;  %v1665_v25 = vmax.f32 %v1498_v1, 0.0  ;;  %v2194_v34 = vmax.f32 %v2027_v55, 0.0  ;;  %v1501_v54 = vadd.f32 %v4525_v9, %v1500_v2  ;;  %v3406_v31 = vpop.f32.mrb[123].mxu0  ;;  %v3516_v43 = vpop.f32.mrb[123].mxu1 }
 0x1dc   :  { %v2030_v19 = vadd.f32 %v4525_v9, %v2029_v57 }
 0x1dd   :  { %2538 = vst.msk [vmem:[%s4918_s3 + $0x24] sm:$0xf] %vm2528_vm4, %v2993_v39  ;;  %v2243_v16 = vmax.f32 %v1665_v25, %v2194_v34  ;;  %v1666_v49 = vmax.f32 %v1501_v54, 0.0 }
 0x1de   :  { %v2195_v56 = vmax.f32 %v2030_v19, 0.0 }
 0x1df   :  { %v2292_v0 = vmax.f32 %v4204_v62, %v2243_v16 }
 0x1e0   :  { %v2244_v58 = vmax.f32 %v1666_v49, %v2195_v56  ;;  %v1505_v52 = vpop.f32.mrb[124].mxu0  ;;  %v2034_v38 = vpop.f32.mrb[124].mxu1 }
 0x1e1   :  { %v2994_v18 = vpack.c.bf16 %v2292_v0, %v2292_v0  ;;  %v1506_v44 = vadd.f32 %v4525_v9, %v1505_v52  ;;  %v2035_v61 = vadd.f32 %v4525_v9, %v2034_v38  ;;  %v3409_v20 = vpop.f32.mrb[125].mxu0  ;;  %v3519_v45 = vpop.f32.mrb[125].mxu1 }
 0x1e2   :  { %v2293_v15 = vmax.f32 %v4212_v3, %v2244_v58  ;;  %v1508_v21 = vpop.f32.mrb[126].mxu0  ;;  %v2037_v28 = vpop.f32.mrb[126].mxu1 }
 0x1e3   :  { %2539 = vst.msk [vmem:[%s4918_s3 + $0x28] sm:$0xf] %vm2528_vm4, %v2994_v18  ;;  %v1667_v62 = vmax.f32 %v1506_v44, 0.0  ;;  %v2196_v11 = vmax.f32 %v2035_v61, 0.0  ;;  %v1509_v1 = vadd.f32 %v4525_v9, %v1508_v21  ;;  %v2038_v55 = vadd.f32 %v4525_v9, %v2037_v28  ;;  %v3410_v41 = vpop.f32.mrb[127].mxu0  ;;  %v3520_v60 = vpop.f32.mrb[127].mxu1 }
 0x1e4   :  { %v2995_v2 = vpack.c.bf16 %v2293_v15, %v2293_v15 }
 0x1e5   :  { %v2245_v57 = vmax.f32 %v1667_v62, %v2196_v11  ;;  %v1668_v39 = vmax.f32 %v1509_v1, 0.0  ;;  %v2197_v25 = vmax.f32 %v2038_v55, 0.0 }
 0x1e6   :  { %2540 = vst.msk [vmem:[%s4918_s3 + $0x2c] sm:$0xf] %vm2528_vm4, %v2995_v2 }
 0x1e7   :  { %v2294_v3 = vmax.f32 %v4224_v24, %v2245_v57  ;;  %v2246_v34 = vmax.f32 %v1668_v39, %v2197_v25 }
 0x1e8   :  { %v1513_v54 = vpop.f32.mrb[128].mxu0  ;;  %v2042_v31 = vpop.f32.mrb[128].mxu1 }
 0x1e9   :  { %v2996_v43 = vpack.c.bf16 %v2294_v3, %v2294_v3  ;;  %v2295_v19 = vmax.f32 %v4232_v27, %v2246_v34  ;;  %v1514_v16 = vadd.f32 %v4525_v9, %v1513_v54  ;;  %v2043_v49 = vadd.f32 %v4525_v9, %v2042_v31  ;;  %v3413_v56 = vpop.f32.mrb[129].mxu0  ;;  %v3523_v0 = vpop.f32.mrb[129].mxu1 }
 0x1ea   :  { %v1516_v58 = vpop.f32.mrb[130].mxu0  ;;  %v2045_v52 = vpop.f32.mrb[130].mxu1 }
 0x1eb   :  { %2541 = vst.msk [vmem:[%s4918_s3 + $0x30] sm:$0xf] %vm2528_vm4, %v2996_v43  ;;  %v2997_v24 = vpack.c.bf16 %v2295_v19, %v2295_v19  ;;  %v1669_v38 = vmax.f32 %v1514_v16, 0.0  ;;  %v2198_v18 = vmax.f32 %v2043_v49, 0.0  ;;  %v1517_v44 = vadd.f32 %v4525_v9, %v1516_v58  ;;  %v3414_v61 = vpop.f32.mrb[131].mxu0  ;;  %v3524_v27 = vpop.f32.mrb[131].mxu1 }
 0x1ec   :  { %v2046_v20 = vadd.f32 %v4525_v9, %v2045_v52 }
 0x1ed   :  { %2542 = vst.msk [vmem:[%s4918_s3 + $0x34] sm:$0xf] %vm2528_vm4, %v2997_v24  ;;  %v2247_v45 = vmax.f32 %v1669_v38, %v2198_v18  ;;  %v1670_v15 = vmax.f32 %v1517_v44, 0.0 }
 0x1ee   :  { %v2199_v21 = vmax.f32 %v2046_v20, 0.0 }
 0x1ef   :  { %v2296_v28 = vmax.f32 %v4244_v48, %v2247_v45 }
 0x1f0   :  { %v2248_v62 = vmax.f32 %v1670_v15, %v2199_v21  ;;  %v1521_v11 = vpop.f32.mrb[132].mxu0  ;;  %v2050_v1 = vpop.f32.mrb[132].mxu1 }
 0x1f1   :  { %v2998_v55 = vpack.c.bf16 %v2296_v28, %v2296_v28  ;;  %v1522_v41 = vadd.f32 %v4525_v9, %v1521_v11  ;;  %v2051_v60 = vadd.f32 %v4525_v9, %v2050_v1  ;;  %v3417_v2 = vpop.f32.mrb[133].mxu0  ;;  %v3527_v57 = vpop.f32.mrb[133].mxu1 }
 0x1f2   :  { %v2297_v39 = vmax.f32 %v4252_v51, %v2248_v62  ;;  %v1524_v25 = vpop.f32.mrb[134].mxu0  ;;  %v2053_v3 = vpop.f32.mrb[134].mxu1 }
 0x1f3   :  { %2543 = vst.msk [vmem:[%s4918_s3 + $0x38] sm:$0xf] %vm2528_vm4, %v2998_v55  ;;  %v1671_v48 = vmax.f32 %v1522_v41, 0.0  ;;  %v2200_v34 = vmax.f32 %v2051_v60, 0.0  ;;  %v1525_v54 = vadd.f32 %v4525_v9, %v1524_v25  ;;  %v2054_v31 = vadd.f32 %v4525_v9, %v2053_v3  ;;  %v3418_v43 = vpop.f32.mrb[135].mxu0  ;;  %v3528_v19 = vpop.f32.mrb[135].mxu1 }
 0x1f4   :  { %v2999_v16 = vpack.c.bf16 %v2297_v39, %v2297_v39 }
 0x1f5   :  { %v2249_v49 = vmax.f32 %v1671_v48, %v2200_v34  ;;  %v1672_v56 = vmax.f32 %v1525_v54, 0.0  ;;  %v2201_v0 = vmax.f32 %v2054_v31, 0.0 }
 0x1f6   :  { %2544 = vst.msk [vmem:[%s4918_s3 + $0x3c] sm:$0xf] %vm2528_vm4, %v2999_v16 }
 0x1f7   :  { %v2298_v51 = vmax.f32 %v4264_v10, %v2249_v49  ;;  %v2250_v58 = vmax.f32 %v1672_v56, %v2201_v0 }
 0x1f8   :  { %v1529_v52 = vpop.f32.mrb[136].mxu0  ;;  %v2058_v24 = vpop.f32.mrb[136].mxu1 }
 0x1f9   :  { %v3000_v38 = vpack.c.bf16 %v2298_v51, %v2298_v51  ;;  %v2299_v18 = vmax.f32 %v4272_v13, %v2250_v58  ;;  %v1530_v44 = vadd.f32 %v4525_v9, %v1529_v52  ;;  %v2059_v61 = vadd.f32 %v4525_v9, %v2058_v24  ;;  %v3421_v27 = vpop.f32.mrb[137].mxu0  ;;  %v3531_v20 = vpop.f32.mrb[137].mxu1 }
 0x1fa   :  { %v1532_v45 = vpop.f32.mrb[138].mxu0  ;;  %v2061_v15 = vpop.f32.mrb[138].mxu1 }
 0x1fb   :  { %2545 = vst.msk [vmem:[%s4918_s3 + $0x40] sm:$0xf] %vm2528_vm4, %v3000_v38  ;;  %v3001_v10 = vpack.c.bf16 %v2299_v18, %v2299_v18  ;;  %v1673_v21 = vmax.f32 %v1530_v44, 0.0  ;;  %v2202_v28 = vmax.f32 %v2059_v61, 0.0  ;;  %v1533_v62 = vadd.f32 %v4525_v9, %v1532_v45  ;;  %v3422_v11 = vpop.f32.mrb[139].mxu0  ;;  %v3532_v13 = vpop.f32.mrb[139].mxu1 }
 0x1fc   :  { %v2062_v1 = vadd.f32 %v4525_v9, %v2061_v15 }
 0x1fd   :  { %2546 = vst.msk [vmem:[%s4918_s3 + $0x44] sm:$0xf] %vm2528_vm4, %v3001_v10  ;;  %v2251_v55 = vmax.f32 %v1673_v21, %v2202_v28  ;;  %v1674_v41 = vmax.f32 %v1533_v62, 0.0 }
 0x1fe   :  { %v2203_v60 = vmax.f32 %v2062_v1, 0.0 }
 0x1ff   :  { %v2300_v2 = vmax.f32 %v4284_v36, %v2251_v55 }
 0x200   :  { %v2252_v57 = vmax.f32 %v1674_v41, %v2203_v60  ;;  %v1537_v39 = vpop.f32.mrb[140].mxu0  ;;  %v2066_v25 = vpop.f32.mrb[140].mxu1 }
 0x201   :  { %v3002_v3 = vpack.c.bf16 %v2300_v2, %v2300_v2  ;;  %v1538_v48 = vadd.f32 %v4525_v9, %v1537_v39  ;;  %v2067_v34 = vadd.f32 %v4525_v9, %v2066_v25  ;;  %v3425_v54 = vpop.f32.mrb[141].mxu0  ;;  %v3535_v31 = vpop.f32.mrb[141].mxu1 }
 0x202   :  { %v2301_v43 = vmax.f32 %v4292_v42, %v2252_v57  ;;  %v1540_v19 = vpop.f32.mrb[142].mxu0  ;;  %v2069_v16 = vpop.f32.mrb[142].mxu1 }
 0x203   :  { %2547 = vst.msk [vmem:[%s4918_s3 + $0x48] sm:$0xf] %vm2528_vm4, %v3002_v3  ;;  %v1675_v36 = vmax.f32 %v1538_v48, 0.0  ;;  %v2204_v49 = vmax.f32 %v2067_v34, 0.0  ;;  %v1541_v56 = vadd.f32 %v4525_v9, %v1540_v19  ;;  %v2070_v0 = vadd.f32 %v4525_v9, %v2069_v16  ;;  %v3426_v51 = vpop.f32.mrb[143].mxu0  ;;  %v3536_v58 = vpop.f32.mrb[143].mxu1 }
 0x204   :  { %v3003_v52 = vpack.c.bf16 %v2301_v43, %v2301_v43 }
 0x205   :  { %v2253_v24 = vmax.f32 %v1675_v36, %v2204_v49  ;;  %v1676_v38 = vmax.f32 %v1541_v56, 0.0  ;;  %v2205_v18 = vmax.f32 %v2070_v0, 0.0 }
 0x206   :  { %2548 = vst.msk [vmem:[%s4918_s3 + $0x4c] sm:$0xf] %vm2528_vm4, %v3003_v52 }
 0x207   :  { %v2302_v42 = vmax.f32 %v4304_v4, %v2253_v24  ;;  %v2254_v44 = vmax.f32 %v1676_v38, %v2205_v18 }
 0x208   :  { %v1545_v61 = vpop.f32.mrb[144].mxu0  ;;  %v2074_v27 = vpop.f32.mrb[144].mxu1 }
 0x209   :  { %v3004_v20 = vpack.c.bf16 %v2302_v42, %v2302_v42  ;;  %v2303_v45 = vmax.f32 %v4312_v7, %v2254_v44  ;;  %v1546_v15 = vadd.f32 %v4525_v9, %v1545_v61  ;;  %v2075_v10 = vadd.f32 %v4525_v9, %v2074_v27  ;;  %v3429_v21 = vpop.f32.mrb[145].mxu0  ;;  %v3539_v28 = vpop.f32.mrb[145].mxu1 }
 0x20a   :  { %v1548_v62 = vpop.f32.mrb[146].mxu0  ;;  %v2077_v11 = vpop.f32.mrb[146].mxu1 }
 0x20b   :  { %2549 = vst.msk [vmem:[%s4918_s3 + $0x50] sm:$0xf] %vm2528_vm4, %v3004_v20  ;;  %v3005_v4 = vpack.c.bf16 %v2303_v45, %v2303_v45  ;;  %v1677_v13 = vmax.f32 %v1546_v15, 0.0  ;;  %v2206_v1 = vmax.f32 %v2075_v10, 0.0  ;;  %v1549_v55 = vadd.f32 %v4525_v9, %v1548_v62  ;;  %v3430_v41 = vpop.f32.mrb[147].mxu0  ;;  %v3540_v7 = vpop.f32.mrb[147].mxu1 }
 0x20c   :  { %v2078_v60 = vadd.f32 %v4525_v9, %v2077_v11 }
 0x20d   :  { %2550 = vst.msk [vmem:[%s4918_s3 + $0x54] sm:$0xf] %vm2528_vm4, %v3005_v4  ;;  %v2255_v2 = vmax.f32 %v1677_v13, %v2206_v1  ;;  %v1678_v57 = vmax.f32 %v1549_v55, 0.0 }
 0x20e   :  { %v2207_v39 = vmax.f32 %v2078_v60, 0.0 }
 0x20f   :  { %v2304_v25 = vmax.f32 %v4324_v32, %v2255_v2 }
 0x210   :  { %v2256_v3 = vmax.f32 %v1678_v57, %v2207_v39  ;;  %v1553_v48 = vpop.f32.mrb[148].mxu0  ;;  %v2082_v34 = vpop.f32.mrb[148].mxu1 }
 0x211   :  { %v3006_v54 = vpack.c.bf16 %v2304_v25, %v2304_v25  ;;  %v1554_v31 = vadd.f32 %v4525_v9, %v1553_v48  ;;  %v2083_v43 = vadd.f32 %v4525_v9, %v2082_v34  ;;  %v3433_v19 = vpop.f32.mrb[149].mxu0  ;;  %v3543_v16 = vpop.f32.mrb[149].mxu1 }
 0x212   :  { %v2305_v36 = vmax.f32 %v4332_v35, %v2256_v3  ;;  %v1556_v49 = vpop.f32.mrb[150].mxu0  ;;  %v2085_v56 = vpop.f32.mrb[150].mxu1 }
 0x213   :  { %2551 = vst.msk [vmem:[%s4918_s3 + $0x58] sm:$0xf] %vm2528_vm4, %v3006_v54  ;;  %v1679_v32 = vmax.f32 %v1554_v31, 0.0  ;;  %v2208_v0 = vmax.f32 %v2083_v43, 0.0  ;;  %v1557_v51 = vadd.f32 %v4525_v9, %v1556_v49  ;;  %v2086_v58 = vadd.f32 %v4525_v9, %v2085_v56  ;;  %v3434_v52 = vpop.f32.mrb[151].mxu0  ;;  %v3544_v24 = vpop.f32.mrb[151].mxu1 }
 0x214   :  { %v3007_v38 = vpack.c.bf16 %v2305_v36, %v2305_v36 }
 0x215   :  { %v2257_v18 = vmax.f32 %v1679_v32, %v2208_v0  ;;  %v1680_v42 = vmax.f32 %v1557_v51, 0.0  ;;  %v2209_v44 = vmax.f32 %v2086_v58, 0.0 }
 0x216   :  { %2552 = vst.msk [vmem:[%s4918_s3 + $0x5c] sm:$0xf] %vm2528_vm4, %v3007_v38 }
 0x217   :  { %v2306_v35 = vmax.f32 %v4344_v63, %v2257_v18  ;;  %v2258_v61 = vmax.f32 %v1680_v42, %v2209_v44 }
 0x218   :  { %v1561_v27 = vpop.f32.mrb[152].mxu0  ;;  %v2090_v20 = vpop.f32.mrb[152].mxu1 }
 0x219   :  { %v3008_v45 = vpack.c.bf16 %v2306_v35, %v2306_v35  ;;  %v2307_v15 = vmax.f32 %v4352_v6, %v2258_v61  ;;  %v1562_v10 = vadd.f32 %v4525_v9, %v1561_v27  ;;  %v2091_v21 = vadd.f32 %v4525_v9, %v2090_v20  ;;  %v3437_v28 = vpop.f32.mrb[153].mxu0  ;;  %v3547_v62 = vpop.f32.mrb[153].mxu1 }
 0x21a   :  { %v1564_v11 = vpop.f32.mrb[154].mxu0  ;;  %v2093_v4 = vpop.f32.mrb[154].mxu1 }
 0x21b   :  { %2553 = vst.msk [vmem:[%s4918_s3 + $0x60] sm:$0xf] %vm2528_vm4, %v3008_v45  ;;  %v3009_v63 = vpack.c.bf16 %v2307_v15, %v2307_v15  ;;  %v1681_v13 = vmax.f32 %v1562_v10, 0.0  ;;  %v2210_v1 = vmax.f32 %v2091_v21, 0.0  ;;  %v1565_v55 = vadd.f32 %v4525_v9, %v1564_v11  ;;  %v3438_v41 = vpop.f32.mrb[155].mxu0  ;;  %v3548_v6 = vpop.f32.mrb[155].mxu1 }
 0x21c   :  { %v2094_v7 = vadd.f32 %v4525_v9, %v2093_v4 }
 0x21d   :  { %2554 = vst.msk [vmem:[%s4918_s3 + $0x64] sm:$0xf] %vm2528_vm4, %v3009_v63  ;;  %v2259_v60 = vmax.f32 %v1681_v13, %v2210_v1  ;;  %v1682_v2 = vmax.f32 %v1565_v55, 0.0 }
 0x21e   :  { %v2211_v57 = vmax.f32 %v2094_v7, 0.0 }
 0x21f   :  { %v2308_v39 = vmax.f32 %v4364_v33, %v2259_v60 }
 0x220   :  { %v2260_v25 = vmax.f32 %v1682_v2, %v2211_v57  ;;  %v1569_v3 = vpop.f32.mrb[156].mxu0  ;;  %v2098_v48 = vpop.f32.mrb[156].mxu1 }
 0x221   :  { %v3010_v34 = vpack.c.bf16 %v2308_v39, %v2308_v39  ;;  %v1570_v54 = vadd.f32 %v4525_v9, %v1569_v3  ;;  %v2099_v31 = vadd.f32 %v4525_v9, %v2098_v48  ;;  %v3441_v43 = vpop.f32.mrb[157].mxu0  ;;  %v3551_v19 = vpop.f32.mrb[157].mxu1 }
 0x222   :  { %v2309_v16 = vmax.f32 %v4372_v40, %v2260_v25  ;;  %v1572_v36 = vpop.f32.mrb[158].mxu0  ;;  %v2101_v49 = vpop.f32.mrb[158].mxu1 }
 0x223   :  { %2555 = vst.msk [vmem:[%s4918_s3 + $0x68] sm:$0xf] %vm2528_vm4, %v3010_v34  ;;  %v1683_v33 = vmax.f32 %v1570_v54, 0.0  ;;  %v2212_v56 = vmax.f32 %v2099_v31, 0.0  ;;  %v1573_v32 = vadd.f32 %v4525_v9, %v1572_v36  ;;  %v2102_v0 = vadd.f32 %v4525_v9, %v2101_v49  ;;  %v3442_v51 = vpop.f32.mrb[159].mxu0  ;;  %v3552_v58 = vpop.f32.mrb[159].mxu1 }
 0x224   :  { %v3011_v52 = vpack.c.bf16 %v2309_v16, %v2309_v16 }
 0x225   :  { %v2261_v24 = vmax.f32 %v1683_v33, %v2212_v56  ;;  %v1684_v38 = vmax.f32 %v1573_v32, 0.0  ;;  %v2213_v18 = vmax.f32 %v2102_v0, 0.0 }
 0x226   :  { %2556 = vst.msk [vmem:[%s4918_s3 + $0x6c] sm:$0xf] %vm2528_vm4, %v3011_v52 }
 0x227   :  { %v2310_v40 = vmax.f32 %v4384_v8, %v2261_v24  ;;  %v2262_v42 = vmax.f32 %v1684_v38, %v2213_v18 }
 0x228   :  { %v1577_v44 = vpop.f32.mrb[160].mxu0  ;;  %v2106_v35 = vpop.f32.mrb[160].mxu1 }
 0x229   :  { %v3012_v61 = vpack.c.bf16 %v2310_v40, %v2310_v40  ;;  %v2311_v27 = vmax.f32 %v4392_v12, %v2262_v42  ;;  %v1578_v20 = vadd.f32 %v4525_v9, %v1577_v44  ;;  %v2107_v45 = vadd.f32 %v4525_v9, %v2106_v35  ;;  %v3445_v15 = vpop.f32.mrb[161].mxu0  ;;  %v3555_v10 = vpop.f32.mrb[161].mxu1 }
 0x22a   :  { %v1580_v21 = vpop.f32.mrb[162].mxu0  ;;  %v2109_v28 = vpop.f32.mrb[162].mxu1 }
 0x22b   :  { %2557 = vst.msk [vmem:[%s4918_s3 + $0x70] sm:$0xf] %vm2528_vm4, %v3012_v61  ;;  %v3013_v8 = vpack.c.bf16 %v2311_v27, %v2311_v27  ;;  %v1685_v62 = vmax.f32 %v1578_v20, 0.0  ;;  %v2214_v11 = vmax.f32 %v2107_v45, 0.0  ;;  %v1581_v4 = vadd.f32 %v4525_v9, %v1580_v21  ;;  %v3446_v63 = vpop.f32.mrb[163].mxu0  ;;  %v3556_v12 = vpop.f32.mrb[163].mxu1 }
 0x22c   :  { %v2110_v13 = vadd.f32 %v4525_v9, %v2109_v28 }
 0x22d   :  { %2558 = vst.msk [vmem:[%s4918_s3 + $0x74] sm:$0xf] %vm2528_vm4, %v3013_v8  ;;  %v2263_v1 = vmax.f32 %v1685_v62, %v2214_v11  ;;  %v1686_v55 = vmax.f32 %v1581_v4, 0.0 }
 0x22e   :  { %v2215_v41 = vmax.f32 %v2110_v13, 0.0 }
 0x22f   :  { %v2312_v6 = vmax.f32 %v4404_v46, %v2263_v1 }
 0x230   :  { %v2264_v7 = vmax.f32 %v1686_v55, %v2215_v41  ;;  %v1585_v60 = vpop.f32.mrb[164].mxu0  ;;  %v2114_v2 = vpop.f32.mrb[164].mxu1 }
 0x231   :  { %v3014_v57 = vpack.c.bf16 %v2312_v6, %v2312_v6  ;;  %v1586_v39 = vadd.f32 %v4525_v9, %v1585_v60  ;;  %v2115_v25 = vadd.f32 %v4525_v9, %v2114_v2  ;;  %v3449_v3 = vpop.f32.mrb[165].mxu0  ;;  %v3559_v48 = vpop.f32.mrb[165].mxu1 }
 0x232   :  { %v2313_v34 = vmax.f32 %v4412_v50, %v2264_v7  ;;  %v1588_v54 = vpop.f32.mrb[166].mxu0  ;;  %v2117_v31 = vpop.f32.mrb[166].mxu1 }
 0x233   :  { %2559 = vst.msk [vmem:[%s4918_s3 + $0x78] sm:$0xf] %vm2528_vm4, %v3014_v57  ;;  %v1687_v46 = vmax.f32 %v1586_v39, 0.0  ;;  %v2216_v43 = vmax.f32 %v2115_v25, 0.0  ;;  %v1589_v19 = vadd.f32 %v4525_v9, %v1588_v54  ;;  %v2118_v16 = vadd.f32 %v4525_v9, %v2117_v31  ;;  %v3450_v36 = vpop.f32.mrb[167].mxu0  ;;  %v3560_v49 = vpop.f32.mrb[167].mxu1 }
 0x234   :  { %v3015_v33 = vpack.c.bf16 %v2313_v34, %v2313_v34 }
 0x235   :  { %v2265_v56 = vmax.f32 %v1687_v46, %v2216_v43  ;;  %v1688_v32 = vmax.f32 %v1589_v19, 0.0  ;;  %v2217_v0 = vmax.f32 %v2118_v16, 0.0 }
 0x236   :  { %2560 = vst.msk [vmem:[%s4918_s3 + $0x7c] sm:$0xf] %vm2528_vm4, %v3015_v33 }
 0x237   :  { %v2314_v50 = vmax.f32 %v4424_v22, %v2265_v56  ;;  %v2266_v51 = vmax.f32 %v1688_v32, %v2217_v0 }
 0x238   :  { %v1593_v58 = vpop.f32.mrb[168].mxu0  ;;  %v2122_v52 = vpop.f32.mrb[168].mxu1 }
 0x239   :  { %v3016_v24 = vpack.c.bf16 %v2314_v50, %v2314_v50  ;;  %v2315_v38 = vmax.f32 %v4432_v26, %v2266_v51  ;;  %v1594_v18 = vadd.f32 %v4525_v9, %v1593_v58  ;;  %v2123_v40 = vadd.f32 %v4525_v9, %v2122_v52  ;;  %v3453_v42 = vpop.f32.mrb[169].mxu0  ;;  %v3563_v44 = vpop.f32.mrb[169].mxu1 }
 0x23a   :  { %v1596_v35 = vpop.f32.mrb[170].mxu0  ;;  %v2125_v61 = vpop.f32.mrb[170].mxu1 }
 0x23b   :  { %2561 = vst.msk [vmem:[%s4918_s3 + $0x80] sm:$0xf] %vm2528_vm4, %v3016_v24  ;;  %v3017_v22 = vpack.c.bf16 %v2315_v38, %v2315_v38  ;;  %v1689_v27 = vmax.f32 %v1594_v18, 0.0  ;;  %v2218_v20 = vmax.f32 %v2123_v40, 0.0  ;;  %v1597_v45 = vadd.f32 %v4525_v9, %v1596_v35  ;;  %v3454_v15 = vpop.f32.mrb[171].mxu0  ;;  %v3564_v26 = vpop.f32.mrb[171].mxu1 }
 0x23c   :  { %v2126_v10 = vadd.f32 %v4525_v9, %v2125_v61 }
 0x23d   :  { %2562 = vst.msk [vmem:[%s4918_s3 + $0x84] sm:$0xf] %vm2528_vm4, %v3017_v22  ;;  %v2267_v21 = vmax.f32 %v1689_v27, %v2218_v20  ;;  %v1690_v28 = vmax.f32 %v1597_v45, 0.0 }
 0x23e   :  { %v2219_v8 = vmax.f32 %v2126_v10, 0.0 }
 0x23f   :  { %v2316_v62 = vmax.f32 %v4444_v59, %v2267_v21 }
 0x240   :  { %v2268_v11 = vmax.f32 %v1690_v28, %v2219_v8  ;;  %v1601_v4 = vpop.f32.mrb[172].mxu0  ;;  %v2130_v63 = vpop.f32.mrb[172].mxu1 }
 0x241   :  { %v3018_v12 = vpack.c.bf16 %v2316_v62, %v2316_v62  ;;  %v1602_v13 = vadd.f32 %v4525_v9, %v1601_v4  ;;  %v2131_v1 = vadd.f32 %v4525_v9, %v2130_v63  ;;  %v3457_v55 = vpop.f32.mrb[173].mxu0  ;;  %v3567_v41 = vpop.f32.mrb[173].mxu1 }
 0x242   :  { %v2317_v6 = vmax.f32 %v4452_v5, %v2268_v11  ;;  %v1604_v7 = vpop.f32.mrb[174].mxu0  ;;  %v2133_v60 = vpop.f32.mrb[174].mxu1 }
 0x243   :  { %2563 = vst.msk [vmem:[%s4918_s3 + $0x88] sm:$0xf] %vm2528_vm4, %v3018_v12  ;;  %v1691_v59 = vmax.f32 %v1602_v13, 0.0  ;;  %v2220_v2 = vmax.f32 %v2131_v1, 0.0  ;;  %v1605_v57 = vadd.f32 %v4525_v9, %v1604_v7  ;;  %v2134_v39 = vadd.f32 %v4525_v9, %v2133_v60  ;;  %v3458_v25 = vpop.f32.mrb[175].mxu0  ;;  %v3568_v3 = vpop.f32.mrb[175].mxu1 }
 0x244   :  { %v3019_v48 = vpack.c.bf16 %v2317_v6, %v2317_v6  ;;  %v4828_v9 = vld [vmem:[%s4917_s2] ss:$0 sm:$0xff] }
 0x245   :  { %v2269_v34 = vmax.f32 %v1691_v59, %v2220_v2  ;;  %v1692_v54 = vmax.f32 %v1605_v57, 0.0  ;;  %v2221_v31 = vmax.f32 %v2134_v39, 0.0 }
 0x246   :  { %2564 = vst.msk [vmem:[%s4918_s3 + $0x8c] sm:$0xf] %vm2528_vm4, %v3019_v48 }
 0x247   :  { %v2318_v5 = vmax.f32 %v4464_v47, %v2269_v34  ;;  %v2270_v46 = vmax.f32 %v1692_v54, %v2221_v31 }
 0x248   :  { %v1609_v43 = vpop.f32.mrb[176].mxu0  ;;  %v2138_v19 = vpop.f32.mrb[176].mxu1 }
 0x249   :  { %v3020_v16 = vpack.c.bf16 %v2318_v5, %v2318_v5  ;;  %v2319_v36 = vmax.f32 %v4472_v53, %v2270_v46  ;;  %v1610_v49 = vadd.f32 %v4828_v9, %v1609_v43  ;;  %v2139_v33 = vadd.f32 %v4828_v9, %v2138_v19  ;;  %v3461_v56 = vpop.f32.mrb[177].mxu0  ;;  %v3571_v32 = vpop.f32.mrb[177].mxu1 }
 0x24a   :  { %v1612_v0 = vpop.f32.mrb[178].mxu0  ;;  %v2141_v50 = vpop.f32.mrb[178].mxu1 }
 0x24b   :  { %2565 = vst.msk [vmem:[%s4918_s3 + $0x90] sm:$0xf] %vm2528_vm4, %v3020_v16  ;;  %v3021_v47 = vpack.c.bf16 %v2319_v36, %v2319_v36  ;;  %v1693_v53 = vmax.f32 %v1610_v49, 0.0  ;;  %v2222_v51 = vmax.f32 %v2139_v33, 0.0  ;;  %v1613_v58 = vadd.f32 %v4828_v9, %v1612_v0  ;;  %v3462_v52 = vpop.f32.mrb[179].mxu0  ;;  %v3572_v24 = vpop.f32.mrb[179].mxu1 }
 0x24c   :  { %v2142_v38 = vadd.f32 %v4828_v9, %v2141_v50 }
 0x24d   :  { %2566 = vst.msk [vmem:[%s4918_s3 + $0x94] sm:$0xf] %vm2528_vm4, %v3021_v47  ;;  %v2271_v18 = vmax.f32 %v1693_v53, %v2222_v51  ;;  %v1694_v40 = vmax.f32 %v1613_v58, 0.0  ;;  %v4924_v51 = vld [vmem:[#allocation2_spill] sm:$0xff] }
 0x24e   :  { %v2223_v42 = vmax.f32 %v2142_v38, 0.0 }
 0x24f   :  { %v2320_v44 = vmax.f32 %v4484_v30, %v2271_v18 }
 0x250   :  { %v2272_v35 = vmax.f32 %v1694_v40, %v2223_v42  ;;  %v1617_v61 = vpop.f32.mrb[180].mxu0  ;;  %v2146_v22 = vpop.f32.mrb[180].mxu1 }
 0x251   :  { %v3022_v27 = vpack.c.bf16 %v2320_v44, %v2320_v44  ;;  %v1618_v20 = vadd.f32 %v4828_v9, %v1617_v61  ;;  %v2147_v45 = vadd.f32 %v4828_v9, %v2146_v22  ;;  %v3465_v15 = vpop.f32.mrb[181].mxu0  ;;  %v3575_v26 = vpop.f32.mrb[181].mxu1 }
 0x252   :  { %v2321_v10 = vmax.f32 %v4492_v37, %v2272_v35  ;;  %v1620_v21 = vpop.f32.mrb[182].mxu0  ;;  %v2149_v28 = vpop.f32.mrb[182].mxu1 }
 0x253   :  { %2567 = vst.msk [vmem:[%s4918_s3 + $0x98] sm:$0xf] %vm2528_vm4, %v3022_v27  ;;  %v1695_v30 = vmax.f32 %v1618_v20, 0.0  ;;  %v2224_v8 = vmax.f32 %v2147_v45, 0.0  ;;  %v1621_v62 = vadd.f32 %v4828_v9, %v1620_v21  ;;  %v2150_v11 = vadd.f32 %v4828_v9, %v2149_v28  ;;  %v3466_v4 = vpop.f32.mrb[183].mxu0  ;;  %v3576_v63 = vpop.f32.mrb[183].mxu1 }
 0x254   :  { %v3023_v12 = vpack.c.bf16 %v2321_v10, %v2321_v10  ;;  %v4925_v20 = vld [vmem:[#allocation3_spill] sm:$0xff]  ;;  %v4926_v28 = vld [vmem:[#allocation4_spill] sm:$0xff] }
 0x255   :  { %v2273_v13 = vmax.f32 %v1695_v30, %v2224_v8  ;;  %v1696_v1 = vmax.f32 %v1621_v62, 0.0  ;;  %v2225_v55 = vmax.f32 %v2150_v11, 0.0 }
 0x256   :  { %2568 = vst.msk [vmem:[%s4918_s3 + $0x9c] sm:$0xf] %vm2528_vm4, %v3023_v12 }
 0x257   :  { %v2322_v37 = vmax.f32 %v4504_v23, %v2273_v13  ;;  %v2274_v41 = vmax.f32 %v1696_v1, %v2225_v55 }
 0x258   :  { %v1625_v6 = vpop.f32.mrb[184].mxu0  ;;  %v2154_v7 = vpop.f32.mrb[184].mxu1 }
 0x259   :  { %v3024_v60 = vpack.c.bf16 %v2322_v37, %v2322_v37  ;;  %v2323_v59 = vmax.f32 %v4512_v29, %v2274_v41  ;;  %v1626_v2 = vadd.f32 %v4828_v9, %v1625_v6  ;;  %v2155_v57 = vadd.f32 %v4828_v9, %v2154_v7  ;;  %v3469_v39 = vpop.f32.mrb[185].mxu0  ;;  %v3579_v25 = vpop.f32.mrb[185].mxu1 }
 0x25a   :  { %v1628_v3 = vpop.f32.mrb[186].mxu0  ;;  %v2157_v48 = vpop.f32.mrb[186].mxu1 }
 0x25b   :  { %2569 = vst.msk [vmem:[%s4918_s3 + $0xa0] sm:$0xf] %vm2528_vm4, %v3024_v60  ;;  %v3025_v23 = vpack.c.bf16 %v2323_v59, %v2323_v59  ;;  %v1697_v34 = vmax.f32 %v1626_v2, 0.0  ;;  %v2226_v54 = vmax.f32 %v2155_v57, 0.0  ;;  %v1629_v31 = vadd.f32 %v4828_v9, %v1628_v3  ;;  %v3470_v5 = vpop.f32.mrb[187].mxu0  ;;  %v3580_v29 = vpop.f32.mrb[187].mxu1 }
 0x25c   :  { %v2158_v46 = vadd.f32 %v4828_v9, %v2157_v48  ;;  %v4927_v5 = vld [vmem:[#allocation5_spill] sm:$0xff] }
 0x25d   :  { %2570 = vst.msk [vmem:[%s4918_s3 + $0xa4] sm:$0xf] %vm2528_vm4, %v3025_v23  ;;  %v2275_v43 = vmax.f32 %v1697_v34, %v2226_v54  ;;  %v1698_v19 = vmax.f32 %v1629_v31, 0.0 }
 0x25e   :  { %v2227_v16 = vmax.f32 %v2158_v46, 0.0 }
 0x25f   :  { %v2324_v36 = vmax.f32 %v4529_v17, %v2275_v43 }
 0x260   :  { %v2276_v49 = vmax.f32 %v1698_v19, %v2227_v16  ;;  %v1633_v33 = vpop.f32.mrb[188].mxu0  ;;  %v2162_v56 = vpop.f32.mrb[188].mxu1 }
 0x261   :  { %v3026_v32 = vpack.c.bf16 %v2324_v36, %v2324_v36  ;;  %v1634_v0 = vadd.f32 %v4828_v9, %v1633_v33  ;;  %v2163_v50 = vadd.f32 %v4828_v9, %v2162_v56  ;;  %v3473_v47 = vpop.f32.mrb[189].mxu0  ;;  %v3583_v53 = vpop.f32.mrb[189].mxu1 }
 0x262   :  { %v2325_v58 = vmax.f32 %v4924_v51, %v2276_v49  ;;  %v1636_v52 = vpop.f32.mrb[190].mxu0  ;;  %v2165_v24 = vpop.f32.mrb[190].mxu1 }
 0x263   :  { %2571 = vst.msk [vmem:[%s4918_s3 + $0xa8] sm:$0xf] %vm2528_vm4, %v3026_v32  ;;  %v1699_v17 = vmax.f32 %v1634_v0, 0.0  ;;  %v2228_v38 = vmax.f32 %v2163_v50, 0.0  ;;  %v1637_v18 = vadd.f32 %v4828_v9, %v1636_v52  ;;  %v2166_v40 = vadd.f32 %v4828_v9, %v2165_v24  ;;  %v3474_v42 = vpop.f32.mrb[191].mxu0  ;;  %v3584_v44 = vpop.f32.mrb[191].mxu1 }
 0x264   :  { %v3027_v35 = vpack.c.bf16 %v2325_v58, %v2325_v58 }
 0x265   :  { %v2277_v61 = vmax.f32 %v1699_v17, %v2228_v38  ;;  %v1700_v22 = vmax.f32 %v1637_v18, 0.0  ;;  %v2229_v27 = vmax.f32 %v2166_v40, 0.0 }
 0x266   :  { %2572 = vst.msk [vmem:[%s4918_s3 + $0xac] sm:$0xf] %vm2528_vm4, %v3027_v35 }
 0x267   :  { %v2326_v45 = vmax.f32 %v4925_v20, %v2277_v61  ;;  %v2278_v15 = vmax.f32 %v1700_v22, %v2229_v27 }
 0x268   :  { %v1641_v26 = vpop.f32.mrb[192].mxu0  ;;  %v2170_v10 = vpop.f32.mrb[192].mxu1 }
 0x269   :  { %v3028_v21 = vpack.c.bf16 %v2326_v45, %v2326_v45  ;;  %v2327_v30 = vmax.f32 %v4926_v28, %v2278_v15  ;;  %v1642_v8 = vadd.f32 %v4828_v9, %v1641_v26  ;;  %v2171_v62 = vadd.f32 %v4828_v9, %v2170_v10  ;;  %v3477_v11 = vpop.f32.mrb[193].mxu0  ;;  %v3587_v4 = vpop.f32.mrb[193].mxu1 }
 0x26a   :  { %v1644_v63 = vpop.f32.mrb[194].mxu0  ;;  %v2173_v12 = vpop.f32.mrb[194].mxu1 }
 0x26b   :  { %2573 = vst.msk [vmem:[%s4918_s3 + $0xb0] sm:$0xf] %vm2528_vm4, %v3028_v21  ;;  %v3029_v13 = vpack.c.bf16 %v2327_v30, %v2327_v30  ;;  %v1701_v1 = vmax.f32 %v1642_v8, 0.0  ;;  %v2230_v55 = vmax.f32 %v2171_v62, 0.0  ;;  %v1645_v37 = vadd.f32 %v4828_v9, %v1644_v63  ;;  %v3478_v41 = vpop.f32.mrb[195].mxu0  ;;  %v3588_v6 = vpop.f32.mrb[195].mxu1 }
 0x26c   :  { %v2174_v7 = vadd.f32 %v4828_v9, %v2173_v12 }
 0x26d   :  { %2574 = vst.msk [vmem:[%s4918_s3 + $0xb4] sm:$0xf] %vm2528_vm4, %v3029_v13  ;;  %v2279_v60 = vmax.f32 %v1701_v1, %v2230_v55  ;;  %v1702_v59 = vmax.f32 %v1645_v37, 0.0 }
 0x26e   :  { %v2231_v2 = vmax.f32 %v2174_v7, 0.0 }
 0x26f   :  { %v2328_v57 = vmax.f32 %v4559_v14, %v2279_v60 }
 0x270   :  { %v2280_v39 = vmax.f32 %v1702_v59, %v2231_v2  ;;  %v1649_v25 = vpop.f32.mrb[196].mxu0  ;;  %v2178_v3 = vpop.f32.mrb[196].mxu1 }
 0x271   :  { %v3030_v48 = vpack.c.bf16 %v2328_v57, %v2328_v57  ;;  %v1650_v23 = vadd.f32 %v4828_v9, %v1649_v25  ;;  %v2179_v34 = vadd.f32 %v4828_v9, %v2178_v3  ;;  %v3481_v54 = vpop.f32.mrb[197].mxu0  ;;  %v3591_v31 = vpop.f32.mrb[197].mxu1  ;;  %v4928_v9 = vld [vmem:[#allocation6_spill] sm:$0xff] }
 0x272   :  { %v2329_v29 = vmax.f32 %v4927_v5, %v2280_v39  ;;  %v1652_v46 = vpop.f32.mrb[198].mxu0  ;;  %v2181_v43 = vpop.f32.mrb[198].mxu1 }
 0x273   :  { %2575 = vst.msk [vmem:[%s4918_s3 + $0xb8] sm:$0xf] %vm2528_vm4, %v3030_v48  ;;  %v1703_v14 = vmax.f32 %v1650_v23, 0.0  ;;  %v2232_v19 = vmax.f32 %v2179_v34, 0.0  ;;  %v3482_v16 = vpop.f32.mrb[199].mxu0  ;;  %v3592_v36 = vpop.f32.mrb[199].mxu1 }
 0x274   :  { %v3031_v49 = vpack.c.bf16 %v2329_v29, %v2329_v29 }
 0x275   :  { %v2281_v33 = vmax.f32 %v1703_v14, %v2232_v19 }
 0x276   :  { %2576 = vst.msk [vmem:[%s4918_s3 + $0xbc] sm:$0xf] %vm2528_vm4, %v3031_v49 }
 0x277   :  { %v2330_v56 = vmax.f32 %v4928_v9, %v2281_v33 }
 0x279   :  { %v3032_v32 = vpack.c.bf16 %v2330_v56, %v2330_v56 }
 0x27b   :  { %2577 = vst.msk [vmem:[%s4918_s3 + $0xc0] sm:$0xf] %vm2528_vm4, %v3032_v32 }

// kernel: convnet_forward.3
= control target key start
LH: loop header
LB: loop body
LE: loop exit
PB: predicated region body
PF: predicated region fallthrough
CT: control target
= control target key end

     0   :  { %v9603_v1 = vmov 0   ;;  %v73_v4 = vlaneseq  ;;  %v9604_v7 = vmov 1966171168   ;;  %vm142_vm0 = vcmask 179200   ;;  %s13056_s0 = inlined_call_operand.vmem [shape: bf16[25,4,2,150], index: 0, kind: input, shape index: {}]   ;;  %s13057_s1 = inlined_call_operand.vmem [shape: bf16[150,16], index: 1, kind: input, shape index: {}]   ;;  %s13058_s2 = inlined_call_operand.vmem [shape: f32[1,16], index: 2, kind: input, shape index: {}]   ;;  %s13059_s3 = inlined_call_operand.vmem [shape: bf16[25,16,120], index: 3, kind: input, shape index: {}]   ;;  %s13060_s4 = inlined_call_operand.vmem [shape: f32[1,120], index: 4, kind: input, shape index: {}]   ;;  %s13061_s5 = inlined_call_operand.vmem [shape: bf16[120,84], index: 5, kind: input, shape index: {}]   ;;  %s13062_s6 = inlined_call_operand.vmem [shape: f32[1,84], index: 6, kind: input, shape index: {}]   ;;  %s13063_s7 = inlined_call_operand.vmem [shape: bf16[84,10], index: 7, kind: input, shape index: {}]   ;;  %s13064_s8 = inlined_call_operand.vmem [shape: f32[1,10], index: 8, kind: input, shape index: {}]   ;;  %s13065_s9 = inlined_call_operand.hbm [shape: f32[2,10], index: 9, kind: output, shape index: {}]  }
   0x1   :  { %v9661_v0 = vld [vmem:[%s13057_s1] sm:$0xff]   ;;  %150 = vmatprep.subr.bf16.mxu0 %v9603_v1  ;;  %220 = vmatprep.subr.bf16.mxu1 %v9603_v1  ;;  %v9670_v2 = vld [vmem:[%s13057_s1 + $0x8] sm:$0xff]   ;;  %v9679_v3 = vld [vmem:[%s13057_s1 + $0x10] sm:$0xff]   ;;  %v71_v8 = vunpack.c.l.s4 %v9604_v7  ;;  %vm146_vm1 = vcmask 1042432  }
   0x2   :  { %151 = vmatpush1.bf16.msra.mxu0 %v9661_v0  ;;  %221 = vmatpush1.bf16.msra.mxu1 %v9661_v0  ;;  %v9686_v5 = vld [vmem:[%s13057_s1 + $0x18] sm:$0xff]   ;;  %v8787_v6 = vld.sshfl [vmem:[%s13056_s0] sm:$0x11 pattern:$0x75316420]  ;;  %v74_v9 = vshrl.u32 %v73_v4, 7 }
   0x3   :  { %152 = vmatprep.subr.bf16.mxu0 %v9603_v1  ;;  %222 = vmatprep.subr.bf16.mxu1 %v9603_v1  ;;  %v8800_v10 = vld.sshfl [vmem:[%s13056_s0 + $0x2] sm:$0x11 pattern:$0x75316420]  ;;  %v69_v11 = vcombine.high %v8787_v6, %v8787_v6  ;;  %v72_v12 = vunpack.c.0.s8 %v71_v8  ;;  %v9712_v16 = vld [vmem:[%s13057_s1 + $0x28] sm:$0xff]   ;;  %v9723_v19 = vld [vmem:[%s13057_s1 + $0x30] sm:$0xff]  }
   0x4   :  { %v201_v13 = vcombine.high %v8800_v10, %v8800_v10  ;;  %v9703_v14 = vld [vmem:[%s13057_s1 + $0x20] sm:$0xff]   ;;  %v9734_v20 = vld [vmem:[%s13057_s1 + $0x38] sm:$0xff]   ;;  %v9479_v22 = vld [vmem:[%s13057_s1 + $0x48] ss:$0 sps:$4 sm:$0x77]  }
   0x5   :  { %v9707_v15 = vsub.s32 %v72_v12, %v74_v9  ;;  %v9743_v21 = vld [vmem:[%s13057_s1 + $0x40] sm:$0xff]   ;;  %v9762_v25 = vsel %vm146_vm1, %v9479_v22, 0 }
   0x6   :  { %153 = vmatpush1.bf16.msra.mxu0 %v9670_v2  ;;  %223 = vmatpush1.bf16.msra.mxu1 %v9670_v2  ;;  %v9755_v23 = vld.sshfl [vmem:[%s13056_s0 + $0x4] sm:$0x11 pattern:$0x75316420] }
   0x7   :  { %154 = vmatprep.subr.bf16.mxu0 %v9603_v1  ;;  %224 = vmatprep.subr.bf16.mxu1 %v9603_v1  ;;  %v83_v17 = vrot.slane %v69_v11, %v9707_v15  ;;  %v215_v18 = vrot.slane %v201_v13, %v9707_v15  ;;  %v9760_v24 = vld.sshfl [vmem:[%s13056_s0 + $0x6] sm:$0x11 pattern:$0x75316420]  ;;  %v272_v26 = vcombine.high %v9755_v23, %v9755_v23 }
   0x8   :  { %v342_v27 = vcombine.high %v9760_v24, %v9760_v24  ;;  %v76_v28 = vrot.slane %v8787_v6, %v9707_v15  ;;  %v208_v29 = vrot.slane %v8800_v10, %v9707_v15 }
   0x9   :  { %8798 = vmatprep.mubr.msk.bf16.mxu0 %vm142_vm0, %v83_v17  ;;  %8801 = vmatprep.mubr.msk.bf16.mxu1 %vm142_vm0, %v215_v18  ;;  %v286_v30 = vrot.slane %v272_v26, %v9707_v15 }
   0xa   :  { %155 = vmatpush1.bf16.msra.mxu0 %v9679_v3  ;;  %225 = vmatpush1.bf16.msra.mxu1 %v9679_v3  ;;  %v356_v31 = vrot.slane %v342_v27, %v9707_v15 }
   0xb   :  { %156 = vmatprep.subr.bf16.mxu0 %v9603_v1  ;;  %226 = vmatprep.subr.bf16.mxu1 %v9603_v1 }
   0xe   :  { %157 = vmatpush1.bf16.msra.mxu0 %v9686_v5  ;;  %227 = vmatpush1.bf16.msra.mxu1 %v9686_v5 }
   0xf   :  { %158 = vmatprep.subr.bf16.mxu0 %v9603_v1  ;;  %228 = vmatprep.subr.bf16.mxu1 %v9603_v1 }
  0x12   :  { %159 = vmatpush1.bf16.msra.mxu0 %v9703_v14  ;;  %229 = vmatpush1.bf16.msra.mxu1 %v9703_v14 }
  0x13   :  { %160 = vmatprep.subr.bf16.mxu0 %v9603_v1  ;;  %230 = vmatprep.subr.bf16.mxu1 %v9603_v1 }
  0x16   :  { %161 = vmatpush1.bf16.msra.mxu0 %v9712_v16  ;;  %231 = vmatpush1.bf16.msra.mxu1 %v9712_v16 }
  0x17   :  { %162 = vmatprep.subr.bf16.mxu0 %v9603_v1  ;;  %232 = vmatprep.subr.bf16.mxu1 %v9603_v1 }
  0x1a   :  { %163 = vmatpush1.bf16.msra.mxu0 %v9723_v19  ;;  %233 = vmatpush1.bf16.msra.mxu1 %v9723_v19 }
  0x1b   :  { %164 = vmatprep.subr.bf16.mxu0 %v9603_v1  ;;  %234 = vmatprep.subr.bf16.mxu1 %v9603_v1 }
  0x1e   :  { %165 = vmatpush1.bf16.msra.mxu0 %v9734_v20  ;;  %235 = vmatpush1.bf16.msra.mxu1 %v9734_v20 }
  0x1f   :  { %166 = vmatprep.subr.bf16.mxu0 %v9603_v1  ;;  %236 = vmatprep.subr.bf16.mxu1 %v9603_v1 }
  0x22   :  { %167 = vmatpush1.bf16.msra.mxu0 %v9743_v21  ;;  %237 = vmatpush1.bf16.msra.mxu1 %v9743_v21 }
  0x23   :  { %168 = vmatprep.subr.bf16.mxu0 %v9603_v1  ;;  %238 = vmatprep.subr.bf16.mxu1 %v9603_v1 }
  0x26   :  { %169 = vmatpush1.bf16.msra.mxu0 %v9762_v25  ;;  %239 = vmatpush1.bf16.msra.mxu1 %v9762_v25 }
  0x27   :  { %291 = vmatprep.subr.bf16.mxu0 %v9603_v1  ;;  %361 = vmatprep.subr.bf16.mxu1 %v9603_v1 }
  0x29   :  { %183 = vmatmul.mubr.bf16.vlgmr.msra.gmra.mrb[0].mxu0 %v76_v28  ;;  %253 = vmatmul.mubr.bf16.vlgmr.msra.gmra.mrb[0].mxu1 %v208_v29 }
  0x2a   :  { %14 = vsyncpa [#allocation3], 0  ;;  %292 = vmatpush1.bf16.msra.mxu0 %v9661_v0  ;;  %362 = vmatpush1.bf16.msra.mxu1 %v9661_v0  ;;  %v9817_v32 = vld.sshfl [vmem:[%s13056_s0 + $0x8] sm:$0x11 pattern:$0x75316420]  ;;  %v279_v36 = vrot.slane %v9755_v23, %v9707_v15  ;;  %v349_v37 = vrot.slane %v9760_v24, %v9707_v15 }
  0x2b   :  { %293 = vmatprep.subr.bf16.mxu0 %v9603_v1  ;;  %363 = vmatprep.subr.bf16.mxu1 %v9603_v1  ;;  %v9822_v33 = vld.sshfl [vmem:[%s13056_s0 + $0xa] sm:$0x11 pattern:$0x75316420]  ;;  %v417_v34 = vcombine.high %v9817_v32, %v9817_v32  ;;  %v424_v44 = vrot.slane %v9817_v32, %v9707_v15  ;;  %v9480_v50 = vld [vmem:[%s13059_s3] sm:$0xff]   ;;  %v9605_v51 = vmov 0.0  }
  0x2c   :  { %8804 = vmatprep.mubr.msk.bf16.mxu0 %vm142_vm0, %v286_v30  ;;  %8807 = vmatprep.mubr.msk.bf16.mxu1 %vm142_vm0, %v356_v31  ;;  %v487_v35 = vcombine.high %v9822_v33, %v9822_v33  ;;  %v8815_v40 = vld.sshfl [vmem:[%s13056_s0 + $0xc] sm:$0x11 pattern:$0x75316420]  ;;  %v494_v45 = vrot.slane %v9822_v33, %v9707_v15  ;;  %vm9606_vm2 = vmmov 0   ;;  %vm700_vm3 = vcmask 130048  }
  0x2d   :  { %v431_v38 = vrot.slane %v417_v34, %v9707_v15  ;;  %v8818_v41 = vld.sshfl [vmem:[%s13056_s0 + $0xe] sm:$0x11 pattern:$0x75316420]  ;;  %v558_v42 = vcombine.high %v8815_v40, %v8815_v40  ;;  %v565_v48 = vrot.slane %v8815_v40, %v9707_v15  ;;  %v9954_v53 = vld [vmem:[%s13058_s2] ss:$0 sm:$0xff] }
  0x2e   :  { %294 = vmatpush1.bf16.msra.mxu0 %v9670_v2  ;;  %364 = vmatpush1.bf16.msra.mxu1 %v9670_v2  ;;  %v501_v39 = vrot.slane %v487_v35, %v9707_v15  ;;  %v628_v43 = vcombine.high %v8818_v41, %v8818_v41  ;;  %v635_v49 = vrot.slane %v8818_v41, %v9707_v15  ;;  %v9481_v52 = vld [vmem:[%s13059_s3 + $0x8] sm:$0xff]   ;;  %v8830_v17 = vld.sshfl [vmem:[%s13056_s0 + $0x12] sm:$0x11 pattern:$0x75316420]  ;;  %vm8625_vm4 = vcmask 1043456  }
  0x2f   :  { %295 = vmatprep.subr.bf16.mxu0 %v9603_v1  ;;  %365 = vmatprep.subr.bf16.mxu1 %v9603_v1  ;;  %v572_v46 = vrot.slane %v558_v42, %v9707_v15  ;;  %v873_v28 = vcombine.high %v8830_v17, %v8830_v17  ;;  %vm8621_vm5 = vcmask 982016   ;;  %vm8726_vm6 = vcmask 1041408  }
  0x30   :  { %v642_v47 = vrot.slane %v628_v43, %v9707_v15  ;;  %vm8722_vm7 = vcmask 687104   ;;  %vm8770_vm8 = vcmask 74752  }
  0x31   :  { %v887_v31 = vrot.slane %v873_v28, %v9707_v15 }
  0x32   :  { %296 = vmatpush1.bf16.msra.mxu0 %v9679_v3  ;;  %366 = vmatpush1.bf16.msra.mxu1 %v9679_v3 }
  0x33   :  { %297 = vmatprep.subr.bf16.mxu0 %v9603_v1  ;;  %367 = vmatprep.subr.bf16.mxu1 %v9603_v1 }
  0x36   :  { %298 = vmatpush1.bf16.msra.mxu0 %v9686_v5  ;;  %368 = vmatpush1.bf16.msra.mxu1 %v9686_v5 }
  0x37   :  { %299 = vmatprep.subr.bf16.mxu0 %v9603_v1  ;;  %369 = vmatprep.subr.bf16.mxu1 %v9603_v1 }
  0x3a   :  { %300 = vmatpush1.bf16.msra.mxu0 %v9703_v14  ;;  %370 = vmatpush1.bf16.msra.mxu1 %v9703_v14 }
  0x3b   :  { %301 = vmatprep.subr.bf16.mxu0 %v9603_v1  ;;  %371 = vmatprep.subr.bf16.mxu1 %v9603_v1 }
  0x3e   :  { %302 = vmatpush1.bf16.msra.mxu0 %v9712_v16  ;;  %372 = vmatpush1.bf16.msra.mxu1 %v9712_v16 }
  0x3f   :  { %303 = vmatprep.subr.bf16.mxu0 %v9603_v1  ;;  %373 = vmatprep.subr.bf16.mxu1 %v9603_v1 }
  0x42   :  { %304 = vmatpush1.bf16.msra.mxu0 %v9723_v19  ;;  %374 = vmatpush1.bf16.msra.mxu1 %v9723_v19 }
  0x43   :  { %305 = vmatprep.subr.bf16.mxu0 %v9603_v1  ;;  %375 = vmatprep.subr.bf16.mxu1 %v9603_v1 }
  0x46   :  { %306 = vmatpush1.bf16.msra.mxu0 %v9734_v20  ;;  %376 = vmatpush1.bf16.msra.mxu1 %v9734_v20 }
  0x47   :  { %307 = vmatprep.subr.bf16.mxu0 %v9603_v1  ;;  %377 = vmatprep.subr.bf16.mxu1 %v9603_v1 }
  0x4a   :  { %308 = vmatpush1.bf16.msra.mxu0 %v9743_v21  ;;  %378 = vmatpush1.bf16.msra.mxu1 %v9743_v21 }
  0x4b   :  { %309 = vmatprep.subr.bf16.mxu0 %v9603_v1  ;;  %379 = vmatprep.subr.bf16.mxu1 %v9603_v1 }
  0x4e   :  { %310 = vmatpush1.bf16.msra.mxu0 %v9762_v25  ;;  %380 = vmatpush1.bf16.msra.mxu1 %v9762_v25 }
  0x4f   :  { %436 = vmatprep.subr.bf16.mxu0 %v9603_v1  ;;  %506 = vmatprep.subr.bf16.mxu1 %v9603_v1 }
  0x51   :  { %324 = vmatmul.mubr.bf16.vlgmr.msra.gmra.mrb[4].mxu0 %v279_v36  ;;  %394 = vmatmul.mubr.bf16.vlgmr.msra.gmra.mrb[4].mxu1 %v349_v37 }
  0x52   :  { %437 = vmatpush1.bf16.msra.mxu0 %v9661_v0  ;;  %507 = vmatpush1.bf16.msra.mxu1 %v9661_v0 }
  0x53   :  { %438 = vmatprep.subr.bf16.mxu0 %v9603_v1  ;;  %508 = vmatprep.subr.bf16.mxu1 %v9603_v1 }
  0x54   :  { %8810 = vmatprep.mubr.msk.bf16.mxu0 %vm142_vm0, %v431_v38  ;;  %8813 = vmatprep.mubr.msk.bf16.mxu1 %vm142_vm0, %v501_v39  ;;  %v8836_v39 = vld.sshfl [vmem:[%s13056_s0 + $0x16] sm:$0x11 pattern:$0x75316420] }
  0x56   :  { %439 = vmatpush1.bf16.msra.mxu0 %v9670_v2  ;;  %509 = vmatpush1.bf16.msra.mxu1 %v9670_v2 }
  0x57   :  { %440 = vmatprep.subr.bf16.mxu0 %v9603_v1  ;;  %510 = vmatprep.subr.bf16.mxu1 %v9603_v1 }
  0x5a   :  { %441 = vmatpush1.bf16.msra.mxu0 %v9679_v3  ;;  %511 = vmatpush1.bf16.msra.mxu1 %v9679_v3 }
  0x5b   :  { %442 = vmatprep.subr.bf16.mxu0 %v9603_v1  ;;  %512 = vmatprep.subr.bf16.mxu1 %v9603_v1 }
  0x5e   :  { %443 = vmatpush1.bf16.msra.mxu0 %v9686_v5  ;;  %513 = vmatpush1.bf16.msra.mxu1 %v9686_v5 }
  0x5f   :  { %444 = vmatprep.subr.bf16.mxu0 %v9603_v1  ;;  %514 = vmatprep.subr.bf16.mxu1 %v9603_v1 }
  0x62   :  { %445 = vmatpush1.bf16.msra.mxu0 %v9703_v14  ;;  %515 = vmatpush1.bf16.msra.mxu1 %v9703_v14 }
  0x63   :  { %446 = vmatprep.subr.bf16.mxu0 %v9603_v1  ;;  %516 = vmatprep.subr.bf16.mxu1 %v9603_v1 }
  0x66   :  { %447 = vmatpush1.bf16.msra.mxu0 %v9712_v16  ;;  %517 = vmatpush1.bf16.msra.mxu1 %v9712_v16 }
  0x67   :  { %448 = vmatprep.subr.bf16.mxu0 %v9603_v1  ;;  %518 = vmatprep.subr.bf16.mxu1 %v9603_v1 }
  0x6a   :  { %449 = vmatpush1.bf16.msra.mxu0 %v9723_v19  ;;  %519 = vmatpush1.bf16.msra.mxu1 %v9723_v19 }
  0x6b   :  { %450 = vmatprep.subr.bf16.mxu0 %v9603_v1  ;;  %520 = vmatprep.subr.bf16.mxu1 %v9603_v1 }
  0x6e   :  { %451 = vmatpush1.bf16.msra.mxu0 %v9734_v20  ;;  %521 = vmatpush1.bf16.msra.mxu1 %v9734_v20 }
  0x6f   :  { %452 = vmatprep.subr.bf16.mxu0 %v9603_v1  ;;  %522 = vmatprep.subr.bf16.mxu1 %v9603_v1 }
  0x72   :  { %453 = vmatpush1.bf16.msra.mxu0 %v9743_v21  ;;  %523 = vmatpush1.bf16.msra.mxu1 %v9743_v21 }
  0x73   :  { %454 = vmatprep.subr.bf16.mxu0 %v9603_v1  ;;  %524 = vmatprep.subr.bf16.mxu1 %v9603_v1 }
  0x76   :  { %455 = vmatpush1.bf16.msra.mxu0 %v9762_v25  ;;  %525 = vmatpush1.bf16.msra.mxu1 %v9762_v25 }
  0x77   :  { %577 = vmatprep.subr.bf16.mxu0 %v9603_v1  ;;  %647 = vmatprep.subr.bf16.mxu1 %v9603_v1 }
  0x79   :  { %469 = vmatmul.mubr.bf16.vlgmr.msra.gmra.mrb[8].mxu0 %v424_v44  ;;  %539 = vmatmul.mubr.bf16.vlgmr.msra.gmra.mrb[8].mxu1 %v494_v45 }
  0x7a   :  { %578 = vmatpush1.bf16.msra.mxu0 %v9661_v0  ;;  %648 = vmatpush1.bf16.msra.mxu1 %v9661_v0 }
  0x7b   :  { %579 = vmatprep.subr.bf16.mxu0 %v9603_v1  ;;  %649 = vmatprep.subr.bf16.mxu1 %v9603_v1 }
  0x7c   :  { %8816 = vmatprep.mubr.msk.bf16.mxu0 %vm142_vm0, %v572_v46  ;;  %8819 = vmatprep.mubr.msk.bf16.mxu1 %vm142_vm0, %v642_v47  ;;  %v1014_v46 = vcombine.high %v8836_v39, %v8836_v39 }
  0x7e   :  { %580 = vmatpush1.bf16.msra.mxu0 %v9670_v2  ;;  %650 = vmatpush1.bf16.msra.mxu1 %v9670_v2 }
  0x7f   :  { %581 = vmatprep.subr.bf16.mxu0 %v9603_v1  ;;  %651 = vmatprep.subr.bf16.mxu1 %v9603_v1 }
  0x82   :  { %582 = vmatpush1.bf16.msra.mxu0 %v9679_v3  ;;  %652 = vmatpush1.bf16.msra.mxu1 %v9679_v3 }
  0x83   :  { %583 = vmatprep.subr.bf16.mxu0 %v9603_v1  ;;  %653 = vmatprep.subr.bf16.mxu1 %v9603_v1 }
  0x86   :  { %584 = vmatpush1.bf16.msra.mxu0 %v9686_v5  ;;  %654 = vmatpush1.bf16.msra.mxu1 %v9686_v5 }
  0x87   :  { %585 = vmatprep.subr.bf16.mxu0 %v9603_v1  ;;  %655 = vmatprep.subr.bf16.mxu1 %v9603_v1 }
  0x8a   :  { %586 = vmatpush1.bf16.msra.mxu0 %v9703_v14  ;;  %656 = vmatpush1.bf16.msra.mxu1 %v9703_v14 }
  0x8b   :  { %587 = vmatprep.subr.bf16.mxu0 %v9603_v1  ;;  %657 = vmatprep.subr.bf16.mxu1 %v9603_v1 }
  0x8e   :  { %588 = vmatpush1.bf16.msra.mxu0 %v9712_v16  ;;  %658 = vmatpush1.bf16.msra.mxu1 %v9712_v16 }
  0x8f   :  { %589 = vmatprep.subr.bf16.mxu0 %v9603_v1  ;;  %659 = vmatprep.subr.bf16.mxu1 %v9603_v1 }
  0x92   :  { %590 = vmatpush1.bf16.msra.mxu0 %v9723_v19  ;;  %660 = vmatpush1.bf16.msra.mxu1 %v9723_v19 }
  0x93   :  { %591 = vmatprep.subr.bf16.mxu0 %v9603_v1  ;;  %661 = vmatprep.subr.bf16.mxu1 %v9603_v1 }
  0x96   :  { %592 = vmatpush1.bf16.msra.mxu0 %v9734_v20  ;;  %662 = vmatpush1.bf16.msra.mxu1 %v9734_v20 }
  0x97   :  { %593 = vmatprep.subr.bf16.mxu0 %v9603_v1  ;;  %663 = vmatprep.subr.bf16.mxu1 %v9603_v1 }
  0x9a   :  { %594 = vmatpush1.bf16.msra.mxu0 %v9743_v21  ;;  %664 = vmatpush1.bf16.msra.mxu1 %v9743_v21 }
  0x9b   :  { %595 = vmatprep.subr.bf16.mxu0 %v9603_v1  ;;  %665 = vmatprep.subr.bf16.mxu1 %v9603_v1 }
  0x9e   :  { %596 = vmatpush1.bf16.msra.mxu0 %v9762_v25  ;;  %666 = vmatpush1.bf16.msra.mxu1 %v9762_v25 }
  0x9f   :  { %9285 = vmatprep.subr.bf16.mxu1 %v9605_v51  ;;  %9279 = vmatprep.subr.bf16.mxu0 %v9605_v51 }
  0xa1   :  { %610 = vmatmul.mubr.bf16.vlgmr.msra.gmra.mrb[12].mxu0 %v565_v48  ;;  %680 = vmatmul.mubr.bf16.vlgmr.msra.gmra.mrb[12].mxu1 %v635_v49  ;;  %v880_v48 = vrot.slane %v8830_v17, %v9707_v15  ;;  %v1028_v49 = vrot.slane %v1014_v46, %v9707_v15 }
  0xa2   :  { %9286 = vmatpush3.bf16.msra.mxu1 %v9480_v50  ;;  %9287 = vmatprep.mubr.msk.bf16.mxu1 %vm9606_vm2, %v9605_v51 }
  0xa3   :  { %892 = vmatprep.subr.bf16.mxu1 %v9603_v1  ;;  %9281 = vmatprep.mubr.msk.bf16.mxu0 %vm9606_vm2, %v9605_v51 }
  0xa4   :  { %9280 = vmatpush3.bf16.msra.mxu0 %v9481_v52 }
  0xa5   :  { %822 = vmatprep.subr.bf16.mxu0 %v9603_v1 }
  0xfc   :  { %v184_v54 = vpop.f32.mrb[0].mxu0  ;;  %v254_v55 = vpop.f32.mrb[0].mxu1 }
  0xfd   :  { %v185_v56 = vadd.f32 %v9954_v53, %v184_v54  ;;  %v255_v57 = vadd.f32 %v9954_v53, %v254_v55  ;;  %v186_v58 = vpop.f32.mrb[1].mxu0  ;;  %v256_v59 = vpop.f32.mrb[1].mxu1 }
  0xfe   :  { %v187_v60 = vpop.f32.mrb[2].mxu0  ;;  %v257_v61 = vpop.f32.mrb[2].mxu1  ;;  %v10015_v58 = vld.sshfl [vmem:[%s13056_s0 + $0x10] sm:$0x11 pattern:$0x75316420] }
  0xff   :  { %v190_v62 = vmax.f32 %v185_v56, 0.0  ;;  %v260_v63 = vmax.f32 %v255_v57, 0.0  ;;  %v188_v4 = vpop.f32.mrb[3].mxu0  ;;  %v258_v6 = vpop.f32.mrb[3].mxu1  ;;  %v810_v17 = vrot.slane %v10015_v58, %v9707_v15 }
 0x100   :  { %v803_v6 = vcombine.high %v10015_v58, %v10015_v58 }
 0x101   :  { %v261_v7 = vmax.f32 %v190_v62, %v260_v63 }
 0x124   :  { %v325_v8 = vpop.f32.mrb[4].mxu0  ;;  %v395_v9 = vpop.f32.mrb[4].mxu1 }
 0x125   :  { %v326_v10 = vadd.f32 %v9954_v53, %v325_v8  ;;  %v396_v11 = vadd.f32 %v9954_v53, %v395_v9  ;;  %v327_v12 = vpop.f32.mrb[5].mxu0  ;;  %v397_v13 = vpop.f32.mrb[5].mxu1  ;;  %v1021_v9 = vrot.slane %v8836_v39, %v9707_v15 }
 0x126   :  { %v328_v18 = vpop.f32.mrb[6].mxu0  ;;  %v398_v22 = vpop.f32.mrb[6].mxu1  ;;  %v8833_v12 = vld.sshfl [vmem:[%s13056_s0 + $0x14] sm:$0x11 pattern:$0x75316420] }
 0x127   :  { %v331_v23 = vmax.f32 %v326_v10, 0.0  ;;  %v401_v24 = vmax.f32 %v396_v11, 0.0  ;;  %v329_v26 = vpop.f32.mrb[7].mxu0  ;;  %v399_v27 = vpop.f32.mrb[7].mxu1  ;;  %v817_v10 = vrot.slane %v803_v6, %v9707_v15  ;;  %v944_v13 = vcombine.high %v8833_v12, %v8833_v12 }
 0x129   :  { %v402_v29 = vmax.f32 %v331_v23, %v401_v24  ;;  %v958_v18 = vrot.slane %v944_v13, %v9707_v15  ;;  %v9482_v23 = vld [vmem:[%s13059_s3 + $0x10] sm:$0xff]   ;;  %v10186_v13 = vld [vmem:[%s13057_s1 + $0x28] sm:$0xff]  }
 0x12b   :  { %v403_v30 = vmax.f32 %v261_v7, %v402_v29  ;;  %v8843_v29 = vld.sshfl [vmem:[%s13056_s0 + $0x18] sm:$0x11 pattern:$0x75316420] }
 0x12d   :  { %v404_v32 = vpack.c.bf16 %v403_v30, %v403_v30  ;;  %v1140_v30 = vcombine.high %v8843_v29, %v8843_v29 }
 0x12f   :  { %9288 = vmatmul.mubr.msk.bf16.vlgmr.msra.gmra.mrb[16].mxu1 %vm700_vm3, %v404_v32  ;;  %v1147_v32 = vrot.slane %v8843_v29, %v9707_v15 }
 0x130   :  { %893 = vmatpush1.bf16.msra.mxu1 %v9661_v0  ;;  %8831 = vmatprep.mubr.msk.bf16.mxu1 %vm142_vm0, %v887_v31  ;;  %v1154_v31 = vrot.slane %v1140_v30, %v9707_v15 }
 0x131   :  { %894 = vmatprep.subr.bf16.mxu1 %v9603_v1 }
 0x134   :  { %895 = vmatpush1.bf16.msra.mxu1 %v9670_v2 }
 0x135   :  { %896 = vmatprep.subr.bf16.mxu1 %v9603_v1 }
 0x138   :  { %897 = vmatpush1.bf16.msra.mxu1 %v9679_v3 }
 0x139   :  { %898 = vmatprep.subr.bf16.mxu1 %v9603_v1 }
 0x13c   :  { %899 = vmatpush1.bf16.msra.mxu1 %v9686_v5 }
 0x13d   :  { %900 = vmatprep.subr.bf16.mxu1 %v9603_v1 }
 0x140   :  { %901 = vmatpush1.bf16.msra.mxu1 %v9703_v14 }
 0x141   :  { %902 = vmatprep.subr.bf16.mxu1 %v9603_v1 }
 0x144   :  { %903 = vmatpush1.bf16.msra.mxu1 %v9712_v16 }
 0x145   :  { %904 = vmatprep.subr.bf16.mxu1 %v9603_v1 }
 0x148   :  { %905 = vmatpush1.bf16.msra.mxu1 %v9723_v19 }
 0x149   :  { %906 = vmatprep.subr.bf16.mxu1 %v9603_v1 }
 0x14c   :  { %v470_v33 = vpop.f32.mrb[8].mxu0  ;;  %v540_v34 = vpop.f32.mrb[8].mxu1  ;;  %907 = vmatpush1.bf16.msra.mxu1 %v9734_v20 }
 0x14d   :  { %v471_v35 = vadd.f32 %v9954_v53, %v470_v33  ;;  %v541_v36 = vadd.f32 %v9954_v53, %v540_v34  ;;  %v472_v37 = vpop.f32.mrb[9].mxu0  ;;  %v542_v38 = vpop.f32.mrb[9].mxu1  ;;  %908 = vmatprep.subr.bf16.mxu1 %v9603_v1 }
 0x14e   :  { %v473_v40 = vpop.f32.mrb[10].mxu0  ;;  %v543_v41 = vpop.f32.mrb[10].mxu1 }
 0x14f   :  { %v476_v42 = vmax.f32 %v471_v35, 0.0  ;;  %v546_v43 = vmax.f32 %v541_v36, 0.0  ;;  %v474_v44 = vpop.f32.mrb[11].mxu0  ;;  %v544_v45 = vpop.f32.mrb[11].mxu1  ;;  %v10113_v40 = vld [vmem:[%s13057_s1] sm:$0xff]  }
 0x150   :  { %909 = vmatpush1.bf16.msra.mxu1 %v9743_v21  ;;  %v10127_v44 = vld [vmem:[%s13057_s1 + $0x10] sm:$0xff]   ;;  %v10134_v45 = vld [vmem:[%s13057_s1 + $0x18] sm:$0xff]  }
 0x151   :  { %v547_v47 = vmax.f32 %v476_v42, %v546_v43  ;;  %910 = vmatprep.subr.bf16.mxu1 %v9603_v1  ;;  %v10120_v43 = vld [vmem:[%s13057_s1 + $0x8] sm:$0xff]  }
 0x154   :  { %911 = vmatpush1.bf16.msra.mxu1 %v9762_v25 }
 0x155   :  { %1033 = vmatprep.subr.bf16.mxu1 %v9603_v1 }
 0x157   :  { %925 = vmatmul.mubr.bf16.vlgmr.msra.gmra.mrb[20].mxu1 %v880_v48 }
 0x158   :  { %1034 = vmatpush1.bf16.msra.mxu1 %v9661_v0  ;;  %8837 = vmatprep.mubr.msk.bf16.mxu1 %vm142_vm0, %v1028_v49 }
 0x159   :  { %1035 = vmatprep.subr.bf16.mxu1 %v9603_v1 }
 0x15c   :  { %1036 = vmatpush1.bf16.msra.mxu1 %v9670_v2 }
 0x15d   :  { %1037 = vmatprep.subr.bf16.mxu1 %v9603_v1 }
 0x160   :  { %1038 = vmatpush1.bf16.msra.mxu1 %v9679_v3 }
 0x161   :  { %1039 = vmatprep.subr.bf16.mxu1 %v9603_v1 }
 0x164   :  { %1040 = vmatpush1.bf16.msra.mxu1 %v9686_v5 }
 0x165   :  { %1041 = vmatprep.subr.bf16.mxu1 %v9603_v1 }
 0x168   :  { %1042 = vmatpush1.bf16.msra.mxu1 %v9703_v14 }
 0x169   :  { %1043 = vmatprep.subr.bf16.mxu1 %v9603_v1 }
 0x16c   :  { %1044 = vmatpush1.bf16.msra.mxu1 %v9712_v16 }
 0x16d   :  { %1045 = vmatprep.subr.bf16.mxu1 %v9603_v1 }
 0x170   :  { %1046 = vmatpush1.bf16.msra.mxu1 %v9723_v19 }
 0x171   :  { %1047 = vmatprep.subr.bf16.mxu1 %v9603_v1 }
 0x174   :  { %v611_v50 = vpop.f32.mrb[12].mxu0  ;;  %v681_v52 = vpop.f32.mrb[12].mxu1  ;;  %1048 = vmatpush1.bf16.msra.mxu1 %v9734_v20 }
 0x175   :  { %v612_v54 = vadd.f32 %v9954_v53, %v611_v50  ;;  %v682_v55 = vadd.f32 %v9954_v53, %v681_v52  ;;  %v613_v56 = vpop.f32.mrb[13].mxu0  ;;  %v683_v57 = vpop.f32.mrb[13].mxu1  ;;  %1049 = vmatprep.subr.bf16.mxu1 %v9603_v1 }
 0x176   :  { %v614_v59 = vpop.f32.mrb[14].mxu0  ;;  %v684_v60 = vpop.f32.mrb[14].mxu1 }
 0x177   :  { %v617_v61 = vmax.f32 %v612_v54, 0.0  ;;  %v687_v62 = vmax.f32 %v682_v55, 0.0  ;;  %v615_v63 = vpop.f32.mrb[15].mxu0  ;;  %v685_v4 = vpop.f32.mrb[15].mxu1 }
 0x178   :  { %1050 = vmatpush1.bf16.msra.mxu1 %v9743_v21 }
 0x179   :  { %v688_v7 = vmax.f32 %v617_v61, %v687_v62  ;;  %1051 = vmatprep.subr.bf16.mxu1 %v9603_v1  ;;  %v8846_v62 = vld.sshfl [vmem:[%s13056_s0 + $0x1a] sm:$0x11 pattern:$0x75316420] }
 0x17b   :  { %v689_v8 = vmax.f32 %v547_v47, %v688_v7  ;;  %v1210_v7 = vcombine.high %v8846_v62, %v8846_v62 }
 0x17c   :  { %1052 = vmatpush1.bf16.msra.mxu1 %v9762_v25 }
 0x17d   :  { %v690_v11 = vpack.c.bf16 %v689_v8, %v689_v8  ;;  %1159 = vmatprep.subr.bf16.mxu1 %v9603_v1 }
 0x17f   :  { %9282 = vmatmul.mubr.msk.bf16.vlgmr.msra.gmra.mrb[16].mxu0 %vm700_vm3, %v690_v11  ;;  %1066 = vmatmul.mubr.bf16.vlgmr.msra.gmra.mrb[24].mxu1 %v1021_v9 }
 0x180   :  { %823 = vmatpush1.bf16.msra.mxu0 %v9661_v0  ;;  %8828 = vmatprep.mubr.msk.bf16.mxu0 %vm142_vm0, %v817_v10  ;;  %v1224_v10 = vrot.slane %v1210_v7, %v9707_v15 }
 0x181   :  { %824 = vmatprep.subr.bf16.mxu0 %v9603_v1  ;;  %1160 = vmatpush1.bf16.msra.mxu1 %v9661_v0 }
 0x182   :  { %1161 = vmatprep.subr.bf16.mxu1 %v9603_v1  ;;  %8844 = vmatprep.mubr.msk.bf16.mxu1 %vm142_vm0, %v1154_v31 }
 0x184   :  { %825 = vmatpush1.bf16.msra.mxu0 %v9670_v2 }
 0x185   :  { %826 = vmatprep.subr.bf16.mxu0 %v9603_v1  ;;  %1162 = vmatpush1.bf16.msra.mxu1 %v9670_v2 }
 0x186   :  { %1163 = vmatprep.subr.bf16.mxu1 %v9603_v1 }
 0x188   :  { %827 = vmatpush1.bf16.msra.mxu0 %v9679_v3 }
 0x189   :  { %828 = vmatprep.subr.bf16.mxu0 %v9603_v1  ;;  %1164 = vmatpush1.bf16.msra.mxu1 %v9679_v3 }
 0x18a   :  { %1165 = vmatprep.subr.bf16.mxu1 %v9603_v1 }
 0x18c   :  { %829 = vmatpush1.bf16.msra.mxu0 %v9686_v5 }
 0x18d   :  { %830 = vmatprep.subr.bf16.mxu0 %v9603_v1  ;;  %1166 = vmatpush1.bf16.msra.mxu1 %v9686_v5 }
 0x18e   :  { %1167 = vmatprep.subr.bf16.mxu1 %v9603_v1 }
 0x190   :  { %831 = vmatpush1.bf16.msra.mxu0 %v9703_v14 }
 0x191   :  { %832 = vmatprep.subr.bf16.mxu0 %v9603_v1  ;;  %1168 = vmatpush1.bf16.msra.mxu1 %v9703_v14 }
 0x192   :  { %1169 = vmatprep.subr.bf16.mxu1 %v9603_v1 }
 0x194   :  { %833 = vmatpush1.bf16.msra.mxu0 %v9712_v16 }
 0x195   :  { %834 = vmatprep.subr.bf16.mxu0 %v9603_v1  ;;  %1170 = vmatpush1.bf16.msra.mxu1 %v9712_v16 }
 0x196   :  { %1171 = vmatprep.subr.bf16.mxu1 %v9603_v1 }
 0x198   :  { %835 = vmatpush1.bf16.msra.mxu0 %v9723_v19 }
 0x199   :  { %836 = vmatprep.subr.bf16.mxu0 %v9603_v1  ;;  %1172 = vmatpush1.bf16.msra.mxu1 %v9723_v19 }
 0x19a   :  { %1173 = vmatprep.subr.bf16.mxu1 %v9603_v1 }
 0x19c   :  { %837 = vmatpush1.bf16.msra.mxu0 %v9734_v20 }
 0x19d   :  { %838 = vmatprep.subr.bf16.mxu0 %v9603_v1  ;;  %1174 = vmatpush1.bf16.msra.mxu1 %v9734_v20 }
 0x19e   :  { %1175 = vmatprep.subr.bf16.mxu1 %v9603_v1 }
 0x1a0   :  { %839 = vmatpush1.bf16.msra.mxu0 %v9743_v21 }
 0x1a1   :  { %840 = vmatprep.subr.bf16.mxu0 %v9603_v1  ;;  %1176 = vmatpush1.bf16.msra.mxu1 %v9743_v21 }
 0x1a2   :  { %1177 = vmatprep.subr.bf16.mxu1 %v9603_v1 }
 0x1a4   :  { %841 = vmatpush1.bf16.msra.mxu0 %v9762_v25 }
 0x1a5   :  { %963 = vmatprep.subr.bf16.mxu0 %v9603_v1  ;;  %1178 = vmatpush1.bf16.msra.mxu1 %v9762_v25 }
 0x1a6   :  { %1300 = vmatprep.subr.bf16.mxu1 %v9603_v1 }
 0x1a7   :  { %855 = vmatmul.mubr.bf16.vlgmr.msra.gmra.mrb[20].mxu0 %v810_v17  ;;  %v10193_v17 = vld [vmem:[%s13057_s1 + $0x30] sm:$0xff]  }
 0x1a8   :  { %964 = vmatpush1.bf16.msra.mxu0 %v9661_v0  ;;  %8834 = vmatprep.mubr.msk.bf16.mxu0 %vm142_vm0, %v958_v18  ;;  %v951_v0 = vrot.slane %v8833_v12, %v9707_v15  ;;  %v10179_v12 = vld [vmem:[%s13057_s1 + $0x20] sm:$0xff]   ;;  %v10200_v18 = vld [vmem:[%s13057_s1 + $0x38] sm:$0xff]  }
 0x1a9   :  { %965 = vmatprep.subr.bf16.mxu0 %v9603_v1  ;;  %1192 = vmatmul.mubr.bf16.vlgmr.msra.gmra.mrb[28].mxu1 %v1147_v32  ;;  %v9483_v32 = vld [vmem:[%s13059_s3 + $0x18] sm:$0xff]  }
 0x1aa   :  { %1301 = vmatpush1.bf16.msra.mxu1 %v10113_v40 }
 0x1ab   :  { %1302 = vmatprep.subr.bf16.mxu1 %v9603_v1 }
 0x1ac   :  { %966 = vmatpush1.bf16.msra.mxu0 %v9670_v2 }
 0x1ad   :  { %967 = vmatprep.subr.bf16.mxu0 %v9603_v1 }
 0x1ae   :  { %1303 = vmatpush1.bf16.msra.mxu1 %v10120_v43 }
 0x1af   :  { %1304 = vmatprep.subr.bf16.mxu1 %v9603_v1 }
 0x1b0   :  { %968 = vmatpush1.bf16.msra.mxu0 %v9679_v3 }
 0x1b1   :  { %969 = vmatprep.subr.bf16.mxu0 %v9603_v1 }
 0x1b2   :  { %1305 = vmatpush1.bf16.msra.mxu1 %v10127_v44 }
 0x1b3   :  { %1306 = vmatprep.subr.bf16.mxu1 %v9603_v1 }
 0x1b4   :  { %970 = vmatpush1.bf16.msra.mxu0 %v9686_v5 }
 0x1b5   :  { %971 = vmatprep.subr.bf16.mxu0 %v9603_v1 }
 0x1b6   :  { %1307 = vmatpush1.bf16.msra.mxu1 %v10134_v45 }
 0x1b7   :  { %1308 = vmatprep.subr.bf16.mxu1 %v9603_v1 }
 0x1b8   :  { %972 = vmatpush1.bf16.msra.mxu0 %v9703_v14 }
 0x1b9   :  { %973 = vmatprep.subr.bf16.mxu0 %v9603_v1 }
 0x1ba   :  { %1309 = vmatpush1.bf16.msra.mxu1 %v9703_v14  ;;  %v8849_v14 = vld.sshfl [vmem:[%s13056_s0 + $0x1c] sm:$0x11 pattern:$0x75316420] }
 0x1bb   :  { %1310 = vmatprep.subr.bf16.mxu1 %v9603_v1  ;;  %v1281_v46 = vcombine.high %v8849_v14, %v8849_v14 }
 0x1bc   :  { %974 = vmatpush1.bf16.msra.mxu0 %v9712_v16 }
 0x1bd   :  { %975 = vmatprep.subr.bf16.mxu0 %v9603_v1  ;;  %v1295_v47 = vrot.slane %v1281_v46, %v9707_v15 }
 0x1be   :  { %1311 = vmatpush1.bf16.msra.mxu1 %v9712_v16 }
 0x1bf   :  { %1312 = vmatprep.subr.bf16.mxu1 %v9603_v1  ;;  %8850 = vmatprep.mubr.msk.bf16.mxu1 %vm142_vm0, %v1295_v47 }
 0x1c0   :  { %976 = vmatpush1.bf16.msra.mxu0 %v9723_v19 }
 0x1c1   :  { %977 = vmatprep.subr.bf16.mxu0 %v9603_v1 }
 0x1c2   :  { %1313 = vmatpush1.bf16.msra.mxu1 %v9723_v19  ;;  %v1288_v19 = vrot.slane %v8849_v14, %v9707_v15 }
 0x1c3   :  { %1314 = vmatprep.subr.bf16.mxu1 %v9603_v1 }
 0x1c4   :  { %978 = vmatpush1.bf16.msra.mxu0 %v9734_v20 }
 0x1c5   :  { %979 = vmatprep.subr.bf16.mxu0 %v9603_v1 }
 0x1c6   :  { %1315 = vmatpush1.bf16.msra.mxu1 %v9734_v20 }
 0x1c7   :  { %1316 = vmatprep.subr.bf16.mxu1 %v9603_v1 }
 0x1c8   :  { %980 = vmatpush1.bf16.msra.mxu0 %v9743_v21 }
 0x1c9   :  { %981 = vmatprep.subr.bf16.mxu0 %v9603_v1 }
 0x1ca   :  { %1317 = vmatpush1.bf16.msra.mxu1 %v9743_v21 }
 0x1cb   :  { %1318 = vmatprep.subr.bf16.mxu1 %v9603_v1 }
 0x1cc   :  { %982 = vmatpush1.bf16.msra.mxu0 %v9762_v25 }
 0x1cd   :  { %9291 = vmatprep.subr.bf16.mxu0 %v9605_v51 }
 0x1ce   :  { %1319 = vmatpush1.bf16.msra.mxu1 %v9762_v25 }
 0x1cf   :  { %996 = vmatmul.mubr.bf16.vlgmr.msra.gmra.mrb[24].mxu0 %v951_v0  ;;  %9297 = vmatprep.subr.bf16.mxu1 %v9605_v51  ;;  %v8852_v0 = vld.sshfl [vmem:[%s13056_s0 + $0x1e] sm:$0x11 pattern:$0x75316420] }
 0x1d0   :  { %9293 = vmatprep.mubr.msk.bf16.mxu0 %vm9606_vm2, %v9605_v51  ;;  %9292 = vmatpush3.bf16.msra.mxu0 %v9482_v23 }
 0x1d1   :  { %1229 = vmatprep.subr.bf16.mxu0 %v9603_v1  ;;  %1333 = vmatmul.mubr.bf16.vlgmr.msra.gmra.mrb[32].mxu1 %v1288_v19 }
 0x1d2   :  { %9299 = vmatprep.mubr.msk.bf16.mxu1 %vm9606_vm2, %v9605_v51  ;;  %9298 = vmatpush3.bf16.msra.mxu1 %v9483_v32  ;;  %v8875_v32 = vld.sshfl [vmem:[%s13056_s0 + $0x28] sm:$0x11 pattern:$0x75316420] }
 0x1d3   :  { %1566 = vmatprep.subr.bf16.mxu1 %v9603_v1 }
 0x202   :  { %v787_v2 = vpop.f32.mrb[16].mxu1 }
 0x203   :  { %v9289_v3 = vpop.f32.mrb[17].mxu1 }
 0x204   :  { %v790_v5 = vpop.f32.mrb[18].mxu1  ;;  %v1217_v3 = vrot.slane %v8846_v62, %v9707_v15  ;;  %v8862_v62 = vld.sshfl [vmem:[%s13056_s0 + $0x22] sm:$0x11 pattern:$0x75316420] }
 0x205   :  { %v9290_v22 = vpop.f32.mrb[19].mxu1  ;;  %v1547_v7 = vcombine.high %v8862_v62, %v8862_v62 }
 0x206   :  { %v1358_v22 = vrot.slane %v8852_v0, %v9707_v15 }
 0x22a   :  { %v926_v24 = vpop.f32.mrb[20].mxu1 }
 0x22b   :  { %v928_v26 = vpop.f32.mrb[21].mxu1  ;;  %v927_v16 = vadd.f32 %v9954_v53, %v926_v24 }
 0x22c   :  { %v929_v27 = vpop.f32.mrb[22].mxu1 }
 0x22d   :  { %v930_v28 = vpop.f32.mrb[23].mxu1  ;;  %v932_v48 = vmax.f32 %v927_v16, 0.0 }
 0x252   :  { %v738_v33 = vpop.f32.mrb[16].mxu0  ;;  %v1067_v34 = vpop.f32.mrb[24].mxu1 }
 0x253   :  { %v10108_v35 = vadd.f32 %v787_v2, %v738_v33  ;;  %v9283_v36 = vpop.f32.mrb[17].mxu0  ;;  %v1069_v37 = vpop.f32.mrb[25].mxu1  ;;  %v1068_v57 = vadd.f32 %v9954_v53, %v1067_v34  ;;  %v1351_v2 = vcombine.high %v8852_v0, %v8852_v0  ;;  %v8859_v33 = vld.sshfl [vmem:[%s13056_s0 + $0x20] sm:$0x11 pattern:$0x75316420] }
 0x254   :  { %v741_v38 = vpop.f32.mrb[18].mxu0  ;;  %v1070_v39 = vpop.f32.mrb[26].mxu1  ;;  %v1477_v34 = vcombine.high %v8859_v33, %v8859_v33  ;;  %v1484_v37 = vrot.slane %v8859_v33, %v9707_v15  ;;  %v1814_v33 = vcombine.high %v8875_v32, %v8875_v32 }
 0x255   :  { %v9284_v41 = vpop.f32.mrb[19].mxu0  ;;  %v1071_v42 = vpop.f32.mrb[27].mxu1  ;;  %v1073_v59 = vmax.f32 %v1068_v57, 0.0  ;;  %v1365_v5 = vrot.slane %v1351_v2, %v9707_v15  ;;  %v1554_v2 = vrot.slane %v8862_v62, %v9707_v15 }
 0x256   :  { %v1491_v36 = vrot.slane %v1477_v34, %v9707_v15  ;;  %v1828_v34 = vrot.slane %v1814_v33, %v9707_v15  ;;  %v8878_v62 = vld.sshfl [vmem:[%s13056_s0 + $0x2a] sm:$0x11 pattern:$0x75316420] }
 0x27a   :  { %v856_v20 = vpop.f32.mrb[20].mxu0 }
 0x27b   :  { %v857_v49 = vadd.f32 %v9954_v53, %v856_v20  ;;  %v858_v50 = vpop.f32.mrb[21].mxu0 }
 0x27c   :  { %v859_v52 = vpop.f32.mrb[22].mxu0  ;;  %v1193_v23 = vpop.f32.mrb[28].mxu1 }
 0x27d   :  { %v862_v54 = vmax.f32 %v857_v49, 0.0  ;;  %v860_v55 = vpop.f32.mrb[23].mxu0  ;;  %v1195_v24 = vpop.f32.mrb[29].mxu1  ;;  %v1194_v16 = vadd.f32 %v9954_v53, %v1193_v23 }
 0x27e   :  { %v1196_v26 = vpop.f32.mrb[30].mxu1 }
 0x27f   :  { %v933_v56 = vmax.f32 %v862_v54, %v932_v48  ;;  %v1197_v27 = vpop.f32.mrb[31].mxu1  ;;  %v1199_v48 = vmax.f32 %v1194_v16, 0.0 }
 0x2a2   :  { %v997_v58 = vpop.f32.mrb[24].mxu0 }
 0x2a3   :  { %v998_v60 = vadd.f32 %v9954_v53, %v997_v58  ;;  %v999_v61 = vpop.f32.mrb[25].mxu0 }
 0x2a4   :  { %v1000_v63 = vpop.f32.mrb[26].mxu0  ;;  %v1334_v28 = vpop.f32.mrb[32].mxu1 }
 0x2a5   :  { %v1003_v4 = vmax.f32 %v998_v60, 0.0  ;;  %v1001_v6 = vpop.f32.mrb[27].mxu0  ;;  %v1336_v29 = vpop.f32.mrb[33].mxu1  ;;  %v1335_v57 = vadd.f32 %v9954_v53, %v1334_v28 }
 0x2a6   :  { %v1337_v30 = vpop.f32.mrb[34].mxu1 }
 0x2a7   :  { %v1074_v8 = vmax.f32 %v1003_v4, %v1073_v59  ;;  %v1338_v31 = vpop.f32.mrb[35].mxu1  ;;  %v1340_v59 = vmax.f32 %v1335_v57, 0.0 }
 0x2a8   :  { %v9484_v31 = vld [vmem:[%s13059_s3 + $0x20] sm:$0xff]  }
 0x2a9   :  { %v1075_v9 = vmax.f32 %v933_v56, %v1074_v8 }
 0x2ab   :  { %v1076_v11 = vpack.c.bf16 %v1075_v9, %v1075_v9 }
 0x2ad   :  { %9294 = vmatmul.mubr.msk.bf16.vlgmr.msra.gmra.mrb[28].mxu0 %vm700_vm3, %v1076_v11 }
 0x2ae   :  { %1230 = vmatpush1.bf16.msra.mxu0 %v10113_v40  ;;  %8847 = vmatprep.mubr.msk.bf16.mxu0 %vm142_vm0, %v1224_v10  ;;  %v1561_v10 = vrot.slane %v1547_v7, %v9707_v15  ;;  %v1884_v7 = vcombine.high %v8878_v62, %v8878_v62 }
 0x2af   :  { %1231 = vmatprep.subr.bf16.mxu0 %v9603_v1 }
 0x2b2   :  { %1232 = vmatpush1.bf16.msra.mxu0 %v10120_v43 }
 0x2b3   :  { %1233 = vmatprep.subr.bf16.mxu0 %v9603_v1 }
 0x2b6   :  { %1234 = vmatpush1.bf16.msra.mxu0 %v10127_v44 }
 0x2b7   :  { %1235 = vmatprep.subr.bf16.mxu0 %v9603_v1 }
 0x2ba   :  { %1236 = vmatpush1.bf16.msra.mxu0 %v10134_v45 }
 0x2bb   :  { %1237 = vmatprep.subr.bf16.mxu0 %v9603_v1 }
 0x2be   :  { %1238 = vmatpush1.bf16.msra.mxu0 %v10179_v12 }
 0x2bf   :  { %1239 = vmatprep.subr.bf16.mxu0 %v9603_v1 }
 0x2c2   :  { %1240 = vmatpush1.bf16.msra.mxu0 %v10186_v13 }
 0x2c3   :  { %1241 = vmatprep.subr.bf16.mxu0 %v9603_v1 }
 0x2c6   :  { %1242 = vmatpush1.bf16.msra.mxu0 %v10193_v17 }
 0x2c7   :  { %1243 = vmatprep.subr.bf16.mxu0 %v9603_v1 }
 0x2ca   :  { %1244 = vmatpush1.bf16.msra.mxu0 %v10200_v18 }
 0x2cb   :  { %1245 = vmatprep.subr.bf16.mxu0 %v9603_v1 }
 0x2ce   :  { %1246 = vmatpush1.bf16.msra.mxu0 %v9743_v21  ;;  %v10233_v21 = vld [vmem:[%s13057_s1 + $0x40] sm:$0xff]  }
 0x2cf   :  { %1247 = vmatprep.subr.bf16.mxu0 %v9603_v1 }
 0x2d2   :  { %1248 = vmatpush1.bf16.msra.mxu0 %v9762_v25 }
 0x2d3   :  { %1370 = vmatprep.subr.bf16.mxu0 %v9603_v1 }
 0x2d5   :  { %1262 = vmatmul.mubr.bf16.vlgmr.msra.gmra.mrb[32].mxu0 %v1217_v3 }
 0x2d6   :  { %1371 = vmatpush1.bf16.msra.mxu0 %v10113_v40  ;;  %8853 = vmatprep.mubr.msk.bf16.mxu0 %vm142_vm0, %v1365_v5 }
 0x2d7   :  { %1372 = vmatprep.subr.bf16.mxu0 %v9603_v1 }
 0x2da   :  { %1373 = vmatpush1.bf16.msra.mxu0 %v10120_v43 }
 0x2db   :  { %1374 = vmatprep.subr.bf16.mxu0 %v9603_v1 }
 0x2de   :  { %1375 = vmatpush1.bf16.msra.mxu0 %v10127_v44 }
 0x2df   :  { %1376 = vmatprep.subr.bf16.mxu0 %v9603_v1 }
 0x2e2   :  { %1377 = vmatpush1.bf16.msra.mxu0 %v10134_v45 }
 0x2e3   :  { %1378 = vmatprep.subr.bf16.mxu0 %v9603_v1 }
 0x2e6   :  { %1379 = vmatpush1.bf16.msra.mxu0 %v10179_v12 }
 0x2e7   :  { %1380 = vmatprep.subr.bf16.mxu0 %v9603_v1 }
 0x2ea   :  { %1381 = vmatpush1.bf16.msra.mxu0 %v10186_v13 }
 0x2eb   :  { %1382 = vmatprep.subr.bf16.mxu0 %v9603_v1 }
 0x2ee   :  { %1383 = vmatpush1.bf16.msra.mxu0 %v10193_v17 }
 0x2ef   :  { %1384 = vmatprep.subr.bf16.mxu0 %v9603_v1 }
 0x2f2   :  { %1385 = vmatpush1.bf16.msra.mxu0 %v10200_v18 }
 0x2f3   :  { %1386 = vmatprep.subr.bf16.mxu0 %v9603_v1 }
 0x2f6   :  { %1387 = vmatpush1.bf16.msra.mxu0 %v10233_v21 }
 0x2f7   :  { %1388 = vmatprep.subr.bf16.mxu0 %v9603_v1 }
 0x2fa   :  { %1389 = vmatpush1.bf16.msra.mxu0 %v9762_v25 }
 0x2fb   :  { %1496 = vmatprep.subr.bf16.mxu0 %v9603_v1 }
 0x2fd   :  { %1403 = vmatmul.mubr.bf16.vlgmr.msra.gmra.mrb[36].mxu0 %v1358_v22 }
 0x2fe   :  { %1497 = vmatpush1.bf16.msra.mxu0 %v10113_v40  ;;  %8860 = vmatprep.mubr.msk.bf16.mxu0 %vm142_vm0, %v1491_v36  ;;  %v1821_v36 = vrot.slane %v8875_v32, %v9707_v15  ;;  %v8891_v32 = vld.sshfl [vmem:[%s13056_s0 + $0x30] sm:$0x11 pattern:$0x75316420] }
 0x2ff   :  { %1498 = vmatprep.subr.bf16.mxu0 %v9603_v1  ;;  %v2151_v33 = vcombine.high %v8891_v32, %v8891_v32 }
 0x302   :  { %1499 = vmatpush1.bf16.msra.mxu0 %v10120_v43 }
 0x303   :  { %1500 = vmatprep.subr.bf16.mxu0 %v9603_v1 }
 0x306   :  { %1501 = vmatpush1.bf16.msra.mxu0 %v10127_v44 }
 0x307   :  { %1502 = vmatprep.subr.bf16.mxu0 %v9603_v1 }
 0x30a   :  { %1503 = vmatpush1.bf16.msra.mxu0 %v10134_v45 }
 0x30b   :  { %1504 = vmatprep.subr.bf16.mxu0 %v9603_v1 }
 0x30e   :  { %1505 = vmatpush1.bf16.msra.mxu0 %v10179_v12 }
 0x30f   :  { %1506 = vmatprep.subr.bf16.mxu0 %v9603_v1 }
 0x312   :  { %1507 = vmatpush1.bf16.msra.mxu0 %v10186_v13 }
 0x313   :  { %1508 = vmatprep.subr.bf16.mxu0 %v9603_v1 }
 0x316   :  { %1509 = vmatpush1.bf16.msra.mxu0 %v10193_v17 }
 0x317   :  { %1510 = vmatprep.subr.bf16.mxu0 %v9603_v1 }
 0x31a   :  { %1511 = vmatpush1.bf16.msra.mxu0 %v10200_v18 }
 0x31b   :  { %1512 = vmatprep.subr.bf16.mxu0 %v9603_v1 }
 0x31e   :  { %1513 = vmatpush1.bf16.msra.mxu0 %v10233_v21 }
 0x31f   :  { %1514 = vmatprep.subr.bf16.mxu0 %v9603_v1 }
 0x322   :  { %1515 = vmatpush1.bf16.msra.mxu0 %v9762_v25 }
 0x323   :  { %1637 = vmatprep.subr.bf16.mxu0 %v9603_v1 }
 0x325   :  { %1529 = vmatmul.mubr.bf16.vlgmr.msra.gmra.mrb[40].mxu0 %v1484_v37 }
 0x326   :  { %1638 = vmatpush1.bf16.msra.mxu0 %v10113_v40 }
 0x327   :  { %1639 = vmatprep.subr.bf16.mxu0 %v9603_v1 }
 0x32a   :  { %1640 = vmatpush1.bf16.msra.mxu0 %v10120_v43 }
 0x32b   :  { %1641 = vmatprep.subr.bf16.mxu0 %v9603_v1 }
 0x32e   :  { %1642 = vmatpush1.bf16.msra.mxu0 %v10127_v44 }
 0x32f   :  { %1643 = vmatprep.subr.bf16.mxu0 %v9603_v1 }
 0x332   :  { %1644 = vmatpush1.bf16.msra.mxu0 %v10134_v45 }
 0x333   :  { %1645 = vmatprep.subr.bf16.mxu0 %v9603_v1 }
 0x336   :  { %1646 = vmatpush1.bf16.msra.mxu0 %v10179_v12 }
 0x337   :  { %1647 = vmatprep.subr.bf16.mxu0 %v9603_v1 }
 0x33a   :  { %1648 = vmatpush1.bf16.msra.mxu0 %v10186_v13 }
 0x33b   :  { %1649 = vmatprep.subr.bf16.mxu0 %v9603_v1 }
 0x33e   :  { %1650 = vmatpush1.bf16.msra.mxu0 %v10193_v17 }
 0x33f   :  { %1651 = vmatprep.subr.bf16.mxu0 %v9603_v1 }
 0x342   :  { %1652 = vmatpush1.bf16.msra.mxu0 %v10200_v18 }
 0x343   :  { %1653 = vmatprep.subr.bf16.mxu0 %v9603_v1 }
 0x346   :  { %1654 = vmatpush1.bf16.msra.mxu0 %v10233_v21 }
 0x347   :  { %1655 = vmatprep.subr.bf16.mxu0 %v9603_v1 }
 0x34a   :  { %1656 = vmatpush1.bf16.msra.mxu0 %v9762_v25 }
 0x34b   :  { %9303 = vmatprep.subr.bf16.mxu0 %v9605_v51 }
 0x380   :  { %v1123_v38 = vpop.f32.mrb[28].mxu0 }
 0x381   :  { %v10271_v39 = vadd.f32 %v1123_v38, %v10108_v35  ;;  %v9295_v41 = vpop.f32.mrb[29].mxu0  ;;  %v8865_v35 = vld.sshfl [vmem:[%s13056_s0 + $0x24] sm:$0x11 pattern:$0x75316420] }
 0x382   :  { %v1126_v42 = vpop.f32.mrb[30].mxu0  ;;  %v1618_v46 = vcombine.high %v8865_v35, %v8865_v35  ;;  %v1625_v19 = vrot.slane %v8865_v35, %v9707_v15 }
 0x383   :  { %v9296_v14 = vpop.f32.mrb[31].mxu0 }
 0x384   :  { %v1632_v47 = vrot.slane %v1618_v46, %v9707_v15  ;;  %v10415_v46 = vld [vmem:[%s13058_s2] ss:$0 sm:$0xff] }
 0x386   :  { %8866 = vmatprep.mubr.msk.bf16.mxu0 %vm142_vm0, %v1632_v47 }
 0x387   :  { %1670 = vmatmul.mubr.bf16.vlgmr.msra.gmra.mrb[44].mxu0 %v1625_v19 }
 0x388   :  { %9305 = vmatprep.mubr.msk.bf16.mxu0 %vm9606_vm2, %v9605_v51  ;;  %9304 = vmatpush3.bf16.msra.mxu0 %v9484_v31  ;;  %v9485_v31 = vld [vmem:[%s13059_s3 + $0x28] sm:$0xff]  }
 0x389   :  { %1903 = vmatprep.subr.bf16.mxu0 %v9603_v1 }
 0x3a8   :  { %v1263_v20 = vpop.f32.mrb[32].mxu0 }
 0x3a9   :  { %v1264_v49 = vadd.f32 %v9954_v53, %v1263_v20  ;;  %v1265_v50 = vpop.f32.mrb[33].mxu0 }
 0x3aa   :  { %v1266_v52 = vpop.f32.mrb[34].mxu0 }
 0x3ab   :  { %v1269_v54 = vmax.f32 %v1264_v49, 0.0  ;;  %v1267_v55 = vpop.f32.mrb[35].mxu0 }
 0x3ad   :  { %v1270_v56 = vmax.f32 %v1199_v48, %v1269_v54 }
 0x3d0   :  { %v1404_v58 = vpop.f32.mrb[36].mxu0 }
 0x3d1   :  { %v1405_v60 = vadd.f32 %v9954_v53, %v1404_v58  ;;  %v1406_v61 = vpop.f32.mrb[37].mxu0  ;;  %v8868_v53 = vld.sshfl [vmem:[%s13056_s0 + $0x26] sm:$0x11 pattern:$0x75316420] }
 0x3d2   :  { %v1407_v63 = vpop.f32.mrb[38].mxu0  ;;  %v1688_v0 = vcombine.high %v8868_v53, %v8868_v53  ;;  %v1695_v5 = vrot.slane %v8868_v53, %v9707_v15  ;;  %v8884_v53 = vld.sshfl [vmem:[%s13056_s0 + $0x2e] sm:$0x11 pattern:$0x75316420] }
 0x3d3   :  { %v1410_v4 = vmax.f32 %v1405_v60, 0.0  ;;  %v1408_v6 = vpop.f32.mrb[39].mxu0 }
 0x3d4   :  { %v1702_v3 = vrot.slane %v1688_v0, %v9707_v15  ;;  %v2025_v0 = vcombine.high %v8884_v53, %v8884_v53 }
 0x3d5   :  { %v1411_v8 = vmax.f32 %v1340_v59, %v1410_v4 }
 0x3d7   :  { %v1412_v9 = vmax.f32 %v1270_v56, %v1411_v8 }
 0x3d9   :  { %v1413_v11 = vpack.c.bf16 %v1412_v9, %v1412_v9 }
 0x3db   :  { %9300 = vmatmul.mubr.msk.bf16.vlgmr.msra.gmra.mrb[36].mxu1 %vm700_vm3, %v1413_v11 }
 0x3dc   :  { %1567 = vmatpush1.bf16.msra.mxu1 %v10113_v40  ;;  %8863 = vmatprep.mubr.msk.bf16.mxu1 %vm142_vm0, %v1561_v10  ;;  %v1898_v10 = vrot.slane %v1884_v7, %v9707_v15 }
 0x3dd   :  { %1568 = vmatprep.subr.bf16.mxu1 %v9603_v1 }
 0x3e0   :  { %1569 = vmatpush1.bf16.msra.mxu1 %v10120_v43 }
 0x3e1   :  { %1570 = vmatprep.subr.bf16.mxu1 %v9603_v1 }
 0x3e4   :  { %1571 = vmatpush1.bf16.msra.mxu1 %v10127_v44 }
 0x3e5   :  { %1572 = vmatprep.subr.bf16.mxu1 %v9603_v1 }
 0x3e8   :  { %1573 = vmatpush1.bf16.msra.mxu1 %v10134_v45 }
 0x3e9   :  { %1574 = vmatprep.subr.bf16.mxu1 %v9603_v1 }
 0x3ec   :  { %1575 = vmatpush1.bf16.msra.mxu1 %v10179_v12 }
 0x3ed   :  { %1576 = vmatprep.subr.bf16.mxu1 %v9603_v1 }
 0x3f0   :  { %1577 = vmatpush1.bf16.msra.mxu1 %v10186_v13 }
 0x3f1   :  { %1578 = vmatprep.subr.bf16.mxu1 %v9603_v1 }
 0x3f4   :  { %1579 = vmatpush1.bf16.msra.mxu1 %v10193_v17 }
 0x3f5   :  { %1580 = vmatprep.subr.bf16.mxu1 %v9603_v1 }
 0x3f8   :  { %1581 = vmatpush1.bf16.msra.mxu1 %v10200_v18  ;;  %v1530_v22 = vpop.f32.mrb[40].mxu0 }
 0x3f9   :  { %1582 = vmatprep.subr.bf16.mxu1 %v9603_v1  ;;  %v1532_v23 = vpop.f32.mrb[41].mxu0  ;;  %v1531_v16 = vadd.f32 %v10415_v46, %v1530_v22 }
 0x3fa   :  { %v1533_v24 = vpop.f32.mrb[42].mxu0 }
 0x3fb   :  { %v1534_v26 = vpop.f32.mrb[43].mxu0  ;;  %v1536_v48 = vmax.f32 %v1531_v16, 0.0 }
 0x3fc   :  { %1583 = vmatpush1.bf16.msra.mxu1 %v10233_v21 }
 0x3fd   :  { %1584 = vmatprep.subr.bf16.mxu1 %v9603_v1 }
 0x400   :  { %1585 = vmatpush1.bf16.msra.mxu1 %v9762_v25 }
 0x401   :  { %1707 = vmatprep.subr.bf16.mxu1 %v9603_v1 }
 0x403   :  { %1599 = vmatmul.mubr.bf16.vlgmr.msra.gmra.mrb[40].mxu1 %v1554_v2  ;;  %v1891_v2 = vrot.slane %v8878_v62, %v9707_v15  ;;  %v8894_v62 = vld.sshfl [vmem:[%s13056_s0 + $0x32] sm:$0x11 pattern:$0x75316420] }
 0x404   :  { %1708 = vmatpush1.bf16.msra.mxu1 %v10113_v40  ;;  %8869 = vmatprep.mubr.msk.bf16.mxu1 %vm142_vm0, %v1702_v3  ;;  %v2039_v3 = vrot.slane %v2025_v0, %v9707_v15  ;;  %v2221_v7 = vcombine.high %v8894_v62, %v8894_v62 }
 0x405   :  { %1709 = vmatprep.subr.bf16.mxu1 %v9603_v1 }
 0x408   :  { %1710 = vmatpush1.bf16.msra.mxu1 %v10120_v43 }
 0x409   :  { %1711 = vmatprep.subr.bf16.mxu1 %v9603_v1 }
 0x40c   :  { %1712 = vmatpush1.bf16.msra.mxu1 %v10127_v44 }
 0x40d   :  { %1713 = vmatprep.subr.bf16.mxu1 %v9603_v1 }
 0x410   :  { %1714 = vmatpush1.bf16.msra.mxu1 %v10134_v45 }
 0x411   :  { %1715 = vmatprep.subr.bf16.mxu1 %v9603_v1 }
 0x414   :  { %1716 = vmatpush1.bf16.msra.mxu1 %v10179_v12 }
 0x415   :  { %1717 = vmatprep.subr.bf16.mxu1 %v9603_v1 }
 0x418   :  { %1718 = vmatpush1.bf16.msra.mxu1 %v10186_v13 }
 0x419   :  { %1719 = vmatprep.subr.bf16.mxu1 %v9603_v1 }
 0x41c   :  { %1720 = vmatpush1.bf16.msra.mxu1 %v10193_v17 }
 0x41d   :  { %1721 = vmatprep.subr.bf16.mxu1 %v9603_v1 }
 0x420   :  { %1722 = vmatpush1.bf16.msra.mxu1 %v10200_v18 }
 0x421   :  { %1723 = vmatprep.subr.bf16.mxu1 %v9603_v1 }
 0x424   :  { %1724 = vmatpush1.bf16.msra.mxu1 %v10233_v21 }
 0x425   :  { %1725 = vmatprep.subr.bf16.mxu1 %v9603_v1 }
 0x428   :  { %1726 = vmatpush1.bf16.msra.mxu1 %v9762_v25 }
 0x429   :  { %1833 = vmatprep.subr.bf16.mxu1 %v9603_v1 }
 0x42b   :  { %1740 = vmatmul.mubr.bf16.vlgmr.msra.gmra.mrb[44].mxu1 %v1695_v5  ;;  %v2032_v5 = vrot.slane %v8884_v53, %v9707_v15  ;;  %v8900_v53 = vld.sshfl [vmem:[%s13056_s0 + $0x36] sm:$0x11 pattern:$0x75316420] }
 0x42c   :  { %1834 = vmatpush1.bf16.msra.mxu1 %v10113_v40  ;;  %8876 = vmatprep.mubr.msk.bf16.mxu1 %vm142_vm0, %v1828_v34  ;;  %v2165_v34 = vrot.slane %v2151_v33, %v9707_v15  ;;  %v2362_v0 = vcombine.high %v8900_v53, %v8900_v53 }
 0x42d   :  { %1835 = vmatprep.subr.bf16.mxu1 %v9603_v1 }
 0x430   :  { %1836 = vmatpush1.bf16.msra.mxu1 %v10120_v43 }
 0x431   :  { %1837 = vmatprep.subr.bf16.mxu1 %v9603_v1 }
 0x434   :  { %1838 = vmatpush1.bf16.msra.mxu1 %v10127_v44 }
 0x435   :  { %1839 = vmatprep.subr.bf16.mxu1 %v9603_v1 }
 0x438   :  { %1840 = vmatpush1.bf16.msra.mxu1 %v10134_v45 }
 0x439   :  { %1841 = vmatprep.subr.bf16.mxu1 %v9603_v1 }
 0x43c   :  { %1842 = vmatpush1.bf16.msra.mxu1 %v10179_v12 }
 0x43d   :  { %1843 = vmatprep.subr.bf16.mxu1 %v9603_v1 }
 0x440   :  { %1844 = vmatpush1.bf16.msra.mxu1 %v10186_v13 }
 0x441   :  { %1845 = vmatprep.subr.bf16.mxu1 %v9603_v1 }
 0x444   :  { %1846 = vmatpush1.bf16.msra.mxu1 %v10193_v17 }
 0x445   :  { %1847 = vmatprep.subr.bf16.mxu1 %v9603_v1 }
 0x448   :  { %1848 = vmatpush1.bf16.msra.mxu1 %v10200_v18 }
 0x449   :  { %1849 = vmatprep.subr.bf16.mxu1 %v9603_v1 }
 0x44c   :  { %1850 = vmatpush1.bf16.msra.mxu1 %v10233_v21 }
 0x44d   :  { %1851 = vmatprep.subr.bf16.mxu1 %v9603_v1 }
 0x450   :  { %1852 = vmatpush1.bf16.msra.mxu1 %v9762_v25 }
 0x451   :  { %1974 = vmatprep.subr.bf16.mxu1 %v9603_v1 }
 0x453   :  { %1866 = vmatmul.mubr.bf16.vlgmr.msra.gmra.mrb[48].mxu1 %v1821_v36  ;;  %v2158_v36 = vrot.slane %v8891_v32, %v9707_v15 }
 0x454   :  { %1975 = vmatpush1.bf16.msra.mxu1 %v10113_v40 }
 0x455   :  { %1976 = vmatprep.subr.bf16.mxu1 %v9603_v1 }
 0x458   :  { %1977 = vmatpush1.bf16.msra.mxu1 %v10120_v43 }
 0x459   :  { %1978 = vmatprep.subr.bf16.mxu1 %v9603_v1 }
 0x45a   :  { %v1671_v27 = vpop.f32.mrb[44].mxu0 }
 0x45b   :  { %v1673_v28 = vpop.f32.mrb[45].mxu0  ;;  %v1672_v57 = vadd.f32 %v10415_v46, %v1671_v27 }
 0x45c   :  { %v1674_v29 = vpop.f32.mrb[46].mxu0  ;;  %1979 = vmatpush1.bf16.msra.mxu1 %v10127_v44 }
 0x45d   :  { %v1675_v30 = vpop.f32.mrb[47].mxu0  ;;  %1980 = vmatprep.subr.bf16.mxu1 %v9603_v1  ;;  %v1677_v59 = vmax.f32 %v1672_v57, 0.0 }
 0x460   :  { %1981 = vmatpush1.bf16.msra.mxu1 %v10134_v45 }
 0x461   :  { %1982 = vmatprep.subr.bf16.mxu1 %v9603_v1 }
 0x464   :  { %1983 = vmatpush1.bf16.msra.mxu1 %v10179_v12 }
 0x465   :  { %1984 = vmatprep.subr.bf16.mxu1 %v9603_v1 }
 0x468   :  { %1985 = vmatpush1.bf16.msra.mxu1 %v10186_v13 }
 0x469   :  { %1986 = vmatprep.subr.bf16.mxu1 %v9603_v1 }
 0x46c   :  { %1987 = vmatpush1.bf16.msra.mxu1 %v10193_v17 }
 0x46d   :  { %1988 = vmatprep.subr.bf16.mxu1 %v9603_v1 }
 0x470   :  { %1989 = vmatpush1.bf16.msra.mxu1 %v10200_v18 }
 0x471   :  { %1990 = vmatprep.subr.bf16.mxu1 %v9603_v1 }
 0x474   :  { %1991 = vmatpush1.bf16.msra.mxu1 %v10233_v21 }
 0x475   :  { %1992 = vmatprep.subr.bf16.mxu1 %v9603_v1 }
 0x478   :  { %1993 = vmatpush1.bf16.msra.mxu1 %v9762_v25 }
 0x479   :  { %9309 = vmatprep.subr.bf16.mxu1 %v9605_v51 }
 0x4ae   :  { %v1460_v37 = vpop.f32.mrb[36].mxu1 }
 0x4af   :  { %v10389_v38 = vadd.f32 %v1460_v37, %v10271_v39  ;;  %v9301_v41 = vpop.f32.mrb[37].mxu1  ;;  %v8881_v39 = vld.sshfl [vmem:[%s13056_s0 + $0x2c] sm:$0x11 pattern:$0x75316420] }
 0x4b0   :  { %v1463_v42 = vpop.f32.mrb[38].mxu1  ;;  %v1955_v35 = vcombine.high %v8881_v39, %v8881_v39  ;;  %v1962_v19 = vrot.slane %v8881_v39, %v9707_v15 }
 0x4b1   :  { %v9302_v14 = vpop.f32.mrb[39].mxu1 }
 0x4b2   :  { %v1969_v47 = vrot.slane %v1955_v35, %v9707_v15 }
 0x4b4   :  { %8882 = vmatprep.mubr.msk.bf16.mxu1 %vm142_vm0, %v1969_v47 }
 0x4b5   :  { %2007 = vmatmul.mubr.bf16.vlgmr.msra.gmra.mrb[52].mxu1 %v1962_v19 }
 0x4b6   :  { %9311 = vmatprep.mubr.msk.bf16.mxu1 %vm9606_vm2, %v9605_v51  ;;  %9310 = vmatpush3.bf16.msra.mxu1 %v9485_v31 }
 0x4b7   :  { %2240 = vmatprep.subr.bf16.mxu1 %v9603_v1 }
 0x4d6   :  { %v1600_v20 = vpop.f32.mrb[40].mxu1 }
 0x4d7   :  { %v1601_v49 = vadd.f32 %v10415_v46, %v1600_v20  ;;  %v1602_v50 = vpop.f32.mrb[41].mxu1 }
 0x4d8   :  { %v1603_v52 = vpop.f32.mrb[42].mxu1 }
 0x4d9   :  { %v1606_v54 = vmax.f32 %v1601_v49, 0.0  ;;  %v1604_v55 = vpop.f32.mrb[43].mxu1 }
 0x4db   :  { %v1607_v56 = vmax.f32 %v1536_v48, %v1606_v54 }
 0x4fe   :  { %v1741_v58 = vpop.f32.mrb[44].mxu1 }
 0x4ff   :  { %v1742_v60 = vadd.f32 %v10415_v46, %v1741_v58  ;;  %v1743_v61 = vpop.f32.mrb[45].mxu1 }
 0x500   :  { %v1744_v63 = vpop.f32.mrb[46].mxu1 }
 0x501   :  { %v1747_v4 = vmax.f32 %v1742_v60, 0.0  ;;  %v1745_v6 = vpop.f32.mrb[47].mxu1 }
 0x503   :  { %v1748_v8 = vmax.f32 %v1677_v59, %v1747_v4 }
 0x505   :  { %v1749_v9 = vmax.f32 %v1607_v56, %v1748_v8 }
 0x507   :  { %v1750_v11 = vpack.c.bf16 %v1749_v9, %v1749_v9 }
 0x509   :  { %9306 = vmatmul.mubr.msk.bf16.vlgmr.msra.gmra.mrb[48].mxu0 %vm700_vm3, %v1750_v11 }
 0x50a   :  { %1904 = vmatpush1.bf16.msra.mxu0 %v10113_v40  ;;  %8879 = vmatprep.mubr.msk.bf16.mxu0 %vm142_vm0, %v1898_v10  ;;  %v2235_v10 = vrot.slane %v2221_v7, %v9707_v15 }
 0x50b   :  { %1905 = vmatprep.subr.bf16.mxu0 %v9603_v1 }
 0x50e   :  { %1906 = vmatpush1.bf16.msra.mxu0 %v10120_v43 }
 0x50f   :  { %1907 = vmatprep.subr.bf16.mxu0 %v9603_v1 }
 0x512   :  { %1908 = vmatpush1.bf16.msra.mxu0 %v10127_v44 }
 0x513   :  { %1909 = vmatprep.subr.bf16.mxu0 %v9603_v1 }
 0x516   :  { %1910 = vmatpush1.bf16.msra.mxu0 %v10134_v45 }
 0x517   :  { %1911 = vmatprep.subr.bf16.mxu0 %v9603_v1 }
 0x51a   :  { %1912 = vmatpush1.bf16.msra.mxu0 %v10179_v12 }
 0x51b   :  { %1913 = vmatprep.subr.bf16.mxu0 %v9603_v1 }
 0x51e   :  { %1914 = vmatpush1.bf16.msra.mxu0 %v10186_v13 }
 0x51f   :  { %1915 = vmatprep.subr.bf16.mxu0 %v9603_v1 }
 0x522   :  { %1916 = vmatpush1.bf16.msra.mxu0 %v10193_v17 }
 0x523   :  { %1917 = vmatprep.subr.bf16.mxu0 %v9603_v1 }
 0x526   :  { %1918 = vmatpush1.bf16.msra.mxu0 %v10200_v18  ;;  %v1867_v22 = vpop.f32.mrb[48].mxu1 }
 0x527   :  { %1919 = vmatprep.subr.bf16.mxu0 %v9603_v1  ;;  %v1869_v23 = vpop.f32.mrb[49].mxu1  ;;  %v1868_v16 = vadd.f32 %v10415_v46, %v1867_v22 }
 0x528   :  { %v1870_v24 = vpop.f32.mrb[50].mxu1 }
 0x529   :  { %v1871_v26 = vpop.f32.mrb[51].mxu1  ;;  %v1873_v48 = vmax.f32 %v1868_v16, 0.0 }
 0x52a   :  { %1920 = vmatpush1.bf16.msra.mxu0 %v10233_v21 }
 0x52b   :  { %1921 = vmatprep.subr.bf16.mxu0 %v9603_v1 }
 0x52e   :  { %1922 = vmatpush1.bf16.msra.mxu0 %v9762_v25 }
 0x52f   :  { %2044 = vmatprep.subr.bf16.mxu0 %v9603_v1 }
 0x531   :  { %1936 = vmatmul.mubr.bf16.vlgmr.msra.gmra.mrb[52].mxu0 %v1891_v2  ;;  %v2228_v2 = vrot.slane %v8894_v62, %v9707_v15 }
 0x532   :  { %2045 = vmatpush1.bf16.msra.mxu0 %v10113_v40  ;;  %8885 = vmatprep.mubr.msk.bf16.mxu0 %vm142_vm0, %v2039_v3  ;;  %v2376_v3 = vrot.slane %v2362_v0, %v9707_v15 }
 0x533   :  { %2046 = vmatprep.subr.bf16.mxu0 %v9603_v1 }
 0x536   :  { %2047 = vmatpush1.bf16.msra.mxu0 %v10120_v43 }
 0x537   :  { %2048 = vmatprep.subr.bf16.mxu0 %v9603_v1 }
 0x53a   :  { %2049 = vmatpush1.bf16.msra.mxu0 %v10127_v44 }
 0x53b   :  { %2050 = vmatprep.subr.bf16.mxu0 %v9603_v1 }
 0x53e   :  { %2051 = vmatpush1.bf16.msra.mxu0 %v10134_v45 }
 0x53f   :  { %2052 = vmatprep.subr.bf16.mxu0 %v9603_v1 }
 0x542   :  { %2053 = vmatpush1.bf16.msra.mxu0 %v10179_v12 }
 0x543   :  { %2054 = vmatprep.subr.bf16.mxu0 %v9603_v1 }
 0x546   :  { %2055 = vmatpush1.bf16.msra.mxu0 %v10186_v13 }
 0x547   :  { %2056 = vmatprep.subr.bf16.mxu0 %v9603_v1 }
 0x54a   :  { %2057 = vmatpush1.bf16.msra.mxu0 %v10193_v17 }
 0x54b   :  { %2058 = vmatprep.subr.bf16.mxu0 %v9603_v1 }
 0x54e   :  { %2059 = vmatpush1.bf16.msra.mxu0 %v10200_v18 }
 0x54f   :  { %2060 = vmatprep.subr.bf16.mxu0 %v9603_v1 }
 0x552   :  { %2061 = vmatpush1.bf16.msra.mxu0 %v10233_v21 }
 0x553   :  { %2062 = vmatprep.subr.bf16.mxu0 %v9603_v1 }
 0x556   :  { %2063 = vmatpush1.bf16.msra.mxu0 %v9762_v25 }
 0x557   :  { %2170 = vmatprep.subr.bf16.mxu0 %v9603_v1 }
 0x559   :  { %2077 = vmatmul.mubr.bf16.vlgmr.msra.gmra.mrb[56].mxu0 %v2032_v5  ;;  %v10623_v5 = vld [vmem:[%s13057_s1 + $0x18] sm:$0xff]  }
 0x55a   :  { %2171 = vmatpush1.bf16.msra.mxu0 %v10113_v40  ;;  %8892 = vmatprep.mubr.msk.bf16.mxu0 %vm142_vm0, %v2165_v34 }
 0x55b   :  { %2172 = vmatprep.subr.bf16.mxu0 %v9603_v1 }
 0x55e   :  { %2173 = vmatpush1.bf16.msra.mxu0 %v10120_v43 }
 0x55f   :  { %2174 = vmatprep.subr.bf16.mxu0 %v9603_v1 }
 0x562   :  { %2175 = vmatpush1.bf16.msra.mxu0 %v10127_v44 }
 0x563   :  { %2176 = vmatprep.subr.bf16.mxu0 %v9603_v1 }
 0x566   :  { %2177 = vmatpush1.bf16.msra.mxu0 %v10134_v45 }
 0x567   :  { %2178 = vmatprep.subr.bf16.mxu0 %v9603_v1 }
 0x56a   :  { %2179 = vmatpush1.bf16.msra.mxu0 %v10179_v12 }
 0x56b   :  { %2180 = vmatprep.subr.bf16.mxu0 %v9603_v1 }
 0x56e   :  { %2181 = vmatpush1.bf16.msra.mxu0 %v10186_v13 }
 0x56f   :  { %2182 = vmatprep.subr.bf16.mxu0 %v9603_v1 }
 0x572   :  { %2183 = vmatpush1.bf16.msra.mxu0 %v10193_v17 }
 0x573   :  { %2184 = vmatprep.subr.bf16.mxu0 %v9603_v1 }
 0x576   :  { %2185 = vmatpush1.bf16.msra.mxu0 %v10200_v18 }
 0x577   :  { %2186 = vmatprep.subr.bf16.mxu0 %v9603_v1 }
 0x57a   :  { %2187 = vmatpush1.bf16.msra.mxu0 %v10233_v21 }
 0x57b   :  { %2188 = vmatprep.subr.bf16.mxu0 %v9603_v1 }
 0x57e   :  { %2189 = vmatpush1.bf16.msra.mxu0 %v9762_v25 }
 0x57f   :  { %2311 = vmatprep.subr.bf16.mxu0 %v9603_v1 }
 0x581   :  { %2203 = vmatmul.mubr.bf16.vlgmr.msra.gmra.mrb[60].mxu0 %v2158_v36 }
 0x582   :  { %2312 = vmatpush1.bf16.msra.mxu0 %v10113_v40 }
 0x583   :  { %2313 = vmatprep.subr.bf16.mxu0 %v9603_v1 }
 0x586   :  { %2314 = vmatpush1.bf16.msra.mxu0 %v10120_v43 }
 0x587   :  { %2315 = vmatprep.subr.bf16.mxu0 %v9603_v1 }
 0x588   :  { %v2008_v27 = vpop.f32.mrb[52].mxu1 }
 0x589   :  { %v2010_v28 = vpop.f32.mrb[53].mxu1  ;;  %v2009_v57 = vadd.f32 %v10415_v46, %v2008_v27 }
 0x58a   :  { %v2011_v29 = vpop.f32.mrb[54].mxu1  ;;  %2316 = vmatpush1.bf16.msra.mxu0 %v10127_v44  ;;  %v8907_v28 = vld.sshfl [vmem:[%s13056_s0 + $0x38] sm:$0x11 pattern:$0x75316420] }
 0x58b   :  { %v2012_v30 = vpop.f32.mrb[55].mxu1  ;;  %2317 = vmatprep.subr.bf16.mxu0 %v9603_v1  ;;  %v2014_v59 = vmax.f32 %v2009_v57, 0.0  ;;  %v2488_v29 = vcombine.high %v8907_v28, %v8907_v28  ;;  %v2495_v31 = vrot.slane %v8907_v28, %v9707_v15  ;;  %v8923_v28 = vld.sshfl [vmem:[%s13056_s0 + $0x40] sm:$0x11 pattern:$0x75316420] }
 0x58d   :  { %v2502_v30 = vrot.slane %v2488_v29, %v9707_v15  ;;  %v2825_v29 = vcombine.high %v8923_v28, %v8923_v28 }
 0x58e   :  { %2318 = vmatpush1.bf16.msra.mxu0 %v10134_v45 }
 0x58f   :  { %2319 = vmatprep.subr.bf16.mxu0 %v9603_v1 }
 0x592   :  { %2320 = vmatpush1.bf16.msra.mxu0 %v10179_v12 }
 0x593   :  { %2321 = vmatprep.subr.bf16.mxu0 %v9603_v1 }
 0x596   :  { %2322 = vmatpush1.bf16.msra.mxu0 %v10186_v13 }
 0x597   :  { %2323 = vmatprep.subr.bf16.mxu0 %v9603_v1 }
 0x59a   :  { %2324 = vmatpush1.bf16.msra.mxu0 %v10193_v17 }
 0x59b   :  { %2325 = vmatprep.subr.bf16.mxu0 %v9603_v1 }
 0x59e   :  { %2326 = vmatpush1.bf16.msra.mxu0 %v10200_v18 }
 0x59f   :  { %2327 = vmatprep.subr.bf16.mxu0 %v9603_v1 }
 0x5a2   :  { %2328 = vmatpush1.bf16.msra.mxu0 %v10233_v21 }
 0x5a3   :  { %2329 = vmatprep.subr.bf16.mxu0 %v9603_v1 }
 0x5a6   :  { %2330 = vmatpush1.bf16.msra.mxu0 %v9762_v25 }
 0x5a7   :  { %9315 = vmatprep.subr.bf16.mxu0 %v9605_v51 }
 0x5dc   :  { %v1797_v37 = vpop.f32.mrb[48].mxu0 }
 0x5dd   :  { %v10512_v41 = vadd.f32 %v1797_v37, %v10389_v38  ;;  %v9307_v42 = vpop.f32.mrb[49].mxu0  ;;  %v8897_v38 = vld.sshfl [vmem:[%s13056_s0 + $0x34] sm:$0x11 pattern:$0x75316420] }
 0x5de   :  { %v1800_v14 = vpop.f32.mrb[50].mxu0  ;;  %v2292_v35 = vcombine.high %v8897_v38, %v8897_v38  ;;  %v2299_v19 = vrot.slane %v8897_v38, %v9707_v15  ;;  %v10670_v42 = vld [vmem:[%s13057_s1 + $0x28] sm:$0xff]   ;;  %v8913_v38 = vld.sshfl [vmem:[%s13056_s0 + $0x3c] sm:$0x11 pattern:$0x75316420] }
 0x5df   :  { %v9308_v39 = vpop.f32.mrb[51].mxu0  ;;  %v10677_v14 = vld [vmem:[%s13057_s1 + $0x30] sm:$0xff]  }
 0x5e0   :  { %v2306_v47 = vrot.slane %v2292_v35, %v9707_v15  ;;  %v10684_v39 = vld [vmem:[%s13057_s1 + $0x38] sm:$0xff]   ;;  %v2629_v35 = vcombine.high %v8913_v38, %v8913_v38 }
 0x5e2   :  { %8898 = vmatprep.mubr.msk.bf16.mxu0 %vm142_vm0, %v2306_v47  ;;  %v2643_v47 = vrot.slane %v2629_v35, %v9707_v15 }
 0x5e3   :  { %2344 = vmatmul.mubr.bf16.vlgmr.msra.gmra.mrb[64].mxu0 %v2299_v19  ;;  %v2636_v19 = vrot.slane %v8913_v38, %v9707_v15 }
 0x5e4   :  { %9317 = vmatprep.mubr.msk.bf16.mxu0 %vm9606_vm2, %v9605_v51 }
 0x604   :  { %v1937_v20 = vpop.f32.mrb[52].mxu0 }
 0x605   :  { %v1938_v49 = vadd.f32 %v10415_v46, %v1937_v20  ;;  %v1939_v50 = vpop.f32.mrb[53].mxu0 }
 0x606   :  { %v1940_v52 = vpop.f32.mrb[54].mxu0 }
 0x607   :  { %v1943_v54 = vmax.f32 %v1938_v49, 0.0  ;;  %v1941_v55 = vpop.f32.mrb[55].mxu0 }
 0x609   :  { %v1944_v56 = vmax.f32 %v1873_v48, %v1943_v54 }
 0x62c   :  { %v2078_v58 = vpop.f32.mrb[56].mxu0 }
 0x62d   :  { %v2079_v60 = vadd.f32 %v10415_v46, %v2078_v58  ;;  %v2080_v61 = vpop.f32.mrb[57].mxu0 }
 0x62e   :  { %v2081_v63 = vpop.f32.mrb[58].mxu0  ;;  %v8910_v61 = vld.sshfl [vmem:[%s13056_s0 + $0x3a] sm:$0x11 pattern:$0x75316420] }
 0x62f   :  { %v2084_v4 = vmax.f32 %v2079_v60, 0.0  ;;  %v2082_v6 = vpop.f32.mrb[59].mxu0 }
 0x630   :  { %v2558_v6 = vcombine.high %v8910_v61, %v8910_v61 }
 0x631   :  { %v2085_v8 = vmax.f32 %v2014_v59, %v2084_v4 }
 0x633   :  { %v2086_v9 = vmax.f32 %v1944_v56, %v2085_v8 }
 0x635   :  { %v2087_v11 = vpack.c.bf16 %v2086_v9, %v2086_v9  ;;  %v2572_v9 = vrot.slane %v2558_v6, %v9707_v15 }
 0x637   :  { %9312 = vmatmul.mubr.msk.bf16.vlgmr.msra.gmra.mrb[56].mxu1 %vm700_vm3, %v2087_v11  ;;  %v8916_v11 = vld.sshfl [vmem:[%s13056_s0 + $0x3e] sm:$0x11 pattern:$0x75316420] }
 0x638   :  { %2241 = vmatpush1.bf16.msra.mxu1 %v10113_v40  ;;  %8895 = vmatprep.mubr.msk.bf16.mxu1 %vm142_vm0, %v2235_v10  ;;  %v2699_v0 = vcombine.high %v8916_v11, %v8916_v11 }
 0x639   :  { %2242 = vmatprep.subr.bf16.mxu1 %v9603_v1 }
 0x63c   :  { %2243 = vmatpush1.bf16.msra.mxu1 %v10120_v43 }
 0x63d   :  { %2244 = vmatprep.subr.bf16.mxu1 %v9603_v1 }
 0x640   :  { %2245 = vmatpush1.bf16.msra.mxu1 %v10127_v44 }
 0x641   :  { %2246 = vmatprep.subr.bf16.mxu1 %v9603_v1 }
 0x644   :  { %2247 = vmatpush1.bf16.msra.mxu1 %v10134_v45 }
 0x645   :  { %2248 = vmatprep.subr.bf16.mxu1 %v9603_v1 }
 0x648   :  { %2249 = vmatpush1.bf16.msra.mxu1 %v10179_v12 }
 0x649   :  { %2250 = vmatprep.subr.bf16.mxu1 %v9603_v1 }
 0x64c   :  { %2251 = vmatpush1.bf16.msra.mxu1 %v10186_v13 }
 0x64d   :  { %2252 = vmatprep.subr.bf16.mxu1 %v9603_v1 }
 0x650   :  { %2253 = vmatpush1.bf16.msra.mxu1 %v10193_v17 }
 0x651   :  { %2254 = vmatprep.subr.bf16.mxu1 %v9603_v1 }
 0x654   :  { %2255 = vmatpush1.bf16.msra.mxu1 %v10200_v18 }
 0x655   :  { %2256 = vmatprep.subr.bf16.mxu1 %v9603_v1 }
 0x658   :  { %2257 = vmatpush1.bf16.msra.mxu1 %v10233_v21 }
 0x659   :  { %2258 = vmatprep.subr.bf16.mxu1 %v9603_v1 }
 0x65c   :  { %2259 = vmatpush1.bf16.msra.mxu1 %v9762_v25 }
 0x65d   :  { %2381 = vmatprep.subr.bf16.mxu1 %v9603_v1 }
 0x65f   :  { %2273 = vmatmul.mubr.bf16.vlgmr.msra.gmra.mrb[60].mxu1 %v2228_v2  ;;  %v2565_v2 = vrot.slane %v8910_v61, %v9707_v15  ;;  %v8926_v61 = vld.sshfl [vmem:[%s13056_s0 + $0x42] sm:$0x11 pattern:$0x75316420] }
 0x660   :  { %2382 = vmatpush1.bf16.msra.mxu1 %v10113_v40  ;;  %8901 = vmatprep.mubr.msk.bf16.mxu1 %vm142_vm0, %v2376_v3  ;;  %v2369_v40 = vrot.slane %v8900_v53, %v9707_v15  ;;  %v10732_v53 = vld [vmem:[%s13057_s1 + $0x40] sm:$0xff]   ;;  %v2713_v3 = vrot.slane %v2699_v0, %v9707_v15  ;;  %v2895_v6 = vcombine.high %v8926_v61, %v8926_v61 }
 0x661   :  { %2383 = vmatprep.subr.bf16.mxu1 %v9603_v1  ;;  %v2902_v0 = vrot.slane %v8926_v61, %v9707_v15  ;;  %v8942_v61 = vld.sshfl [vmem:[%s13056_s0 + $0x4a] sm:$0x11 pattern:$0x75316420] }
 0x664   :  { %2384 = vmatpush1.bf16.msra.mxu1 %v10120_v43  ;;  %v10602_v43 = vld [vmem:[%s13057_s1] sm:$0xff]  }
 0x665   :  { %2385 = vmatprep.subr.bf16.mxu1 %v9603_v1 }
 0x668   :  { %2386 = vmatpush1.bf16.msra.mxu1 %v10127_v44  ;;  %v10609_v44 = vld [vmem:[%s13057_s1 + $0x8] sm:$0xff]  }
 0x669   :  { %2387 = vmatprep.subr.bf16.mxu1 %v9603_v1 }
 0x66c   :  { %2388 = vmatpush1.bf16.msra.mxu1 %v10134_v45  ;;  %v10616_v45 = vld [vmem:[%s13057_s1 + $0x10] sm:$0xff]  }
 0x66d   :  { %2389 = vmatprep.subr.bf16.mxu1 %v9603_v1 }
 0x670   :  { %2390 = vmatpush1.bf16.msra.mxu1 %v10179_v12 }
 0x671   :  { %2391 = vmatprep.subr.bf16.mxu1 %v9603_v1 }
 0x674   :  { %2392 = vmatpush1.bf16.msra.mxu1 %v10186_v13 }
 0x675   :  { %2393 = vmatprep.subr.bf16.mxu1 %v9603_v1 }
 0x678   :  { %2394 = vmatpush1.bf16.msra.mxu1 %v10193_v17 }
 0x679   :  { %2395 = vmatprep.subr.bf16.mxu1 %v9603_v1 }
 0x67c   :  { %2396 = vmatpush1.bf16.msra.mxu1 %v10200_v18 }
 0x67d   :  { %2397 = vmatprep.subr.bf16.mxu1 %v9603_v1 }
 0x680   :  { %2398 = vmatpush1.bf16.msra.mxu1 %v10233_v21 }
 0x681   :  { %2399 = vmatprep.subr.bf16.mxu1 %v9603_v1 }
 0x684   :  { %2400 = vmatpush1.bf16.msra.mxu1 %v9762_v25 }
 0x685   :  { %2507 = vmatprep.subr.bf16.mxu1 %v9603_v1 }
 0x687   :  { %2414 = vmatmul.mubr.bf16.vlgmr.msra.gmra.mrb[64].mxu1 %v2369_v40  ;;  %v2706_v40 = vrot.slane %v8916_v11, %v9707_v15 }
 0x688   :  { %2508 = vmatpush1.bf16.msra.mxu1 %v10602_v43  ;;  %8908 = vmatprep.mubr.msk.bf16.mxu1 %vm142_vm0, %v2502_v30  ;;  %v2839_v30 = vrot.slane %v2825_v29, %v9707_v15 }
 0x689   :  { %2509 = vmatprep.subr.bf16.mxu1 %v9603_v1 }
 0x68c   :  { %2510 = vmatpush1.bf16.msra.mxu1 %v10609_v44 }
 0x68d   :  { %2511 = vmatprep.subr.bf16.mxu1 %v9603_v1 }
 0x690   :  { %2512 = vmatpush1.bf16.msra.mxu1 %v10616_v45 }
 0x691   :  { %2513 = vmatprep.subr.bf16.mxu1 %v9603_v1 }
 0x694   :  { %2514 = vmatpush1.bf16.msra.mxu1 %v10623_v5 }
 0x695   :  { %2515 = vmatprep.subr.bf16.mxu1 %v9603_v1 }
 0x698   :  { %2516 = vmatpush1.bf16.msra.mxu1 %v10179_v12  ;;  %v2204_v12 = vpop.f32.mrb[60].mxu0 }
 0x699   :  { %2517 = vmatprep.subr.bf16.mxu1 %v9603_v1  ;;  %v2205_v16 = vadd.f32 %v10415_v46, %v2204_v12 }
 0x69b   :  { %v2210_v20 = vmax.f32 %v2205_v16, 0.0 }
 0x69c   :  { %2518 = vmatpush1.bf16.msra.mxu1 %v10186_v13  ;;  %v2206_v13 = vpop.f32.mrb[61].mxu0 }
 0x69d   :  { %2519 = vmatprep.subr.bf16.mxu1 %v9603_v1  ;;  %v2207_v22 = vpop.f32.mrb[62].mxu0 }
 0x69e   :  { %v2208_v23 = vpop.f32.mrb[63].mxu0 }
 0x6a0   :  { %2520 = vmatpush1.bf16.msra.mxu1 %v10193_v17 }
 0x6a1   :  { %2521 = vmatprep.subr.bf16.mxu1 %v9603_v1 }
 0x6a4   :  { %2522 = vmatpush1.bf16.msra.mxu1 %v10200_v18  ;;  %v9486_v18 = vld [vmem:[%s13059_s3 + $0x30] sm:$0xff]  }
 0x6a5   :  { %2523 = vmatprep.subr.bf16.mxu1 %v9603_v1  ;;  %9316 = vmatpush3.bf16.msra.mxu0 %v9486_v18  ;;  %v9487_v18 = vld [vmem:[%s13059_s3 + $0x38] sm:$0xff]  }
 0x6a6   :  { %2577 = vmatprep.subr.bf16.mxu0 %v9603_v1 }
 0x6a8   :  { %2524 = vmatpush1.bf16.msra.mxu1 %v10233_v21 }
 0x6a9   :  { %2525 = vmatprep.subr.bf16.mxu1 %v9603_v1 }
 0x6ac   :  { %2526 = vmatpush1.bf16.msra.mxu1 %v9762_v25 }
 0x6ad   :  { %2648 = vmatprep.subr.bf16.mxu1 %v9603_v1 }
 0x6af   :  { %2540 = vmatmul.mubr.bf16.vlgmr.msra.gmra.mrb[68].mxu1 %v2495_v31  ;;  %v2832_v31 = vrot.slane %v8923_v28, %v9707_v15 }
 0x6b0   :  { %2649 = vmatpush1.bf16.msra.mxu1 %v10602_v43  ;;  %8914 = vmatprep.mubr.msk.bf16.mxu1 %vm142_vm0, %v2643_v47 }
 0x6b1   :  { %2650 = vmatprep.subr.bf16.mxu1 %v9603_v1 }
 0x6b4   :  { %2651 = vmatpush1.bf16.msra.mxu1 %v10609_v44 }
 0x6b5   :  { %2652 = vmatprep.subr.bf16.mxu1 %v9603_v1 }
 0x6b6   :  { %v2345_v24 = vpop.f32.mrb[64].mxu0 }
 0x6b7   :  { %v2347_v17 = vpop.f32.mrb[65].mxu0  ;;  %v2346_v56 = vadd.f32 %v10415_v46, %v2345_v24 }
 0x6b8   :  { %v2348_v26 = vpop.f32.mrb[66].mxu0  ;;  %2653 = vmatpush1.bf16.msra.mxu1 %v10616_v45 }
 0x6b9   :  { %v2349_v27 = vpop.f32.mrb[67].mxu0  ;;  %2654 = vmatprep.subr.bf16.mxu1 %v9603_v1  ;;  %v2351_v58 = vmax.f32 %v2346_v56, 0.0 }
 0x6bc   :  { %2655 = vmatpush1.bf16.msra.mxu1 %v10623_v5 }
 0x6bd   :  { %2656 = vmatprep.subr.bf16.mxu1 %v9603_v1 }
 0x70a   :  { %v2134_v32 = vpop.f32.mrb[56].mxu1 }
 0x70b   :  { %v10650_v33 = vadd.f32 %v2134_v32, %v10512_v41  ;;  %v9313_v34 = vpop.f32.mrb[57].mxu1  ;;  %v10663_v41 = vld [vmem:[%s13057_s1 + $0x20] sm:$0xff]  }
 0x70c   :  { %v2137_v36 = vpop.f32.mrb[58].mxu1  ;;  %2657 = vmatpush1.bf16.msra.mxu1 %v10663_v41 }
 0x70d   :  { %v9314_v37 = vpop.f32.mrb[59].mxu1  ;;  %2658 = vmatprep.subr.bf16.mxu1 %v9603_v1 }
 0x710   :  { %2659 = vmatpush1.bf16.msra.mxu1 %v10670_v42 }
 0x711   :  { %2660 = vmatprep.subr.bf16.mxu1 %v9603_v1 }
 0x714   :  { %2661 = vmatpush1.bf16.msra.mxu1 %v10677_v14 }
 0x715   :  { %2662 = vmatprep.subr.bf16.mxu1 %v9603_v1 }
 0x718   :  { %2663 = vmatpush1.bf16.msra.mxu1 %v10684_v39 }
 0x719   :  { %2664 = vmatprep.subr.bf16.mxu1 %v9603_v1 }
 0x71c   :  { %2665 = vmatpush1.bf16.msra.mxu1 %v10233_v21 }
 0x71d   :  { %2666 = vmatprep.subr.bf16.mxu1 %v9603_v1 }
 0x720   :  { %2667 = vmatpush1.bf16.msra.mxu1 %v9762_v25 }
 0x721   :  { %9321 = vmatprep.subr.bf16.mxu1 %v9605_v51 }
 0x723   :  { %2681 = vmatmul.mubr.bf16.vlgmr.msra.gmra.mrb[72].mxu1 %v2636_v19 }
 0x724   :  { %9323 = vmatprep.mubr.msk.bf16.mxu1 %vm9606_vm2, %v9605_v51  ;;  %9322 = vmatpush3.bf16.msra.mxu1 %v9487_v18  ;;  %v8939_v18 = vld.sshfl [vmem:[%s13056_s0 + $0x48] sm:$0x11 pattern:$0x75316420] }
 0x725   :  { %2914 = vmatprep.subr.bf16.mxu1 %v9603_v1  ;;  %v3162_v28 = vcombine.high %v8939_v18, %v8939_v18 }
 0x727   :  { %v3176_v29 = vrot.slane %v3162_v28, %v9707_v15 }
 0x732   :  { %v2274_v21 = vpop.f32.mrb[60].mxu1 }
 0x733   :  { %v2275_v48 = vadd.f32 %v10415_v46, %v2274_v21  ;;  %v2276_v49 = vpop.f32.mrb[61].mxu1 }
 0x734   :  { %v2277_v50 = vpop.f32.mrb[62].mxu1 }
 0x735   :  { %v2280_v52 = vmax.f32 %v2275_v48, 0.0  ;;  %v2278_v54 = vpop.f32.mrb[63].mxu1 }
 0x737   :  { %v2281_v55 = vmax.f32 %v2210_v20, %v2280_v52 }
 0x75a   :  { %v2415_v57 = vpop.f32.mrb[64].mxu1 }
 0x75b   :  { %v2416_v59 = vadd.f32 %v10415_v46, %v2415_v57  ;;  %v2417_v60 = vpop.f32.mrb[65].mxu1 }
 0x75c   :  { %v2418_v62 = vpop.f32.mrb[66].mxu1 }
 0x75d   :  { %v2421_v63 = vmax.f32 %v2416_v59, 0.0  ;;  %v2419_v4 = vpop.f32.mrb[67].mxu1 }
 0x75f   :  { %v2422_v7 = vmax.f32 %v2351_v58, %v2421_v63 }
 0x761   :  { %v2423_v8 = vmax.f32 %v2281_v55, %v2422_v7 }
 0x763   :  { %v2424_v10 = vpack.c.bf16 %v2423_v8, %v2423_v8 }
 0x765   :  { %9318 = vmatmul.mubr.msk.bf16.vlgmr.msra.gmra.mrb[68].mxu0 %vm700_vm3, %v2424_v10 }
 0x766   :  { %2578 = vmatpush1.bf16.msra.mxu0 %v10602_v43  ;;  %8911 = vmatprep.mubr.msk.bf16.mxu0 %vm142_vm0, %v2572_v9  ;;  %v2909_v9 = vrot.slane %v2895_v6, %v9707_v15  ;;  %v3232_v6 = vcombine.high %v8942_v61, %v8942_v61 }
 0x767   :  { %2579 = vmatprep.subr.bf16.mxu0 %v9603_v1 }
 0x76a   :  { %2580 = vmatpush1.bf16.msra.mxu0 %v10609_v44 }
 0x76b   :  { %2581 = vmatprep.subr.bf16.mxu0 %v9603_v1 }
 0x76e   :  { %2582 = vmatpush1.bf16.msra.mxu0 %v10616_v45 }
 0x76f   :  { %2583 = vmatprep.subr.bf16.mxu0 %v9603_v1 }
 0x772   :  { %2584 = vmatpush1.bf16.msra.mxu0 %v10623_v5 }
 0x773   :  { %2585 = vmatprep.subr.bf16.mxu0 %v9603_v1 }
 0x776   :  { %2586 = vmatpush1.bf16.msra.mxu0 %v10663_v41 }
 0x777   :  { %2587 = vmatprep.subr.bf16.mxu0 %v9603_v1 }
 0x77a   :  { %2588 = vmatpush1.bf16.msra.mxu0 %v10670_v42 }
 0x77b   :  { %2589 = vmatprep.subr.bf16.mxu0 %v9603_v1 }
 0x77e   :  { %2590 = vmatpush1.bf16.msra.mxu0 %v10677_v14 }
 0x77f   :  { %2591 = vmatprep.subr.bf16.mxu0 %v9603_v1 }
 0x782   :  { %2592 = vmatpush1.bf16.msra.mxu0 %v10684_v39  ;;  %v2541_v12 = vpop.f32.mrb[68].mxu1 }
 0x783   :  { %2593 = vmatprep.subr.bf16.mxu0 %v9603_v1  ;;  %v2543_v13 = vpop.f32.mrb[69].mxu1  ;;  %v2542_v16 = vadd.f32 %v10415_v46, %v2541_v12 }
 0x784   :  { %v2544_v22 = vpop.f32.mrb[70].mxu1 }
 0x785   :  { %v2545_v23 = vpop.f32.mrb[71].mxu1  ;;  %v2547_v20 = vmax.f32 %v2542_v16, 0.0 }
 0x786   :  { %2594 = vmatpush1.bf16.msra.mxu0 %v10732_v53 }
 0x787   :  { %2595 = vmatprep.subr.bf16.mxu0 %v9603_v1 }
 0x78a   :  { %2596 = vmatpush1.bf16.msra.mxu0 %v9762_v25 }
 0x78b   :  { %2718 = vmatprep.subr.bf16.mxu0 %v9603_v1 }
 0x78d   :  { %2610 = vmatmul.mubr.bf16.vlgmr.msra.gmra.mrb[72].mxu0 %v2565_v2 }
 0x78e   :  { %2719 = vmatpush1.bf16.msra.mxu0 %v10602_v43  ;;  %8917 = vmatprep.mubr.msk.bf16.mxu0 %vm142_vm0, %v2713_v3 }
 0x78f   :  { %2720 = vmatprep.subr.bf16.mxu0 %v9603_v1 }
 0x792   :  { %2721 = vmatpush1.bf16.msra.mxu0 %v10609_v44 }
 0x793   :  { %2722 = vmatprep.subr.bf16.mxu0 %v9603_v1 }
 0x796   :  { %2723 = vmatpush1.bf16.msra.mxu0 %v10616_v45 }
 0x797   :  { %2724 = vmatprep.subr.bf16.mxu0 %v9603_v1 }
 0x79a   :  { %2725 = vmatpush1.bf16.msra.mxu0 %v10623_v5 }
 0x79b   :  { %2726 = vmatprep.subr.bf16.mxu0 %v9603_v1 }
 0x79e   :  { %2727 = vmatpush1.bf16.msra.mxu0 %v10663_v41 }
 0x79f   :  { %2728 = vmatprep.subr.bf16.mxu0 %v9603_v1 }
 0x7a2   :  { %2729 = vmatpush1.bf16.msra.mxu0 %v10670_v42 }
 0x7a3   :  { %2730 = vmatprep.subr.bf16.mxu0 %v9603_v1 }
 0x7a6   :  { %2731 = vmatpush1.bf16.msra.mxu0 %v10677_v14 }
 0x7a7   :  { %2732 = vmatprep.subr.bf16.mxu0 %v9603_v1 }
 0x7aa   :  { %2733 = vmatpush1.bf16.msra.mxu0 %v10684_v39 }
 0x7ab   :  { %2734 = vmatprep.subr.bf16.mxu0 %v9603_v1 }
 0x7ae   :  { %2735 = vmatpush1.bf16.msra.mxu0 %v10732_v53 }
 0x7af   :  { %2736 = vmatprep.subr.bf16.mxu0 %v9603_v1 }
 0x7b2   :  { %2737 = vmatpush1.bf16.msra.mxu0 %v9762_v25 }
 0x7b3   :  { %2844 = vmatprep.subr.bf16.mxu0 %v9603_v1 }
 0x7b5   :  { %2751 = vmatmul.mubr.bf16.vlgmr.msra.gmra.mrb[76].mxu0 %v2706_v40 }
 0x7b6   :  { %2845 = vmatpush1.bf16.msra.mxu0 %v10602_v43  ;;  %8924 = vmatprep.mubr.msk.bf16.mxu0 %vm142_vm0, %v2839_v30  ;;  %v3169_v30 = vrot.slane %v8939_v18, %v9707_v15  ;;  %v8955_v18 = vld.sshfl [vmem:[%s13056_s0 + $0x50] sm:$0x11 pattern:$0x75316420] }
 0x7b7   :  { %2846 = vmatprep.subr.bf16.mxu0 %v9603_v1  ;;  %v3499_v28 = vcombine.high %v8955_v18, %v8955_v18 }
 0x7ba   :  { %2847 = vmatpush1.bf16.msra.mxu0 %v10609_v44 }
 0x7bb   :  { %2848 = vmatprep.subr.bf16.mxu0 %v9603_v1 }
 0x7be   :  { %2849 = vmatpush1.bf16.msra.mxu0 %v10616_v45 }
 0x7bf   :  { %2850 = vmatprep.subr.bf16.mxu0 %v9603_v1 }
 0x7c2   :  { %2851 = vmatpush1.bf16.msra.mxu0 %v10623_v5 }
 0x7c3   :  { %2852 = vmatprep.subr.bf16.mxu0 %v9603_v1 }
 0x7c6   :  { %2853 = vmatpush1.bf16.msra.mxu0 %v10663_v41 }
 0x7c7   :  { %2854 = vmatprep.subr.bf16.mxu0 %v9603_v1 }
 0x7ca   :  { %2855 = vmatpush1.bf16.msra.mxu0 %v10670_v42 }
 0x7cb   :  { %2856 = vmatprep.subr.bf16.mxu0 %v9603_v1 }
 0x7ce   :  { %2857 = vmatpush1.bf16.msra.mxu0 %v10677_v14 }
 0x7cf   :  { %2858 = vmatprep.subr.bf16.mxu0 %v9603_v1 }
 0x7d2   :  { %2859 = vmatpush1.bf16.msra.mxu0 %v10684_v39 }
 0x7d3   :  { %2860 = vmatprep.subr.bf16.mxu0 %v9603_v1 }
 0x7d6   :  { %2861 = vmatpush1.bf16.msra.mxu0 %v10732_v53 }
 0x7d7   :  { %2862 = vmatprep.subr.bf16.mxu0 %v9603_v1 }
 0x7da   :  { %2863 = vmatpush1.bf16.msra.mxu0 %v9762_v25 }
 0x7db   :  { %2985 = vmatprep.subr.bf16.mxu0 %v9603_v1 }
 0x7dd   :  { %2877 = vmatmul.mubr.bf16.vlgmr.msra.gmra.mrb[80].mxu0 %v2832_v31 }
 0x7de   :  { %2986 = vmatpush1.bf16.msra.mxu0 %v10602_v43 }
 0x7df   :  { %2987 = vmatprep.subr.bf16.mxu0 %v9603_v1 }
 0x7e2   :  { %2988 = vmatpush1.bf16.msra.mxu0 %v10609_v44 }
 0x7e3   :  { %2989 = vmatprep.subr.bf16.mxu0 %v9603_v1 }
 0x7e6   :  { %2990 = vmatpush1.bf16.msra.mxu0 %v10616_v45 }
 0x7e7   :  { %2991 = vmatprep.subr.bf16.mxu0 %v9603_v1 }
 0x7ea   :  { %2992 = vmatpush1.bf16.msra.mxu0 %v10623_v5 }
 0x7eb   :  { %2993 = vmatprep.subr.bf16.mxu0 %v9603_v1 }
 0x7ee   :  { %2994 = vmatpush1.bf16.msra.mxu0 %v10663_v41 }
 0x7ef   :  { %2995 = vmatprep.subr.bf16.mxu0 %v9603_v1 }
 0x7f2   :  { %2996 = vmatpush1.bf16.msra.mxu0 %v10670_v42 }
 0x7f3   :  { %2997 = vmatprep.subr.bf16.mxu0 %v9603_v1 }
 0x7f6   :  { %v2682_v24 = vpop.f32.mrb[72].mxu1  ;;  %2998 = vmatpush1.bf16.msra.mxu0 %v10677_v14 }
 0x7f7   :  { %v2684_v17 = vpop.f32.mrb[73].mxu1  ;;  %2999 = vmatprep.subr.bf16.mxu0 %v9603_v1  ;;  %v2683_v56 = vadd.f32 %v10415_v46, %v2682_v24 }
 0x7f8   :  { %v2685_v26 = vpop.f32.mrb[74].mxu1 }
 0x7f9   :  { %v2686_v27 = vpop.f32.mrb[75].mxu1  ;;  %v2688_v58 = vmax.f32 %v2683_v56, 0.0 }
 0x7fa   :  { %3000 = vmatpush1.bf16.msra.mxu0 %v10684_v39  ;;  %v9488_v27 = vld [vmem:[%s13059_s3 + $0x40] sm:$0xff]  }
 0x7fb   :  { %3001 = vmatprep.subr.bf16.mxu0 %v9603_v1 }
 0x7fe   :  { %3002 = vmatpush1.bf16.msra.mxu0 %v10732_v53 }
 0x7ff   :  { %3003 = vmatprep.subr.bf16.mxu0 %v9603_v1 }
 0x802   :  { %3004 = vmatpush1.bf16.msra.mxu0 %v9762_v25 }
 0x803   :  { %9327 = vmatprep.subr.bf16.mxu0 %v9605_v51 }
 0x838   :  { %v2471_v32 = vpop.f32.mrb[68].mxu0 }
 0x839   :  { %v10793_v34 = vadd.f32 %v2471_v32, %v10650_v33  ;;  %v9319_v36 = vpop.f32.mrb[69].mxu0  ;;  %v8929_v33 = vld.sshfl [vmem:[%s13056_s0 + $0x44] sm:$0x11 pattern:$0x75316420] }
 0x83a   :  { %v2474_v37 = vpop.f32.mrb[70].mxu0  ;;  %v2966_v35 = vcombine.high %v8929_v33, %v8929_v33  ;;  %v2973_v19 = vrot.slane %v8929_v33, %v9707_v15 }
 0x83b   :  { %v9320_v38 = vpop.f32.mrb[71].mxu0 }
 0x83c   :  { %v2980_v47 = vrot.slane %v2966_v35, %v9707_v15  ;;  %v10937_v35 = vld [vmem:[%s13058_s2] ss:$0 sm:$0xff] }
 0x83e   :  { %8930 = vmatprep.mubr.msk.bf16.mxu0 %vm142_vm0, %v2980_v47 }
 0x83f   :  { %3018 = vmatmul.mubr.bf16.vlgmr.msra.gmra.mrb[84].mxu0 %v2973_v19 }
 0x840   :  { %9329 = vmatprep.mubr.msk.bf16.mxu0 %vm9606_vm2, %v9605_v51  ;;  %9328 = vmatpush3.bf16.msra.mxu0 %v9488_v27  ;;  %v9489_v27 = vld [vmem:[%s13059_s3 + $0x48] sm:$0xff]  }
 0x841   :  { %3251 = vmatprep.subr.bf16.mxu0 %v9603_v1 }
 0x860   :  { %v2611_v21 = vpop.f32.mrb[72].mxu0 }
 0x861   :  { %v2612_v48 = vadd.f32 %v10415_v46, %v2611_v21  ;;  %v2613_v49 = vpop.f32.mrb[73].mxu0 }
 0x862   :  { %v2614_v50 = vpop.f32.mrb[74].mxu0 }
 0x863   :  { %v2617_v52 = vmax.f32 %v2612_v48, 0.0  ;;  %v2615_v54 = vpop.f32.mrb[75].mxu0 }
 0x865   :  { %v2618_v55 = vmax.f32 %v2547_v20, %v2617_v52 }
 0x888   :  { %v2752_v57 = vpop.f32.mrb[76].mxu0 }
 0x889   :  { %v2753_v59 = vadd.f32 %v10415_v46, %v2752_v57  ;;  %v2754_v60 = vpop.f32.mrb[77].mxu0  ;;  %v8932_v46 = vld.sshfl [vmem:[%s13056_s0 + $0x46] sm:$0x11 pattern:$0x75316420] }
 0x88a   :  { %v2755_v62 = vpop.f32.mrb[78].mxu0  ;;  %v3036_v11 = vcombine.high %v8932_v46, %v8932_v46  ;;  %v3043_v3 = vrot.slane %v8932_v46, %v9707_v15  ;;  %v8948_v46 = vld.sshfl [vmem:[%s13056_s0 + $0x4e] sm:$0x11 pattern:$0x75316420] }
 0x88b   :  { %v2758_v63 = vmax.f32 %v2753_v59, 0.0  ;;  %v2756_v4 = vpop.f32.mrb[79].mxu0 }
 0x88c   :  { %v3050_v2 = vrot.slane %v3036_v11, %v9707_v15  ;;  %v3373_v11 = vcombine.high %v8948_v46, %v8948_v46 }
 0x88d   :  { %v2759_v7 = vmax.f32 %v2688_v58, %v2758_v63 }
 0x88f   :  { %v2760_v8 = vmax.f32 %v2618_v55, %v2759_v7 }
 0x891   :  { %v2761_v10 = vpack.c.bf16 %v2760_v8, %v2760_v8 }
 0x893   :  { %9324 = vmatmul.mubr.msk.bf16.vlgmr.msra.gmra.mrb[76].mxu1 %vm700_vm3, %v2761_v10 }
 0x894   :  { %2915 = vmatpush1.bf16.msra.mxu1 %v10602_v43  ;;  %8927 = vmatprep.mubr.msk.bf16.mxu1 %vm142_vm0, %v2909_v9  ;;  %v3246_v9 = vrot.slane %v3232_v6, %v9707_v15 }
 0x895   :  { %2916 = vmatprep.subr.bf16.mxu1 %v9603_v1 }
 0x898   :  { %2917 = vmatpush1.bf16.msra.mxu1 %v10609_v44 }
 0x899   :  { %2918 = vmatprep.subr.bf16.mxu1 %v9603_v1 }
 0x89c   :  { %2919 = vmatpush1.bf16.msra.mxu1 %v10616_v45 }
 0x89d   :  { %2920 = vmatprep.subr.bf16.mxu1 %v9603_v1 }
 0x8a0   :  { %2921 = vmatpush1.bf16.msra.mxu1 %v10623_v5 }
 0x8a1   :  { %2922 = vmatprep.subr.bf16.mxu1 %v9603_v1 }
 0x8a4   :  { %2923 = vmatpush1.bf16.msra.mxu1 %v10663_v41 }
 0x8a5   :  { %2924 = vmatprep.subr.bf16.mxu1 %v9603_v1 }
 0x8a8   :  { %2925 = vmatpush1.bf16.msra.mxu1 %v10670_v42 }
 0x8a9   :  { %2926 = vmatprep.subr.bf16.mxu1 %v9603_v1 }
 0x8ac   :  { %2927 = vmatpush1.bf16.msra.mxu1 %v10677_v14 }
 0x8ad   :  { %2928 = vmatprep.subr.bf16.mxu1 %v9603_v1 }
 0x8b0   :  { %2929 = vmatpush1.bf16.msra.mxu1 %v10684_v39  ;;  %v2878_v40 = vpop.f32.mrb[80].mxu0 }
 0x8b1   :  { %2930 = vmatprep.subr.bf16.mxu1 %v9603_v1  ;;  %v2880_v12 = vpop.f32.mrb[81].mxu0  ;;  %v2879_v16 = vadd.f32 %v10937_v35, %v2878_v40 }
 0x8b2   :  { %v2881_v13 = vpop.f32.mrb[82].mxu0 }
 0x8b3   :  { %v2882_v22 = vpop.f32.mrb[83].mxu0  ;;  %v2884_v20 = vmax.f32 %v2879_v16, 0.0 }
 0x8b4   :  { %2931 = vmatpush1.bf16.msra.mxu1 %v10732_v53 }
 0x8b5   :  { %2932 = vmatprep.subr.bf16.mxu1 %v9603_v1 }
 0x8b8   :  { %2933 = vmatpush1.bf16.msra.mxu1 %v9762_v25 }
 0x8b9   :  { %3055 = vmatprep.subr.bf16.mxu1 %v9603_v1 }
 0x8bb   :  { %2947 = vmatmul.mubr.bf16.vlgmr.msra.gmra.mrb[80].mxu1 %v2902_v0  ;;  %v3239_v0 = vrot.slane %v8942_v61, %v9707_v15 }
 0x8bc   :  { %3056 = vmatpush1.bf16.msra.mxu1 %v10602_v43  ;;  %8933 = vmatprep.mubr.msk.bf16.mxu1 %vm142_vm0, %v3050_v2  ;;  %v3387_v2 = vrot.slane %v3373_v11, %v9707_v15 }
 0x8bd   :  { %3057 = vmatprep.subr.bf16.mxu1 %v9603_v1 }
 0x8c0   :  { %3058 = vmatpush1.bf16.msra.mxu1 %v10609_v44 }
 0x8c1   :  { %3059 = vmatprep.subr.bf16.mxu1 %v9603_v1 }
 0x8c4   :  { %3060 = vmatpush1.bf16.msra.mxu1 %v10616_v45 }
 0x8c5   :  { %3061 = vmatprep.subr.bf16.mxu1 %v9603_v1 }
 0x8c8   :  { %3062 = vmatpush1.bf16.msra.mxu1 %v10623_v5 }
 0x8c9   :  { %3063 = vmatprep.subr.bf16.mxu1 %v9603_v1 }
 0x8cc   :  { %3064 = vmatpush1.bf16.msra.mxu1 %v10663_v41 }
 0x8cd   :  { %3065 = vmatprep.subr.bf16.mxu1 %v9603_v1 }
 0x8d0   :  { %3066 = vmatpush1.bf16.msra.mxu1 %v10670_v42 }
 0x8d1   :  { %3067 = vmatprep.subr.bf16.mxu1 %v9603_v1 }
 0x8d4   :  { %3068 = vmatpush1.bf16.msra.mxu1 %v10677_v14 }
 0x8d5   :  { %3069 = vmatprep.subr.bf16.mxu1 %v9603_v1 }
 0x8d8   :  { %3070 = vmatpush1.bf16.msra.mxu1 %v10684_v39 }
 0x8d9   :  { %3071 = vmatprep.subr.bf16.mxu1 %v9603_v1 }
 0x8dc   :  { %3072 = vmatpush1.bf16.msra.mxu1 %v10732_v53 }
 0x8dd   :  { %3073 = vmatprep.subr.bf16.mxu1 %v9603_v1 }
 0x8e0   :  { %3074 = vmatpush1.bf16.msra.mxu1 %v9762_v25 }
 0x8e1   :  { %3181 = vmatprep.subr.bf16.mxu1 %v9603_v1 }
 0x8e3   :  { %3088 = vmatmul.mubr.bf16.vlgmr.msra.gmra.mrb[84].mxu1 %v3043_v3  ;;  %v3380_v3 = vrot.slane %v8948_v46, %v9707_v15  ;;  %v8964_v46 = vld.sshfl [vmem:[%s13056_s0 + $0x56] sm:$0x11 pattern:$0x75316420] }
 0x8e4   :  { %3182 = vmatpush1.bf16.msra.mxu1 %v10602_v43  ;;  %8940 = vmatprep.mubr.msk.bf16.mxu1 %vm142_vm0, %v3176_v29  ;;  %v3513_v29 = vrot.slane %v3499_v28, %v9707_v15  ;;  %v3710_v11 = vcombine.high %v8964_v46, %v8964_v46 }
 0x8e5   :  { %3183 = vmatprep.subr.bf16.mxu1 %v9603_v1 }
 0x8e8   :  { %3184 = vmatpush1.bf16.msra.mxu1 %v10609_v44 }
 0x8e9   :  { %3185 = vmatprep.subr.bf16.mxu1 %v9603_v1 }
 0x8ec   :  { %3186 = vmatpush1.bf16.msra.mxu1 %v10616_v45 }
 0x8ed   :  { %3187 = vmatprep.subr.bf16.mxu1 %v9603_v1 }
 0x8f0   :  { %3188 = vmatpush1.bf16.msra.mxu1 %v10623_v5 }
 0x8f1   :  { %3189 = vmatprep.subr.bf16.mxu1 %v9603_v1 }
 0x8f4   :  { %3190 = vmatpush1.bf16.msra.mxu1 %v10663_v41 }
 0x8f5   :  { %3191 = vmatprep.subr.bf16.mxu1 %v9603_v1 }
 0x8f8   :  { %3192 = vmatpush1.bf16.msra.mxu1 %v10670_v42 }
 0x8f9   :  { %3193 = vmatprep.subr.bf16.mxu1 %v9603_v1 }
 0x8fc   :  { %3194 = vmatpush1.bf16.msra.mxu1 %v10677_v14 }
 0x8fd   :  { %3195 = vmatprep.subr.bf16.mxu1 %v9603_v1 }
 0x900   :  { %3196 = vmatpush1.bf16.msra.mxu1 %v10684_v39 }
 0x901   :  { %3197 = vmatprep.subr.bf16.mxu1 %v9603_v1 }
 0x904   :  { %3198 = vmatpush1.bf16.msra.mxu1 %v10732_v53 }
 0x905   :  { %3199 = vmatprep.subr.bf16.mxu1 %v9603_v1 }
 0x908   :  { %3200 = vmatpush1.bf16.msra.mxu1 %v9762_v25 }
 0x909   :  { %3322 = vmatprep.subr.bf16.mxu1 %v9603_v1 }
 0x90b   :  { %3214 = vmatmul.mubr.bf16.vlgmr.msra.gmra.mrb[88].mxu1 %v3169_v30  ;;  %v3506_v30 = vrot.slane %v8955_v18, %v9707_v15 }
 0x90c   :  { %3323 = vmatpush1.bf16.msra.mxu1 %v10602_v43 }
 0x90d   :  { %3324 = vmatprep.subr.bf16.mxu1 %v9603_v1 }
 0x910   :  { %3325 = vmatpush1.bf16.msra.mxu1 %v10609_v44 }
 0x911   :  { %3326 = vmatprep.subr.bf16.mxu1 %v9603_v1 }
 0x912   :  { %v3019_v23 = vpop.f32.mrb[84].mxu0 }
 0x913   :  { %v3021_v24 = vpop.f32.mrb[85].mxu0  ;;  %v3020_v56 = vadd.f32 %v10937_v35, %v3019_v23 }
 0x914   :  { %v3022_v17 = vpop.f32.mrb[86].mxu0  ;;  %3327 = vmatpush1.bf16.msra.mxu1 %v10616_v45 }
 0x915   :  { %v3023_v26 = vpop.f32.mrb[87].mxu0  ;;  %3328 = vmatprep.subr.bf16.mxu1 %v9603_v1  ;;  %v3025_v58 = vmax.f32 %v3020_v56, 0.0 }
 0x918   :  { %3329 = vmatpush1.bf16.msra.mxu1 %v10623_v5 }
 0x919   :  { %3330 = vmatprep.subr.bf16.mxu1 %v9603_v1 }
 0x91c   :  { %3331 = vmatpush1.bf16.msra.mxu1 %v10663_v41 }
 0x91d   :  { %3332 = vmatprep.subr.bf16.mxu1 %v9603_v1 }
 0x920   :  { %3333 = vmatpush1.bf16.msra.mxu1 %v10670_v42 }
 0x921   :  { %3334 = vmatprep.subr.bf16.mxu1 %v9603_v1 }
 0x924   :  { %3335 = vmatpush1.bf16.msra.mxu1 %v10677_v14 }
 0x925   :  { %3336 = vmatprep.subr.bf16.mxu1 %v9603_v1 }
 0x928   :  { %3337 = vmatpush1.bf16.msra.mxu1 %v10684_v39 }
 0x929   :  { %3338 = vmatprep.subr.bf16.mxu1 %v9603_v1 }
 0x92c   :  { %3339 = vmatpush1.bf16.msra.mxu1 %v10732_v53 }
 0x92d   :  { %3340 = vmatprep.subr.bf16.mxu1 %v9603_v1 }
 0x930   :  { %3341 = vmatpush1.bf16.msra.mxu1 %v9762_v25 }
 0x931   :  { %9333 = vmatprep.subr.bf16.mxu1 %v9605_v51 }
 0x966   :  { %v2808_v31 = vpop.f32.mrb[76].mxu1 }
 0x967   :  { %v10911_v32 = vadd.f32 %v2808_v31, %v10793_v34  ;;  %v9325_v36 = vpop.f32.mrb[77].mxu1  ;;  %v8945_v34 = vld.sshfl [vmem:[%s13056_s0 + $0x4c] sm:$0x11 pattern:$0x75316420] }
 0x968   :  { %v2811_v37 = vpop.f32.mrb[78].mxu1  ;;  %v3303_v33 = vcombine.high %v8945_v34, %v8945_v34  ;;  %v3310_v19 = vrot.slane %v8945_v34, %v9707_v15 }
 0x969   :  { %v9326_v38 = vpop.f32.mrb[79].mxu1 }
 0x96a   :  { %v3317_v47 = vrot.slane %v3303_v33, %v9707_v15 }
 0x96c   :  { %8946 = vmatprep.mubr.msk.bf16.mxu1 %vm142_vm0, %v3317_v47 }
 0x96d   :  { %3355 = vmatmul.mubr.bf16.vlgmr.msra.gmra.mrb[92].mxu1 %v3310_v19 }
 0x96e   :  { %9335 = vmatprep.mubr.msk.bf16.mxu1 %vm9606_vm2, %v9605_v51  ;;  %9334 = vmatpush3.bf16.msra.mxu1 %v9489_v27  ;;  %v9490_v27 = vld [vmem:[%s13059_s3 + $0x50] sm:$0xff]  }
 0x96f   :  { %3588 = vmatprep.subr.bf16.mxu1 %v9603_v1 }
 0x98e   :  { %v2948_v21 = vpop.f32.mrb[80].mxu1 }
 0x98f   :  { %v2949_v48 = vadd.f32 %v10937_v35, %v2948_v21  ;;  %v2950_v49 = vpop.f32.mrb[81].mxu1 }
 0x990   :  { %v2951_v50 = vpop.f32.mrb[82].mxu1 }
 0x991   :  { %v2954_v52 = vmax.f32 %v2949_v48, 0.0  ;;  %v2952_v54 = vpop.f32.mrb[83].mxu1 }
 0x993   :  { %v2955_v55 = vmax.f32 %v2884_v20, %v2954_v52 }
 0x9b6   :  { %v3089_v57 = vpop.f32.mrb[84].mxu1 }
 0x9b7   :  { %v3090_v59 = vadd.f32 %v10937_v35, %v3089_v57  ;;  %v3091_v60 = vpop.f32.mrb[85].mxu1  ;;  %v8958_v57 = vld.sshfl [vmem:[%s13056_s0 + $0x52] sm:$0x11 pattern:$0x75316420] }
 0x9b8   :  { %v3092_v62 = vpop.f32.mrb[86].mxu1  ;;  %v3569_v61 = vcombine.high %v8958_v57, %v8958_v57 }
 0x9b9   :  { %v3095_v63 = vmax.f32 %v3090_v59, 0.0  ;;  %v3093_v4 = vpop.f32.mrb[87].mxu1 }
 0x9ba   :  { %v3583_v4 = vrot.slane %v3569_v61, %v9707_v15 }
 0x9bb   :  { %v3096_v7 = vmax.f32 %v3025_v58, %v3095_v63 }
 0x9bd   :  { %v3097_v8 = vmax.f32 %v2955_v55, %v3096_v7  ;;  %v11076_v7 = vld [vmem:[%s13057_s1] sm:$0xff]  }
 0x9bf   :  { %v3098_v10 = vpack.c.bf16 %v3097_v8, %v3097_v8  ;;  %v11084_v8 = vld [vmem:[%s13057_s1 + $0x8] sm:$0xff]  }
 0x9c1   :  { %9330 = vmatmul.mubr.msk.bf16.vlgmr.msra.gmra.mrb[88].mxu0 %vm700_vm3, %v3098_v10  ;;  %v11098_v10 = vld [vmem:[%s13057_s1 + $0x18] sm:$0xff]  }
 0x9c2   :  { %3252 = vmatpush1.bf16.msra.mxu0 %v10602_v43  ;;  %8943 = vmatprep.mubr.msk.bf16.mxu0 %vm142_vm0, %v3246_v9  ;;  %v11091_v9 = vld [vmem:[%s13057_s1 + $0x10] sm:$0xff]  }
 0x9c3   :  { %3253 = vmatprep.subr.bf16.mxu0 %v9603_v1 }
 0x9c6   :  { %3254 = vmatpush1.bf16.msra.mxu0 %v10609_v44 }
 0x9c7   :  { %3255 = vmatprep.subr.bf16.mxu0 %v9603_v1 }
 0x9ca   :  { %3256 = vmatpush1.bf16.msra.mxu0 %v10616_v45 }
 0x9cb   :  { %3257 = vmatprep.subr.bf16.mxu0 %v9603_v1 }
 0x9ce   :  { %3258 = vmatpush1.bf16.msra.mxu0 %v10623_v5 }
 0x9cf   :  { %3259 = vmatprep.subr.bf16.mxu0 %v9603_v1 }
 0x9d2   :  { %3260 = vmatpush1.bf16.msra.mxu0 %v10663_v41 }
 0x9d3   :  { %3261 = vmatprep.subr.bf16.mxu0 %v9603_v1 }
 0x9d6   :  { %3262 = vmatpush1.bf16.msra.mxu0 %v10670_v42 }
 0x9d7   :  { %3263 = vmatprep.subr.bf16.mxu0 %v9603_v1 }
 0x9da   :  { %3264 = vmatpush1.bf16.msra.mxu0 %v10677_v14 }
 0x9db   :  { %3265 = vmatprep.subr.bf16.mxu0 %v9603_v1 }
 0x9de   :  { %3266 = vmatpush1.bf16.msra.mxu0 %v10684_v39  ;;  %v3215_v40 = vpop.f32.mrb[88].mxu1 }
 0x9df   :  { %3267 = vmatprep.subr.bf16.mxu0 %v9603_v1  ;;  %v3217_v12 = vpop.f32.mrb[89].mxu1 }
 0x9e0   :  { %v3218_v13 = vpop.f32.mrb[90].mxu1 }
 0x9e1   :  { %v3219_v22 = vpop.f32.mrb[91].mxu1 }
 0x9e2   :  { %3268 = vmatpush1.bf16.msra.mxu0 %v10732_v53 }
 0x9e3   :  { %3269 = vmatprep.subr.bf16.mxu0 %v9603_v1 }
 0x9e6   :  { %3270 = vmatpush1.bf16.msra.mxu0 %v9762_v25 }
 0x9e7   :  { %3392 = vmatprep.subr.bf16.mxu0 %v9603_v1 }
 0x9e9   :  { %3284 = vmatmul.mubr.bf16.vlgmr.msra.gmra.mrb[92].mxu0 %v3239_v0  ;;  %v3576_v0 = vrot.slane %v8958_v57, %v9707_v15  ;;  %v8974_v57 = vld.sshfl [vmem:[%s13056_s0 + $0x5a] sm:$0x11 pattern:$0x75316420] }
 0x9ea   :  { %3393 = vmatpush1.bf16.msra.mxu0 %v10602_v43  ;;  %8949 = vmatprep.mubr.msk.bf16.mxu0 %vm142_vm0, %v3387_v2  ;;  %v3724_v2 = vrot.slane %v3710_v11, %v9707_v15  ;;  %v3906_v61 = vcombine.high %v8974_v57, %v8974_v57 }
 0x9eb   :  { %3394 = vmatprep.subr.bf16.mxu0 %v9603_v1 }
 0x9ee   :  { %3395 = vmatpush1.bf16.msra.mxu0 %v10609_v44 }
 0x9ef   :  { %3396 = vmatprep.subr.bf16.mxu0 %v9603_v1 }
 0x9f2   :  { %3397 = vmatpush1.bf16.msra.mxu0 %v10616_v45 }
 0x9f3   :  { %3398 = vmatprep.subr.bf16.mxu0 %v9603_v1 }
 0x9f6   :  { %3399 = vmatpush1.bf16.msra.mxu0 %v10623_v5 }
 0x9f7   :  { %3400 = vmatprep.subr.bf16.mxu0 %v9603_v1 }
 0x9fa   :  { %3401 = vmatpush1.bf16.msra.mxu0 %v10663_v41 }
 0x9fb   :  { %3402 = vmatprep.subr.bf16.mxu0 %v9603_v1 }
 0x9fe   :  { %3403 = vmatpush1.bf16.msra.mxu0 %v10670_v42 }
 0x9ff   :  { %3404 = vmatprep.subr.bf16.mxu0 %v9603_v1 }
 0xa02   :  { %3405 = vmatpush1.bf16.msra.mxu0 %v10677_v14 }
 0xa03   :  { %3406 = vmatprep.subr.bf16.mxu0 %v9603_v1 }
 0xa06   :  { %3407 = vmatpush1.bf16.msra.mxu0 %v10684_v39 }
 0xa07   :  { %3408 = vmatprep.subr.bf16.mxu0 %v9603_v1 }
 0xa0a   :  { %3409 = vmatpush1.bf16.msra.mxu0 %v10732_v53 }
 0xa0b   :  { %3410 = vmatprep.subr.bf16.mxu0 %v9603_v1 }
 0xa0e   :  { %3411 = vmatpush1.bf16.msra.mxu0 %v9762_v25 }
 0xa0f   :  { %3518 = vmatprep.subr.bf16.mxu0 %v9603_v1 }
 0xa11   :  { %3425 = vmatmul.mubr.bf16.vlgmr.msra.gmra.mrb[96].mxu0 %v3380_v3  ;;  %v11173_v3 = vld [vmem:[%s13057_s1 + $0x38] sm:$0xff]  }
 0xa12   :  { %3519 = vmatpush1.bf16.msra.mxu0 %v10602_v43  ;;  %8956 = vmatprep.mubr.msk.bf16.mxu0 %vm142_vm0, %v3513_v29 }
 0xa13   :  { %3520 = vmatprep.subr.bf16.mxu0 %v9603_v1 }
 0xa16   :  { %3521 = vmatpush1.bf16.msra.mxu0 %v10609_v44 }
 0xa17   :  { %3522 = vmatprep.subr.bf16.mxu0 %v9603_v1 }
 0xa1a   :  { %3523 = vmatpush1.bf16.msra.mxu0 %v10616_v45 }
 0xa1b   :  { %3524 = vmatprep.subr.bf16.mxu0 %v9603_v1 }
 0xa1e   :  { %3525 = vmatpush1.bf16.msra.mxu0 %v10623_v5 }
 0xa1f   :  { %3526 = vmatprep.subr.bf16.mxu0 %v9603_v1 }
 0xa22   :  { %3527 = vmatpush1.bf16.msra.mxu0 %v10663_v41 }
 0xa23   :  { %3528 = vmatprep.subr.bf16.mxu0 %v9603_v1 }
 0xa26   :  { %3529 = vmatpush1.bf16.msra.mxu0 %v10670_v42 }
 0xa27   :  { %3530 = vmatprep.subr.bf16.mxu0 %v9603_v1 }
 0xa2a   :  { %3531 = vmatpush1.bf16.msra.mxu0 %v10677_v14 }
 0xa2b   :  { %3532 = vmatprep.subr.bf16.mxu0 %v9603_v1 }
 0xa2e   :  { %3533 = vmatpush1.bf16.msra.mxu0 %v10684_v39 }
 0xa2f   :  { %3534 = vmatprep.subr.bf16.mxu0 %v9603_v1 }
 0xa32   :  { %3535 = vmatpush1.bf16.msra.mxu0 %v10732_v53 }
 0xa33   :  { %3536 = vmatprep.subr.bf16.mxu0 %v9603_v1 }
 0xa36   :  { %3537 = vmatpush1.bf16.msra.mxu0 %v9762_v25 }
 0xa37   :  { %3659 = vmatprep.subr.bf16.mxu0 %v9603_v1 }
 0xa39   :  { %3551 = vmatmul.mubr.bf16.vlgmr.msra.gmra.mrb[100].mxu0 %v3506_v30 }
 0xa3a   :  { %3660 = vmatpush1.bf16.msra.mxu0 %v10602_v43  ;;  %v8961_v43 = vld.sshfl [vmem:[%s13056_s0 + $0x54] sm:$0x11 pattern:$0x75316420] }
 0xa3b   :  { %3661 = vmatprep.subr.bf16.mxu0 %v9603_v1 }
 0xa3e   :  { %3662 = vmatpush1.bf16.msra.mxu0 %v10609_v44  ;;  %v3640_v44 = vcombine.high %v8961_v43, %v8961_v43 }
 0xa3f   :  { %3663 = vmatprep.subr.bf16.mxu0 %v9603_v1 }
 0xa40   :  { %v3356_v23 = vpop.f32.mrb[92].mxu1 }
 0xa41   :  { %v3358_v24 = vpop.f32.mrb[93].mxu1  ;;  %v3357_v50 = vadd.f32 %v10937_v35, %v3356_v23 }
 0xa42   :  { %v3359_v17 = vpop.f32.mrb[94].mxu1  ;;  %3664 = vmatpush1.bf16.msra.mxu0 %v10616_v45  ;;  %v3216_v45 = vadd.f32 %v10937_v35, %v3215_v40 }
 0xa43   :  { %v3360_v26 = vpop.f32.mrb[95].mxu1  ;;  %3665 = vmatprep.subr.bf16.mxu0 %v9603_v1  ;;  %v3362_v54 = vmax.f32 %v3357_v50, 0.0 }
 0xa44   :  { %v3221_v16 = vmax.f32 %v3216_v45, 0.0 }
 0xa46   :  { %3666 = vmatpush1.bf16.msra.mxu0 %v10623_v5  ;;  %v3654_v5 = vrot.slane %v3640_v44, %v9707_v15 }
 0xa47   :  { %3667 = vmatprep.subr.bf16.mxu0 %v9603_v1 }
 0xa48   :  { %8962 = vmatprep.mubr.msk.bf16.mxu0 %vm142_vm0, %v3654_v5 }
 0xa4a   :  { %3668 = vmatpush1.bf16.msra.mxu0 %v10663_v41 }
 0xa4b   :  { %3669 = vmatprep.subr.bf16.mxu0 %v9603_v1 }
 0xa4e   :  { %3670 = vmatpush1.bf16.msra.mxu0 %v10670_v42 }
 0xa4f   :  { %3671 = vmatprep.subr.bf16.mxu0 %v9603_v1 }
 0xa52   :  { %3672 = vmatpush1.bf16.msra.mxu0 %v10677_v14 }
 0xa53   :  { %3673 = vmatprep.subr.bf16.mxu0 %v9603_v1 }
 0xa56   :  { %3674 = vmatpush1.bf16.msra.mxu0 %v10684_v39 }
 0xa57   :  { %3675 = vmatprep.subr.bf16.mxu0 %v9603_v1 }
 0xa5a   :  { %3676 = vmatpush1.bf16.msra.mxu0 %v10732_v53 }
 0xa5b   :  { %3677 = vmatprep.subr.bf16.mxu0 %v9603_v1 }
 0xa5e   :  { %3678 = vmatpush1.bf16.msra.mxu0 %v9762_v25 }
 0xa5f   :  { %9339 = vmatprep.subr.bf16.mxu0 %v9605_v51 }
 0xa94   :  { %v3145_v31 = vpop.f32.mrb[88].mxu0 }
 0xa95   :  { %v11034_v36 = vadd.f32 %v3145_v31, %v10911_v32  ;;  %v9331_v37 = vpop.f32.mrb[89].mxu0  ;;  %v3647_v32 = vrot.slane %v8961_v43, %v9707_v15  ;;  %v8977_v43 = vld.sshfl [vmem:[%s13056_s0 + $0x5c] sm:$0x11 pattern:$0x75316420] }
 0xa96   :  { %v3148_v38 = vpop.f32.mrb[90].mxu0  ;;  %v3977_v44 = vcombine.high %v8977_v43, %v8977_v43 }
 0xa97   :  { %v9332_v34 = vpop.f32.mrb[91].mxu0  ;;  %3692 = vmatmul.mubr.bf16.vlgmr.msra.gmra.mrb[104].mxu0 %v3647_v32  ;;  %v3984_v32 = vrot.slane %v8977_v43, %v9707_v15 }
 0xa98   :  { %9341 = vmatprep.mubr.msk.bf16.mxu0 %vm9606_vm2, %v9605_v51  ;;  %9340 = vmatpush3.bf16.msra.mxu0 %v9490_v27  ;;  %v3991_v5 = vrot.slane %v3977_v44, %v9707_v15  ;;  %v9491_v27 = vld [vmem:[%s13059_s3 + $0x58] sm:$0xff]  }
 0xa99   :  { %3925 = vmatprep.subr.bf16.mxu0 %v9603_v1 }
 0xabc   :  { %v3285_v33 = vpop.f32.mrb[92].mxu0 }
 0xabd   :  { %v3286_v47 = vadd.f32 %v10937_v35, %v3285_v33  ;;  %v3287_v19 = vpop.f32.mrb[93].mxu0 }
 0xabe   :  { %v3288_v21 = vpop.f32.mrb[94].mxu0 }
 0xabf   :  { %v3291_v20 = vmax.f32 %v3286_v47, 0.0  ;;  %v3289_v48 = vpop.f32.mrb[95].mxu0 }
 0xac1   :  { %v3292_v49 = vmax.f32 %v3221_v16, %v3291_v20 }
 0xae4   :  { %v3426_v52 = vpop.f32.mrb[96].mxu0 }
 0xae5   :  { %v3427_v55 = vadd.f32 %v10937_v35, %v3426_v52  ;;  %v3428_v56 = vpop.f32.mrb[97].mxu0 }
 0xae6   :  { %v3429_v58 = vpop.f32.mrb[98].mxu0 }
 0xae7   :  { %v3432_v59 = vmax.f32 %v3427_v55, 0.0  ;;  %v3430_v60 = vpop.f32.mrb[99].mxu0 }
 0xae9   :  { %v3433_v62 = vmax.f32 %v3362_v54, %v3432_v59 }
 0xaeb   :  { %v3434_v63 = vmax.f32 %v3292_v49, %v3433_v62 }
 0xaed   :  { %v3435_v6 = vpack.c.bf16 %v3434_v63, %v3434_v63 }
 0xaef   :  { %9336 = vmatmul.mubr.msk.bf16.vlgmr.msra.gmra.mrb[96].mxu1 %vm700_vm3, %v3435_v6 }
 0xaf0   :  { %3589 = vmatpush1.bf16.msra.mxu1 %v11076_v7  ;;  %8959 = vmatprep.mubr.msk.bf16.mxu1 %vm142_vm0, %v3583_v4  ;;  %v3920_v4 = vrot.slane %v3906_v61, %v9707_v15 }
 0xaf1   :  { %3590 = vmatprep.subr.bf16.mxu1 %v9603_v1 }
 0xaf4   :  { %3591 = vmatpush1.bf16.msra.mxu1 %v11084_v8 }
 0xaf5   :  { %3592 = vmatprep.subr.bf16.mxu1 %v9603_v1 }
 0xaf8   :  { %3593 = vmatpush1.bf16.msra.mxu1 %v11091_v9 }
 0xaf9   :  { %3594 = vmatprep.subr.bf16.mxu1 %v9603_v1 }
 0xafc   :  { %3595 = vmatpush1.bf16.msra.mxu1 %v11098_v10 }
 0xafd   :  { %3596 = vmatprep.subr.bf16.mxu1 %v9603_v1 }
 0xb00   :  { %3597 = vmatpush1.bf16.msra.mxu1 %v10663_v41 }
 0xb01   :  { %3598 = vmatprep.subr.bf16.mxu1 %v9603_v1 }
 0xb04   :  { %3599 = vmatpush1.bf16.msra.mxu1 %v10670_v42 }
 0xb05   :  { %3600 = vmatprep.subr.bf16.mxu1 %v9603_v1 }
 0xb08   :  { %3601 = vmatpush1.bf16.msra.mxu1 %v10677_v14 }
 0xb09   :  { %3602 = vmatprep.subr.bf16.mxu1 %v9603_v1 }
 0xb0c   :  { %3603 = vmatpush1.bf16.msra.mxu1 %v10684_v39  ;;  %v3552_v40 = vpop.f32.mrb[100].mxu0 }
 0xb0d   :  { %3604 = vmatprep.subr.bf16.mxu1 %v9603_v1  ;;  %v3554_v12 = vpop.f32.mrb[101].mxu0  ;;  %v3553_v45 = vadd.f32 %v10937_v35, %v3552_v40 }
 0xb0e   :  { %v3555_v13 = vpop.f32.mrb[102].mxu0 }
 0xb0f   :  { %v3556_v22 = vpop.f32.mrb[103].mxu0  ;;  %v3558_v16 = vmax.f32 %v3553_v45, 0.0 }
 0xb10   :  { %3605 = vmatpush1.bf16.msra.mxu1 %v10732_v53 }
 0xb11   :  { %3606 = vmatprep.subr.bf16.mxu1 %v9603_v1 }
 0xb14   :  { %3607 = vmatpush1.bf16.msra.mxu1 %v9762_v25 }
 0xb15   :  { %3729 = vmatprep.subr.bf16.mxu1 %v9603_v1 }
 0xb17   :  { %3621 = vmatmul.mubr.bf16.vlgmr.msra.gmra.mrb[100].mxu1 %v3576_v0  ;;  %v3913_v0 = vrot.slane %v8974_v57, %v9707_v15  ;;  %v8990_v57 = vld.sshfl [vmem:[%s13056_s0 + $0x62] sm:$0x11 pattern:$0x75316420] }
 0xb18   :  { %3730 = vmatpush1.bf16.msra.mxu1 %v11076_v7  ;;  %8965 = vmatprep.mubr.msk.bf16.mxu1 %vm142_vm0, %v3724_v2  ;;  %v4243_v61 = vcombine.high %v8990_v57, %v8990_v57 }
 0xb19   :  { %3731 = vmatprep.subr.bf16.mxu1 %v9603_v1 }
 0xb1c   :  { %3732 = vmatpush1.bf16.msra.mxu1 %v11084_v8 }
 0xb1d   :  { %3733 = vmatprep.subr.bf16.mxu1 %v9603_v1 }
 0xb20   :  { %3734 = vmatpush1.bf16.msra.mxu1 %v11091_v9 }
 0xb21   :  { %3735 = vmatprep.subr.bf16.mxu1 %v9603_v1 }
 0xb24   :  { %3736 = vmatpush1.bf16.msra.mxu1 %v11098_v10 }
 0xb25   :  { %3737 = vmatprep.subr.bf16.mxu1 %v9603_v1 }
 0xb28   :  { %3738 = vmatpush1.bf16.msra.mxu1 %v10663_v41  ;;  %v3717_v41 = vrot.slane %v8964_v46, %v9707_v15  ;;  %v8980_v46 = vld.sshfl [vmem:[%s13056_s0 + $0x5e] sm:$0x11 pattern:$0x75316420] }
 0xb29   :  { %3739 = vmatprep.subr.bf16.mxu1 %v9603_v1  ;;  %v4047_v11 = vcombine.high %v8980_v46, %v8980_v46 }
 0xb2b   :  { %v4061_v2 = vrot.slane %v4047_v11, %v9707_v15  ;;  %v4250_v11 = vrot.slane %v8990_v57, %v9707_v15  ;;  %v9006_v57 = vld.sshfl [vmem:[%s13056_s0 + $0x6a] sm:$0x11 pattern:$0x75316420] }
 0xb2c   :  { %3740 = vmatpush1.bf16.msra.mxu1 %v10670_v42  ;;  %v11152_v42 = vld [vmem:[%s13057_s1 + $0x20] sm:$0xff]  }
 0xb2d   :  { %3741 = vmatprep.subr.bf16.mxu1 %v9603_v1 }
 0xb30   :  { %3742 = vmatpush1.bf16.msra.mxu1 %v10677_v14  ;;  %v11159_v14 = vld [vmem:[%s13057_s1 + $0x28] sm:$0xff]  }
 0xb31   :  { %3743 = vmatprep.subr.bf16.mxu1 %v9603_v1 }
 0xb34   :  { %3744 = vmatpush1.bf16.msra.mxu1 %v10684_v39  ;;  %v11166_v39 = vld [vmem:[%s13057_s1 + $0x30] sm:$0xff]  }
 0xb35   :  { %3745 = vmatprep.subr.bf16.mxu1 %v9603_v1 }
 0xb38   :  { %3746 = vmatpush1.bf16.msra.mxu1 %v10732_v53 }
 0xb39   :  { %3747 = vmatprep.subr.bf16.mxu1 %v9603_v1 }
 0xb3c   :  { %3748 = vmatpush1.bf16.msra.mxu1 %v9762_v25 }
 0xb3d   :  { %3855 = vmatprep.subr.bf16.mxu1 %v9603_v1 }
 0xb3f   :  { %3762 = vmatmul.mubr.bf16.vlgmr.msra.gmra.mrb[104].mxu1 %v3717_v41  ;;  %v4054_v41 = vrot.slane %v8980_v46, %v9707_v15 }
 0xb40   :  { %3856 = vmatpush1.bf16.msra.mxu1 %v11076_v7 }
 0xb41   :  { %3857 = vmatprep.subr.bf16.mxu1 %v9603_v1 }
 0xb44   :  { %3858 = vmatpush1.bf16.msra.mxu1 %v11084_v8 }
 0xb45   :  { %3859 = vmatprep.subr.bf16.mxu1 %v9603_v1 }
 0xb48   :  { %3860 = vmatpush1.bf16.msra.mxu1 %v11091_v9 }
 0xb49   :  { %3861 = vmatprep.subr.bf16.mxu1 %v9603_v1 }
 0xb4c   :  { %3862 = vmatpush1.bf16.msra.mxu1 %v11098_v10 }
 0xb4d   :  { %3863 = vmatprep.subr.bf16.mxu1 %v9603_v1 }
 0xb50   :  { %3864 = vmatpush1.bf16.msra.mxu1 %v11152_v42 }
 0xb51   :  { %3865 = vmatprep.subr.bf16.mxu1 %v9603_v1 }
 0xb54   :  { %3866 = vmatpush1.bf16.msra.mxu1 %v11159_v14 }
 0xb55   :  { %3867 = vmatprep.subr.bf16.mxu1 %v9603_v1 }
 0xb58   :  { %3868 = vmatpush1.bf16.msra.mxu1 %v11166_v39 }
 0xb59   :  { %3869 = vmatprep.subr.bf16.mxu1 %v9603_v1 }
 0xb5c   :  { %3870 = vmatpush1.bf16.msra.mxu1 %v11173_v3 }
 0xb5d   :  { %3871 = vmatprep.subr.bf16.mxu1 %v9603_v1 }
 0xb60   :  { %3872 = vmatpush1.bf16.msra.mxu1 %v10732_v53  ;;  %v8971_v53 = vld.sshfl [vmem:[%s13056_s0 + $0x58] sm:$0x11 pattern:$0x75316420] }
 0xb61   :  { %3873 = vmatprep.subr.bf16.mxu1 %v9603_v1  ;;  %v3836_v18 = vcombine.high %v8971_v53, %v8971_v53  ;;  %v3843_v29 = vrot.slane %v8971_v53, %v9707_v15  ;;  %v8987_v53 = vld.sshfl [vmem:[%s13056_s0 + $0x60] sm:$0x11 pattern:$0x75316420] }
 0xb63   :  { %v3850_v28 = vrot.slane %v3836_v18, %v9707_v15  ;;  %v4173_v18 = vcombine.high %v8987_v53, %v8987_v53 }
 0xb64   :  { %3874 = vmatpush1.bf16.msra.mxu1 %v9762_v25 }
 0xb65   :  { %3996 = vmatprep.subr.bf16.mxu1 %v9603_v1  ;;  %8972 = vmatprep.mubr.msk.bf16.mxu1 %vm142_vm0, %v3850_v28  ;;  %v4187_v28 = vrot.slane %v4173_v18, %v9707_v15 }
 0xb67   :  { %3888 = vmatmul.mubr.bf16.vlgmr.msra.gmra.mrb[108].mxu1 %v3843_v29  ;;  %v4180_v29 = vrot.slane %v8987_v53, %v9707_v15 }
 0xb68   :  { %3997 = vmatpush1.bf16.msra.mxu1 %v11076_v7  ;;  %8978 = vmatprep.mubr.msk.bf16.mxu1 %vm142_vm0, %v3991_v5 }
 0xb69   :  { %3998 = vmatprep.subr.bf16.mxu1 %v9603_v1 }
 0xb6a   :  { %v3693_v23 = vpop.f32.mrb[104].mxu0 }
 0xb6b   :  { %v3695_v24 = vpop.f32.mrb[105].mxu0  ;;  %v3694_v50 = vadd.f32 %v10937_v35, %v3693_v23 }
 0xb6c   :  { %v3696_v17 = vpop.f32.mrb[106].mxu0  ;;  %3999 = vmatpush1.bf16.msra.mxu1 %v11084_v8 }
 0xb6d   :  { %v3697_v26 = vpop.f32.mrb[107].mxu0  ;;  %4000 = vmatprep.subr.bf16.mxu1 %v9603_v1  ;;  %v3699_v54 = vmax.f32 %v3694_v50, 0.0 }
 0xb70   :  { %4001 = vmatpush1.bf16.msra.mxu1 %v11091_v9 }
 0xb71   :  { %4002 = vmatprep.subr.bf16.mxu1 %v9603_v1 }
 0xb74   :  { %4003 = vmatpush1.bf16.msra.mxu1 %v11098_v10 }
 0xb75   :  { %4004 = vmatprep.subr.bf16.mxu1 %v9603_v1 }
 0xb78   :  { %4005 = vmatpush1.bf16.msra.mxu1 %v11152_v42 }
 0xb79   :  { %4006 = vmatprep.subr.bf16.mxu1 %v9603_v1 }
 0xb7c   :  { %4007 = vmatpush1.bf16.msra.mxu1 %v11159_v14 }
 0xb7d   :  { %4008 = vmatprep.subr.bf16.mxu1 %v9603_v1 }
 0xb80   :  { %4009 = vmatpush1.bf16.msra.mxu1 %v11166_v39 }
 0xb81   :  { %4010 = vmatprep.subr.bf16.mxu1 %v9603_v1 }
 0xb84   :  { %4011 = vmatpush1.bf16.msra.mxu1 %v11173_v3 }
 0xb85   :  { %4012 = vmatprep.subr.bf16.mxu1 %v9603_v1 }
 0xbc2   :  { %v3482_v30 = vpop.f32.mrb[96].mxu1 }
 0xbc3   :  { %v11192_v31 = vadd.f32 %v3482_v30, %v11034_v36  ;;  %v9337_v37 = vpop.f32.mrb[97].mxu1  ;;  %v11213_v36 = vld [vmem:[%s13057_s1 + $0x40] sm:$0xff]  }
 0xbc4   :  { %v3485_v38 = vpop.f32.mrb[98].mxu1  ;;  %4013 = vmatpush1.bf16.msra.mxu1 %v11213_v36 }
 0xbc5   :  { %v9338_v34 = vpop.f32.mrb[99].mxu1  ;;  %4014 = vmatprep.subr.bf16.mxu1 %v9603_v1 }
 0xbc8   :  { %4015 = vmatpush1.bf16.msra.mxu1 %v9762_v25 }
 0xbc9   :  { %9345 = vmatprep.subr.bf16.mxu1 %v9605_v51 }
 0xbcb   :  { %4029 = vmatmul.mubr.bf16.vlgmr.msra.gmra.mrb[112].mxu1 %v3984_v32 }
 0xbcc   :  { %9347 = vmatprep.mubr.msk.bf16.mxu1 %vm9606_vm2, %v9605_v51  ;;  %9346 = vmatpush3.bf16.msra.mxu1 %v9491_v27  ;;  %v9003_v27 = vld.sshfl [vmem:[%s13056_s0 + $0x68] sm:$0x11 pattern:$0x75316420] }
 0xbcd   :  { %4262 = vmatprep.subr.bf16.mxu1 %v9603_v1  ;;  %v4510_v53 = vcombine.high %v9003_v27, %v9003_v27 }
 0xbcf   :  { %v4524_v18 = vrot.slane %v4510_v53, %v9707_v15 }
 0xbea   :  { %v3622_v33 = vpop.f32.mrb[100].mxu1 }
 0xbeb   :  { %v3623_v47 = vadd.f32 %v10937_v35, %v3622_v33  ;;  %v3624_v19 = vpop.f32.mrb[101].mxu1 }
 0xbec   :  { %v3625_v21 = vpop.f32.mrb[102].mxu1 }
 0xbed   :  { %v3628_v20 = vmax.f32 %v3623_v47, 0.0  ;;  %v3626_v48 = vpop.f32.mrb[103].mxu1 }
 0xbef   :  { %v3629_v49 = vmax.f32 %v3558_v16, %v3628_v20 }
 0xc12   :  { %v3763_v52 = vpop.f32.mrb[104].mxu1 }
 0xc13   :  { %v3764_v55 = vadd.f32 %v10937_v35, %v3763_v52  ;;  %v3765_v56 = vpop.f32.mrb[105].mxu1 }
 0xc14   :  { %v3766_v58 = vpop.f32.mrb[106].mxu1 }
 0xc15   :  { %v3769_v59 = vmax.f32 %v3764_v55, 0.0  ;;  %v3767_v60 = vpop.f32.mrb[107].mxu1 }
 0xc17   :  { %v3770_v62 = vmax.f32 %v3699_v54, %v3769_v59 }
 0xc19   :  { %v3771_v63 = vmax.f32 %v3629_v49, %v3770_v62 }
 0xc1b   :  { %v3772_v6 = vpack.c.bf16 %v3771_v63, %v3771_v63 }
 0xc1d   :  { %9342 = vmatmul.mubr.msk.bf16.vlgmr.msra.gmra.mrb[108].mxu0 %vm700_vm3, %v3772_v6 }
 0xc1e   :  { %3926 = vmatpush1.bf16.msra.mxu0 %v11076_v7  ;;  %8975 = vmatprep.mubr.msk.bf16.mxu0 %vm142_vm0, %v3920_v4  ;;  %v4257_v4 = vrot.slane %v4243_v61, %v9707_v15  ;;  %v4580_v61 = vcombine.high %v9006_v57, %v9006_v57 }
 0xc1f   :  { %3927 = vmatprep.subr.bf16.mxu0 %v9603_v1 }
 0xc22   :  { %3928 = vmatpush1.bf16.msra.mxu0 %v11084_v8 }
 0xc23   :  { %3929 = vmatprep.subr.bf16.mxu0 %v9603_v1 }
 0xc26   :  { %3930 = vmatpush1.bf16.msra.mxu0 %v11091_v9 }
 0xc27   :  { %3931 = vmatprep.subr.bf16.mxu0 %v9603_v1 }
 0xc2a   :  { %3932 = vmatpush1.bf16.msra.mxu0 %v11098_v10 }
 0xc2b   :  { %3933 = vmatprep.subr.bf16.mxu0 %v9603_v1 }
 0xc2e   :  { %3934 = vmatpush1.bf16.msra.mxu0 %v11152_v42 }
 0xc2f   :  { %3935 = vmatprep.subr.bf16.mxu0 %v9603_v1 }
 0xc32   :  { %3936 = vmatpush1.bf16.msra.mxu0 %v11159_v14 }
 0xc33   :  { %3937 = vmatprep.subr.bf16.mxu0 %v9603_v1 }
 0xc36   :  { %3938 = vmatpush1.bf16.msra.mxu0 %v11166_v39 }
 0xc37   :  { %3939 = vmatprep.subr.bf16.mxu0 %v9603_v1 }
 0xc3a   :  { %3940 = vmatpush1.bf16.msra.mxu0 %v11173_v3  ;;  %v3889_v40 = vpop.f32.mrb[108].mxu1 }
 0xc3b   :  { %3941 = vmatprep.subr.bf16.mxu0 %v9603_v1  ;;  %v3891_v12 = vpop.f32.mrb[109].mxu1  ;;  %v3890_v45 = vadd.f32 %v10937_v35, %v3889_v40 }
 0xc3c   :  { %v3892_v13 = vpop.f32.mrb[110].mxu1 }
 0xc3d   :  { %v3893_v22 = vpop.f32.mrb[111].mxu1  ;;  %v3895_v16 = vmax.f32 %v3890_v45, 0.0 }
 0xc3e   :  { %3942 = vmatpush1.bf16.msra.mxu0 %v11213_v36 }
 0xc3f   :  { %3943 = vmatprep.subr.bf16.mxu0 %v9603_v1 }
 0xc42   :  { %3944 = vmatpush1.bf16.msra.mxu0 %v9762_v25 }
 0xc43   :  { %4066 = vmatprep.subr.bf16.mxu0 %v9603_v1 }
 0xc45   :  { %3958 = vmatmul.mubr.bf16.vlgmr.msra.gmra.mrb[112].mxu0 %v3913_v0 }
 0xc46   :  { %4067 = vmatpush1.bf16.msra.mxu0 %v11076_v7  ;;  %8981 = vmatprep.mubr.msk.bf16.mxu0 %vm142_vm0, %v4061_v2 }
 0xc47   :  { %4068 = vmatprep.subr.bf16.mxu0 %v9603_v1 }
 0xc4a   :  { %4069 = vmatpush1.bf16.msra.mxu0 %v11084_v8 }
 0xc4b   :  { %4070 = vmatprep.subr.bf16.mxu0 %v9603_v1 }
 0xc4e   :  { %4071 = vmatpush1.bf16.msra.mxu0 %v11091_v9 }
 0xc4f   :  { %4072 = vmatprep.subr.bf16.mxu0 %v9603_v1 }
 0xc52   :  { %4073 = vmatpush1.bf16.msra.mxu0 %v11098_v10 }
 0xc53   :  { %4074 = vmatprep.subr.bf16.mxu0 %v9603_v1 }
 0xc56   :  { %4075 = vmatpush1.bf16.msra.mxu0 %v11152_v42 }
 0xc57   :  { %4076 = vmatprep.subr.bf16.mxu0 %v9603_v1 }
 0xc5a   :  { %4077 = vmatpush1.bf16.msra.mxu0 %v11159_v14 }
 0xc5b   :  { %4078 = vmatprep.subr.bf16.mxu0 %v9603_v1 }
 0xc5e   :  { %4079 = vmatpush1.bf16.msra.mxu0 %v11166_v39 }
 0xc5f   :  { %4080 = vmatprep.subr.bf16.mxu0 %v9603_v1 }
 0xc62   :  { %4081 = vmatpush1.bf16.msra.mxu0 %v11173_v3 }
 0xc63   :  { %4082 = vmatprep.subr.bf16.mxu0 %v9603_v1 }
 0xc66   :  { %4083 = vmatpush1.bf16.msra.mxu0 %v11213_v36 }
 0xc67   :  { %4084 = vmatprep.subr.bf16.mxu0 %v9603_v1 }
 0xc6a   :  { %4085 = vmatpush1.bf16.msra.mxu0 %v9762_v25 }
 0xc6b   :  { %4192 = vmatprep.subr.bf16.mxu0 %v9603_v1 }
 0xc6d   :  { %4099 = vmatmul.mubr.bf16.vlgmr.msra.gmra.mrb[116].mxu0 %v4054_v41 }
 0xc6e   :  { %4193 = vmatpush1.bf16.msra.mxu0 %v11076_v7  ;;  %8988 = vmatprep.mubr.msk.bf16.mxu0 %vm142_vm0, %v4187_v28  ;;  %v4517_v28 = vrot.slane %v9003_v27, %v9707_v15 }
 0xc6f   :  { %4194 = vmatprep.subr.bf16.mxu0 %v9603_v1 }
 0xc72   :  { %4195 = vmatpush1.bf16.msra.mxu0 %v11084_v8 }
 0xc73   :  { %4196 = vmatprep.subr.bf16.mxu0 %v9603_v1 }
 0xc76   :  { %4197 = vmatpush1.bf16.msra.mxu0 %v11091_v9 }
 0xc77   :  { %4198 = vmatprep.subr.bf16.mxu0 %v9603_v1 }
 0xc7a   :  { %4199 = vmatpush1.bf16.msra.mxu0 %v11098_v10 }
 0xc7b   :  { %4200 = vmatprep.subr.bf16.mxu0 %v9603_v1 }
 0xc7e   :  { %4201 = vmatpush1.bf16.msra.mxu0 %v11152_v42 }
 0xc7f   :  { %4202 = vmatprep.subr.bf16.mxu0 %v9603_v1 }
 0xc82   :  { %4203 = vmatpush1.bf16.msra.mxu0 %v11159_v14 }
 0xc83   :  { %4204 = vmatprep.subr.bf16.mxu0 %v9603_v1 }
 0xc86   :  { %4205 = vmatpush1.bf16.msra.mxu0 %v11166_v39 }
 0xc87   :  { %4206 = vmatprep.subr.bf16.mxu0 %v9603_v1 }
 0xc8a   :  { %4207 = vmatpush1.bf16.msra.mxu0 %v11173_v3 }
 0xc8b   :  { %4208 = vmatprep.subr.bf16.mxu0 %v9603_v1 }
 0xc8e   :  { %4209 = vmatpush1.bf16.msra.mxu0 %v11213_v36 }
 0xc8f   :  { %4210 = vmatprep.subr.bf16.mxu0 %v9603_v1 }
 0xc92   :  { %4211 = vmatpush1.bf16.msra.mxu0 %v9762_v25 }
 0xc93   :  { %4333 = vmatprep.subr.bf16.mxu0 %v9603_v1 }
 0xc95   :  { %4225 = vmatmul.mubr.bf16.vlgmr.msra.gmra.mrb[120].mxu0 %v4180_v29 }
 0xc96   :  { %4334 = vmatpush1.bf16.msra.mxu0 %v11076_v7 }
 0xc97   :  { %4335 = vmatprep.subr.bf16.mxu0 %v9603_v1 }
 0xc9a   :  { %4336 = vmatpush1.bf16.msra.mxu0 %v11084_v8 }
 0xc9b   :  { %4337 = vmatprep.subr.bf16.mxu0 %v9603_v1 }
 0xc9e   :  { %v4030_v23 = vpop.f32.mrb[112].mxu1  ;;  %4338 = vmatpush1.bf16.msra.mxu0 %v11091_v9 }
 0xc9f   :  { %v4032_v24 = vpop.f32.mrb[113].mxu1  ;;  %4339 = vmatprep.subr.bf16.mxu0 %v9603_v1  ;;  %v4031_v50 = vadd.f32 %v10937_v35, %v4030_v23 }
 0xca0   :  { %v4033_v17 = vpop.f32.mrb[114].mxu1 }
 0xca1   :  { %v4034_v26 = vpop.f32.mrb[115].mxu1  ;;  %v4036_v54 = vmax.f32 %v4031_v50, 0.0 }
 0xca2   :  { %4340 = vmatpush1.bf16.msra.mxu0 %v11098_v10  ;;  %v9492_v26 = vld [vmem:[%s13059_s3 + $0x60] sm:$0xff]  }
 0xca3   :  { %4341 = vmatprep.subr.bf16.mxu0 %v9603_v1 }
 0xca6   :  { %4342 = vmatpush1.bf16.msra.mxu0 %v11152_v42 }
 0xca7   :  { %4343 = vmatprep.subr.bf16.mxu0 %v9603_v1 }
 0xcaa   :  { %4344 = vmatpush1.bf16.msra.mxu0 %v11159_v14 }
 0xcab   :  { %4345 = vmatprep.subr.bf16.mxu0 %v9603_v1 }
 0xcae   :  { %4346 = vmatpush1.bf16.msra.mxu0 %v11166_v39 }
 0xcaf   :  { %4347 = vmatprep.subr.bf16.mxu0 %v9603_v1 }
 0xcb2   :  { %4348 = vmatpush1.bf16.msra.mxu0 %v11173_v3 }
 0xcb3   :  { %4349 = vmatprep.subr.bf16.mxu0 %v9603_v1 }
 0xcb6   :  { %4350 = vmatpush1.bf16.msra.mxu0 %v11213_v36 }
 0xcb7   :  { %4351 = vmatprep.subr.bf16.mxu0 %v9603_v1 }
 0xcba   :  { %4352 = vmatpush1.bf16.msra.mxu0 %v9762_v25 }
 0xcbb   :  { %9351 = vmatprep.subr.bf16.mxu0 %v9605_v51 }
 0xcf0   :  { %v3819_v30 = vpop.f32.mrb[108].mxu0 }
 0xcf1   :  { %v11315_v37 = vadd.f32 %v3819_v30, %v11192_v31  ;;  %v9343_v38 = vpop.f32.mrb[109].mxu0  ;;  %v8993_v31 = vld.sshfl [vmem:[%s13056_s0 + $0x64] sm:$0x11 pattern:$0x75316420] }
 0xcf2   :  { %v3822_v34 = vpop.f32.mrb[110].mxu0  ;;  %v4314_v44 = vcombine.high %v8993_v31, %v8993_v31  ;;  %v4321_v32 = vrot.slane %v8993_v31, %v9707_v15 }
 0xcf3   :  { %v9344_v43 = vpop.f32.mrb[111].mxu0 }
 0xcf4   :  { %v4328_v5 = vrot.slane %v4314_v44, %v9707_v15  ;;  %v11459_v44 = vld [vmem:[%s13058_s2] ss:$0 sm:$0xff] }
 0xcf6   :  { %8994 = vmatprep.mubr.msk.bf16.mxu0 %vm142_vm0, %v4328_v5 }
 0xcf7   :  { %4366 = vmatmul.mubr.bf16.vlgmr.msra.gmra.mrb[124].mxu0 %v4321_v32 }
 0xcf8   :  { %9353 = vmatprep.mubr.msk.bf16.mxu0 %vm9606_vm2, %v9605_v51  ;;  %9352 = vmatpush3.bf16.msra.mxu0 %v9492_v26 }
 0xcf9   :  { %4599 = vmatprep.subr.bf16.mxu0 %v9603_v1 }
 0xd18   :  { %v3959_v33 = vpop.f32.mrb[112].mxu0 }
 0xd19   :  { %v3960_v47 = vadd.f32 %v10937_v35, %v3959_v33  ;;  %v3961_v19 = vpop.f32.mrb[113].mxu0 }
 0xd1a   :  { %v3962_v21 = vpop.f32.mrb[114].mxu0 }
 0xd1b   :  { %v3965_v20 = vmax.f32 %v3960_v47, 0.0  ;;  %v3963_v48 = vpop.f32.mrb[115].mxu0 }
 0xd1d   :  { %v3966_v49 = vmax.f32 %v3895_v16, %v3965_v20 }
 0xd40   :  { %v4100_v52 = vpop.f32.mrb[116].mxu0 }
 0xd41   :  { %v4101_v55 = vadd.f32 %v10937_v35, %v4100_v52  ;;  %v4102_v56 = vpop.f32.mrb[117].mxu0  ;;  %v8996_v35 = vld.sshfl [vmem:[%s13056_s0 + $0x66] sm:$0x11 pattern:$0x75316420] }
 0xd42   :  { %v4103_v58 = vpop.f32.mrb[118].mxu0  ;;  %v4384_v46 = vcombine.high %v8996_v35, %v8996_v35  ;;  %v4391_v2 = vrot.slane %v8996_v35, %v9707_v15  ;;  %v9012_v35 = vld.sshfl [vmem:[%s13056_s0 + $0x6e] sm:$0x11 pattern:$0x75316420] }
 0xd43   :  { %v4106_v59 = vmax.f32 %v4101_v55, 0.0  ;;  %v4104_v60 = vpop.f32.mrb[119].mxu0 }
 0xd44   :  { %v4398_v0 = vrot.slane %v4384_v46, %v9707_v15  ;;  %v4721_v46 = vcombine.high %v9012_v35, %v9012_v35 }
 0xd45   :  { %v4107_v62 = vmax.f32 %v4036_v54, %v4106_v59 }
 0xd47   :  { %v4108_v63 = vmax.f32 %v3966_v49, %v4107_v62 }
 0xd49   :  { %v4109_v6 = vpack.c.bf16 %v4108_v63, %v4108_v63 }
 0xd4b   :  { %9348 = vmatmul.mubr.msk.bf16.vlgmr.msra.gmra.mrb[116].mxu1 %vm700_vm3, %v4109_v6 }
 0xd4c   :  { %4263 = vmatpush1.bf16.msra.mxu1 %v11076_v7  ;;  %8991 = vmatprep.mubr.msk.bf16.mxu1 %vm142_vm0, %v4257_v4  ;;  %v4594_v4 = vrot.slane %v4580_v61, %v9707_v15 }
 0xd4d   :  { %4264 = vmatprep.subr.bf16.mxu1 %v9603_v1 }
 0xd50   :  { %4265 = vmatpush1.bf16.msra.mxu1 %v11084_v8 }
 0xd51   :  { %4266 = vmatprep.subr.bf16.mxu1 %v9603_v1 }
 0xd54   :  { %4267 = vmatpush1.bf16.msra.mxu1 %v11091_v9 }
 0xd55   :  { %4268 = vmatprep.subr.bf16.mxu1 %v9603_v1 }
 0xd58   :  { %4269 = vmatpush1.bf16.msra.mxu1 %v11098_v10 }
 0xd59   :  { %4270 = vmatprep.subr.bf16.mxu1 %v9603_v1 }
 0xd5c   :  { %4271 = vmatpush1.bf16.msra.mxu1 %v11152_v42 }
 0xd5d   :  { %4272 = vmatprep.subr.bf16.mxu1 %v9603_v1 }
 0xd60   :  { %4273 = vmatpush1.bf16.msra.mxu1 %v11159_v14 }
 0xd61   :  { %4274 = vmatprep.subr.bf16.mxu1 %v9603_v1 }
 0xd64   :  { %4275 = vmatpush1.bf16.msra.mxu1 %v11166_v39 }
 0xd65   :  { %4276 = vmatprep.subr.bf16.mxu1 %v9603_v1 }
 0xd68   :  { %4277 = vmatpush1.bf16.msra.mxu1 %v11173_v3  ;;  %v4226_v41 = vpop.f32.mrb[120].mxu0 }
 0xd69   :  { %4278 = vmatprep.subr.bf16.mxu1 %v9603_v1  ;;  %v4228_v40 = vpop.f32.mrb[121].mxu0  ;;  %v4227_v45 = vadd.f32 %v11459_v44, %v4226_v41 }
 0xd6a   :  { %v4229_v12 = vpop.f32.mrb[122].mxu0 }
 0xd6b   :  { %v4230_v13 = vpop.f32.mrb[123].mxu0  ;;  %v4232_v16 = vmax.f32 %v4227_v45, 0.0 }
 0xd6c   :  { %4279 = vmatpush1.bf16.msra.mxu1 %v11213_v36 }
 0xd6d   :  { %4280 = vmatprep.subr.bf16.mxu1 %v9603_v1 }
 0xd70   :  { %4281 = vmatpush1.bf16.msra.mxu1 %v9762_v25 }
 0xd71   :  { %4403 = vmatprep.subr.bf16.mxu1 %v9603_v1 }
 0xd73   :  { %4295 = vmatmul.mubr.bf16.vlgmr.msra.gmra.mrb[120].mxu1 %v4250_v11  ;;  %v4587_v11 = vrot.slane %v9006_v57, %v9707_v15 }
 0xd74   :  { %4404 = vmatpush1.bf16.msra.mxu1 %v11076_v7  ;;  %8997 = vmatprep.mubr.msk.bf16.mxu1 %vm142_vm0, %v4398_v0  ;;  %v4735_v0 = vrot.slane %v4721_v46, %v9707_v15 }
 0xd75   :  { %4405 = vmatprep.subr.bf16.mxu1 %v9603_v1 }
 0xd78   :  { %4406 = vmatpush1.bf16.msra.mxu1 %v11084_v8 }
 0xd79   :  { %4407 = vmatprep.subr.bf16.mxu1 %v9603_v1 }
 0xd7c   :  { %4408 = vmatpush1.bf16.msra.mxu1 %v11091_v9 }
 0xd7d   :  { %4409 = vmatprep.subr.bf16.mxu1 %v9603_v1 }
 0xd80   :  { %4410 = vmatpush1.bf16.msra.mxu1 %v11098_v10 }
 0xd81   :  { %4411 = vmatprep.subr.bf16.mxu1 %v9603_v1 }
 0xd84   :  { %4412 = vmatpush1.bf16.msra.mxu1 %v11152_v42 }
 0xd85   :  { %4413 = vmatprep.subr.bf16.mxu1 %v9603_v1 }
 0xd88   :  { %4414 = vmatpush1.bf16.msra.mxu1 %v11159_v14 }
 0xd89   :  { %4415 = vmatprep.subr.bf16.mxu1 %v9603_v1 }
 0xd8c   :  { %4416 = vmatpush1.bf16.msra.mxu1 %v11166_v39 }
 0xd8d   :  { %4417 = vmatprep.subr.bf16.mxu1 %v9603_v1 }
 0xd90   :  { %4418 = vmatpush1.bf16.msra.mxu1 %v11173_v3 }
 0xd91   :  { %4419 = vmatprep.subr.bf16.mxu1 %v9603_v1 }
 0xd94   :  { %4420 = vmatpush1.bf16.msra.mxu1 %v11213_v36 }
 0xd95   :  { %4421 = vmatprep.subr.bf16.mxu1 %v9603_v1 }
 0xd98   :  { %4422 = vmatpush1.bf16.msra.mxu1 %v9762_v25 }
 0xd99   :  { %4529 = vmatprep.subr.bf16.mxu1 %v9603_v1 }
 0xd9b   :  { %4436 = vmatmul.mubr.bf16.vlgmr.msra.gmra.mrb[124].mxu1 %v4391_v2  ;;  %v4728_v2 = vrot.slane %v9012_v35, %v9707_v15  ;;  %v9028_v35 = vld.sshfl [vmem:[%s13056_s0 + $0x76] sm:$0x11 pattern:$0x75316420] }
 0xd9c   :  { %4530 = vmatpush1.bf16.msra.mxu1 %v11076_v7  ;;  %9004 = vmatprep.mubr.msk.bf16.mxu1 %vm142_vm0, %v4524_v18  ;;  %v5058_v46 = vcombine.high %v9028_v35, %v9028_v35 }
 0xd9d   :  { %4531 = vmatprep.subr.bf16.mxu1 %v9603_v1 }
 0xda0   :  { %4532 = vmatpush1.bf16.msra.mxu1 %v11084_v8 }
 0xda1   :  { %4533 = vmatprep.subr.bf16.mxu1 %v9603_v1 }
 0xda4   :  { %4534 = vmatpush1.bf16.msra.mxu1 %v11091_v9 }
 0xda5   :  { %4535 = vmatprep.subr.bf16.mxu1 %v9603_v1 }
 0xda8   :  { %4536 = vmatpush1.bf16.msra.mxu1 %v11098_v10 }
 0xda9   :  { %4537 = vmatprep.subr.bf16.mxu1 %v9603_v1 }
 0xdac   :  { %4538 = vmatpush1.bf16.msra.mxu1 %v11152_v42 }
 0xdad   :  { %4539 = vmatprep.subr.bf16.mxu1 %v9603_v1 }
 0xdb0   :  { %4540 = vmatpush1.bf16.msra.mxu1 %v11159_v14 }
 0xdb1   :  { %4541 = vmatprep.subr.bf16.mxu1 %v9603_v1 }
 0xdb4   :  { %4542 = vmatpush1.bf16.msra.mxu1 %v11166_v39 }
 0xdb5   :  { %4543 = vmatprep.subr.bf16.mxu1 %v9603_v1 }
 0xdb8   :  { %4544 = vmatpush1.bf16.msra.mxu1 %v11173_v3 }
 0xdb9   :  { %4545 = vmatprep.subr.bf16.mxu1 %v9603_v1 }
 0xdbc   :  { %4546 = vmatpush1.bf16.msra.mxu1 %v11213_v36 }
 0xdbd   :  { %4547 = vmatprep.subr.bf16.mxu1 %v9603_v1 }
 0xdc0   :  { %4548 = vmatpush1.bf16.msra.mxu1 %v9762_v25 }
 0xdc1   :  { %4670 = vmatprep.subr.bf16.mxu1 %v9603_v1 }
 0xdc3   :  { %4562 = vmatmul.mubr.bf16.vlgmr.msra.gmra.mrb[128].mxu1 %v4517_v28 }
 0xdc4   :  { %4671 = vmatpush1.bf16.msra.mxu1 %v11076_v7 }
 0xdc5   :  { %4672 = vmatprep.subr.bf16.mxu1 %v9603_v1 }
 0xdc8   :  { %4673 = vmatpush1.bf16.msra.mxu1 %v11084_v8 }
 0xdc9   :  { %4674 = vmatprep.subr.bf16.mxu1 %v9603_v1 }
 0xdca   :  { %v4367_v22 = vpop.f32.mrb[124].mxu0 }
 0xdcb   :  { %v4369_v23 = vpop.f32.mrb[125].mxu0  ;;  %v4368_v50 = vadd.f32 %v11459_v44, %v4367_v22  ;;  %v9493_v22 = vld [vmem:[%s13059_s3 + $0x68] sm:$0xff]  }
 0xdcc   :  { %v4370_v24 = vpop.f32.mrb[126].mxu0  ;;  %4675 = vmatpush1.bf16.msra.mxu1 %v11091_v9  ;;  %v9019_v23 = vld.sshfl [vmem:[%s13056_s0 + $0x70] sm:$0x11 pattern:$0x75316420] }
 0xdcd   :  { %v4371_v17 = vpop.f32.mrb[127].mxu0  ;;  %4676 = vmatprep.subr.bf16.mxu1 %v9603_v1  ;;  %v4373_v54 = vmax.f32 %v4368_v50, 0.0  ;;  %v4847_v24 = vcombine.high %v9019_v23, %v9019_v23  ;;  %v4854_v26 = vrot.slane %v9019_v23, %v9707_v15  ;;  %v9035_v23 = vld.sshfl [vmem:[%s13056_s0 + $0x78] sm:$0x11 pattern:$0x75316420] }
 0xdcf   :  { %v4861_v17 = vrot.slane %v4847_v24, %v9707_v15  ;;  %v5184_v24 = vcombine.high %v9035_v23, %v9035_v23 }
 0xdd0   :  { %4677 = vmatpush1.bf16.msra.mxu1 %v11098_v10 }
 0xdd1   :  { %4678 = vmatprep.subr.bf16.mxu1 %v9603_v1 }
 0xdd4   :  { %4679 = vmatpush1.bf16.msra.mxu1 %v11152_v42 }
 0xdd5   :  { %4680 = vmatprep.subr.bf16.mxu1 %v9603_v1 }
 0xdd8   :  { %4681 = vmatpush1.bf16.msra.mxu1 %v11159_v14 }
 0xdd9   :  { %4682 = vmatprep.subr.bf16.mxu1 %v9603_v1 }
 0xddc   :  { %4683 = vmatpush1.bf16.msra.mxu1 %v11166_v39 }
 0xddd   :  { %4684 = vmatprep.subr.bf16.mxu1 %v9603_v1 }
 0xde0   :  { %4685 = vmatpush1.bf16.msra.mxu1 %v11173_v3 }
 0xde1   :  { %4686 = vmatprep.subr.bf16.mxu1 %v9603_v1 }
 0xde4   :  { %4687 = vmatpush1.bf16.msra.mxu1 %v11213_v36 }
 0xde5   :  { %4688 = vmatprep.subr.bf16.mxu1 %v9603_v1 }
 0xde8   :  { %4689 = vmatpush1.bf16.msra.mxu1 %v9762_v25 }
 0xde9   :  { %9357 = vmatprep.subr.bf16.mxu1 %v9605_v51 }
 0xe1e   :  { %v4156_v29 = vpop.f32.mrb[116].mxu1 }
 0xe1f   :  { %v11433_v30 = vadd.f32 %v4156_v29, %v11315_v37  ;;  %v9349_v38 = vpop.f32.mrb[117].mxu1  ;;  %v9009_v37 = vld.sshfl [vmem:[%s13056_s0 + $0x6c] sm:$0x11 pattern:$0x75316420]  ;;  %v11561_v29 = vld [vmem:[%s13057_s1] sm:$0xff]  }
 0xe20   :  { %v4159_v34 = vpop.f32.mrb[118].mxu1  ;;  %v4651_v31 = vcombine.high %v9009_v37, %v9009_v37  ;;  %v4658_v32 = vrot.slane %v9009_v37, %v9707_v15 }
 0xe21   :  { %v9350_v43 = vpop.f32.mrb[119].mxu1  ;;  %v11568_v34 = vld [vmem:[%s13057_s1 + $0x8] sm:$0xff]  }
 0xe22   :  { %v4665_v5 = vrot.slane %v4651_v31, %v9707_v15  ;;  %v11582_v43 = vld [vmem:[%s13057_s1 + $0x18] sm:$0xff]  }
 0xe24   :  { %9010 = vmatprep.mubr.msk.bf16.mxu1 %vm142_vm0, %v4665_v5 }
 0xe25   :  { %4703 = vmatmul.mubr.bf16.vlgmr.msra.gmra.mrb[132].mxu1 %v4658_v32 }
 0xe26   :  { %9359 = vmatprep.mubr.msk.bf16.mxu1 %vm9606_vm2, %v9605_v51  ;;  %9358 = vmatpush3.bf16.msra.mxu1 %v9493_v22  ;;  %v9494_v22 = vld [vmem:[%s13059_s3 + $0x70] sm:$0xff]  }
 0xe27   :  { %4936 = vmatprep.subr.bf16.mxu1 %v9603_v1 }
 0xe46   :  { %v4296_v33 = vpop.f32.mrb[120].mxu1 }
 0xe47   :  { %v4297_v47 = vadd.f32 %v11459_v44, %v4296_v33  ;;  %v4298_v19 = vpop.f32.mrb[121].mxu1 }
 0xe48   :  { %v4299_v21 = vpop.f32.mrb[122].mxu1 }
 0xe49   :  { %v4302_v20 = vmax.f32 %v4297_v47, 0.0  ;;  %v4300_v48 = vpop.f32.mrb[123].mxu1 }
 0xe4b   :  { %v4303_v49 = vmax.f32 %v4232_v16, %v4302_v20 }
 0xe6e   :  { %v4437_v52 = vpop.f32.mrb[124].mxu1 }
 0xe6f   :  { %v4438_v55 = vadd.f32 %v11459_v44, %v4437_v52  ;;  %v4439_v56 = vpop.f32.mrb[125].mxu1  ;;  %v9022_v52 = vld.sshfl [vmem:[%s13056_s0 + $0x72] sm:$0x11 pattern:$0x75316420] }
 0xe70   :  { %v4440_v58 = vpop.f32.mrb[126].mxu1  ;;  %v4917_v57 = vcombine.high %v9022_v52, %v9022_v52 }
 0xe71   :  { %v4443_v59 = vmax.f32 %v4438_v55, 0.0  ;;  %v4441_v60 = vpop.f32.mrb[127].mxu1 }
 0xe72   :  { %v4931_v60 = vrot.slane %v4917_v57, %v9707_v15 }
 0xe73   :  { %v4444_v62 = vmax.f32 %v4373_v54, %v4443_v59 }
 0xe75   :  { %v4445_v63 = vmax.f32 %v4303_v49, %v4444_v62  ;;  %v11627_v62 = vld [vmem:[%s13057_s1 + $0x20] sm:$0xff]  }
 0xe77   :  { %v4446_v6 = vpack.c.bf16 %v4445_v63, %v4445_v63  ;;  %v11634_v63 = vld [vmem:[%s13057_s1 + $0x28] sm:$0xff]  }
 0xe79   :  { %9354 = vmatmul.mubr.msk.bf16.vlgmr.msra.gmra.mrb[128].mxu0 %vm700_vm3, %v4446_v6  ;;  %v11648_v6 = vld [vmem:[%s13057_s1 + $0x38] sm:$0xff]  }
 0xe7a   :  { %4600 = vmatpush1.bf16.msra.mxu0 %v11076_v7  ;;  %9007 = vmatprep.mubr.msk.bf16.mxu0 %vm142_vm0, %v4594_v4  ;;  %v11641_v4 = vld [vmem:[%s13057_s1 + $0x30] sm:$0xff]  }
 0xe7b   :  { %4601 = vmatprep.subr.bf16.mxu0 %v9603_v1 }
 0xe7e   :  { %4602 = vmatpush1.bf16.msra.mxu0 %v11084_v8 }
 0xe7f   :  { %4603 = vmatprep.subr.bf16.mxu0 %v9603_v1 }
 0xe82   :  { %4604 = vmatpush1.bf16.msra.mxu0 %v11091_v9 }
 0xe83   :  { %4605 = vmatprep.subr.bf16.mxu0 %v9603_v1 }
 0xe86   :  { %4606 = vmatpush1.bf16.msra.mxu0 %v11098_v10 }
 0xe87   :  { %4607 = vmatprep.subr.bf16.mxu0 %v9603_v1 }
 0xe8a   :  { %4608 = vmatpush1.bf16.msra.mxu0 %v11152_v42 }
 0xe8b   :  { %4609 = vmatprep.subr.bf16.mxu0 %v9603_v1 }
 0xe8e   :  { %4610 = vmatpush1.bf16.msra.mxu0 %v11159_v14 }
 0xe8f   :  { %4611 = vmatprep.subr.bf16.mxu0 %v9603_v1 }
 0xe92   :  { %4612 = vmatpush1.bf16.msra.mxu0 %v11166_v39 }
 0xe93   :  { %4613 = vmatprep.subr.bf16.mxu0 %v9603_v1 }
 0xe96   :  { %4614 = vmatpush1.bf16.msra.mxu0 %v11173_v3 }
 0xe97   :  { %4615 = vmatprep.subr.bf16.mxu0 %v9603_v1 }
 0xe9a   :  { %4616 = vmatpush1.bf16.msra.mxu0 %v11213_v36 }
 0xe9b   :  { %4617 = vmatprep.subr.bf16.mxu0 %v9603_v1 }
 0xe9e   :  { %4618 = vmatpush1.bf16.msra.mxu0 %v9762_v25 }
 0xe9f   :  { %4740 = vmatprep.subr.bf16.mxu0 %v9603_v1 }
 0xea1   :  { %4632 = vmatmul.mubr.bf16.vlgmr.msra.gmra.mrb[132].mxu0 %v4587_v11  ;;  %v4924_v11 = vrot.slane %v9022_v52, %v9707_v15  ;;  %v9038_v52 = vld.sshfl [vmem:[%s13056_s0 + $0x7a] sm:$0x11 pattern:$0x75316420] }
 0xea2   :  { %4741 = vmatpush1.bf16.msra.mxu0 %v11076_v7  ;;  %9013 = vmatprep.mubr.msk.bf16.mxu0 %vm142_vm0, %v4735_v0  ;;  %v5072_v0 = vrot.slane %v5058_v46, %v9707_v15  ;;  %v5254_v57 = vcombine.high %v9038_v52, %v9038_v52 }
 0xea3   :  { %4742 = vmatprep.subr.bf16.mxu0 %v9603_v1 }
 0xea6   :  { %4743 = vmatpush1.bf16.msra.mxu0 %v11084_v8 }
 0xea7   :  { %4744 = vmatprep.subr.bf16.mxu0 %v9603_v1 }
 0xeaa   :  { %4745 = vmatpush1.bf16.msra.mxu0 %v11091_v9 }
 0xeab   :  { %4746 = vmatprep.subr.bf16.mxu0 %v9603_v1 }
 0xeae   :  { %4747 = vmatpush1.bf16.msra.mxu0 %v11098_v10 }
 0xeaf   :  { %4748 = vmatprep.subr.bf16.mxu0 %v9603_v1 }
 0xeb2   :  { %4749 = vmatpush1.bf16.msra.mxu0 %v11152_v42 }
 0xeb3   :  { %4750 = vmatprep.subr.bf16.mxu0 %v9603_v1 }
 0xeb6   :  { %4751 = vmatpush1.bf16.msra.mxu0 %v11159_v14 }
 0xeb7   :  { %4752 = vmatprep.subr.bf16.mxu0 %v9603_v1 }
 0xeba   :  { %4753 = vmatpush1.bf16.msra.mxu0 %v11166_v39 }
 0xebb   :  { %4754 = vmatprep.subr.bf16.mxu0 %v9603_v1 }
 0xebe   :  { %4755 = vmatpush1.bf16.msra.mxu0 %v11173_v3 }
 0xebf   :  { %4756 = vmatprep.subr.bf16.mxu0 %v9603_v1 }
 0xec2   :  { %4757 = vmatpush1.bf16.msra.mxu0 %v11213_v36 }
 0xec3   :  { %4758 = vmatprep.subr.bf16.mxu0 %v9603_v1 }
 0xec6   :  { %4759 = vmatpush1.bf16.msra.mxu0 %v9762_v25 }
 0xec7   :  { %4866 = vmatprep.subr.bf16.mxu0 %v9603_v1 }
 0xec9   :  { %4773 = vmatmul.mubr.bf16.vlgmr.msra.gmra.mrb[136].mxu0 %v4728_v2  ;;  %v5065_v2 = vrot.slane %v9028_v35, %v9707_v15  ;;  %v9044_v35 = vld.sshfl [vmem:[%s13056_s0 + $0x7e] sm:$0x11 pattern:$0x75316420] }
 0xeca   :  { %4867 = vmatpush1.bf16.msra.mxu0 %v11076_v7  ;;  %v4563_v7 = vpop.f32.mrb[128].mxu1  ;;  %9020 = vmatprep.mubr.msk.bf16.mxu0 %vm142_vm0, %v4861_v17  ;;  %v5198_v17 = vrot.slane %v5184_v24, %v9707_v15  ;;  %v5395_v46 = vcombine.high %v9044_v35, %v9044_v35 }
 0xecb   :  { %4868 = vmatprep.subr.bf16.mxu0 %v9603_v1 }
 0xece   :  { %4869 = vmatpush1.bf16.msra.mxu0 %v11084_v8  ;;  %v4565_v8 = vpop.f32.mrb[129].mxu1 }
 0xecf   :  { %4870 = vmatprep.subr.bf16.mxu0 %v9603_v1 }
 0xed2   :  { %4871 = vmatpush1.bf16.msra.mxu0 %v11091_v9  ;;  %v4566_v9 = vpop.f32.mrb[130].mxu1 }
 0xed3   :  { %4872 = vmatprep.subr.bf16.mxu0 %v9603_v1 }
 0xed6   :  { %4873 = vmatpush1.bf16.msra.mxu0 %v11098_v10  ;;  %v4567_v10 = vpop.f32.mrb[131].mxu1 }
 0xed7   :  { %4874 = vmatprep.subr.bf16.mxu0 %v9603_v1 }
 0xeda   :  { %4875 = vmatpush1.bf16.msra.mxu0 %v11152_v42 }
 0xedb   :  { %4876 = vmatprep.subr.bf16.mxu0 %v9603_v1 }
 0xede   :  { %4877 = vmatpush1.bf16.msra.mxu0 %v11159_v14 }
 0xedf   :  { %4878 = vmatprep.subr.bf16.mxu0 %v9603_v1 }
 0xee2   :  { %4879 = vmatpush1.bf16.msra.mxu0 %v11166_v39 }
 0xee3   :  { %4880 = vmatprep.subr.bf16.mxu0 %v9603_v1 }
 0xee6   :  { %4881 = vmatpush1.bf16.msra.mxu0 %v11173_v3 }
 0xee7   :  { %4882 = vmatprep.subr.bf16.mxu0 %v9603_v1 }
 0xeea   :  { %4883 = vmatpush1.bf16.msra.mxu0 %v11213_v36 }
 0xeeb   :  { %4884 = vmatprep.subr.bf16.mxu0 %v9603_v1 }
 0xeee   :  { %4885 = vmatpush1.bf16.msra.mxu0 %v9762_v25 }
 0xeef   :  { %5007 = vmatprep.subr.bf16.mxu0 %v9603_v1 }
 0xef1   :  { %4899 = vmatmul.mubr.bf16.vlgmr.msra.gmra.mrb[140].mxu0 %v4854_v26  ;;  %v5191_v26 = vrot.slane %v9035_v23, %v9707_v15  ;;  %v9051_v23 = vld.sshfl [vmem:[%s13056_s0 + $0x80] sm:$0x11 pattern:$0x75316420] }
 0xef2   :  { %5008 = vmatpush1.bf16.msra.mxu0 %v11561_v29  ;;  %v5521_v24 = vcombine.high %v9051_v23, %v9051_v23 }
 0xef3   :  { %5009 = vmatprep.subr.bf16.mxu0 %v9603_v1 }
 0xef6   :  { %5010 = vmatpush1.bf16.msra.mxu0 %v11568_v34 }
 0xef7   :  { %5011 = vmatprep.subr.bf16.mxu0 %v9603_v1 }
 0xef8   :  { %v4704_v41 = vpop.f32.mrb[132].mxu1 }
 0xef9   :  { %v4706_v40 = vpop.f32.mrb[133].mxu1  ;;  %v4705_v21 = vadd.f32 %v11459_v44, %v4704_v41 }
 0xefa   :  { %v4707_v12 = vpop.f32.mrb[134].mxu1 }
 0xefb   :  { %v4708_v13 = vpop.f32.mrb[135].mxu1  ;;  %v4710_v48 = vmax.f32 %v4705_v21, 0.0 }
 0xf4c   :  { %v4493_v27 = vpop.f32.mrb[128].mxu0 }
 0xf4d   :  { %v11556_v53 = vadd.f32 %v4493_v27, %v11433_v30  ;;  %v9355_v18 = vpop.f32.mrb[129].mxu0  ;;  %v11575_v30 = vld [vmem:[%s13057_s1 + $0x10] sm:$0xff]  }
 0xf4e   :  { %v4496_v28 = vpop.f32.mrb[130].mxu0  ;;  %5012 = vmatpush1.bf16.msra.mxu0 %v11575_v30 }
 0xf4f   :  { %v9356_v38 = vpop.f32.mrb[131].mxu0  ;;  %5013 = vmatprep.subr.bf16.mxu0 %v9603_v1 }
 0xf52   :  { %5014 = vmatpush1.bf16.msra.mxu0 %v11582_v43 }
 0xf53   :  { %5015 = vmatprep.subr.bf16.mxu0 %v9603_v1 }
 0xf56   :  { %5016 = vmatpush1.bf16.msra.mxu0 %v11152_v42  ;;  %v9025_v42 = vld.sshfl [vmem:[%s13056_s0 + $0x74] sm:$0x11 pattern:$0x75316420] }
 0xf57   :  { %5017 = vmatprep.subr.bf16.mxu0 %v9603_v1  ;;  %v4988_v37 = vcombine.high %v9025_v42, %v9025_v42 }
 0xf59   :  { %v5002_v31 = vrot.slane %v4988_v37, %v9707_v15 }
 0xf5a   :  { %5018 = vmatpush1.bf16.msra.mxu0 %v11159_v14  ;;  %v4564_v14 = vadd.f32 %v11459_v44, %v4563_v7 }
 0xf5b   :  { %5019 = vmatprep.subr.bf16.mxu0 %v9603_v1  ;;  %9026 = vmatprep.mubr.msk.bf16.mxu0 %vm142_vm0, %v5002_v31 }
 0xf5c   :  { %v4569_v45 = vmax.f32 %v4564_v14, 0.0 }
 0xf5e   :  { %5020 = vmatpush1.bf16.msra.mxu0 %v11166_v39  ;;  %v4995_v39 = vrot.slane %v9025_v42, %v9707_v15 }
 0xf5f   :  { %5021 = vmatprep.subr.bf16.mxu0 %v9603_v1 }
 0xf62   :  { %5022 = vmatpush1.bf16.msra.mxu0 %v11173_v3 }
 0xf63   :  { %5023 = vmatprep.subr.bf16.mxu0 %v9603_v1 }
 0xf66   :  { %5024 = vmatpush1.bf16.msra.mxu0 %v11213_v36 }
 0xf67   :  { %5025 = vmatprep.subr.bf16.mxu0 %v9603_v1 }
 0xf6a   :  { %5026 = vmatpush1.bf16.msra.mxu0 %v9762_v25 }
 0xf6b   :  { %9363 = vmatprep.subr.bf16.mxu0 %v9605_v51 }
 0xf6d   :  { %5040 = vmatmul.mubr.bf16.vlgmr.msra.gmra.mrb[144].mxu0 %v4995_v39 }
 0xf6e   :  { %9365 = vmatprep.mubr.msk.bf16.mxu0 %vm9606_vm2, %v9605_v51  ;;  %9364 = vmatpush3.bf16.msra.mxu0 %v9494_v22  ;;  %v9495_v22 = vld [vmem:[%s13059_s3 + $0x78] sm:$0xff]  }
 0xf6f   :  { %5273 = vmatprep.subr.bf16.mxu0 %v9603_v1 }
 0xf74   :  { %v4633_v3 = vpop.f32.mrb[132].mxu0 }
 0xf75   :  { %v4634_v5 = vadd.f32 %v11459_v44, %v4633_v3  ;;  %v4635_v32 = vpop.f32.mrb[133].mxu0 }
 0xf76   :  { %v4636_v33 = vpop.f32.mrb[134].mxu0 }
 0xf77   :  { %v4639_v16 = vmax.f32 %v4634_v5, 0.0  ;;  %v4637_v47 = vpop.f32.mrb[135].mxu0 }
 0xf79   :  { %v4640_v19 = vmax.f32 %v4569_v45, %v4639_v16 }
 0xf9c   :  { %v4774_v20 = vpop.f32.mrb[136].mxu0 }
 0xf9d   :  { %v4775_v49 = vadd.f32 %v11459_v44, %v4774_v20  ;;  %v4776_v50 = vpop.f32.mrb[137].mxu0 }
 0xf9e   :  { %v4777_v54 = vpop.f32.mrb[138].mxu0 }
 0xf9f   :  { %v4780_v55 = vmax.f32 %v4775_v49, 0.0  ;;  %v4778_v56 = vpop.f32.mrb[139].mxu0 }
 0xfa1   :  { %v4781_v58 = vmax.f32 %v4710_v48, %v4780_v55 }
 0xfa3   :  { %v4782_v59 = vmax.f32 %v4640_v19, %v4781_v58 }
 0xfa5   :  { %v4783_v61 = vpack.c.bf16 %v4782_v59, %v4782_v59 }
 0xfa7   :  { %9360 = vmatmul.mubr.msk.bf16.vlgmr.msra.gmra.mrb[136].mxu1 %vm700_vm3, %v4783_v61 }
 0xfa8   :  { %4937 = vmatpush1.bf16.msra.mxu1 %v11561_v29  ;;  %9023 = vmatprep.mubr.msk.bf16.mxu1 %vm142_vm0, %v4931_v60  ;;  %v5268_v60 = vrot.slane %v5254_v57, %v9707_v15 }
 0xfa9   :  { %4938 = vmatprep.subr.bf16.mxu1 %v9603_v1 }
 0xfac   :  { %4939 = vmatpush1.bf16.msra.mxu1 %v11568_v34 }
 0xfad   :  { %4940 = vmatprep.subr.bf16.mxu1 %v9603_v1 }
 0xfb0   :  { %4941 = vmatpush1.bf16.msra.mxu1 %v11575_v30 }
 0xfb1   :  { %4942 = vmatprep.subr.bf16.mxu1 %v9603_v1 }
 0xfb4   :  { %4943 = vmatpush1.bf16.msra.mxu1 %v11582_v43 }
 0xfb5   :  { %4944 = vmatprep.subr.bf16.mxu1 %v9603_v1 }
 0xfb8   :  { %4945 = vmatpush1.bf16.msra.mxu1 %v11627_v62 }
 0xfb9   :  { %4946 = vmatprep.subr.bf16.mxu1 %v9603_v1 }
 0xfbc   :  { %4947 = vmatpush1.bf16.msra.mxu1 %v11634_v63 }
 0xfbd   :  { %4948 = vmatprep.subr.bf16.mxu1 %v9603_v1 }
 0xfc0   :  { %4949 = vmatpush1.bf16.msra.mxu1 %v11641_v4 }
 0xfc1   :  { %4950 = vmatprep.subr.bf16.mxu1 %v9603_v1 }
 0xfc4   :  { %4951 = vmatpush1.bf16.msra.mxu1 %v11648_v6  ;;  %v4900_v7 = vpop.f32.mrb[140].mxu0 }
 0xfc5   :  { %4952 = vmatprep.subr.bf16.mxu1 %v9603_v1  ;;  %v4902_v8 = vpop.f32.mrb[141].mxu0  ;;  %v4901_v14 = vadd.f32 %v11459_v44, %v4900_v7 }
 0xfc6   :  { %v4903_v9 = vpop.f32.mrb[142].mxu0 }
 0xfc7   :  { %v4904_v10 = vpop.f32.mrb[143].mxu0  ;;  %v4906_v45 = vmax.f32 %v4901_v14, 0.0 }
 0xfc8   :  { %4953 = vmatpush1.bf16.msra.mxu1 %v11213_v36 }
 0xfc9   :  { %4954 = vmatprep.subr.bf16.mxu1 %v9603_v1 }
 0xfcc   :  { %4955 = vmatpush1.bf16.msra.mxu1 %v9762_v25 }
 0xfcd   :  { %5077 = vmatprep.subr.bf16.mxu1 %v9603_v1 }
 0xfcf   :  { %4969 = vmatmul.mubr.bf16.vlgmr.msra.gmra.mrb[140].mxu1 %v4924_v11  ;;  %v5261_v11 = vrot.slane %v9038_v52, %v9707_v15  ;;  %v9054_v52 = vld.sshfl [vmem:[%s13056_s0 + $0x82] sm:$0x11 pattern:$0x75316420] }
 0xfd0   :  { %5078 = vmatpush1.bf16.msra.mxu1 %v11561_v29  ;;  %9029 = vmatprep.mubr.msk.bf16.mxu1 %vm142_vm0, %v5072_v0  ;;  %v5409_v0 = vrot.slane %v5395_v46, %v9707_v15  ;;  %v5591_v57 = vcombine.high %v9054_v52, %v9054_v52  ;;  %v5598_v46 = vrot.slane %v9054_v52, %v9707_v15  ;;  %v9070_v52 = vld.sshfl [vmem:[%s13056_s0 + $0x8a] sm:$0x11 pattern:$0x75316420] }
 0xfd1   :  { %5079 = vmatprep.subr.bf16.mxu1 %v9603_v1 }
 0xfd4   :  { %5080 = vmatpush1.bf16.msra.mxu1 %v11568_v34 }
 0xfd5   :  { %5081 = vmatprep.subr.bf16.mxu1 %v9603_v1 }
 0xfd8   :  { %5082 = vmatpush1.bf16.msra.mxu1 %v11575_v30 }
 0xfd9   :  { %5083 = vmatprep.subr.bf16.mxu1 %v9603_v1 }
 0xfdc   :  { %5084 = vmatpush1.bf16.msra.mxu1 %v11582_v43 }
 0xfdd   :  { %5085 = vmatprep.subr.bf16.mxu1 %v9603_v1 }
 0xfe0   :  { %5086 = vmatpush1.bf16.msra.mxu1 %v11627_v62 }
 0xfe1   :  { %5087 = vmatprep.subr.bf16.mxu1 %v9603_v1 }
 0xfe4   :  { %5088 = vmatpush1.bf16.msra.mxu1 %v11634_v63 }
 0xfe5   :  { %5089 = vmatprep.subr.bf16.mxu1 %v9603_v1 }
 0xfe8   :  { %5090 = vmatpush1.bf16.msra.mxu1 %v11641_v4 }
 0xfe9   :  { %5091 = vmatprep.subr.bf16.mxu1 %v9603_v1 }
 0xfec   :  { %5092 = vmatpush1.bf16.msra.mxu1 %v11648_v6 }
 0xfed   :  { %5093 = vmatprep.subr.bf16.mxu1 %v9603_v1 }
 0xff0   :  { %5094 = vmatpush1.bf16.msra.mxu1 %v11213_v36  ;;  %v11702_v36 = vld [vmem:[%s13057_s1 + $0x40] sm:$0xff]  }
 0xff1   :  { %5095 = vmatprep.subr.bf16.mxu1 %v9603_v1 }
 0xff4   :  { %5096 = vmatpush1.bf16.msra.mxu1 %v9762_v25 }
 0xff5   :  { %5203 = vmatprep.subr.bf16.mxu1 %v9603_v1 }
 0xff7   :  { %5110 = vmatmul.mubr.bf16.vlgmr.msra.gmra.mrb[144].mxu1 %v5065_v2  ;;  %v5402_v2 = vrot.slane %v9044_v35, %v9707_v15 }
 0xff8   :  { %5204 = vmatpush1.bf16.msra.mxu1 %v11561_v29  ;;  %9036 = vmatprep.mubr.msk.bf16.mxu1 %vm142_vm0, %v5198_v17  ;;  %v5535_v17 = vrot.slane %v5521_v24, %v9707_v15 }
 0xff9   :  { %5205 = vmatprep.subr.bf16.mxu1 %v9603_v1 }
 0xffc   :  { %5206 = vmatpush1.bf16.msra.mxu1 %v11568_v34 }
 0xffd   :  { %5207 = vmatprep.subr.bf16.mxu1 %v9603_v1 }
0x1000   :  { %5208 = vmatpush1.bf16.msra.mxu1 %v11575_v30 }
0x1001   :  { %5209 = vmatprep.subr.bf16.mxu1 %v9603_v1 }
0x1004   :  { %5210 = vmatpush1.bf16.msra.mxu1 %v11582_v43 }
0x1005   :  { %5211 = vmatprep.subr.bf16.mxu1 %v9603_v1 }
0x1008   :  { %5212 = vmatpush1.bf16.msra.mxu1 %v11627_v62 }
0x1009   :  { %5213 = vmatprep.subr.bf16.mxu1 %v9603_v1 }
0x100c   :  { %5214 = vmatpush1.bf16.msra.mxu1 %v11634_v63 }
0x100d   :  { %5215 = vmatprep.subr.bf16.mxu1 %v9603_v1 }
0x1010   :  { %5216 = vmatpush1.bf16.msra.mxu1 %v11641_v4 }
0x1011   :  { %5217 = vmatprep.subr.bf16.mxu1 %v9603_v1 }
0x1014   :  { %5218 = vmatpush1.bf16.msra.mxu1 %v11648_v6 }
0x1015   :  { %5219 = vmatprep.subr.bf16.mxu1 %v9603_v1 }
0x1018   :  { %5220 = vmatpush1.bf16.msra.mxu1 %v11702_v36 }
0x1019   :  { %5221 = vmatprep.subr.bf16.mxu1 %v9603_v1 }
0x101c   :  { %5222 = vmatpush1.bf16.msra.mxu1 %v9762_v25 }
0x101d   :  { %5344 = vmatprep.subr.bf16.mxu1 %v9603_v1 }
0x101f   :  { %5236 = vmatmul.mubr.bf16.vlgmr.msra.gmra.mrb[148].mxu1 %v5191_v26  ;;  %v5528_v26 = vrot.slane %v9051_v23, %v9707_v15 }
0x1020   :  { %5345 = vmatpush1.bf16.msra.mxu1 %v11561_v29 }
0x1021   :  { %5346 = vmatprep.subr.bf16.mxu1 %v9603_v1 }
0x1024   :  { %5347 = vmatpush1.bf16.msra.mxu1 %v11568_v34 }
0x1025   :  { %5348 = vmatprep.subr.bf16.mxu1 %v9603_v1 }
0x1028   :  { %5349 = vmatpush1.bf16.msra.mxu1 %v11575_v30 }
0x1029   :  { %5350 = vmatprep.subr.bf16.mxu1 %v9603_v1 }
0x102c   :  { %5351 = vmatpush1.bf16.msra.mxu1 %v11582_v43 }
0x102d   :  { %5352 = vmatprep.subr.bf16.mxu1 %v9603_v1 }
0x1030   :  { %5353 = vmatpush1.bf16.msra.mxu1 %v11627_v62 }
0x1031   :  { %5354 = vmatprep.subr.bf16.mxu1 %v9603_v1 }
0x1034   :  { %5355 = vmatpush1.bf16.msra.mxu1 %v11634_v63 }
0x1035   :  { %5356 = vmatprep.subr.bf16.mxu1 %v9603_v1 }
0x1038   :  { %5357 = vmatpush1.bf16.msra.mxu1 %v11641_v4 }
0x1039   :  { %5358 = vmatprep.subr.bf16.mxu1 %v9603_v1 }
0x103c   :  { %5359 = vmatpush1.bf16.msra.mxu1 %v11648_v6 }
0x103d   :  { %5360 = vmatprep.subr.bf16.mxu1 %v9603_v1 }
0x1040   :  { %v5041_v41 = vpop.f32.mrb[144].mxu0  ;;  %5361 = vmatpush1.bf16.msra.mxu1 %v11702_v36 }
0x1041   :  { %v5043_v40 = vpop.f32.mrb[145].mxu0  ;;  %5362 = vmatprep.subr.bf16.mxu1 %v9603_v1  ;;  %v5042_v21 = vadd.f32 %v11459_v44, %v5041_v41 }
0x1042   :  { %v5044_v12 = vpop.f32.mrb[146].mxu0 }
0x1043   :  { %v5045_v13 = vpop.f32.mrb[147].mxu0  ;;  %v5047_v48 = vmax.f32 %v5042_v21, 0.0 }
0x1044   :  { %5363 = vmatpush1.bf16.msra.mxu1 %v9762_v25 }
0x1045   :  { %9369 = vmatprep.subr.bf16.mxu1 %v9605_v51 }
0x107a   :  { %v4830_v27 = vpop.f32.mrb[136].mxu1 }
0x107b   :  { %v11719_v18 = vadd.f32 %v4830_v27, %v11556_v53  ;;  %v9361_v28 = vpop.f32.mrb[137].mxu1  ;;  %v9041_v53 = vld.sshfl [vmem:[%s13056_s0 + $0x7c] sm:$0x11 pattern:$0x75316420] }
0x107c   :  { %v4833_v38 = vpop.f32.mrb[138].mxu1  ;;  %v5325_v37 = vcombine.high %v9041_v53, %v9041_v53  ;;  %v5332_v39 = vrot.slane %v9041_v53, %v9707_v15 }
0x107d   :  { %v9362_v42 = vpop.f32.mrb[139].mxu1 }
0x107e   :  { %v5339_v31 = vrot.slane %v5325_v37, %v9707_v15 }
0x1080   :  { %9042 = vmatprep.mubr.msk.bf16.mxu1 %vm142_vm0, %v5339_v31 }
0x1081   :  { %5377 = vmatmul.mubr.bf16.vlgmr.msra.gmra.mrb[152].mxu1 %v5332_v39 }
0x1082   :  { %9371 = vmatprep.mubr.msk.bf16.mxu1 %vm9606_vm2, %v9605_v51  ;;  %9370 = vmatpush3.bf16.msra.mxu1 %v9495_v22  ;;  %v9067_v22 = vld.sshfl [vmem:[%s13056_s0 + $0x88] sm:$0x11 pattern:$0x75316420] }
0x1083   :  { %5610 = vmatprep.subr.bf16.mxu1 %v9603_v1  ;;  %v5858_v23 = vcombine.high %v9067_v22, %v9067_v22 }
0x1085   :  { %v5872_v24 = vrot.slane %v5858_v23, %v9707_v15 }
0x10a2   :  { %v4970_v3 = vpop.f32.mrb[140].mxu1 }
0x10a3   :  { %v4971_v5 = vadd.f32 %v11459_v44, %v4970_v3  ;;  %v4972_v32 = vpop.f32.mrb[141].mxu1 }
0x10a4   :  { %v4973_v33 = vpop.f32.mrb[142].mxu1 }
0x10a5   :  { %v4976_v16 = vmax.f32 %v4971_v5, 0.0  ;;  %v4974_v47 = vpop.f32.mrb[143].mxu1 }
0x10a7   :  { %v4977_v19 = vmax.f32 %v4906_v45, %v4976_v16 }
0x10ca   :  { %v5111_v20 = vpop.f32.mrb[144].mxu1 }
0x10cb   :  { %v5112_v49 = vadd.f32 %v11459_v44, %v5111_v20  ;;  %v5113_v50 = vpop.f32.mrb[145].mxu1 }
0x10cc   :  { %v5114_v54 = vpop.f32.mrb[146].mxu1 }
0x10cd   :  { %v5117_v55 = vmax.f32 %v5112_v49, 0.0  ;;  %v5115_v56 = vpop.f32.mrb[147].mxu1 }
0x10cf   :  { %v5118_v58 = vmax.f32 %v5047_v48, %v5117_v55 }
0x10d1   :  { %v5119_v59 = vmax.f32 %v4977_v19, %v5118_v58 }
0x10d3   :  { %v5120_v61 = vpack.c.bf16 %v5119_v59, %v5119_v59 }
0x10d5   :  { %9366 = vmatmul.mubr.msk.bf16.vlgmr.msra.gmra.mrb[148].mxu0 %vm700_vm3, %v5120_v61 }
0x10d6   :  { %5274 = vmatpush1.bf16.msra.mxu0 %v11561_v29  ;;  %9039 = vmatprep.mubr.msk.bf16.mxu0 %vm142_vm0, %v5268_v60  ;;  %v5605_v60 = vrot.slane %v5591_v57, %v9707_v15  ;;  %v5928_v57 = vcombine.high %v9070_v52, %v9070_v52 }
0x10d7   :  { %5275 = vmatprep.subr.bf16.mxu0 %v9603_v1 }
0x10da   :  { %5276 = vmatpush1.bf16.msra.mxu0 %v11568_v34 }
0x10db   :  { %5277 = vmatprep.subr.bf16.mxu0 %v9603_v1 }
0x10de   :  { %5278 = vmatpush1.bf16.msra.mxu0 %v11575_v30 }
0x10df   :  { %5279 = vmatprep.subr.bf16.mxu0 %v9603_v1 }
0x10e2   :  { %5280 = vmatpush1.bf16.msra.mxu0 %v11582_v43 }
0x10e3   :  { %5281 = vmatprep.subr.bf16.mxu0 %v9603_v1 }
0x10e6   :  { %5282 = vmatpush1.bf16.msra.mxu0 %v11627_v62 }
0x10e7   :  { %5283 = vmatprep.subr.bf16.mxu0 %v9603_v1 }
0x10ea   :  { %5284 = vmatpush1.bf16.msra.mxu0 %v11634_v63 }
0x10eb   :  { %5285 = vmatprep.subr.bf16.mxu0 %v9603_v1 }
0x10ee   :  { %5286 = vmatpush1.bf16.msra.mxu0 %v11641_v4 }
0x10ef   :  { %5287 = vmatprep.subr.bf16.mxu0 %v9603_v1 }
0x10f2   :  { %5288 = vmatpush1.bf16.msra.mxu0 %v11648_v6  ;;  %v5237_v7 = vpop.f32.mrb[148].mxu1 }
0x10f3   :  { %5289 = vmatprep.subr.bf16.mxu0 %v9603_v1  ;;  %v5239_v8 = vpop.f32.mrb[149].mxu1  ;;  %v5238_v14 = vadd.f32 %v11459_v44, %v5237_v7 }
0x10f4   :  { %v5240_v9 = vpop.f32.mrb[150].mxu1 }
0x10f5   :  { %v5241_v10 = vpop.f32.mrb[151].mxu1  ;;  %v5243_v45 = vmax.f32 %v5238_v14, 0.0 }
0x10f6   :  { %5290 = vmatpush1.bf16.msra.mxu0 %v11702_v36 }
0x10f7   :  { %5291 = vmatprep.subr.bf16.mxu0 %v9603_v1 }
0x10fa   :  { %5292 = vmatpush1.bf16.msra.mxu0 %v9762_v25 }
0x10fb   :  { %5414 = vmatprep.subr.bf16.mxu0 %v9603_v1 }
0x10fd   :  { %5306 = vmatmul.mubr.bf16.vlgmr.msra.gmra.mrb[152].mxu0 %v5261_v11 }
0x10fe   :  { %5415 = vmatpush1.bf16.msra.mxu0 %v11561_v29  ;;  %9045 = vmatprep.mubr.msk.bf16.mxu0 %vm142_vm0, %v5409_v0 }
0x10ff   :  { %5416 = vmatprep.subr.bf16.mxu0 %v9603_v1 }
0x1102   :  { %5417 = vmatpush1.bf16.msra.mxu0 %v11568_v34 }
0x1103   :  { %5418 = vmatprep.subr.bf16.mxu0 %v9603_v1 }
0x1106   :  { %5419 = vmatpush1.bf16.msra.mxu0 %v11575_v30 }
0x1107   :  { %5420 = vmatprep.subr.bf16.mxu0 %v9603_v1 }
0x110a   :  { %5421 = vmatpush1.bf16.msra.mxu0 %v11582_v43 }
0x110b   :  { %5422 = vmatprep.subr.bf16.mxu0 %v9603_v1 }
0x110e   :  { %5423 = vmatpush1.bf16.msra.mxu0 %v11627_v62 }
0x110f   :  { %5424 = vmatprep.subr.bf16.mxu0 %v9603_v1 }
0x1112   :  { %5425 = vmatpush1.bf16.msra.mxu0 %v11634_v63 }
0x1113   :  { %5426 = vmatprep.subr.bf16.mxu0 %v9603_v1 }
0x1116   :  { %5427 = vmatpush1.bf16.msra.mxu0 %v11641_v4 }
0x1117   :  { %5428 = vmatprep.subr.bf16.mxu0 %v9603_v1 }
0x111a   :  { %5429 = vmatpush1.bf16.msra.mxu0 %v11648_v6 }
0x111b   :  { %5430 = vmatprep.subr.bf16.mxu0 %v9603_v1 }
0x111e   :  { %5431 = vmatpush1.bf16.msra.mxu0 %v11702_v36 }
0x111f   :  { %5432 = vmatprep.subr.bf16.mxu0 %v9603_v1 }
0x1122   :  { %5433 = vmatpush1.bf16.msra.mxu0 %v9762_v25 }
0x1123   :  { %5540 = vmatprep.subr.bf16.mxu0 %v9603_v1 }
0x1125   :  { %5447 = vmatmul.mubr.bf16.vlgmr.msra.gmra.mrb[156].mxu0 %v5402_v2 }
0x1126   :  { %5541 = vmatpush1.bf16.msra.mxu0 %v11561_v29  ;;  %9052 = vmatprep.mubr.msk.bf16.mxu0 %vm142_vm0, %v5535_v17  ;;  %v5865_v17 = vrot.slane %v9067_v22, %v9707_v15 }
0x1127   :  { %5542 = vmatprep.subr.bf16.mxu0 %v9603_v1 }
0x112a   :  { %5543 = vmatpush1.bf16.msra.mxu0 %v11568_v34 }
0x112b   :  { %5544 = vmatprep.subr.bf16.mxu0 %v9603_v1 }
0x112e   :  { %5545 = vmatpush1.bf16.msra.mxu0 %v11575_v30 }
0x112f   :  { %5546 = vmatprep.subr.bf16.mxu0 %v9603_v1 }
0x1132   :  { %5547 = vmatpush1.bf16.msra.mxu0 %v11582_v43 }
0x1133   :  { %5548 = vmatprep.subr.bf16.mxu0 %v9603_v1 }
0x1136   :  { %5549 = vmatpush1.bf16.msra.mxu0 %v11627_v62 }
0x1137   :  { %5550 = vmatprep.subr.bf16.mxu0 %v9603_v1 }
0x113a   :  { %5551 = vmatpush1.bf16.msra.mxu0 %v11634_v63 }
0x113b   :  { %5552 = vmatprep.subr.bf16.mxu0 %v9603_v1 }
0x113e   :  { %5553 = vmatpush1.bf16.msra.mxu0 %v11641_v4 }
0x113f   :  { %5554 = vmatprep.subr.bf16.mxu0 %v9603_v1 }
0x1142   :  { %5555 = vmatpush1.bf16.msra.mxu0 %v11648_v6 }
0x1143   :  { %5556 = vmatprep.subr.bf16.mxu0 %v9603_v1 }
0x1146   :  { %5557 = vmatpush1.bf16.msra.mxu0 %v11702_v36 }
0x1147   :  { %5558 = vmatprep.subr.bf16.mxu0 %v9603_v1 }
0x114a   :  { %5559 = vmatpush1.bf16.msra.mxu0 %v9762_v25 }
0x114b   :  { %5681 = vmatprep.subr.bf16.mxu0 %v9603_v1 }
0x114d   :  { %5573 = vmatmul.mubr.bf16.vlgmr.msra.gmra.mrb[160].mxu0 %v5528_v26 }
0x114e   :  { %5682 = vmatpush1.bf16.msra.mxu0 %v11561_v29 }
0x114f   :  { %5683 = vmatprep.subr.bf16.mxu0 %v9603_v1 }
0x1152   :  { %5684 = vmatpush1.bf16.msra.mxu0 %v11568_v34 }
0x1153   :  { %5685 = vmatprep.subr.bf16.mxu0 %v9603_v1 }
0x1154   :  { %v5378_v41 = vpop.f32.mrb[152].mxu1 }
0x1155   :  { %v5380_v40 = vpop.f32.mrb[153].mxu1  ;;  %v5379_v21 = vadd.f32 %v11459_v44, %v5378_v41 }
0x1156   :  { %v5381_v12 = vpop.f32.mrb[154].mxu1  ;;  %5686 = vmatpush1.bf16.msra.mxu0 %v11575_v30 }
0x1157   :  { %v5382_v13 = vpop.f32.mrb[155].mxu1  ;;  %5687 = vmatprep.subr.bf16.mxu0 %v9603_v1  ;;  %v5384_v48 = vmax.f32 %v5379_v21, 0.0 }
0x1158   :  { %v9496_v13 = vld [vmem:[%s13059_s3 + $0x80] sm:$0xff]  }
0x115a   :  { %5688 = vmatpush1.bf16.msra.mxu0 %v11582_v43 }
0x115b   :  { %5689 = vmatprep.subr.bf16.mxu0 %v9603_v1 }
0x115e   :  { %5690 = vmatpush1.bf16.msra.mxu0 %v11627_v62 }
0x115f   :  { %5691 = vmatprep.subr.bf16.mxu0 %v9603_v1 }
0x1162   :  { %5692 = vmatpush1.bf16.msra.mxu0 %v11634_v63 }
0x1163   :  { %5693 = vmatprep.subr.bf16.mxu0 %v9603_v1 }
0x1166   :  { %5694 = vmatpush1.bf16.msra.mxu0 %v11641_v4 }
0x1167   :  { %5695 = vmatprep.subr.bf16.mxu0 %v9603_v1 }
0x116a   :  { %5696 = vmatpush1.bf16.msra.mxu0 %v11648_v6 }
0x116b   :  { %5697 = vmatprep.subr.bf16.mxu0 %v9603_v1 }
0x116e   :  { %5698 = vmatpush1.bf16.msra.mxu0 %v11702_v36 }
0x116f   :  { %5699 = vmatprep.subr.bf16.mxu0 %v9603_v1 }
0x1172   :  { %5700 = vmatpush1.bf16.msra.mxu0 %v9762_v25 }
0x1173   :  { %9375 = vmatprep.subr.bf16.mxu0 %v9605_v51 }
0x11a8   :  { %v5167_v27 = vpop.f32.mrb[148].mxu0 }
0x11a9   :  { %v11837_v28 = vadd.f32 %v5167_v27, %v11719_v18  ;;  %v9367_v38 = vpop.f32.mrb[149].mxu0  ;;  %v9057_v18 = vld.sshfl [vmem:[%s13056_s0 + $0x84] sm:$0x11 pattern:$0x75316420] }
0x11aa   :  { %v5170_v42 = vpop.f32.mrb[150].mxu0  ;;  %v5662_v37 = vcombine.high %v9057_v18, %v9057_v18  ;;  %v5669_v39 = vrot.slane %v9057_v18, %v9707_v15 }
0x11ab   :  { %v9368_v53 = vpop.f32.mrb[151].mxu0 }
0x11ac   :  { %v5676_v31 = vrot.slane %v5662_v37, %v9707_v15  ;;  %v11981_v37 = vld [vmem:[%s13058_s2] ss:$0 sm:$0xff] }
0x11ae   :  { %9058 = vmatprep.mubr.msk.bf16.mxu0 %vm142_vm0, %v5676_v31 }
0x11af   :  { %5714 = vmatmul.mubr.bf16.vlgmr.msra.gmra.mrb[164].mxu0 %v5669_v39 }
0x11b0   :  { %9377 = vmatprep.mubr.msk.bf16.mxu0 %vm9606_vm2, %v9605_v51  ;;  %9376 = vmatpush3.bf16.msra.mxu0 %v9496_v13 }
0x11b1   :  { %5947 = vmatprep.subr.bf16.mxu0 %v9603_v1 }
0x11d0   :  { %v5307_v3 = vpop.f32.mrb[152].mxu0 }
0x11d1   :  { %v5308_v5 = vadd.f32 %v11459_v44, %v5307_v3  ;;  %v5309_v32 = vpop.f32.mrb[153].mxu0 }
0x11d2   :  { %v5310_v33 = vpop.f32.mrb[154].mxu0 }
0x11d3   :  { %v5313_v16 = vmax.f32 %v5308_v5, 0.0  ;;  %v5311_v47 = vpop.f32.mrb[155].mxu0 }
0x11d5   :  { %v5314_v19 = vmax.f32 %v5243_v45, %v5313_v16 }
0x11f8   :  { %v5448_v20 = vpop.f32.mrb[156].mxu0 }
0x11f9   :  { %v5449_v49 = vadd.f32 %v11459_v44, %v5448_v20  ;;  %v5450_v50 = vpop.f32.mrb[157].mxu0  ;;  %v9060_v44 = vld.sshfl [vmem:[%s13056_s0 + $0x86] sm:$0x11 pattern:$0x75316420] }
0x11fa   :  { %v5451_v54 = vpop.f32.mrb[158].mxu0  ;;  %v5732_v35 = vcombine.high %v9060_v44, %v9060_v44  ;;  %v5739_v0 = vrot.slane %v9060_v44, %v9707_v15  ;;  %v9076_v44 = vld.sshfl [vmem:[%s13056_s0 + $0x8e] sm:$0x11 pattern:$0x75316420] }
0x11fb   :  { %v5454_v55 = vmax.f32 %v5449_v49, 0.0  ;;  %v5452_v56 = vpop.f32.mrb[159].mxu0 }
0x11fc   :  { %v5746_v11 = vrot.slane %v5732_v35, %v9707_v15  ;;  %v6069_v35 = vcombine.high %v9076_v44, %v9076_v44 }
0x11fd   :  { %v5455_v58 = vmax.f32 %v5384_v48, %v5454_v55 }
0x11ff   :  { %v5456_v59 = vmax.f32 %v5314_v19, %v5455_v58 }
0x1201   :  { %v5457_v61 = vpack.c.bf16 %v5456_v59, %v5456_v59 }
0x1203   :  { %9372 = vmatmul.mubr.msk.bf16.vlgmr.msra.gmra.mrb[156].mxu1 %vm700_vm3, %v5457_v61 }
0x1204   :  { %5611 = vmatpush1.bf16.msra.mxu1 %v11561_v29  ;;  %9055 = vmatprep.mubr.msk.bf16.mxu1 %vm142_vm0, %v5605_v60  ;;  %v5942_v60 = vrot.slane %v5928_v57, %v9707_v15 }
0x1205   :  { %5612 = vmatprep.subr.bf16.mxu1 %v9603_v1 }
0x1208   :  { %5613 = vmatpush1.bf16.msra.mxu1 %v11568_v34 }
0x1209   :  { %5614 = vmatprep.subr.bf16.mxu1 %v9603_v1 }
0x120c   :  { %5615 = vmatpush1.bf16.msra.mxu1 %v11575_v30 }
0x120d   :  { %5616 = vmatprep.subr.bf16.mxu1 %v9603_v1 }
0x1210   :  { %5617 = vmatpush1.bf16.msra.mxu1 %v11582_v43 }
0x1211   :  { %5618 = vmatprep.subr.bf16.mxu1 %v9603_v1 }
0x1214   :  { %5619 = vmatpush1.bf16.msra.mxu1 %v11627_v62 }
0x1215   :  { %5620 = vmatprep.subr.bf16.mxu1 %v9603_v1 }
0x1218   :  { %5621 = vmatpush1.bf16.msra.mxu1 %v11634_v63 }
0x1219   :  { %5622 = vmatprep.subr.bf16.mxu1 %v9603_v1 }
0x121c   :  { %5623 = vmatpush1.bf16.msra.mxu1 %v11641_v4 }
0x121d   :  { %5624 = vmatprep.subr.bf16.mxu1 %v9603_v1 }
0x1220   :  { %5625 = vmatpush1.bf16.msra.mxu1 %v11648_v6  ;;  %v5574_v2 = vpop.f32.mrb[160].mxu0 }
0x1221   :  { %5626 = vmatprep.subr.bf16.mxu1 %v9603_v1  ;;  %v5576_v7 = vpop.f32.mrb[161].mxu0  ;;  %v5575_v14 = vadd.f32 %v11981_v37, %v5574_v2 }
0x1222   :  { %v5577_v8 = vpop.f32.mrb[162].mxu0 }
0x1223   :  { %v5578_v9 = vpop.f32.mrb[163].mxu0  ;;  %v5580_v45 = vmax.f32 %v5575_v14, 0.0 }
0x1224   :  { %5627 = vmatpush1.bf16.msra.mxu1 %v11702_v36 }
0x1225   :  { %5628 = vmatprep.subr.bf16.mxu1 %v9603_v1 }
0x1228   :  { %5629 = vmatpush1.bf16.msra.mxu1 %v9762_v25 }
0x1229   :  { %5751 = vmatprep.subr.bf16.mxu1 %v9603_v1 }
0x122b   :  { %5643 = vmatmul.mubr.bf16.vlgmr.msra.gmra.mrb[160].mxu1 %v5598_v46  ;;  %v5935_v46 = vrot.slane %v9070_v52, %v9707_v15 }
0x122c   :  { %5752 = vmatpush1.bf16.msra.mxu1 %v11561_v29  ;;  %9061 = vmatprep.mubr.msk.bf16.mxu1 %vm142_vm0, %v5746_v11  ;;  %v6083_v11 = vrot.slane %v6069_v35, %v9707_v15 }
0x122d   :  { %5753 = vmatprep.subr.bf16.mxu1 %v9603_v1 }
0x1230   :  { %5754 = vmatpush1.bf16.msra.mxu1 %v11568_v34 }
0x1231   :  { %5755 = vmatprep.subr.bf16.mxu1 %v9603_v1 }
0x1234   :  { %5756 = vmatpush1.bf16.msra.mxu1 %v11575_v30 }
0x1235   :  { %5757 = vmatprep.subr.bf16.mxu1 %v9603_v1 }
0x1238   :  { %5758 = vmatpush1.bf16.msra.mxu1 %v11582_v43 }
0x1239   :  { %5759 = vmatprep.subr.bf16.mxu1 %v9603_v1 }
0x123c   :  { %5760 = vmatpush1.bf16.msra.mxu1 %v11627_v62 }
0x123d   :  { %5761 = vmatprep.subr.bf16.mxu1 %v9603_v1 }
0x1240   :  { %5762 = vmatpush1.bf16.msra.mxu1 %v11634_v63 }
0x1241   :  { %5763 = vmatprep.subr.bf16.mxu1 %v9603_v1 }
0x1244   :  { %5764 = vmatpush1.bf16.msra.mxu1 %v11641_v4 }
0x1245   :  { %5765 = vmatprep.subr.bf16.mxu1 %v9603_v1 }
0x1248   :  { %5766 = vmatpush1.bf16.msra.mxu1 %v11648_v6 }
0x1249   :  { %5767 = vmatprep.subr.bf16.mxu1 %v9603_v1 }
0x124c   :  { %5768 = vmatpush1.bf16.msra.mxu1 %v11702_v36 }
0x124d   :  { %5769 = vmatprep.subr.bf16.mxu1 %v9603_v1 }
0x1250   :  { %5770 = vmatpush1.bf16.msra.mxu1 %v9762_v25 }
0x1251   :  { %5877 = vmatprep.subr.bf16.mxu1 %v9603_v1 }
0x1253   :  { %5784 = vmatmul.mubr.bf16.vlgmr.msra.gmra.mrb[164].mxu1 %v5739_v0  ;;  %v12071_v0 = vld [vmem:[%s13057_s1 + $0x18] sm:$0xff]  }
0x1254   :  { %5878 = vmatpush1.bf16.msra.mxu1 %v11561_v29  ;;  %9068 = vmatprep.mubr.msk.bf16.mxu1 %vm142_vm0, %v5872_v24 }
0x1255   :  { %5879 = vmatprep.subr.bf16.mxu1 %v9603_v1 }
0x1258   :  { %5880 = vmatpush1.bf16.msra.mxu1 %v11568_v34 }
0x1259   :  { %5881 = vmatprep.subr.bf16.mxu1 %v9603_v1 }
0x125c   :  { %5882 = vmatpush1.bf16.msra.mxu1 %v11575_v30 }
0x125d   :  { %5883 = vmatprep.subr.bf16.mxu1 %v9603_v1 }
0x1260   :  { %5884 = vmatpush1.bf16.msra.mxu1 %v11582_v43 }
0x1261   :  { %5885 = vmatprep.subr.bf16.mxu1 %v9603_v1 }
0x1264   :  { %5886 = vmatpush1.bf16.msra.mxu1 %v11627_v62 }
0x1265   :  { %5887 = vmatprep.subr.bf16.mxu1 %v9603_v1 }
0x1268   :  { %5888 = vmatpush1.bf16.msra.mxu1 %v11634_v63 }
0x1269   :  { %5889 = vmatprep.subr.bf16.mxu1 %v9603_v1 }
0x126c   :  { %5890 = vmatpush1.bf16.msra.mxu1 %v11641_v4 }
0x126d   :  { %5891 = vmatprep.subr.bf16.mxu1 %v9603_v1 }
0x1270   :  { %5892 = vmatpush1.bf16.msra.mxu1 %v11648_v6 }
0x1271   :  { %5893 = vmatprep.subr.bf16.mxu1 %v9603_v1 }
0x1274   :  { %5894 = vmatpush1.bf16.msra.mxu1 %v11702_v36 }
0x1275   :  { %5895 = vmatprep.subr.bf16.mxu1 %v9603_v1 }
0x1278   :  { %5896 = vmatpush1.bf16.msra.mxu1 %v9762_v25 }
0x1279   :  { %6018 = vmatprep.subr.bf16.mxu1 %v9603_v1 }
0x127b   :  { %5910 = vmatmul.mubr.bf16.vlgmr.msra.gmra.mrb[168].mxu1 %v5865_v17 }
0x127c   :  { %6019 = vmatpush1.bf16.msra.mxu1 %v11561_v29 }
0x127d   :  { %6020 = vmatprep.subr.bf16.mxu1 %v9603_v1 }
0x1280   :  { %6021 = vmatpush1.bf16.msra.mxu1 %v11568_v34 }
0x1281   :  { %6022 = vmatprep.subr.bf16.mxu1 %v9603_v1 }
0x1282   :  { %v5715_v10 = vpop.f32.mrb[164].mxu0 }
0x1283   :  { %v5717_v41 = vpop.f32.mrb[165].mxu0  ;;  %v5716_v21 = vadd.f32 %v11981_v37, %v5715_v10 }
0x1284   :  { %v5718_v40 = vpop.f32.mrb[166].mxu0  ;;  %6023 = vmatpush1.bf16.msra.mxu1 %v11575_v30  ;;  %v9083_v41 = vld.sshfl [vmem:[%s13056_s0 + $0x90] sm:$0x11 pattern:$0x75316420] }
0x1285   :  { %v5719_v12 = vpop.f32.mrb[167].mxu0  ;;  %6024 = vmatprep.subr.bf16.mxu1 %v9603_v1  ;;  %v5721_v48 = vmax.f32 %v5716_v21, 0.0  ;;  %v6195_v40 = vcombine.high %v9083_v41, %v9083_v41  ;;  %v6202_v13 = vrot.slane %v9083_v41, %v9707_v15  ;;  %v9099_v41 = vld.sshfl [vmem:[%s13056_s0 + $0x98] sm:$0x11 pattern:$0x75316420] }
0x1287   :  { %v6209_v12 = vrot.slane %v6195_v40, %v9707_v15  ;;  %v6532_v40 = vcombine.high %v9099_v41, %v9099_v41 }
0x1288   :  { %6025 = vmatpush1.bf16.msra.mxu1 %v11582_v43 }
0x1289   :  { %6026 = vmatprep.subr.bf16.mxu1 %v9603_v1 }
0x128c   :  { %6027 = vmatpush1.bf16.msra.mxu1 %v11627_v62 }
0x128d   :  { %6028 = vmatprep.subr.bf16.mxu1 %v9603_v1 }
0x1290   :  { %6029 = vmatpush1.bf16.msra.mxu1 %v11634_v63 }
0x1291   :  { %6030 = vmatprep.subr.bf16.mxu1 %v9603_v1 }
0x1294   :  { %6031 = vmatpush1.bf16.msra.mxu1 %v11641_v4 }
0x1295   :  { %6032 = vmatprep.subr.bf16.mxu1 %v9603_v1 }
0x1298   :  { %6033 = vmatpush1.bf16.msra.mxu1 %v11648_v6 }
0x1299   :  { %6034 = vmatprep.subr.bf16.mxu1 %v9603_v1 }
0x129c   :  { %6035 = vmatpush1.bf16.msra.mxu1 %v11702_v36 }
0x129d   :  { %6036 = vmatprep.subr.bf16.mxu1 %v9603_v1 }
0x12a0   :  { %6037 = vmatpush1.bf16.msra.mxu1 %v9762_v25 }
0x12a1   :  { %9381 = vmatprep.subr.bf16.mxu1 %v9605_v51 }
0x12d6   :  { %v5504_v26 = vpop.f32.mrb[156].mxu1 }
0x12d7   :  { %v11955_v27 = vadd.f32 %v5504_v26, %v11837_v28  ;;  %v9373_v38 = vpop.f32.mrb[157].mxu1  ;;  %v9073_v28 = vld.sshfl [vmem:[%s13056_s0 + $0x8c] sm:$0x11 pattern:$0x75316420] }
0x12d8   :  { %v5507_v42 = vpop.f32.mrb[158].mxu1  ;;  %v5999_v18 = vcombine.high %v9073_v28, %v9073_v28  ;;  %v6006_v39 = vrot.slane %v9073_v28, %v9707_v15  ;;  %v12118_v38 = vld [vmem:[%s13057_s1 + $0x28] sm:$0xff]   ;;  %v9089_v28 = vld.sshfl [vmem:[%s13056_s0 + $0x94] sm:$0x11 pattern:$0x75316420] }
0x12d9   :  { %v9374_v53 = vpop.f32.mrb[159].mxu1  ;;  %v12125_v42 = vld [vmem:[%s13057_s1 + $0x30] sm:$0xff]  }
0x12da   :  { %v6013_v31 = vrot.slane %v5999_v18, %v9707_v15  ;;  %v12132_v53 = vld [vmem:[%s13057_s1 + $0x38] sm:$0xff]   ;;  %v6336_v18 = vcombine.high %v9089_v28, %v9089_v28 }
0x12dc   :  { %9074 = vmatprep.mubr.msk.bf16.mxu1 %vm142_vm0, %v6013_v31  ;;  %v6350_v31 = vrot.slane %v6336_v18, %v9707_v15 }
0x12dd   :  { %6051 = vmatmul.mubr.bf16.vlgmr.msra.gmra.mrb[172].mxu1 %v6006_v39  ;;  %v6343_v39 = vrot.slane %v9089_v28, %v9707_v15 }
0x12de   :  { %9383 = vmatprep.mubr.msk.bf16.mxu1 %vm9606_vm2, %v9605_v51 }
0x12fe   :  { %v5644_v3 = vpop.f32.mrb[160].mxu1 }
0x12ff   :  { %v5645_v5 = vadd.f32 %v11981_v37, %v5644_v3  ;;  %v5646_v32 = vpop.f32.mrb[161].mxu1 }
0x1300   :  { %v5647_v33 = vpop.f32.mrb[162].mxu1 }
0x1301   :  { %v5650_v16 = vmax.f32 %v5645_v5, 0.0  ;;  %v5648_v47 = vpop.f32.mrb[163].mxu1 }
0x1303   :  { %v5651_v19 = vmax.f32 %v5580_v45, %v5650_v16 }
0x1326   :  { %v5785_v20 = vpop.f32.mrb[164].mxu1 }
0x1327   :  { %v5786_v49 = vadd.f32 %v11981_v37, %v5785_v20  ;;  %v5787_v50 = vpop.f32.mrb[165].mxu1 }
0x1328   :  { %v5788_v54 = vpop.f32.mrb[166].mxu1  ;;  %v9086_v50 = vld.sshfl [vmem:[%s13056_s0 + $0x92] sm:$0x11 pattern:$0x75316420] }
0x1329   :  { %v5791_v55 = vmax.f32 %v5786_v49, 0.0  ;;  %v5789_v56 = vpop.f32.mrb[167].mxu1 }
0x132a   :  { %v6265_v56 = vcombine.high %v9086_v50, %v9086_v50 }
0x132b   :  { %v5792_v58 = vmax.f32 %v5721_v48, %v5791_v55 }
0x132d   :  { %v5793_v59 = vmax.f32 %v5651_v19, %v5792_v58 }
0x132f   :  { %v5794_v61 = vpack.c.bf16 %v5793_v59, %v5793_v59  ;;  %v6279_v59 = vrot.slane %v6265_v56, %v9707_v15 }
0x1331   :  { %9378 = vmatmul.mubr.msk.bf16.vlgmr.msra.gmra.mrb[168].mxu0 %vm700_vm3, %v5794_v61  ;;  %v9092_v61 = vld.sshfl [vmem:[%s13056_s0 + $0x96] sm:$0x11 pattern:$0x75316420] }
0x1332   :  { %5948 = vmatpush1.bf16.msra.mxu0 %v11561_v29  ;;  %9071 = vmatprep.mubr.msk.bf16.mxu0 %vm142_vm0, %v5942_v60  ;;  %v6406_v35 = vcombine.high %v9092_v61, %v9092_v61 }
0x1333   :  { %5949 = vmatprep.subr.bf16.mxu0 %v9603_v1 }
0x1336   :  { %5950 = vmatpush1.bf16.msra.mxu0 %v11568_v34 }
0x1337   :  { %5951 = vmatprep.subr.bf16.mxu0 %v9603_v1 }
0x133a   :  { %5952 = vmatpush1.bf16.msra.mxu0 %v11575_v30 }
0x133b   :  { %5953 = vmatprep.subr.bf16.mxu0 %v9603_v1 }
0x133e   :  { %5954 = vmatpush1.bf16.msra.mxu0 %v11582_v43 }
0x133f   :  { %5955 = vmatprep.subr.bf16.mxu0 %v9603_v1 }
0x1342   :  { %5956 = vmatpush1.bf16.msra.mxu0 %v11627_v62 }
0x1343   :  { %5957 = vmatprep.subr.bf16.mxu0 %v9603_v1 }
0x1346   :  { %5958 = vmatpush1.bf16.msra.mxu0 %v11634_v63 }
0x1347   :  { %5959 = vmatprep.subr.bf16.mxu0 %v9603_v1 }
0x134a   :  { %5960 = vmatpush1.bf16.msra.mxu0 %v11641_v4 }
0x134b   :  { %5961 = vmatprep.subr.bf16.mxu0 %v9603_v1 }
0x134e   :  { %5962 = vmatpush1.bf16.msra.mxu0 %v11648_v6 }
0x134f   :  { %5963 = vmatprep.subr.bf16.mxu0 %v9603_v1 }
0x1352   :  { %5964 = vmatpush1.bf16.msra.mxu0 %v11702_v36 }
0x1353   :  { %5965 = vmatprep.subr.bf16.mxu0 %v9603_v1 }
0x1356   :  { %5966 = vmatpush1.bf16.msra.mxu0 %v9762_v25 }
0x1357   :  { %6088 = vmatprep.subr.bf16.mxu0 %v9603_v1 }
0x1359   :  { %5980 = vmatmul.mubr.bf16.vlgmr.msra.gmra.mrb[172].mxu0 %v5935_v46  ;;  %v6272_v46 = vrot.slane %v9086_v50, %v9707_v15  ;;  %v9102_v50 = vld.sshfl [vmem:[%s13056_s0 + $0x9a] sm:$0x11 pattern:$0x75316420] }
0x135a   :  { %6089 = vmatpush1.bf16.msra.mxu0 %v11561_v29  ;;  %9077 = vmatprep.mubr.msk.bf16.mxu0 %vm142_vm0, %v6083_v11  ;;  %v6076_v29 = vrot.slane %v9076_v44, %v9707_v15  ;;  %v12180_v44 = vld [vmem:[%s13057_s1 + $0x40] sm:$0xff]   ;;  %v6420_v11 = vrot.slane %v6406_v35, %v9707_v15  ;;  %v6602_v56 = vcombine.high %v9102_v50, %v9102_v50 }
0x135b   :  { %6090 = vmatprep.subr.bf16.mxu0 %v9603_v1 }
0x135e   :  { %6091 = vmatpush1.bf16.msra.mxu0 %v11568_v34  ;;  %v12050_v34 = vld [vmem:[%s13057_s1] sm:$0xff]  }
0x135f   :  { %6092 = vmatprep.subr.bf16.mxu0 %v9603_v1 }
0x1362   :  { %6093 = vmatpush1.bf16.msra.mxu0 %v11575_v30  ;;  %v12057_v30 = vld [vmem:[%s13057_s1 + $0x8] sm:$0xff]  }
0x1363   :  { %6094 = vmatprep.subr.bf16.mxu0 %v9603_v1 }
0x1366   :  { %6095 = vmatpush1.bf16.msra.mxu0 %v11582_v43  ;;  %v12064_v43 = vld [vmem:[%s13057_s1 + $0x10] sm:$0xff]  }
0x1367   :  { %6096 = vmatprep.subr.bf16.mxu0 %v9603_v1 }
0x136a   :  { %6097 = vmatpush1.bf16.msra.mxu0 %v11627_v62 }
0x136b   :  { %6098 = vmatprep.subr.bf16.mxu0 %v9603_v1 }
0x136e   :  { %6099 = vmatpush1.bf16.msra.mxu0 %v11634_v63 }
0x136f   :  { %6100 = vmatprep.subr.bf16.mxu0 %v9603_v1 }
0x1372   :  { %6101 = vmatpush1.bf16.msra.mxu0 %v11641_v4 }
0x1373   :  { %6102 = vmatprep.subr.bf16.mxu0 %v9603_v1 }
0x1376   :  { %6103 = vmatpush1.bf16.msra.mxu0 %v11648_v6 }
0x1377   :  { %6104 = vmatprep.subr.bf16.mxu0 %v9603_v1 }
0x137a   :  { %6105 = vmatpush1.bf16.msra.mxu0 %v11702_v36 }
0x137b   :  { %6106 = vmatprep.subr.bf16.mxu0 %v9603_v1 }
0x137e   :  { %6107 = vmatpush1.bf16.msra.mxu0 %v9762_v25 }
0x137f   :  { %6214 = vmatprep.subr.bf16.mxu0 %v9603_v1 }
0x1381   :  { %6121 = vmatmul.mubr.bf16.vlgmr.msra.gmra.mrb[176].mxu0 %v6076_v29  ;;  %v6413_v29 = vrot.slane %v9092_v61, %v9707_v15  ;;  %v9108_v61 = vld.sshfl [vmem:[%s13056_s0 + $0x9e] sm:$0x11 pattern:$0x75316420] }
0x1382   :  { %6215 = vmatpush1.bf16.msra.mxu0 %v12050_v34  ;;  %9084 = vmatprep.mubr.msk.bf16.mxu0 %vm142_vm0, %v6209_v12  ;;  %v6546_v12 = vrot.slane %v6532_v40, %v9707_v15  ;;  %v6743_v35 = vcombine.high %v9108_v61, %v9108_v61 }
0x1383   :  { %6216 = vmatprep.subr.bf16.mxu0 %v9603_v1 }
0x1386   :  { %6217 = vmatpush1.bf16.msra.mxu0 %v12057_v30 }
0x1387   :  { %6218 = vmatprep.subr.bf16.mxu0 %v9603_v1 }
0x138a   :  { %6219 = vmatpush1.bf16.msra.mxu0 %v12064_v43 }
0x138b   :  { %6220 = vmatprep.subr.bf16.mxu0 %v9603_v1 }
0x138e   :  { %6221 = vmatpush1.bf16.msra.mxu0 %v12071_v0 }
0x138f   :  { %6222 = vmatprep.subr.bf16.mxu0 %v9603_v1 }
0x1392   :  { %6223 = vmatpush1.bf16.msra.mxu0 %v11627_v62  ;;  %v5911_v62 = vpop.f32.mrb[168].mxu1 }
0x1393   :  { %6224 = vmatprep.subr.bf16.mxu0 %v9603_v1  ;;  %v5912_v14 = vadd.f32 %v11981_v37, %v5911_v62 }
0x1395   :  { %v5917_v3 = vmax.f32 %v5912_v14, 0.0 }
0x1396   :  { %6225 = vmatpush1.bf16.msra.mxu0 %v11634_v63  ;;  %v5913_v63 = vpop.f32.mrb[169].mxu1 }
0x1397   :  { %6226 = vmatprep.subr.bf16.mxu0 %v9603_v1  ;;  %v5914_v2 = vpop.f32.mrb[170].mxu1 }
0x1398   :  { %v5915_v7 = vpop.f32.mrb[171].mxu1 }
0x139a   :  { %6227 = vmatpush1.bf16.msra.mxu0 %v11641_v4 }
0x139b   :  { %6228 = vmatprep.subr.bf16.mxu0 %v9603_v1 }
0x139e   :  { %6229 = vmatpush1.bf16.msra.mxu0 %v11648_v6  ;;  %v9497_v6 = vld [vmem:[%s13059_s3 + $0x88] sm:$0xff]  }
0x139f   :  { %6230 = vmatprep.subr.bf16.mxu0 %v9603_v1  ;;  %9382 = vmatpush3.bf16.msra.mxu1 %v9497_v6  ;;  %v9498_v6 = vld [vmem:[%s13059_s3 + $0x90] sm:$0xff]  }
0x13a0   :  { %6284 = vmatprep.subr.bf16.mxu1 %v9603_v1 }
0x13a2   :  { %6231 = vmatpush1.bf16.msra.mxu0 %v11702_v36 }
0x13a3   :  { %6232 = vmatprep.subr.bf16.mxu0 %v9603_v1 }
0x13a6   :  { %6233 = vmatpush1.bf16.msra.mxu0 %v9762_v25 }
0x13a7   :  { %6355 = vmatprep.subr.bf16.mxu0 %v9603_v1 }
0x13a9   :  { %6247 = vmatmul.mubr.bf16.vlgmr.msra.gmra.mrb[180].mxu0 %v6202_v13  ;;  %v6539_v13 = vrot.slane %v9099_v41, %v9707_v15  ;;  %v9115_v41 = vld.sshfl [vmem:[%s13056_s0 + $0xa0] sm:$0x11 pattern:$0x75316420] }
0x13aa   :  { %6356 = vmatpush1.bf16.msra.mxu0 %v12050_v34  ;;  %9090 = vmatprep.mubr.msk.bf16.mxu0 %vm142_vm0, %v6350_v31  ;;  %v6869_v40 = vcombine.high %v9115_v41, %v9115_v41 }
0x13ab   :  { %6357 = vmatprep.subr.bf16.mxu0 %v9603_v1 }
0x13ae   :  { %6358 = vmatpush1.bf16.msra.mxu0 %v12057_v30 }
0x13af   :  { %6359 = vmatprep.subr.bf16.mxu0 %v9603_v1 }
0x13b0   :  { %v6052_v8 = vpop.f32.mrb[172].mxu1 }
0x13b1   :  { %v6054_v4 = vpop.f32.mrb[173].mxu1  ;;  %v6053_v19 = vadd.f32 %v11981_v37, %v6052_v8 }
0x13b2   :  { %v6055_v9 = vpop.f32.mrb[174].mxu1  ;;  %6360 = vmatpush1.bf16.msra.mxu0 %v12064_v43 }
0x13b3   :  { %v6056_v10 = vpop.f32.mrb[175].mxu1  ;;  %6361 = vmatprep.subr.bf16.mxu0 %v9603_v1  ;;  %v6058_v20 = vmax.f32 %v6053_v19, 0.0 }
0x13b6   :  { %6362 = vmatpush1.bf16.msra.mxu0 %v12071_v0 }
0x13b7   :  { %6363 = vmatprep.subr.bf16.mxu0 %v9603_v1 }
0x1404   :  { %v5841_v22 = vpop.f32.mrb[168].mxu0 }
0x1405   :  { %v12098_v23 = vadd.f32 %v5841_v22, %v11955_v27  ;;  %v9379_v24 = vpop.f32.mrb[169].mxu0  ;;  %v12111_v27 = vld [vmem:[%s13057_s1 + $0x20] sm:$0xff]  }
0x1406   :  { %v5844_v17 = vpop.f32.mrb[170].mxu0  ;;  %6364 = vmatpush1.bf16.msra.mxu0 %v12111_v27 }
0x1407   :  { %v9380_v26 = vpop.f32.mrb[171].mxu0  ;;  %6365 = vmatprep.subr.bf16.mxu0 %v9603_v1 }
0x140a   :  { %6366 = vmatpush1.bf16.msra.mxu0 %v12118_v38 }
0x140b   :  { %6367 = vmatprep.subr.bf16.mxu0 %v9603_v1 }
0x140e   :  { %6368 = vmatpush1.bf16.msra.mxu0 %v12125_v42 }
0x140f   :  { %6369 = vmatprep.subr.bf16.mxu0 %v9603_v1 }
0x1412   :  { %6370 = vmatpush1.bf16.msra.mxu0 %v12132_v53 }
0x1413   :  { %6371 = vmatprep.subr.bf16.mxu0 %v9603_v1 }
0x1416   :  { %6372 = vmatpush1.bf16.msra.mxu0 %v11702_v36 }
0x1417   :  { %6373 = vmatprep.subr.bf16.mxu0 %v9603_v1 }
0x141a   :  { %6374 = vmatpush1.bf16.msra.mxu0 %v9762_v25 }
0x141b   :  { %9387 = vmatprep.subr.bf16.mxu0 %v9605_v51 }
0x141d   :  { %6388 = vmatmul.mubr.bf16.vlgmr.msra.gmra.mrb[184].mxu0 %v6343_v39 }
0x141e   :  { %9389 = vmatprep.mubr.msk.bf16.mxu0 %vm9606_vm2, %v9605_v51  ;;  %9388 = vmatpush3.bf16.msra.mxu0 %v9498_v6  ;;  %v9499_v6 = vld [vmem:[%s13059_s3 + $0x98] sm:$0xff]  }
0x141f   :  { %6621 = vmatprep.subr.bf16.mxu0 %v9603_v1 }
0x142c   :  { %v5981_v36 = vpop.f32.mrb[172].mxu0 }
0x142d   :  { %v5982_v45 = vadd.f32 %v11981_v37, %v5981_v36  ;;  %v5983_v5 = vpop.f32.mrb[173].mxu0 }
0x142e   :  { %v5984_v32 = vpop.f32.mrb[174].mxu0 }
0x142f   :  { %v5987_v33 = vmax.f32 %v5982_v45, 0.0  ;;  %v5985_v16 = vpop.f32.mrb[175].mxu0 }
0x1431   :  { %v5988_v47 = vmax.f32 %v5917_v3, %v5987_v33 }
0x1454   :  { %v6122_v21 = vpop.f32.mrb[176].mxu0 }
0x1455   :  { %v6123_v48 = vadd.f32 %v11981_v37, %v6122_v21  ;;  %v6124_v49 = vpop.f32.mrb[177].mxu0 }
0x1456   :  { %v6125_v52 = vpop.f32.mrb[178].mxu0 }
0x1457   :  { %v6128_v54 = vmax.f32 %v6123_v48, 0.0  ;;  %v6126_v55 = vpop.f32.mrb[179].mxu0 }
0x1459   :  { %v6129_v57 = vmax.f32 %v6058_v20, %v6128_v54 }
0x145b   :  { %v6130_v58 = vmax.f32 %v5988_v47, %v6129_v57 }
0x145d   :  { %v6131_v60 = vpack.c.bf16 %v6130_v58, %v6130_v58 }
0x145f   :  { %9384 = vmatmul.mubr.msk.bf16.vlgmr.msra.gmra.mrb[176].mxu1 %vm700_vm3, %v6131_v60 }
0x1460   :  { %6285 = vmatpush1.bf16.msra.mxu1 %v12050_v34  ;;  %9087 = vmatprep.mubr.msk.bf16.mxu1 %vm142_vm0, %v6279_v59  ;;  %v6616_v59 = vrot.slane %v6602_v56, %v9707_v15 }
0x1461   :  { %6286 = vmatprep.subr.bf16.mxu1 %v9603_v1 }
0x1464   :  { %6287 = vmatpush1.bf16.msra.mxu1 %v12057_v30 }
0x1465   :  { %6288 = vmatprep.subr.bf16.mxu1 %v9603_v1 }
0x1468   :  { %6289 = vmatpush1.bf16.msra.mxu1 %v12064_v43 }
0x1469   :  { %6290 = vmatprep.subr.bf16.mxu1 %v9603_v1 }
0x146c   :  { %6291 = vmatpush1.bf16.msra.mxu1 %v12071_v0 }
0x146d   :  { %6292 = vmatprep.subr.bf16.mxu1 %v9603_v1 }
0x1470   :  { %6293 = vmatpush1.bf16.msra.mxu1 %v12111_v27 }
0x1471   :  { %6294 = vmatprep.subr.bf16.mxu1 %v9603_v1 }
0x1474   :  { %6295 = vmatpush1.bf16.msra.mxu1 %v12118_v38 }
0x1475   :  { %6296 = vmatprep.subr.bf16.mxu1 %v9603_v1 }
0x1478   :  { %6297 = vmatpush1.bf16.msra.mxu1 %v12125_v42 }
0x1479   :  { %6298 = vmatprep.subr.bf16.mxu1 %v9603_v1 }
0x147c   :  { %6299 = vmatpush1.bf16.msra.mxu1 %v12132_v53  ;;  %v6248_v62 = vpop.f32.mrb[180].mxu0 }
0x147d   :  { %6300 = vmatprep.subr.bf16.mxu1 %v9603_v1  ;;  %v6250_v63 = vpop.f32.mrb[181].mxu0  ;;  %v6249_v14 = vadd.f32 %v11981_v37, %v6248_v62 }
0x147e   :  { %v6251_v2 = vpop.f32.mrb[182].mxu0 }
0x147f   :  { %v6252_v7 = vpop.f32.mrb[183].mxu0  ;;  %v6254_v3 = vmax.f32 %v6249_v14, 0.0 }
0x1480   :  { %6301 = vmatpush1.bf16.msra.mxu1 %v12180_v44 }
0x1481   :  { %6302 = vmatprep.subr.bf16.mxu1 %v9603_v1 }
0x1484   :  { %6303 = vmatpush1.bf16.msra.mxu1 %v9762_v25 }
0x1485   :  { %6425 = vmatprep.subr.bf16.mxu1 %v9603_v1 }
0x1487   :  { %6317 = vmatmul.mubr.bf16.vlgmr.msra.gmra.mrb[180].mxu1 %v6272_v46  ;;  %v6609_v46 = vrot.slane %v9102_v50, %v9707_v15  ;;  %v9118_v50 = vld.sshfl [vmem:[%s13056_s0 + $0xa2] sm:$0x11 pattern:$0x75316420] }
0x1488   :  { %6426 = vmatpush1.bf16.msra.mxu1 %v12050_v34  ;;  %9093 = vmatprep.mubr.msk.bf16.mxu1 %vm142_vm0, %v6420_v11  ;;  %v6757_v11 = vrot.slane %v6743_v35, %v9707_v15  ;;  %v6939_v56 = vcombine.high %v9118_v50, %v9118_v50  ;;  %v6946_v35 = vrot.slane %v9118_v50, %v9707_v15 }
0x1489   :  { %6427 = vmatprep.subr.bf16.mxu1 %v9603_v1 }
0x148c   :  { %6428 = vmatpush1.bf16.msra.mxu1 %v12057_v30 }
0x148d   :  { %6429 = vmatprep.subr.bf16.mxu1 %v9603_v1 }
0x1490   :  { %6430 = vmatpush1.bf16.msra.mxu1 %v12064_v43 }
0x1491   :  { %6431 = vmatprep.subr.bf16.mxu1 %v9603_v1 }
0x1494   :  { %6432 = vmatpush1.bf16.msra.mxu1 %v12071_v0 }
0x1495   :  { %6433 = vmatprep.subr.bf16.mxu1 %v9603_v1 }
0x1498   :  { %6434 = vmatpush1.bf16.msra.mxu1 %v12111_v27 }
0x1499   :  { %6435 = vmatprep.subr.bf16.mxu1 %v9603_v1 }
0x149c   :  { %6436 = vmatpush1.bf16.msra.mxu1 %v12118_v38 }
0x149d   :  { %6437 = vmatprep.subr.bf16.mxu1 %v9603_v1 }
0x14a0   :  { %6438 = vmatpush1.bf16.msra.mxu1 %v12125_v42 }
0x14a1   :  { %6439 = vmatprep.subr.bf16.mxu1 %v9603_v1 }
0x14a4   :  { %6440 = vmatpush1.bf16.msra.mxu1 %v12132_v53 }
0x14a5   :  { %6441 = vmatprep.subr.bf16.mxu1 %v9603_v1 }
0x14a8   :  { %6442 = vmatpush1.bf16.msra.mxu1 %v12180_v44 }
0x14a9   :  { %6443 = vmatprep.subr.bf16.mxu1 %v9603_v1 }
0x14ac   :  { %6444 = vmatpush1.bf16.msra.mxu1 %v9762_v25 }
0x14ad   :  { %6551 = vmatprep.subr.bf16.mxu1 %v9603_v1 }
0x14af   :  { %6458 = vmatmul.mubr.bf16.vlgmr.msra.gmra.mrb[184].mxu1 %v6413_v29  ;;  %v6750_v29 = vrot.slane %v9108_v61, %v9707_v15 }
0x14b0   :  { %6552 = vmatpush1.bf16.msra.mxu1 %v12050_v34  ;;  %9100 = vmatprep.mubr.msk.bf16.mxu1 %vm142_vm0, %v6546_v12  ;;  %v6883_v12 = vrot.slane %v6869_v40, %v9707_v15 }
0x14b1   :  { %6553 = vmatprep.subr.bf16.mxu1 %v9603_v1 }
0x14b4   :  { %6554 = vmatpush1.bf16.msra.mxu1 %v12057_v30 }
0x14b5   :  { %6555 = vmatprep.subr.bf16.mxu1 %v9603_v1 }
0x14b8   :  { %6556 = vmatpush1.bf16.msra.mxu1 %v12064_v43 }
0x14b9   :  { %6557 = vmatprep.subr.bf16.mxu1 %v9603_v1 }
0x14bc   :  { %6558 = vmatpush1.bf16.msra.mxu1 %v12071_v0 }
0x14bd   :  { %6559 = vmatprep.subr.bf16.mxu1 %v9603_v1 }
0x14c0   :  { %6560 = vmatpush1.bf16.msra.mxu1 %v12111_v27 }
0x14c1   :  { %6561 = vmatprep.subr.bf16.mxu1 %v9603_v1 }
0x14c4   :  { %6562 = vmatpush1.bf16.msra.mxu1 %v12118_v38 }
0x14c5   :  { %6563 = vmatprep.subr.bf16.mxu1 %v9603_v1 }
0x14c8   :  { %6564 = vmatpush1.bf16.msra.mxu1 %v12125_v42 }
0x14c9   :  { %6565 = vmatprep.subr.bf16.mxu1 %v9603_v1 }
0x14cc   :  { %6566 = vmatpush1.bf16.msra.mxu1 %v12132_v53 }
0x14cd   :  { %6567 = vmatprep.subr.bf16.mxu1 %v9603_v1 }
0x14d0   :  { %6568 = vmatpush1.bf16.msra.mxu1 %v12180_v44 }
0x14d1   :  { %6569 = vmatprep.subr.bf16.mxu1 %v9603_v1 }
0x14d4   :  { %6570 = vmatpush1.bf16.msra.mxu1 %v9762_v25 }
0x14d5   :  { %6692 = vmatprep.subr.bf16.mxu1 %v9603_v1 }
0x14d7   :  { %6584 = vmatmul.mubr.bf16.vlgmr.msra.gmra.mrb[188].mxu1 %v6539_v13  ;;  %v6876_v13 = vrot.slane %v9115_v41, %v9707_v15 }
0x14d8   :  { %6693 = vmatpush1.bf16.msra.mxu1 %v12050_v34 }
0x14d9   :  { %6694 = vmatprep.subr.bf16.mxu1 %v9603_v1 }
0x14dc   :  { %6695 = vmatpush1.bf16.msra.mxu1 %v12057_v30 }
0x14dd   :  { %6696 = vmatprep.subr.bf16.mxu1 %v9603_v1 }
0x14e0   :  { %6697 = vmatpush1.bf16.msra.mxu1 %v12064_v43 }
0x14e1   :  { %6698 = vmatprep.subr.bf16.mxu1 %v9603_v1 }
0x14e4   :  { %6699 = vmatpush1.bf16.msra.mxu1 %v12071_v0 }
0x14e5   :  { %6700 = vmatprep.subr.bf16.mxu1 %v9603_v1 }
0x14e8   :  { %6701 = vmatpush1.bf16.msra.mxu1 %v12111_v27 }
0x14e9   :  { %6702 = vmatprep.subr.bf16.mxu1 %v9603_v1 }
0x14ec   :  { %6703 = vmatpush1.bf16.msra.mxu1 %v12118_v38 }
0x14ed   :  { %6704 = vmatprep.subr.bf16.mxu1 %v9603_v1 }
0x14f0   :  { %v6389_v8 = vpop.f32.mrb[184].mxu0  ;;  %6705 = vmatpush1.bf16.msra.mxu1 %v12125_v42 }
0x14f1   :  { %v6391_v4 = vpop.f32.mrb[185].mxu0  ;;  %6706 = vmatprep.subr.bf16.mxu1 %v9603_v1  ;;  %v6390_v19 = vadd.f32 %v11981_v37, %v6389_v8 }
0x14f2   :  { %v6392_v9 = vpop.f32.mrb[186].mxu0 }
0x14f3   :  { %v6393_v10 = vpop.f32.mrb[187].mxu0  ;;  %v6395_v20 = vmax.f32 %v6390_v19, 0.0 }
0x14f4   :  { %6707 = vmatpush1.bf16.msra.mxu1 %v12132_v53 }
0x14f5   :  { %6708 = vmatprep.subr.bf16.mxu1 %v9603_v1 }
0x14f8   :  { %6709 = vmatpush1.bf16.msra.mxu1 %v12180_v44 }
0x14f9   :  { %6710 = vmatprep.subr.bf16.mxu1 %v9603_v1 }
0x14fc   :  { %6711 = vmatpush1.bf16.msra.mxu1 %v9762_v25 }
0x14fd   :  { %9393 = vmatprep.subr.bf16.mxu1 %v9605_v51 }
0x1532   :  { %v6178_v22 = vpop.f32.mrb[176].mxu1 }
0x1533   :  { %v12241_v24 = vadd.f32 %v6178_v22, %v12098_v23  ;;  %v9385_v17 = vpop.f32.mrb[177].mxu1  ;;  %v9105_v23 = vld.sshfl [vmem:[%s13056_s0 + $0x9c] sm:$0x11 pattern:$0x75316420] }
0x1534   :  { %v6181_v26 = vpop.f32.mrb[178].mxu1  ;;  %v6673_v18 = vcombine.high %v9105_v23, %v9105_v23  ;;  %v6680_v39 = vrot.slane %v9105_v23, %v9707_v15 }
0x1535   :  { %v9386_v28 = vpop.f32.mrb[179].mxu1 }
0x1536   :  { %v6687_v31 = vrot.slane %v6673_v18, %v9707_v15 }
0x1538   :  { %9106 = vmatprep.mubr.msk.bf16.mxu1 %vm142_vm0, %v6687_v31 }
0x1539   :  { %6725 = vmatmul.mubr.bf16.vlgmr.msra.gmra.mrb[192].mxu1 %v6680_v39 }
0x153a   :  { %9395 = vmatprep.mubr.msk.bf16.mxu1 %vm9606_vm2, %v9605_v51  ;;  %9394 = vmatpush3.bf16.msra.mxu1 %v9499_v6  ;;  %v9131_v6 = vld.sshfl [vmem:[%s13056_s0 + $0xa8] sm:$0x11 pattern:$0x75316420] }
0x153b   :  { %6958 = vmatprep.subr.bf16.mxu1 %v9603_v1  ;;  %v7206_v41 = vcombine.high %v9131_v6, %v9131_v6 }
0x153d   :  { %v7220_v40 = vrot.slane %v7206_v41, %v9707_v15 }
0x155a   :  { %v6318_v36 = vpop.f32.mrb[180].mxu1 }
0x155b   :  { %v6319_v45 = vadd.f32 %v11981_v37, %v6318_v36  ;;  %v6320_v5 = vpop.f32.mrb[181].mxu1 }
0x155c   :  { %v6321_v32 = vpop.f32.mrb[182].mxu1 }
0x155d   :  { %v6324_v33 = vmax.f32 %v6319_v45, 0.0  ;;  %v6322_v16 = vpop.f32.mrb[183].mxu1 }
0x155f   :  { %v6325_v47 = vmax.f32 %v6254_v3, %v6324_v33 }
0x1582   :  { %v6459_v21 = vpop.f32.mrb[184].mxu1 }
0x1583   :  { %v6460_v48 = vadd.f32 %v11981_v37, %v6459_v21  ;;  %v6461_v49 = vpop.f32.mrb[185].mxu1 }
0x1584   :  { %v6462_v52 = vpop.f32.mrb[186].mxu1 }
0x1585   :  { %v6465_v54 = vmax.f32 %v6460_v48, 0.0  ;;  %v6463_v55 = vpop.f32.mrb[187].mxu1 }
0x1587   :  { %v6466_v57 = vmax.f32 %v6395_v20, %v6465_v54 }
0x1589   :  { %v6467_v58 = vmax.f32 %v6325_v47, %v6466_v57 }
0x158b   :  { %v6468_v60 = vpack.c.bf16 %v6467_v58, %v6467_v58 }
0x158d   :  { %9390 = vmatmul.mubr.msk.bf16.vlgmr.msra.gmra.mrb[188].mxu0 %vm700_vm3, %v6468_v60 }
0x158e   :  { %6622 = vmatpush1.bf16.msra.mxu0 %v12050_v34  ;;  %9103 = vmatprep.mubr.msk.bf16.mxu0 %vm142_vm0, %v6616_v59  ;;  %v6953_v59 = vrot.slane %v6939_v56, %v9707_v15 }
0x158f   :  { %6623 = vmatprep.subr.bf16.mxu0 %v9603_v1 }
0x1592   :  { %6624 = vmatpush1.bf16.msra.mxu0 %v12057_v30 }
0x1593   :  { %6625 = vmatprep.subr.bf16.mxu0 %v9603_v1 }
0x1596   :  { %6626 = vmatpush1.bf16.msra.mxu0 %v12064_v43 }
0x1597   :  { %6627 = vmatprep.subr.bf16.mxu0 %v9603_v1 }
0x159a   :  { %6628 = vmatpush1.bf16.msra.mxu0 %v12071_v0 }
0x159b   :  { %6629 = vmatprep.subr.bf16.mxu0 %v9603_v1 }
0x159e   :  { %6630 = vmatpush1.bf16.msra.mxu0 %v12111_v27 }
0x159f   :  { %6631 = vmatprep.subr.bf16.mxu0 %v9603_v1 }
0x15a2   :  { %6632 = vmatpush1.bf16.msra.mxu0 %v12118_v38 }
0x15a3   :  { %6633 = vmatprep.subr.bf16.mxu0 %v9603_v1 }
0x15a6   :  { %6634 = vmatpush1.bf16.msra.mxu0 %v12125_v42 }
0x15a7   :  { %6635 = vmatprep.subr.bf16.mxu0 %v9603_v1 }
0x15aa   :  { %6636 = vmatpush1.bf16.msra.mxu0 %v12132_v53  ;;  %v6585_v62 = vpop.f32.mrb[188].mxu1 }
0x15ab   :  { %6637 = vmatprep.subr.bf16.mxu0 %v9603_v1  ;;  %v6587_v63 = vpop.f32.mrb[189].mxu1  ;;  %v6586_v14 = vadd.f32 %v11981_v37, %v6585_v62 }
0x15ac   :  { %v6588_v2 = vpop.f32.mrb[190].mxu1 }
0x15ad   :  { %v6589_v7 = vpop.f32.mrb[191].mxu1  ;;  %v6591_v3 = vmax.f32 %v6586_v14, 0.0 }
0x15ae   :  { %6638 = vmatpush1.bf16.msra.mxu0 %v12180_v44 }
0x15af   :  { %6639 = vmatprep.subr.bf16.mxu0 %v9603_v1 }
0x15b2   :  { %6640 = vmatpush1.bf16.msra.mxu0 %v9762_v25 }
0x15b3   :  { %6762 = vmatprep.subr.bf16.mxu0 %v9603_v1 }
0x15b5   :  { %6654 = vmatmul.mubr.bf16.vlgmr.msra.gmra.mrb[192].mxu0 %v6609_v46 }
0x15b6   :  { %6763 = vmatpush1.bf16.msra.mxu0 %v12050_v34  ;;  %9109 = vmatprep.mubr.msk.bf16.mxu0 %vm142_vm0, %v6757_v11 }
0x15b7   :  { %6764 = vmatprep.subr.bf16.mxu0 %v9603_v1 }
0x15ba   :  { %6765 = vmatpush1.bf16.msra.mxu0 %v12057_v30 }
0x15bb   :  { %6766 = vmatprep.subr.bf16.mxu0 %v9603_v1 }
0x15be   :  { %6767 = vmatpush1.bf16.msra.mxu0 %v12064_v43 }
0x15bf   :  { %6768 = vmatprep.subr.bf16.mxu0 %v9603_v1 }
0x15c2   :  { %6769 = vmatpush1.bf16.msra.mxu0 %v12071_v0 }
0x15c3   :  { %6770 = vmatprep.subr.bf16.mxu0 %v9603_v1 }
0x15c6   :  { %6771 = vmatpush1.bf16.msra.mxu0 %v12111_v27 }
0x15c7   :  { %6772 = vmatprep.subr.bf16.mxu0 %v9603_v1 }
0x15ca   :  { %6773 = vmatpush1.bf16.msra.mxu0 %v12118_v38 }
0x15cb   :  { %6774 = vmatprep.subr.bf16.mxu0 %v9603_v1 }
0x15ce   :  { %6775 = vmatpush1.bf16.msra.mxu0 %v12125_v42 }
0x15cf   :  { %6776 = vmatprep.subr.bf16.mxu0 %v9603_v1 }
0x15d2   :  { %6777 = vmatpush1.bf16.msra.mxu0 %v12132_v53 }
0x15d3   :  { %6778 = vmatprep.subr.bf16.mxu0 %v9603_v1 }
0x15d6   :  { %6779 = vmatpush1.bf16.msra.mxu0 %v12180_v44 }
0x15d7   :  { %6780 = vmatprep.subr.bf16.mxu0 %v9603_v1 }
0x15da   :  { %6781 = vmatpush1.bf16.msra.mxu0 %v9762_v25 }
0x15db   :  { %6888 = vmatprep.subr.bf16.mxu0 %v9603_v1 }
0x15dd   :  { %6795 = vmatmul.mubr.bf16.vlgmr.msra.gmra.mrb[196].mxu0 %v6750_v29 }
0x15de   :  { %6889 = vmatpush1.bf16.msra.mxu0 %v12050_v34  ;;  %9116 = vmatprep.mubr.msk.bf16.mxu0 %vm142_vm0, %v6883_v12  ;;  %v7213_v12 = vrot.slane %v9131_v6, %v9707_v15 }
0x15df   :  { %6890 = vmatprep.subr.bf16.mxu0 %v9603_v1 }
0x15e2   :  { %6891 = vmatpush1.bf16.msra.mxu0 %v12057_v30 }
0x15e3   :  { %6892 = vmatprep.subr.bf16.mxu0 %v9603_v1 }
0x15e6   :  { %6893 = vmatpush1.bf16.msra.mxu0 %v12064_v43 }
0x15e7   :  { %6894 = vmatprep.subr.bf16.mxu0 %v9603_v1 }
0x15ea   :  { %6895 = vmatpush1.bf16.msra.mxu0 %v12071_v0 }
0x15eb   :  { %6896 = vmatprep.subr.bf16.mxu0 %v9603_v1 }
0x15ee   :  { %6897 = vmatpush1.bf16.msra.mxu0 %v12111_v27 }
0x15ef   :  { %6898 = vmatprep.subr.bf16.mxu0 %v9603_v1 }
0x15f2   :  { %6899 = vmatpush1.bf16.msra.mxu0 %v12118_v38 }
0x15f3   :  { %6900 = vmatprep.subr.bf16.mxu0 %v9603_v1 }
0x15f6   :  { %6901 = vmatpush1.bf16.msra.mxu0 %v12125_v42 }
0x15f7   :  { %6902 = vmatprep.subr.bf16.mxu0 %v9603_v1 }
0x15fa   :  { %6903 = vmatpush1.bf16.msra.mxu0 %v12132_v53 }
0x15fb   :  { %6904 = vmatprep.subr.bf16.mxu0 %v9603_v1 }
0x15fe   :  { %6905 = vmatpush1.bf16.msra.mxu0 %v12180_v44 }
0x15ff   :  { %6906 = vmatprep.subr.bf16.mxu0 %v9603_v1 }
0x1602   :  { %6907 = vmatpush1.bf16.msra.mxu0 %v9762_v25 }
0x1603   :  { %7029 = vmatprep.subr.bf16.mxu0 %v9603_v1 }
0x1605   :  { %6921 = vmatmul.mubr.bf16.vlgmr.msra.gmra.mrb[200].mxu0 %v6876_v13 }
0x1606   :  { %7030 = vmatpush1.bf16.msra.mxu0 %v12050_v34 }
0x1607   :  { %7031 = vmatprep.subr.bf16.mxu0 %v9603_v1 }
0x160a   :  { %7032 = vmatpush1.bf16.msra.mxu0 %v12057_v30 }
0x160b   :  { %7033 = vmatprep.subr.bf16.mxu0 %v9603_v1 }
0x160c   :  { %v6726_v8 = vpop.f32.mrb[192].mxu1 }
0x160d   :  { %v6728_v4 = vpop.f32.mrb[193].mxu1  ;;  %v6727_v19 = vadd.f32 %v11981_v37, %v6726_v8 }
0x160e   :  { %v6729_v9 = vpop.f32.mrb[194].mxu1  ;;  %7034 = vmatpush1.bf16.msra.mxu0 %v12064_v43 }
0x160f   :  { %v6730_v10 = vpop.f32.mrb[195].mxu1  ;;  %7035 = vmatprep.subr.bf16.mxu0 %v9603_v1  ;;  %v6732_v20 = vmax.f32 %v6727_v19, 0.0 }
0x1610   :  { %v9500_v10 = vld [vmem:[%s13059_s3 + $0xa0] sm:$0xff]  }
0x1612   :  { %7036 = vmatpush1.bf16.msra.mxu0 %v12071_v0 }
0x1613   :  { %7037 = vmatprep.subr.bf16.mxu0 %v9603_v1 }
0x1616   :  { %7038 = vmatpush1.bf16.msra.mxu0 %v12111_v27 }
0x1617   :  { %7039 = vmatprep.subr.bf16.mxu0 %v9603_v1 }
0x161a   :  { %7040 = vmatpush1.bf16.msra.mxu0 %v12118_v38 }
0x161b   :  { %7041 = vmatprep.subr.bf16.mxu0 %v9603_v1 }
0x161e   :  { %7042 = vmatpush1.bf16.msra.mxu0 %v12125_v42 }
0x161f   :  { %7043 = vmatprep.subr.bf16.mxu0 %v9603_v1 }
0x1622   :  { %7044 = vmatpush1.bf16.msra.mxu0 %v12132_v53 }
0x1623   :  { %7045 = vmatprep.subr.bf16.mxu0 %v9603_v1 }
0x1626   :  { %7046 = vmatpush1.bf16.msra.mxu0 %v12180_v44 }
0x1627   :  { %7047 = vmatprep.subr.bf16.mxu0 %v9603_v1 }
0x162a   :  { %7048 = vmatpush1.bf16.msra.mxu0 %v9762_v25 }
0x162b   :  { %9399 = vmatprep.subr.bf16.mxu0 %v9605_v51 }
0x1660   :  { %v6515_v22 = vpop.f32.mrb[188].mxu0 }
0x1661   :  { %v12359_v17 = vadd.f32 %v6515_v22, %v12241_v24  ;;  %v9391_v26 = vpop.f32.mrb[189].mxu0  ;;  %v9121_v24 = vld.sshfl [vmem:[%s13056_s0 + $0xa4] sm:$0x11 pattern:$0x75316420] }
0x1662   :  { %v6518_v28 = vpop.f32.mrb[190].mxu0  ;;  %v7010_v18 = vcombine.high %v9121_v24, %v9121_v24  ;;  %v7017_v39 = vrot.slane %v9121_v24, %v9707_v15 }
0x1663   :  { %v9392_v23 = vpop.f32.mrb[191].mxu0 }
0x1664   :  { %v7024_v31 = vrot.slane %v7010_v18, %v9707_v15 }
0x1666   :  { %9122 = vmatprep.mubr.msk.bf16.mxu0 %vm142_vm0, %v7024_v31 }
0x1667   :  { %7062 = vmatmul.mubr.bf16.vlgmr.msra.gmra.mrb[204].mxu0 %v7017_v39 }
0x1668   :  { %9401 = vmatprep.mubr.msk.bf16.mxu0 %vm9606_vm2, %v9605_v51  ;;  %9400 = vmatpush3.bf16.msra.mxu0 %v9500_v10  ;;  %v9501_v10 = vld [vmem:[%s13059_s3 + $0xa8] sm:$0xff]  }
0x1669   :  { %7295 = vmatprep.subr.bf16.mxu0 %v9603_v1 }
0x1688   :  { %v6655_v36 = vpop.f32.mrb[192].mxu0 }
0x1689   :  { %v6656_v45 = vadd.f32 %v11981_v37, %v6655_v36  ;;  %v6657_v5 = vpop.f32.mrb[193].mxu0 }
0x168a   :  { %v6658_v32 = vpop.f32.mrb[194].mxu0 }
0x168b   :  { %v6661_v33 = vmax.f32 %v6656_v45, 0.0  ;;  %v6659_v16 = vpop.f32.mrb[195].mxu0 }
0x168d   :  { %v6662_v47 = vmax.f32 %v6591_v3, %v6661_v33 }
0x16b0   :  { %v6796_v21 = vpop.f32.mrb[196].mxu0 }
0x16b1   :  { %v6797_v48 = vadd.f32 %v11981_v37, %v6796_v21  ;;  %v6798_v49 = vpop.f32.mrb[197].mxu0  ;;  %v9124_v37 = vld.sshfl [vmem:[%s13056_s0 + $0xa6] sm:$0x11 pattern:$0x75316420] }
0x16b2   :  { %v6799_v52 = vpop.f32.mrb[198].mxu0  ;;  %v7080_v61 = vcombine.high %v9124_v37, %v9124_v37  ;;  %v7087_v11 = vrot.slane %v9124_v37, %v9707_v15  ;;  %v9134_v21 = vld.sshfl [vmem:[%s13056_s0 + $0xaa] sm:$0x11 pattern:$0x75316420] }
0x16b3   :  { %v6802_v54 = vmax.f32 %v6797_v48, 0.0  ;;  %v6800_v55 = vpop.f32.mrb[199].mxu0  ;;  %v7276_v50 = vcombine.high %v9134_v21, %v9134_v21  ;;  %v9140_v37 = vld.sshfl [vmem:[%s13056_s0 + $0xae] sm:$0x11 pattern:$0x75316420] }
0x16b4   :  { %v7094_v46 = vrot.slane %v7080_v61, %v9707_v15  ;;  %v7417_v61 = vcombine.high %v9140_v37, %v9140_v37 }
0x16b5   :  { %v6803_v57 = vmax.f32 %v6732_v20, %v6802_v54  ;;  %v7290_v55 = vrot.slane %v7276_v50, %v9707_v15 }
0x16b7   :  { %v6804_v58 = vmax.f32 %v6662_v47, %v6803_v57  ;;  %v12524_v57 = vld [vmem:[%s13057_s1] sm:$0xff]  }
0x16b9   :  { %v6805_v60 = vpack.c.bf16 %v6804_v58, %v6804_v58  ;;  %v12532_v58 = vld [vmem:[%s13057_s1 + $0x8] sm:$0xff]  }
0x16bb   :  { %9396 = vmatmul.mubr.msk.bf16.vlgmr.msra.gmra.mrb[196].mxu1 %vm700_vm3, %v6805_v60  ;;  %v12546_v60 = vld [vmem:[%s13057_s1 + $0x18] sm:$0xff]  }
0x16bc   :  { %6959 = vmatpush1.bf16.msra.mxu1 %v12050_v34  ;;  %9119 = vmatprep.mubr.msk.bf16.mxu1 %vm142_vm0, %v6953_v59  ;;  %v12539_v59 = vld [vmem:[%s13057_s1 + $0x10] sm:$0xff]  }
0x16bd   :  { %6960 = vmatprep.subr.bf16.mxu1 %v9603_v1 }
0x16c0   :  { %6961 = vmatpush1.bf16.msra.mxu1 %v12057_v30 }
0x16c1   :  { %6962 = vmatprep.subr.bf16.mxu1 %v9603_v1 }
0x16c4   :  { %6963 = vmatpush1.bf16.msra.mxu1 %v12064_v43 }
0x16c5   :  { %6964 = vmatprep.subr.bf16.mxu1 %v9603_v1 }
0x16c8   :  { %6965 = vmatpush1.bf16.msra.mxu1 %v12071_v0 }
0x16c9   :  { %6966 = vmatprep.subr.bf16.mxu1 %v9603_v1 }
0x16cc   :  { %6967 = vmatpush1.bf16.msra.mxu1 %v12111_v27 }
0x16cd   :  { %6968 = vmatprep.subr.bf16.mxu1 %v9603_v1 }
0x16d0   :  { %6969 = vmatpush1.bf16.msra.mxu1 %v12118_v38 }
0x16d1   :  { %6970 = vmatprep.subr.bf16.mxu1 %v9603_v1 }
0x16d4   :  { %6971 = vmatpush1.bf16.msra.mxu1 %v12125_v42 }
0x16d5   :  { %6972 = vmatprep.subr.bf16.mxu1 %v9603_v1 }
0x16d8   :  { %6973 = vmatpush1.bf16.msra.mxu1 %v12132_v53  ;;  %v6922_v29 = vpop.f32.mrb[200].mxu0 }
0x16d9   :  { %6974 = vmatprep.subr.bf16.mxu1 %v9603_v1  ;;  %v6924_v62 = vpop.f32.mrb[201].mxu0 }
0x16da   :  { %v6925_v63 = vpop.f32.mrb[202].mxu0 }
0x16db   :  { %v6926_v2 = vpop.f32.mrb[203].mxu0 }
0x16dc   :  { %6975 = vmatpush1.bf16.msra.mxu1 %v12180_v44 }
0x16dd   :  { %6976 = vmatprep.subr.bf16.mxu1 %v9603_v1 }
0x16e0   :  { %6977 = vmatpush1.bf16.msra.mxu1 %v9762_v25 }
0x16e1   :  { %7099 = vmatprep.subr.bf16.mxu1 %v9603_v1 }
0x16e3   :  { %6991 = vmatmul.mubr.bf16.vlgmr.msra.gmra.mrb[200].mxu1 %v6946_v35  ;;  %v7283_v35 = vrot.slane %v9134_v21, %v9707_v15  ;;  %v9150_v21 = vld.sshfl [vmem:[%s13056_s0 + $0xb2] sm:$0x11 pattern:$0x75316420] }
0x16e4   :  { %7100 = vmatpush1.bf16.msra.mxu1 %v12050_v34  ;;  %9125 = vmatprep.mubr.msk.bf16.mxu1 %vm142_vm0, %v7094_v46  ;;  %v7431_v46 = vrot.slane %v7417_v61, %v9707_v15  ;;  %v7613_v50 = vcombine.high %v9150_v21, %v9150_v21 }
0x16e5   :  { %7101 = vmatprep.subr.bf16.mxu1 %v9603_v1 }
0x16e8   :  { %7102 = vmatpush1.bf16.msra.mxu1 %v12057_v30 }
0x16e9   :  { %7103 = vmatprep.subr.bf16.mxu1 %v9603_v1 }
0x16ec   :  { %7104 = vmatpush1.bf16.msra.mxu1 %v12064_v43 }
0x16ed   :  { %7105 = vmatprep.subr.bf16.mxu1 %v9603_v1 }
0x16f0   :  { %7106 = vmatpush1.bf16.msra.mxu1 %v12071_v0 }
0x16f1   :  { %7107 = vmatprep.subr.bf16.mxu1 %v9603_v1 }
0x16f4   :  { %7108 = vmatpush1.bf16.msra.mxu1 %v12111_v27 }
0x16f5   :  { %7109 = vmatprep.subr.bf16.mxu1 %v9603_v1 }
0x16f8   :  { %7110 = vmatpush1.bf16.msra.mxu1 %v12118_v38 }
0x16f9   :  { %7111 = vmatprep.subr.bf16.mxu1 %v9603_v1 }
0x16fc   :  { %7112 = vmatpush1.bf16.msra.mxu1 %v12125_v42 }
0x16fd   :  { %7113 = vmatprep.subr.bf16.mxu1 %v9603_v1 }
0x1700   :  { %7114 = vmatpush1.bf16.msra.mxu1 %v12132_v53 }
0x1701   :  { %7115 = vmatprep.subr.bf16.mxu1 %v9603_v1 }
0x1704   :  { %7116 = vmatpush1.bf16.msra.mxu1 %v12180_v44 }
0x1705   :  { %7117 = vmatprep.subr.bf16.mxu1 %v9603_v1 }
0x1708   :  { %7118 = vmatpush1.bf16.msra.mxu1 %v9762_v25 }
0x1709   :  { %7225 = vmatprep.subr.bf16.mxu1 %v9603_v1 }
0x170b   :  { %7132 = vmatmul.mubr.bf16.vlgmr.msra.gmra.mrb[204].mxu1 %v7087_v11  ;;  %v12621_v11 = vld [vmem:[%s13057_s1 + $0x38] sm:$0xff]  }
0x170c   :  { %7226 = vmatpush1.bf16.msra.mxu1 %v12050_v34  ;;  %9132 = vmatprep.mubr.msk.bf16.mxu1 %vm142_vm0, %v7220_v40 }
0x170d   :  { %7227 = vmatprep.subr.bf16.mxu1 %v9603_v1 }
0x1710   :  { %7228 = vmatpush1.bf16.msra.mxu1 %v12057_v30 }
0x1711   :  { %7229 = vmatprep.subr.bf16.mxu1 %v9603_v1 }
0x1714   :  { %7230 = vmatpush1.bf16.msra.mxu1 %v12064_v43 }
0x1715   :  { %7231 = vmatprep.subr.bf16.mxu1 %v9603_v1 }
0x1718   :  { %7232 = vmatpush1.bf16.msra.mxu1 %v12071_v0 }
0x1719   :  { %7233 = vmatprep.subr.bf16.mxu1 %v9603_v1 }
0x171c   :  { %7234 = vmatpush1.bf16.msra.mxu1 %v12111_v27 }
0x171d   :  { %7235 = vmatprep.subr.bf16.mxu1 %v9603_v1 }
0x1720   :  { %7236 = vmatpush1.bf16.msra.mxu1 %v12118_v38 }
0x1721   :  { %7237 = vmatprep.subr.bf16.mxu1 %v9603_v1 }
0x1724   :  { %7238 = vmatpush1.bf16.msra.mxu1 %v12125_v42 }
0x1725   :  { %7239 = vmatprep.subr.bf16.mxu1 %v9603_v1 }
0x1728   :  { %7240 = vmatpush1.bf16.msra.mxu1 %v12132_v53 }
0x1729   :  { %7241 = vmatprep.subr.bf16.mxu1 %v9603_v1 }
0x172c   :  { %7242 = vmatpush1.bf16.msra.mxu1 %v12180_v44 }
0x172d   :  { %7243 = vmatprep.subr.bf16.mxu1 %v9603_v1 }
0x1730   :  { %7244 = vmatpush1.bf16.msra.mxu1 %v9762_v25 }
0x1731   :  { %7366 = vmatprep.subr.bf16.mxu1 %v9603_v1 }
0x1733   :  { %7258 = vmatmul.mubr.bf16.vlgmr.msra.gmra.mrb[208].mxu1 %v7213_v12 }
0x1734   :  { %7367 = vmatpush1.bf16.msra.mxu1 %v12050_v34  ;;  %v9137_v34 = vld.sshfl [vmem:[%s13056_s0 + $0xac] sm:$0x11 pattern:$0x75316420] }
0x1735   :  { %7368 = vmatprep.subr.bf16.mxu1 %v9603_v1  ;;  %v7354_v24 = vrot.slane %v9137_v34, %v9707_v15 }
0x1738   :  { %7369 = vmatpush1.bf16.msra.mxu1 %v12057_v30  ;;  %v7347_v30 = vcombine.high %v9137_v34, %v9137_v34  ;;  %v9153_v34 = vld.sshfl [vmem:[%s13056_s0 + $0xb4] sm:$0x11 pattern:$0x75316420] }
0x1739   :  { %7370 = vmatprep.subr.bf16.mxu1 %v9603_v1 }
0x173a   :  { %v7063_v7 = vpop.f32.mrb[204].mxu0 }
0x173b   :  { %v7065_v8 = vpop.f32.mrb[205].mxu0 }
0x173c   :  { %v7066_v4 = vpop.f32.mrb[206].mxu0  ;;  %7371 = vmatpush1.bf16.msra.mxu1 %v12064_v43  ;;  %v12503_v43 = vld [vmem:[%s13058_s2] ss:$0 sm:$0xff] }
0x173d   :  { %v7067_v9 = vpop.f32.mrb[207].mxu0  ;;  %7372 = vmatprep.subr.bf16.mxu1 %v9603_v1  ;;  %v7064_v32 = vadd.f32 %v12503_v43, %v7063_v7 }
0x173f   :  { %v7069_v16 = vmax.f32 %v7064_v32, 0.0 }
0x1740   :  { %7373 = vmatpush1.bf16.msra.mxu1 %v12071_v0  ;;  %v6923_v0 = vadd.f32 %v12503_v43, %v6922_v29 }
0x1741   :  { %7374 = vmatprep.subr.bf16.mxu1 %v9603_v1 }
0x1742   :  { %v6928_v14 = vmax.f32 %v6923_v0, 0.0 }
0x1744   :  { %7375 = vmatpush1.bf16.msra.mxu1 %v12111_v27 }
0x1745   :  { %7376 = vmatprep.subr.bf16.mxu1 %v9603_v1 }
0x1748   :  { %7377 = vmatpush1.bf16.msra.mxu1 %v12118_v38 }
0x1749   :  { %7378 = vmatprep.subr.bf16.mxu1 %v9603_v1 }
0x174c   :  { %7379 = vmatpush1.bf16.msra.mxu1 %v12125_v42 }
0x174d   :  { %7380 = vmatprep.subr.bf16.mxu1 %v9603_v1 }
0x1750   :  { %7381 = vmatpush1.bf16.msra.mxu1 %v12132_v53 }
0x1751   :  { %7382 = vmatprep.subr.bf16.mxu1 %v9603_v1 }
0x1754   :  { %7383 = vmatpush1.bf16.msra.mxu1 %v12180_v44 }
0x1755   :  { %7384 = vmatprep.subr.bf16.mxu1 %v9603_v1 }
0x1758   :  { %7385 = vmatpush1.bf16.msra.mxu1 %v9762_v25 }
0x1759   :  { %9405 = vmatprep.subr.bf16.mxu1 %v9605_v51 }
0x178e   :  { %v6852_v13 = vpop.f32.mrb[196].mxu1 }
0x178f   :  { %v12477_v22 = vadd.f32 %v6852_v13, %v12359_v17  ;;  %v9397_v26 = vpop.f32.mrb[197].mxu1  ;;  %v7361_v17 = vrot.slane %v7347_v30, %v9707_v15  ;;  %v7684_v30 = vcombine.high %v9153_v34, %v9153_v34 }
0x1790   :  { %v6855_v28 = vpop.f32.mrb[198].mxu1 }
0x1791   :  { %v9398_v23 = vpop.f32.mrb[199].mxu1  ;;  %9138 = vmatprep.mubr.msk.bf16.mxu1 %vm142_vm0, %v7361_v17  ;;  %v7698_v17 = vrot.slane %v7684_v30, %v9707_v15 }
0x1792   :  { %7399 = vmatmul.mubr.bf16.vlgmr.msra.gmra.mrb[212].mxu1 %v7354_v24  ;;  %v7691_v24 = vrot.slane %v9153_v34, %v9707_v15 }
0x1793   :  { %9407 = vmatprep.mubr.msk.bf16.mxu1 %vm9606_vm2, %v9605_v51  ;;  %9406 = vmatpush3.bf16.msra.mxu1 %v9501_v10  ;;  %v9502_v10 = vld [vmem:[%s13059_s3 + $0xb0] sm:$0xff]  }
0x1794   :  { %7632 = vmatprep.subr.bf16.mxu1 %v9603_v1 }
0x17b6   :  { %v6992_v18 = vpop.f32.mrb[200].mxu1 }
0x17b7   :  { %v6993_v31 = vadd.f32 %v12503_v43, %v6992_v18  ;;  %v6994_v39 = vpop.f32.mrb[201].mxu1 }
0x17b8   :  { %v6995_v36 = vpop.f32.mrb[202].mxu1 }
0x17b9   :  { %v6998_v3 = vmax.f32 %v6993_v31, 0.0  ;;  %v6996_v45 = vpop.f32.mrb[203].mxu1 }
0x17bb   :  { %v6999_v5 = vmax.f32 %v6928_v14, %v6998_v3 }
0x17de   :  { %v7133_v33 = vpop.f32.mrb[204].mxu1 }
0x17df   :  { %v7134_v47 = vadd.f32 %v12503_v43, %v7133_v33  ;;  %v7135_v19 = vpop.f32.mrb[205].mxu1 }
0x17e0   :  { %v7136_v20 = vpop.f32.mrb[206].mxu1 }
0x17e1   :  { %v7139_v48 = vmax.f32 %v7134_v47, 0.0  ;;  %v7137_v49 = vpop.f32.mrb[207].mxu1 }
0x17e3   :  { %v7140_v52 = vmax.f32 %v7069_v16, %v7139_v48 }
0x17e5   :  { %v7141_v54 = vmax.f32 %v6999_v5, %v7140_v52 }
0x17e7   :  { %v7142_v56 = vpack.c.bf16 %v7141_v54, %v7141_v54 }
0x17e9   :  { %9402 = vmatmul.mubr.msk.bf16.vlgmr.msra.gmra.mrb[208].mxu0 %vm700_vm3, %v7142_v56 }
0x17ea   :  { %7296 = vmatpush1.bf16.msra.mxu0 %v12524_v57  ;;  %9135 = vmatprep.mubr.msk.bf16.mxu0 %vm142_vm0, %v7290_v55  ;;  %v7627_v55 = vrot.slane %v7613_v50, %v9707_v15 }
0x17eb   :  { %7297 = vmatprep.subr.bf16.mxu0 %v9603_v1 }
0x17ee   :  { %7298 = vmatpush1.bf16.msra.mxu0 %v12532_v58 }
0x17ef   :  { %7299 = vmatprep.subr.bf16.mxu0 %v9603_v1 }
0x17f2   :  { %7300 = vmatpush1.bf16.msra.mxu0 %v12539_v59 }
0x17f3   :  { %7301 = vmatprep.subr.bf16.mxu0 %v9603_v1 }
0x17f6   :  { %7302 = vmatpush1.bf16.msra.mxu0 %v12546_v60 }
0x17f7   :  { %7303 = vmatprep.subr.bf16.mxu0 %v9603_v1 }
0x17fa   :  { %7304 = vmatpush1.bf16.msra.mxu0 %v12111_v27 }
0x17fb   :  { %7305 = vmatprep.subr.bf16.mxu0 %v9603_v1 }
0x17fe   :  { %7306 = vmatpush1.bf16.msra.mxu0 %v12118_v38 }
0x17ff   :  { %7307 = vmatprep.subr.bf16.mxu0 %v9603_v1 }
0x1802   :  { %7308 = vmatpush1.bf16.msra.mxu0 %v12125_v42 }
0x1803   :  { %7309 = vmatprep.subr.bf16.mxu0 %v9603_v1 }
0x1806   :  { %7310 = vmatpush1.bf16.msra.mxu0 %v12132_v53  ;;  %v7259_v29 = vpop.f32.mrb[208].mxu1 }
0x1807   :  { %7311 = vmatprep.subr.bf16.mxu0 %v9603_v1  ;;  %v7261_v62 = vpop.f32.mrb[209].mxu1  ;;  %v7260_v0 = vadd.f32 %v12503_v43, %v7259_v29 }
0x1808   :  { %v7262_v63 = vpop.f32.mrb[210].mxu1 }
0x1809   :  { %v7263_v2 = vpop.f32.mrb[211].mxu1  ;;  %v7265_v14 = vmax.f32 %v7260_v0, 0.0 }
0x180a   :  { %7312 = vmatpush1.bf16.msra.mxu0 %v12180_v44 }
0x180b   :  { %7313 = vmatprep.subr.bf16.mxu0 %v9603_v1 }
0x180e   :  { %7314 = vmatpush1.bf16.msra.mxu0 %v9762_v25 }
0x180f   :  { %7436 = vmatprep.subr.bf16.mxu0 %v9603_v1 }
0x1811   :  { %7328 = vmatmul.mubr.bf16.vlgmr.msra.gmra.mrb[212].mxu0 %v7283_v35  ;;  %v7620_v35 = vrot.slane %v9150_v21, %v9707_v15  ;;  %v9166_v21 = vld.sshfl [vmem:[%s13056_s0 + $0xba] sm:$0x11 pattern:$0x75316420] }
0x1812   :  { %7437 = vmatpush1.bf16.msra.mxu0 %v12524_v57  ;;  %9141 = vmatprep.mubr.msk.bf16.mxu0 %vm142_vm0, %v7431_v46  ;;  %v7950_v50 = vcombine.high %v9166_v21, %v9166_v21 }
0x1813   :  { %7438 = vmatprep.subr.bf16.mxu0 %v9603_v1 }
0x1816   :  { %7439 = vmatpush1.bf16.msra.mxu0 %v12532_v58 }
0x1817   :  { %7440 = vmatprep.subr.bf16.mxu0 %v9603_v1 }
0x181a   :  { %7441 = vmatpush1.bf16.msra.mxu0 %v12539_v59 }
0x181b   :  { %7442 = vmatprep.subr.bf16.mxu0 %v9603_v1 }
0x181e   :  { %7443 = vmatpush1.bf16.msra.mxu0 %v12546_v60 }
0x181f   :  { %7444 = vmatprep.subr.bf16.mxu0 %v9603_v1 }
0x1822   :  { %7445 = vmatpush1.bf16.msra.mxu0 %v12111_v27  ;;  %v7424_v27 = vrot.slane %v9140_v37, %v9707_v15  ;;  %v9156_v37 = vld.sshfl [vmem:[%s13056_s0 + $0xb6] sm:$0x11 pattern:$0x75316420] }
0x1823   :  { %7446 = vmatprep.subr.bf16.mxu0 %v9603_v1  ;;  %v7754_v61 = vcombine.high %v9156_v37, %v9156_v37 }
0x1825   :  { %v7768_v46 = vrot.slane %v7754_v61, %v9707_v15 }
0x1826   :  { %7447 = vmatpush1.bf16.msra.mxu0 %v12118_v38  ;;  %v12600_v38 = vld [vmem:[%s13057_s1 + $0x20] sm:$0xff]  }
0x1827   :  { %7448 = vmatprep.subr.bf16.mxu0 %v9603_v1 }
0x182a   :  { %7449 = vmatpush1.bf16.msra.mxu0 %v12125_v42  ;;  %v12607_v42 = vld [vmem:[%s13057_s1 + $0x28] sm:$0xff]  }
0x182b   :  { %7450 = vmatprep.subr.bf16.mxu0 %v9603_v1 }
0x182e   :  { %7451 = vmatpush1.bf16.msra.mxu0 %v12132_v53  ;;  %v12614_v53 = vld [vmem:[%s13057_s1 + $0x30] sm:$0xff]  }
0x182f   :  { %7452 = vmatprep.subr.bf16.mxu0 %v9603_v1 }
0x1832   :  { %7453 = vmatpush1.bf16.msra.mxu0 %v12180_v44 }
0x1833   :  { %7454 = vmatprep.subr.bf16.mxu0 %v9603_v1 }
0x1836   :  { %7455 = vmatpush1.bf16.msra.mxu0 %v9762_v25 }
0x1837   :  { %7562 = vmatprep.subr.bf16.mxu0 %v9603_v1 }
0x1839   :  { %7469 = vmatmul.mubr.bf16.vlgmr.msra.gmra.mrb[216].mxu0 %v7424_v27  ;;  %v7761_v27 = vrot.slane %v9156_v37, %v9707_v15  ;;  %v9172_v37 = vld.sshfl [vmem:[%s13056_s0 + $0xbe] sm:$0x11 pattern:$0x75316420] }
0x183a   :  { %7563 = vmatpush1.bf16.msra.mxu0 %v12524_v57  ;;  %v8091_v61 = vcombine.high %v9172_v37, %v9172_v37 }
0x183b   :  { %7564 = vmatprep.subr.bf16.mxu0 %v9603_v1 }
0x183e   :  { %7565 = vmatpush1.bf16.msra.mxu0 %v12532_v58 }
0x183f   :  { %7566 = vmatprep.subr.bf16.mxu0 %v9603_v1 }
0x1842   :  { %7567 = vmatpush1.bf16.msra.mxu0 %v12539_v59 }
0x1843   :  { %7568 = vmatprep.subr.bf16.mxu0 %v9603_v1 }
0x1846   :  { %7569 = vmatpush1.bf16.msra.mxu0 %v12546_v60 }
0x1847   :  { %7570 = vmatprep.subr.bf16.mxu0 %v9603_v1 }
0x184a   :  { %7571 = vmatpush1.bf16.msra.mxu0 %v12600_v38 }
0x184b   :  { %7572 = vmatprep.subr.bf16.mxu0 %v9603_v1 }
0x184e   :  { %7573 = vmatpush1.bf16.msra.mxu0 %v12607_v42 }
0x184f   :  { %7574 = vmatprep.subr.bf16.mxu0 %v9603_v1 }
0x1852   :  { %7575 = vmatpush1.bf16.msra.mxu0 %v12614_v53 }
0x1853   :  { %7576 = vmatprep.subr.bf16.mxu0 %v9603_v1 }
0x1856   :  { %7577 = vmatpush1.bf16.msra.mxu0 %v12621_v11 }
0x1857   :  { %7578 = vmatprep.subr.bf16.mxu0 %v9603_v1 }
0x185a   :  { %7579 = vmatpush1.bf16.msra.mxu0 %v12180_v44  ;;  %v9147_v44 = vld.sshfl [vmem:[%s13056_s0 + $0xb0] sm:$0x11 pattern:$0x75316420] }
0x185b   :  { %7580 = vmatprep.subr.bf16.mxu0 %v9603_v1  ;;  %v7543_v6 = vcombine.high %v9147_v44, %v9147_v44  ;;  %v7550_v40 = vrot.slane %v9147_v44, %v9707_v15  ;;  %v9163_v44 = vld.sshfl [vmem:[%s13056_s0 + $0xb8] sm:$0x11 pattern:$0x75316420] }
0x185d   :  { %v7557_v41 = vrot.slane %v7543_v6, %v9707_v15  ;;  %v7880_v6 = vcombine.high %v9163_v44, %v9163_v44 }
0x185e   :  { %7581 = vmatpush1.bf16.msra.mxu0 %v9762_v25 }
0x185f   :  { %7703 = vmatprep.subr.bf16.mxu0 %v9603_v1  ;;  %9148 = vmatprep.mubr.msk.bf16.mxu0 %vm142_vm0, %v7557_v41  ;;  %v7894_v41 = vrot.slane %v7880_v6, %v9707_v15 }
0x1861   :  { %7595 = vmatmul.mubr.bf16.vlgmr.msra.gmra.mrb[220].mxu0 %v7550_v40  ;;  %v7887_v40 = vrot.slane %v9163_v44, %v9707_v15  ;;  %v9179_v44 = vld.sshfl [vmem:[%s13056_s0 + $0xc0] sm:$0x11 pattern:$0x75316420] }
0x1862   :  { %7704 = vmatpush1.bf16.msra.mxu0 %v12524_v57  ;;  %9154 = vmatprep.mubr.msk.bf16.mxu0 %vm142_vm0, %v7698_v17  ;;  %v8217_v6 = vcombine.high %v9179_v44, %v9179_v44 }
0x1863   :  { %7705 = vmatprep.subr.bf16.mxu0 %v9603_v1 }
0x1865   :  { %v7400_v7 = vpop.f32.mrb[212].mxu1 }
0x1866   :  { %v7402_v8 = vpop.f32.mrb[213].mxu1  ;;  %7706 = vmatpush1.bf16.msra.mxu0 %v12532_v58  ;;  %v7401_v32 = vadd.f32 %v12503_v43, %v7400_v7 }
0x1867   :  { %v7403_v4 = vpop.f32.mrb[214].mxu1  ;;  %7707 = vmatprep.subr.bf16.mxu0 %v9603_v1 }
0x1868   :  { %v7404_v9 = vpop.f32.mrb[215].mxu1  ;;  %v7406_v16 = vmax.f32 %v7401_v32, 0.0 }
0x186a   :  { %7708 = vmatpush1.bf16.msra.mxu0 %v12539_v59 }
0x186b   :  { %7709 = vmatprep.subr.bf16.mxu0 %v9603_v1 }
0x186e   :  { %7710 = vmatpush1.bf16.msra.mxu0 %v12546_v60 }
0x186f   :  { %7711 = vmatprep.subr.bf16.mxu0 %v9603_v1 }
0x1872   :  { %7712 = vmatpush1.bf16.msra.mxu0 %v12600_v38 }
0x1873   :  { %7713 = vmatprep.subr.bf16.mxu0 %v9603_v1 }
0x1876   :  { %7714 = vmatpush1.bf16.msra.mxu0 %v12607_v42 }
0x1877   :  { %7715 = vmatprep.subr.bf16.mxu0 %v9603_v1 }
0x187a   :  { %7716 = vmatpush1.bf16.msra.mxu0 %v12614_v53 }
0x187b   :  { %7717 = vmatprep.subr.bf16.mxu0 %v9603_v1 }
0x187e   :  { %7718 = vmatpush1.bf16.msra.mxu0 %v12621_v11 }
0x187f   :  { %7719 = vmatprep.subr.bf16.mxu0 %v9603_v1 }
0x18bc   :  { %v7189_v12 = vpop.f32.mrb[208].mxu0 }
0x18bd   :  { %v12640_v13 = vadd.f32 %v7189_v12, %v12477_v22  ;;  %v9403_v26 = vpop.f32.mrb[209].mxu0  ;;  %v12661_v22 = vld [vmem:[%s13057_s1 + $0x40] sm:$0xff]  }
0x18be   :  { %v7192_v28 = vpop.f32.mrb[210].mxu0  ;;  %7720 = vmatpush1.bf16.msra.mxu0 %v12661_v22 }
0x18bf   :  { %v9404_v23 = vpop.f32.mrb[211].mxu0  ;;  %7721 = vmatprep.subr.bf16.mxu0 %v9603_v1 }
0x18c2   :  { %7722 = vmatpush1.bf16.msra.mxu0 %v9762_v25 }
0x18c3   :  { %9411 = vmatprep.subr.bf16.mxu0 %v9605_v51 }
0x18c5   :  { %7736 = vmatmul.mubr.bf16.vlgmr.msra.gmra.mrb[224].mxu0 %v7691_v24 }
0x18c6   :  { %9413 = vmatprep.mubr.msk.bf16.mxu0 %vm9606_vm2, %v9605_v51  ;;  %9412 = vmatpush3.bf16.msra.mxu0 %v9502_v10  ;;  %v9503_v10 = vld [vmem:[%s13059_s3 + $0xb8] sm:$0xff]  }
0x18c7   :  { %7969 = vmatprep.subr.bf16.mxu0 %v9603_v1 }
0x18e4   :  { %v7329_v18 = vpop.f32.mrb[212].mxu0 }
0x18e5   :  { %v7330_v31 = vadd.f32 %v12503_v43, %v7329_v18  ;;  %v7331_v39 = vpop.f32.mrb[213].mxu0 }
0x18e6   :  { %v7332_v36 = vpop.f32.mrb[214].mxu0 }
0x18e7   :  { %v7335_v3 = vmax.f32 %v7330_v31, 0.0  ;;  %v7333_v45 = vpop.f32.mrb[215].mxu0 }
0x18e9   :  { %v7336_v5 = vmax.f32 %v7265_v14, %v7335_v3 }
0x190c   :  { %v7470_v33 = vpop.f32.mrb[216].mxu0 }
0x190d   :  { %v7471_v47 = vadd.f32 %v12503_v43, %v7470_v33  ;;  %v7472_v19 = vpop.f32.mrb[217].mxu0 }
0x190e   :  { %v7473_v20 = vpop.f32.mrb[218].mxu0 }
0x190f   :  { %v7476_v48 = vmax.f32 %v7471_v47, 0.0  ;;  %v7474_v49 = vpop.f32.mrb[219].mxu0 }
0x1911   :  { %v7477_v52 = vmax.f32 %v7406_v16, %v7476_v48 }
0x1913   :  { %v7478_v54 = vmax.f32 %v7336_v5, %v7477_v52 }
0x1915   :  { %v7479_v56 = vpack.c.bf16 %v7478_v54, %v7478_v54 }
0x1917   :  { %9408 = vmatmul.mubr.msk.bf16.vlgmr.msra.gmra.mrb[216].mxu1 %vm700_vm3, %v7479_v56 }
0x1918   :  { %7633 = vmatpush1.bf16.msra.mxu1 %v12524_v57  ;;  %9151 = vmatprep.mubr.msk.bf16.mxu1 %vm142_vm0, %v7627_v55  ;;  %v7964_v55 = vrot.slane %v7950_v50, %v9707_v15 }
0x1919   :  { %7634 = vmatprep.subr.bf16.mxu1 %v9603_v1 }
0x191c   :  { %7635 = vmatpush1.bf16.msra.mxu1 %v12532_v58 }
0x191d   :  { %7636 = vmatprep.subr.bf16.mxu1 %v9603_v1 }
0x1920   :  { %7637 = vmatpush1.bf16.msra.mxu1 %v12539_v59 }
0x1921   :  { %7638 = vmatprep.subr.bf16.mxu1 %v9603_v1 }
0x1924   :  { %7639 = vmatpush1.bf16.msra.mxu1 %v12546_v60 }
0x1925   :  { %7640 = vmatprep.subr.bf16.mxu1 %v9603_v1 }
0x1928   :  { %7641 = vmatpush1.bf16.msra.mxu1 %v12600_v38 }
0x1929   :  { %7642 = vmatprep.subr.bf16.mxu1 %v9603_v1 }
0x192c   :  { %7643 = vmatpush1.bf16.msra.mxu1 %v12607_v42 }
0x192d   :  { %7644 = vmatprep.subr.bf16.mxu1 %v9603_v1 }
0x1930   :  { %7645 = vmatpush1.bf16.msra.mxu1 %v12614_v53 }
0x1931   :  { %7646 = vmatprep.subr.bf16.mxu1 %v9603_v1 }
0x1934   :  { %7647 = vmatpush1.bf16.msra.mxu1 %v12621_v11  ;;  %v7596_v29 = vpop.f32.mrb[220].mxu0 }
0x1935   :  { %7648 = vmatprep.subr.bf16.mxu1 %v9603_v1  ;;  %v7598_v62 = vpop.f32.mrb[221].mxu0  ;;  %v7597_v0 = vadd.f32 %v12503_v43, %v7596_v29 }
0x1936   :  { %v7599_v63 = vpop.f32.mrb[222].mxu0 }
0x1937   :  { %v7600_v2 = vpop.f32.mrb[223].mxu0  ;;  %v7602_v14 = vmax.f32 %v7597_v0, 0.0 }
0x1938   :  { %7649 = vmatpush1.bf16.msra.mxu1 %v12661_v22 }
0x1939   :  { %7650 = vmatprep.subr.bf16.mxu1 %v9603_v1 }
0x193c   :  { %7651 = vmatpush1.bf16.msra.mxu1 %v9762_v25 }
0x193d   :  { %7773 = vmatprep.subr.bf16.mxu1 %v9603_v1 }
0x193f   :  { %7665 = vmatmul.mubr.bf16.vlgmr.msra.gmra.mrb[220].mxu1 %v7620_v35  ;;  %v7957_v35 = vrot.slane %v9166_v21, %v9707_v15  ;;  %v9182_v21 = vld.sshfl [vmem:[%s13056_s0 + $0xc2] sm:$0x11 pattern:$0x75316420] }
0x1940   :  { %7774 = vmatpush1.bf16.msra.mxu1 %v12524_v57  ;;  %9157 = vmatprep.mubr.msk.bf16.mxu1 %vm142_vm0, %v7768_v46  ;;  %v8105_v46 = vrot.slane %v8091_v61, %v9707_v15  ;;  %v8287_v50 = vcombine.high %v9182_v21, %v9182_v21  ;;  %v8294_v61 = vrot.slane %v9182_v21, %v9707_v15  ;;  %v9194_v21 = vld [vmem:[%s13060_s4] ss:$0 sm:$0xff] }
0x1941   :  { %7775 = vmatprep.subr.bf16.mxu1 %v9603_v1 }
0x1944   :  { %7776 = vmatpush1.bf16.msra.mxu1 %v12532_v58 }
0x1945   :  { %7777 = vmatprep.subr.bf16.mxu1 %v9603_v1 }
0x1948   :  { %7778 = vmatpush1.bf16.msra.mxu1 %v12539_v59 }
0x1949   :  { %7779 = vmatprep.subr.bf16.mxu1 %v9603_v1 }
0x194c   :  { %7780 = vmatpush1.bf16.msra.mxu1 %v12546_v60 }
0x194d   :  { %7781 = vmatprep.subr.bf16.mxu1 %v9603_v1 }
0x1950   :  { %7782 = vmatpush1.bf16.msra.mxu1 %v12600_v38 }
0x1951   :  { %7783 = vmatprep.subr.bf16.mxu1 %v9603_v1 }
0x1954   :  { %7784 = vmatpush1.bf16.msra.mxu1 %v12607_v42 }
0x1955   :  { %7785 = vmatprep.subr.bf16.mxu1 %v9603_v1 }
0x1958   :  { %7786 = vmatpush1.bf16.msra.mxu1 %v12614_v53 }
0x1959   :  { %7787 = vmatprep.subr.bf16.mxu1 %v9603_v1 }
0x195c   :  { %7788 = vmatpush1.bf16.msra.mxu1 %v12621_v11 }
0x195d   :  { %7789 = vmatprep.subr.bf16.mxu1 %v9603_v1 }
0x1960   :  { %7790 = vmatpush1.bf16.msra.mxu1 %v12661_v22 }
0x1961   :  { %7791 = vmatprep.subr.bf16.mxu1 %v9603_v1 }
0x1964   :  { %7792 = vmatpush1.bf16.msra.mxu1 %v9762_v25 }
0x1965   :  { %7899 = vmatprep.subr.bf16.mxu1 %v9603_v1 }
0x1967   :  { %7806 = vmatmul.mubr.bf16.vlgmr.msra.gmra.mrb[224].mxu1 %v7761_v27  ;;  %v8098_v27 = vrot.slane %v9172_v37, %v9707_v15 }
0x1968   :  { %7900 = vmatpush1.bf16.msra.mxu1 %v12524_v57  ;;  %9164 = vmatprep.mubr.msk.bf16.mxu1 %vm142_vm0, %v7894_v41  ;;  %v8231_v41 = vrot.slane %v8217_v6, %v9707_v15 }
0x1969   :  { %7901 = vmatprep.subr.bf16.mxu1 %v9603_v1 }
0x196c   :  { %7902 = vmatpush1.bf16.msra.mxu1 %v12532_v58 }
0x196d   :  { %7903 = vmatprep.subr.bf16.mxu1 %v9603_v1 }
0x1970   :  { %7904 = vmatpush1.bf16.msra.mxu1 %v12539_v59 }
0x1971   :  { %7905 = vmatprep.subr.bf16.mxu1 %v9603_v1 }
0x1974   :  { %7906 = vmatpush1.bf16.msra.mxu1 %v12546_v60 }
0x1975   :  { %7907 = vmatprep.subr.bf16.mxu1 %v9603_v1 }
0x1978   :  { %7908 = vmatpush1.bf16.msra.mxu1 %v12600_v38 }
0x1979   :  { %7909 = vmatprep.subr.bf16.mxu1 %v9603_v1 }
0x197c   :  { %7910 = vmatpush1.bf16.msra.mxu1 %v12607_v42 }
0x197d   :  { %7911 = vmatprep.subr.bf16.mxu1 %v9603_v1 }
0x1980   :  { %7912 = vmatpush1.bf16.msra.mxu1 %v12614_v53 }
0x1981   :  { %7913 = vmatprep.subr.bf16.mxu1 %v9603_v1 }
0x1984   :  { %7914 = vmatpush1.bf16.msra.mxu1 %v12621_v11 }
0x1985   :  { %7915 = vmatprep.subr.bf16.mxu1 %v9603_v1 }
0x1988   :  { %7916 = vmatpush1.bf16.msra.mxu1 %v12661_v22 }
0x1989   :  { %7917 = vmatprep.subr.bf16.mxu1 %v9603_v1 }
0x198c   :  { %7918 = vmatpush1.bf16.msra.mxu1 %v9762_v25 }
0x198d   :  { %8040 = vmatprep.subr.bf16.mxu1 %v9603_v1 }
0x198f   :  { %7932 = vmatmul.mubr.bf16.vlgmr.msra.gmra.mrb[228].mxu1 %v7887_v40  ;;  %v8224_v40 = vrot.slane %v9179_v44, %v9707_v15 }
0x1990   :  { %8041 = vmatpush1.bf16.msra.mxu1 %v12524_v57 }
0x1991   :  { %8042 = vmatprep.subr.bf16.mxu1 %v9603_v1 }
0x1994   :  { %8043 = vmatpush1.bf16.msra.mxu1 %v12532_v58 }
0x1995   :  { %8044 = vmatprep.subr.bf16.mxu1 %v9603_v1 }
0x1998   :  { %v7737_v7 = vpop.f32.mrb[224].mxu0  ;;  %8045 = vmatpush1.bf16.msra.mxu1 %v12539_v59 }
0x1999   :  { %v7739_v8 = vpop.f32.mrb[225].mxu0  ;;  %8046 = vmatprep.subr.bf16.mxu1 %v9603_v1  ;;  %v7738_v32 = vadd.f32 %v12503_v43, %v7737_v7 }
0x199a   :  { %v7740_v4 = vpop.f32.mrb[226].mxu0 }
0x199b   :  { %v7741_v9 = vpop.f32.mrb[227].mxu0  ;;  %v7743_v16 = vmax.f32 %v7738_v32, 0.0 }
0x199c   :  { %8047 = vmatpush1.bf16.msra.mxu1 %v12546_v60 }
0x199d   :  { %8048 = vmatprep.subr.bf16.mxu1 %v9603_v1 }
0x19a0   :  { %8049 = vmatpush1.bf16.msra.mxu1 %v12600_v38 }
0x19a1   :  { %8050 = vmatprep.subr.bf16.mxu1 %v9603_v1 }
0x19a4   :  { %8051 = vmatpush1.bf16.msra.mxu1 %v12607_v42 }
0x19a5   :  { %8052 = vmatprep.subr.bf16.mxu1 %v9603_v1 }
0x19a8   :  { %8053 = vmatpush1.bf16.msra.mxu1 %v12614_v53 }
0x19a9   :  { %8054 = vmatprep.subr.bf16.mxu1 %v9603_v1 }
0x19ac   :  { %8055 = vmatpush1.bf16.msra.mxu1 %v12621_v11 }
0x19ad   :  { %8056 = vmatprep.subr.bf16.mxu1 %v9603_v1 }
0x19b0   :  { %8057 = vmatpush1.bf16.msra.mxu1 %v12661_v22 }
0x19b1   :  { %8058 = vmatprep.subr.bf16.mxu1 %v9603_v1 }
0x19b4   :  { %8059 = vmatpush1.bf16.msra.mxu1 %v9762_v25 }
0x19b5   :  { %9417 = vmatprep.subr.bf16.mxu1 %v9605_v51 }
0x19ea   :  { %v7526_v12 = vpop.f32.mrb[216].mxu1 }
0x19eb   :  { %v12763_v26 = vadd.f32 %v7526_v12, %v12640_v13  ;;  %v9409_v28 = vpop.f32.mrb[217].mxu1  ;;  %v9169_v13 = vld.sshfl [vmem:[%s13056_s0 + $0xbc] sm:$0x11 pattern:$0x75316420] }
0x19ec   :  { %v7529_v23 = vpop.f32.mrb[218].mxu1  ;;  %v8021_v30 = vcombine.high %v9169_v13, %v9169_v13  ;;  %v8028_v24 = vrot.slane %v9169_v13, %v9707_v15 }
0x19ed   :  { %v9410_v34 = vpop.f32.mrb[219].mxu1 }
0x19ee   :  { %v8035_v17 = vrot.slane %v8021_v30, %v9707_v15 }
0x19f0   :  { %9170 = vmatprep.mubr.msk.bf16.mxu1 %vm142_vm0, %v8035_v17 }
0x19f1   :  { %8073 = vmatmul.mubr.bf16.vlgmr.msra.gmra.mrb[232].mxu1 %v8028_v24 }
0x19f2   :  { %9419 = vmatprep.mubr.msk.bf16.mxu1 %vm9606_vm2, %v9605_v51  ;;  %9418 = vmatpush3.bf16.msra.mxu1 %v9503_v10 }
0x19f3   :  { %8306 = vmatprep.subr.bf16.mxu1 %v9603_v1 }
0x1a12   :  { %v7666_v18 = vpop.f32.mrb[220].mxu1 }
0x1a13   :  { %v7667_v31 = vadd.f32 %v12503_v43, %v7666_v18  ;;  %v7668_v39 = vpop.f32.mrb[221].mxu1 }
0x1a14   :  { %v7669_v36 = vpop.f32.mrb[222].mxu1 }
0x1a15   :  { %v7672_v3 = vmax.f32 %v7667_v31, 0.0  ;;  %v7670_v45 = vpop.f32.mrb[223].mxu1 }
0x1a17   :  { %v7673_v5 = vmax.f32 %v7602_v14, %v7672_v3 }
0x1a3a   :  { %v7807_v33 = vpop.f32.mrb[224].mxu1 }
0x1a3b   :  { %v7808_v47 = vadd.f32 %v12503_v43, %v7807_v33  ;;  %v7809_v19 = vpop.f32.mrb[225].mxu1 }
0x1a3c   :  { %v7810_v20 = vpop.f32.mrb[226].mxu1 }
0x1a3d   :  { %v7813_v48 = vmax.f32 %v7808_v47, 0.0  ;;  %v7811_v49 = vpop.f32.mrb[227].mxu1 }
0x1a3f   :  { %v7814_v52 = vmax.f32 %v7743_v16, %v7813_v48 }
0x1a41   :  { %v7815_v54 = vmax.f32 %v7673_v5, %v7814_v52 }
0x1a43   :  { %v7816_v56 = vpack.c.bf16 %v7815_v54, %v7815_v54 }
0x1a45   :  { %9414 = vmatmul.mubr.msk.bf16.vlgmr.msra.gmra.mrb[228].mxu0 %vm700_vm3, %v7816_v56 }
0x1a46   :  { %7970 = vmatpush1.bf16.msra.mxu0 %v12524_v57  ;;  %9167 = vmatprep.mubr.msk.bf16.mxu0 %vm142_vm0, %v7964_v55  ;;  %v8301_v55 = vrot.slane %v8287_v50, %v9707_v15 }
0x1a47   :  { %7971 = vmatprep.subr.bf16.mxu0 %v9603_v1 }
0x1a4a   :  { %7972 = vmatpush1.bf16.msra.mxu0 %v12532_v58 }
0x1a4b   :  { %7973 = vmatprep.subr.bf16.mxu0 %v9603_v1 }
0x1a4e   :  { %7974 = vmatpush1.bf16.msra.mxu0 %v12539_v59 }
0x1a4f   :  { %7975 = vmatprep.subr.bf16.mxu0 %v9603_v1 }
0x1a52   :  { %7976 = vmatpush1.bf16.msra.mxu0 %v12546_v60 }
0x1a53   :  { %7977 = vmatprep.subr.bf16.mxu0 %v9603_v1 }
0x1a56   :  { %7978 = vmatpush1.bf16.msra.mxu0 %v12600_v38 }
0x1a57   :  { %7979 = vmatprep.subr.bf16.mxu0 %v9603_v1 }
0x1a5a   :  { %7980 = vmatpush1.bf16.msra.mxu0 %v12607_v42 }
0x1a5b   :  { %7981 = vmatprep.subr.bf16.mxu0 %v9603_v1 }
0x1a5e   :  { %7982 = vmatpush1.bf16.msra.mxu0 %v12614_v53 }
0x1a5f   :  { %7983 = vmatprep.subr.bf16.mxu0 %v9603_v1 }
0x1a62   :  { %7984 = vmatpush1.bf16.msra.mxu0 %v12621_v11  ;;  %v7933_v29 = vpop.f32.mrb[228].mxu1 }
0x1a63   :  { %7985 = vmatprep.subr.bf16.mxu0 %v9603_v1  ;;  %v7935_v62 = vpop.f32.mrb[229].mxu1  ;;  %v7934_v0 = vadd.f32 %v12503_v43, %v7933_v29  ;;  %v9509_v29 = vld [vmem:[%s13061_s5 + $0x20] sm:$0xff]  }
0x1a64   :  { %v7936_v63 = vpop.f32.mrb[230].mxu1  ;;  %v9510_v62 = vld [vmem:[%s13061_s5 + $0x28] sm:$0xff]  }
0x1a65   :  { %v7937_v2 = vpop.f32.mrb[231].mxu1  ;;  %v7939_v14 = vmax.f32 %v7934_v0, 0.0 }
0x1a66   :  { %7986 = vmatpush1.bf16.msra.mxu0 %v12661_v22 }
0x1a67   :  { %7987 = vmatprep.subr.bf16.mxu0 %v9603_v1 }
0x1a6a   :  { %7988 = vmatpush1.bf16.msra.mxu0 %v9762_v25 }
0x1a6b   :  { %8110 = vmatprep.subr.bf16.mxu0 %v9603_v1 }
0x1a6d   :  { %8002 = vmatmul.mubr.bf16.vlgmr.msra.gmra.mrb[232].mxu0 %v7957_v35 }
0x1a6e   :  { %8111 = vmatpush1.bf16.msra.mxu0 %v12524_v57  ;;  %9173 = vmatprep.mubr.msk.bf16.mxu0 %vm142_vm0, %v8105_v46  ;;  %v9507_v46 = vld [vmem:[%s13061_s5 + $0x10] sm:$0xff]  }
0x1a6f   :  { %8112 = vmatprep.subr.bf16.mxu0 %v9603_v1 }
0x1a72   :  { %8113 = vmatpush1.bf16.msra.mxu0 %v12532_v58 }
0x1a73   :  { %8114 = vmatprep.subr.bf16.mxu0 %v9603_v1 }
0x1a76   :  { %8115 = vmatpush1.bf16.msra.mxu0 %v12539_v59 }
0x1a77   :  { %8116 = vmatprep.subr.bf16.mxu0 %v9603_v1 }
0x1a7a   :  { %8117 = vmatpush1.bf16.msra.mxu0 %v12546_v60 }
0x1a7b   :  { %8118 = vmatprep.subr.bf16.mxu0 %v9603_v1 }
0x1a7e   :  { %8119 = vmatpush1.bf16.msra.mxu0 %v12600_v38 }
0x1a7f   :  { %8120 = vmatprep.subr.bf16.mxu0 %v9603_v1 }
0x1a82   :  { %8121 = vmatpush1.bf16.msra.mxu0 %v12607_v42 }
0x1a83   :  { %8122 = vmatprep.subr.bf16.mxu0 %v9603_v1 }
0x1a86   :  { %8123 = vmatpush1.bf16.msra.mxu0 %v12614_v53 }
0x1a87   :  { %8124 = vmatprep.subr.bf16.mxu0 %v9603_v1 }
0x1a8a   :  { %8125 = vmatpush1.bf16.msra.mxu0 %v12621_v11 }
0x1a8b   :  { %8126 = vmatprep.subr.bf16.mxu0 %v9603_v1 }
0x1a8e   :  { %8127 = vmatpush1.bf16.msra.mxu0 %v12661_v22 }
0x1a8f   :  { %8128 = vmatprep.subr.bf16.mxu0 %v9603_v1 }
0x1a92   :  { %8129 = vmatpush1.bf16.msra.mxu0 %v9762_v25 }
0x1a93   :  { %8236 = vmatprep.subr.bf16.mxu0 %v9603_v1 }
0x1a95   :  { %8143 = vmatmul.mubr.bf16.vlgmr.msra.gmra.mrb[236].mxu0 %v8098_v27  ;;  %v9508_v27 = vld [vmem:[%s13061_s5 + $0x18] sm:$0xff]  }
0x1a96   :  { %8237 = vmatpush1.bf16.msra.mxu0 %v12524_v57  ;;  %9180 = vmatprep.mubr.msk.bf16.mxu0 %vm142_vm0, %v8231_v41 }
0x1a97   :  { %8238 = vmatprep.subr.bf16.mxu0 %v9603_v1 }
0x1a9a   :  { %8239 = vmatpush1.bf16.msra.mxu0 %v12532_v58 }
0x1a9b   :  { %8240 = vmatprep.subr.bf16.mxu0 %v9603_v1 }
0x1a9e   :  { %8241 = vmatpush1.bf16.msra.mxu0 %v12539_v59 }
0x1a9f   :  { %8242 = vmatprep.subr.bf16.mxu0 %v9603_v1 }
0x1aa2   :  { %8243 = vmatpush1.bf16.msra.mxu0 %v12546_v60 }
0x1aa3   :  { %8244 = vmatprep.subr.bf16.mxu0 %v9603_v1 }
0x1aa6   :  { %8245 = vmatpush1.bf16.msra.mxu0 %v12600_v38 }
0x1aa7   :  { %8246 = vmatprep.subr.bf16.mxu0 %v9603_v1 }
0x1aaa   :  { %8247 = vmatpush1.bf16.msra.mxu0 %v12607_v42 }
0x1aab   :  { %8248 = vmatprep.subr.bf16.mxu0 %v9603_v1 }
0x1aae   :  { %8249 = vmatpush1.bf16.msra.mxu0 %v12614_v53 }
0x1aaf   :  { %8250 = vmatprep.subr.bf16.mxu0 %v9603_v1 }
0x1ab2   :  { %8251 = vmatpush1.bf16.msra.mxu0 %v12621_v11 }
0x1ab3   :  { %8252 = vmatprep.subr.bf16.mxu0 %v9603_v1 }
0x1ab6   :  { %8253 = vmatpush1.bf16.msra.mxu0 %v12661_v22 }
0x1ab7   :  { %8254 = vmatprep.subr.bf16.mxu0 %v9603_v1 }
0x1aba   :  { %8255 = vmatpush1.bf16.msra.mxu0 %v9762_v25 }
0x1abb   :  { %8377 = vmatprep.subr.bf16.mxu0 %v9603_v1 }
0x1abd   :  { %8269 = vmatmul.mubr.bf16.vlgmr.msra.gmra.mrb[240].mxu0 %v8224_v40 }
0x1abe   :  { %8378 = vmatpush1.bf16.msra.mxu0 %v12524_v57 }
0x1abf   :  { %8379 = vmatprep.subr.bf16.mxu0 %v9603_v1 }
0x1ac2   :  { %8380 = vmatpush1.bf16.msra.mxu0 %v12532_v58 }
0x1ac3   :  { %8381 = vmatprep.subr.bf16.mxu0 %v9603_v1 }
0x1ac4   :  { %v8074_v7 = vpop.f32.mrb[232].mxu1 }
0x1ac5   :  { %v8076_v8 = vpop.f32.mrb[233].mxu1  ;;  %v8075_v32 = vadd.f32 %v12503_v43, %v8074_v7 }
0x1ac6   :  { %v8077_v4 = vpop.f32.mrb[234].mxu1  ;;  %8382 = vmatpush1.bf16.msra.mxu0 %v12539_v59 }
0x1ac7   :  { %v8078_v9 = vpop.f32.mrb[235].mxu1  ;;  %8383 = vmatprep.subr.bf16.mxu0 %v9603_v1  ;;  %v8080_v16 = vmax.f32 %v8075_v32, 0.0  ;;  %v9513_v32 = vld [vmem:[%s13063_s7] sm:$0xff]  }
0x1ac8   :  { %v9578_v9 = vld [vmem:[%s13058_s2] ss:$0 sm:$0xff] }
0x1aca   :  { %8384 = vmatpush1.bf16.msra.mxu0 %v12546_v60 }
0x1acb   :  { %8385 = vmatprep.subr.bf16.mxu0 %v9603_v1 }
0x1ace   :  { %8386 = vmatpush1.bf16.msra.mxu0 %v12600_v38 }
0x1acf   :  { %8387 = vmatprep.subr.bf16.mxu0 %v9603_v1 }
0x1ad2   :  { %8388 = vmatpush1.bf16.msra.mxu0 %v12607_v42 }
0x1ad3   :  { %8389 = vmatprep.subr.bf16.mxu0 %v9603_v1 }
0x1ad6   :  { %8390 = vmatpush1.bf16.msra.mxu0 %v12614_v53 }
0x1ad7   :  { %8391 = vmatprep.subr.bf16.mxu0 %v9603_v1 }
0x1ada   :  { %8392 = vmatpush1.bf16.msra.mxu0 %v12621_v11 }
0x1adb   :  { %8393 = vmatprep.subr.bf16.mxu0 %v9603_v1 }
0x1ade   :  { %8394 = vmatpush1.bf16.msra.mxu0 %v12661_v22 }
0x1adf   :  { %8395 = vmatprep.subr.bf16.mxu0 %v9603_v1 }
0x1ae2   :  { %8396 = vmatpush1.bf16.msra.mxu0 %v9762_v25 }
0x1ae3   :  { %9423 = vmatprep.subr.bf16.mxu0 %v9605_v51 }
0x1b18   :  { %v7863_v12 = vpop.f32.mrb[228].mxu0 }
0x1b19   :  { %v12881_v28 = vadd.f32 %v7863_v12, %v12763_v26  ;;  %v9415_v23 = vpop.f32.mrb[229].mxu0  ;;  %v9185_v26 = vld.sshfl [vmem:[%s13056_s0 + $0xc4] sm:$0x11 pattern:$0x75316420] }
0x1b1a   :  { %v7866_v34 = vpop.f32.mrb[230].mxu0  ;;  %v8358_v30 = vcombine.high %v9185_v26, %v9185_v26  ;;  %v8365_v24 = vrot.slane %v9185_v26, %v9707_v15 }
0x1b1b   :  { %v9416_v13 = vpop.f32.mrb[231].mxu0 }
0x1b1c   :  { %v8372_v17 = vrot.slane %v8358_v30, %v9707_v15 }
0x1b1e   :  { %9186 = vmatprep.mubr.msk.bf16.mxu0 %vm142_vm0, %v8372_v17 }
0x1b1f   :  { %8410 = vmatmul.mubr.bf16.vlgmr.msra.gmra.mrb[244].mxu0 %v8365_v24 }
0x1b20   :  { %9425 = vmatprep.mubr.msk.bf16.mxu0 %vm9606_vm2, %v9605_v51 }
0x1b40   :  { %v8003_v18 = vpop.f32.mrb[232].mxu0 }
0x1b41   :  { %v8004_v31 = vadd.f32 %v12503_v43, %v8003_v18  ;;  %v8005_v39 = vpop.f32.mrb[233].mxu0 }
0x1b42   :  { %v8006_v36 = vpop.f32.mrb[234].mxu0 }
0x1b43   :  { %v8009_v3 = vmax.f32 %v8004_v31, 0.0  ;;  %v8007_v45 = vpop.f32.mrb[235].mxu0 }
0x1b44   :  { %v9512_v45 = vld [vmem:[%s13061_s5 + $0x38] ss:$0 sps:$4 sm:$0xff]  }
0x1b45   :  { %v8010_v5 = vmax.f32 %v7939_v14, %v8009_v3  ;;  %v9511_v3 = vld [vmem:[%s13061_s5 + $0x30] sm:$0xff]  }
0x1b68   :  { %v8144_v33 = vpop.f32.mrb[236].mxu0 }
0x1b69   :  { %v8145_v47 = vadd.f32 %v12503_v43, %v8144_v33  ;;  %v8146_v19 = vpop.f32.mrb[237].mxu0  ;;  %v9188_v43 = vld.sshfl [vmem:[%s13056_s0 + $0xc6] sm:$0x11 pattern:$0x75316420]  ;;  %v9514_v33 = vld [vmem:[%s13063_s7 + $0x8] sm:$0xff]  }
0x1b6a   :  { %v8147_v20 = vpop.f32.mrb[238].mxu0  ;;  %v8428_v37 = vcombine.high %v9188_v43, %v9188_v43 }
0x1b6b   :  { %v8150_v48 = vmax.f32 %v8145_v47, 0.0  ;;  %v8148_v49 = vpop.f32.mrb[239].mxu0  ;;  %v9516_v47 = vld [vmem:[%s13063_s7 + $0x18] sm:$0xff]  }
0x1b6c   :  { %v8442_v35 = vrot.slane %v8428_v37, %v9707_v15 }
0x1b6d   :  { %v8151_v52 = vmax.f32 %v8080_v16, %v8150_v48  ;;  %v9515_v16 = vld [vmem:[%s13063_s7 + $0x10] sm:$0xff]  }
0x1b6f   :  { %v8152_v54 = vmax.f32 %v8010_v5, %v8151_v52  ;;  %v8627_v5 = vsel %vm8625_vm4, %v9512_v45, 0 }
0x1b71   :  { %v8153_v56 = vpack.c.bf16 %v8152_v54, %v8152_v54 }
0x1b73   :  { %9420 = vmatmul.mubr.msk.bf16.vlgmr.msra.gmra.mrb[236].mxu1 %vm700_vm3, %v8153_v56  ;;  %v9517_v56 = vld [vmem:[%s13063_s7 + $0x20] sm:$0xff]  }
0x1b74   :  { %8307 = vmatpush1.bf16.msra.mxu1 %v12524_v57  ;;  %9183 = vmatprep.mubr.msk.bf16.mxu1 %vm142_vm0, %v8301_v55 }
0x1b75   :  { %8308 = vmatprep.subr.bf16.mxu1 %v9603_v1 }
0x1b78   :  { %8309 = vmatpush1.bf16.msra.mxu1 %v12532_v58 }
0x1b79   :  { %8310 = vmatprep.subr.bf16.mxu1 %v9603_v1 }
0x1b7c   :  { %8311 = vmatpush1.bf16.msra.mxu1 %v12539_v59 }
0x1b7d   :  { %8312 = vmatprep.subr.bf16.mxu1 %v9603_v1 }
0x1b80   :  { %8313 = vmatpush1.bf16.msra.mxu1 %v12546_v60 }
0x1b81   :  { %8314 = vmatprep.subr.bf16.mxu1 %v9603_v1 }
0x1b84   :  { %8315 = vmatpush1.bf16.msra.mxu1 %v12600_v38 }
0x1b85   :  { %8316 = vmatprep.subr.bf16.mxu1 %v9603_v1 }
0x1b88   :  { %8317 = vmatpush1.bf16.msra.mxu1 %v12607_v42 }
0x1b89   :  { %8318 = vmatprep.subr.bf16.mxu1 %v9603_v1 }
0x1b8c   :  { %8319 = vmatpush1.bf16.msra.mxu1 %v12614_v53 }
0x1b8d   :  { %8320 = vmatprep.subr.bf16.mxu1 %v9603_v1 }
0x1b90   :  { %8321 = vmatpush1.bf16.msra.mxu1 %v12621_v11 }
0x1b91   :  { %8322 = vmatprep.subr.bf16.mxu1 %v9603_v1 }
0x1b94   :  { %8323 = vmatpush1.bf16.msra.mxu1 %v12661_v22 }
0x1b95   :  { %8324 = vmatprep.subr.bf16.mxu1 %v9603_v1 }
0x1b98   :  { %8325 = vmatpush1.bf16.msra.mxu1 %v9762_v25 }
0x1b99   :  { %8447 = vmatprep.subr.bf16.mxu1 %v9603_v1 }
0x1b9b   :  { %8339 = vmatmul.mubr.bf16.vlgmr.msra.gmra.mrb[240].mxu1 %v8294_v61  ;;  %v9195_v61 = vld [vmem:[%s13062_s6] ss:$0 sm:$0xff] }
0x1b9c   :  { %8448 = vmatpush1.bf16.msra.mxu1 %v12524_v57  ;;  %9189 = vmatprep.mubr.msk.bf16.mxu1 %vm142_vm0, %v8442_v35  ;;  %v8435_v57 = vrot.slane %v9188_v43, %v9707_v15  ;;  %v9505_v15 = vld [vmem:[%s13061_s5] sm:$0xff]   ;;  %v9518_v43 = vld [vmem:[%s13063_s7 + $0x28] ss:$0 sps:$4 sm:$0x33]   ;;  %s9607_s7 = smov [#allocation2]  }
0x1b9d   :  { %8449 = vmatprep.subr.bf16.mxu1 %v9603_v1  ;;  %v8728_v37 = vsel %vm8726_vm6, %v9518_v43, 0  ;;  %s8778_s26 = sshll.u32 %s9607_s7, 4  ;;  %s8779_s26 = int_to_ptr.vmem [resolvable:$true] %s8778_s26 }
0x1b9e   :  { %s9579_s6 = scalar_lea.vmem %s8779_s26, 32  ;;  %p9584_p1 = scmp.lt.s32.totalorder %s8779_s26, %s8779_s26 }
0x1b9f   :  { %p9580_p0 = scmp.ne.s32.totalorder %s8779_s26, %s9579_s6  ;;  %p9585_p2 = scmp.lt.s32.totalorder %s9579_s6, %s9579_s6 }
0x1ba0   :  { %8450 = vmatpush1.bf16.msra.mxu1 %v12532_v58  ;;  %v8270_v58 = vpop.f32.mrb[240].mxu0 }
0x1ba1   :  { %8451 = vmatprep.subr.bf16.mxu1 %v9603_v1  ;;  %v8271_v10 = vadd.f32 %v9578_v9, %v8270_v58  ;;  %p9586_p3 = por %p9585_p2, %p9584_p1 }
0x1ba3   :  { %v8276_v6 = vmax.f32 %v8271_v10, 0.0  ;;  %p9587_p4 = pnand %p9586_p3, %p9580_p0 }
0x1ba4   :  { %8452 = vmatpush1.bf16.msra.mxu1 %v12539_v59  ;;  %v8272_v59 = vpop.f32.mrb[241].mxu0 }
0x1ba5   :  { %8453 = vmatprep.subr.bf16.mxu1 %v9603_v1 }
0x1ba8   :  { %8454 = vmatpush1.bf16.msra.mxu1 %v12546_v60  ;;  %v8273_v60 = vpop.f32.mrb[242].mxu0 }
0x1ba9   :  { %8455 = vmatprep.subr.bf16.mxu1 %v9603_v1 }
0x1bac   :  { %8456 = vmatpush1.bf16.msra.mxu1 %v12600_v38  ;;  %v8274_v38 = vpop.f32.mrb[243].mxu0 }
0x1bad   :  { %8457 = vmatprep.subr.bf16.mxu1 %v9603_v1 }
0x1bb0   :  { %8458 = vmatpush1.bf16.msra.mxu1 %v12607_v42 }
0x1bb1   :  { %8459 = vmatprep.subr.bf16.mxu1 %v9603_v1 }
0x1bb4   :  { %8460 = vmatpush1.bf16.msra.mxu1 %v12614_v53 }
0x1bb5   :  { %8461 = vmatprep.subr.bf16.mxu1 %v9603_v1 }
0x1bb8   :  { %8462 = vmatpush1.bf16.msra.mxu1 %v12621_v11 }
0x1bb9   :  { %8463 = vmatprep.subr.bf16.mxu1 %v9603_v1 }
0x1bbc   :  { %8464 = vmatpush1.bf16.msra.mxu1 %v12661_v22 }
0x1bbd   :  { %8465 = vmatprep.subr.bf16.mxu1 %v9603_v1  ;;  %v9504_v1 = vld [vmem:[%s13059_s3 + $0xc0] sm:$0xff]  }
0x1bbe   :  { %9424 = vmatpush3.bf16.msra.mxu0 %v9504_v1 }
0x1bbf   :  { %9449 = vmatprep.subr.bf16.mxu0 %v9605_v51 }
0x1bc0   :  { %8466 = vmatpush1.bf16.msra.mxu1 %v9762_v25  ;;  %v9506_v25 = vld [vmem:[%s13061_s5 + $0x8] sm:$0xff]  }
0x1bc1   :  { %9429 = vmatprep.subr.bf16.mxu1 %v9605_v51 }
0x1bc3   :  { %8480 = vmatmul.mubr.bf16.vlgmr.msra.gmra.mrb[244].mxu1 %v8435_v57 }
0x1bc4   :  { %9445 = vmatprep.mubr.msk.bf16.mxu1 %vm9606_vm2, %v9605_v51  ;;  %9430 = vmatpush3.bf16.msra.mxu1 %v9505_v15 }
0x1bc5   :  { %9431 = vmatprep.subr.bf16.mxu1 %v9605_v51 }
0x1bc8   :  { %9432 = vmatpush3.bf16.msra.mxu1 %v9506_v25 }
0x1bc9   :  { %9433 = vmatprep.subr.bf16.mxu1 %v9605_v51 }
0x1bcc   :  { %9434 = vmatpush3.bf16.msra.mxu1 %v9507_v46 }
0x1bcd   :  { %9435 = vmatprep.subr.bf16.mxu1 %v9605_v51 }
0x1bd0   :  { %9436 = vmatpush3.bf16.msra.mxu1 %v9508_v27 }
0x1bd1   :  { %9437 = vmatprep.subr.bf16.mxu1 %v9605_v51 }
0x1bd4   :  { %9438 = vmatpush3.bf16.msra.mxu1 %v9509_v29 }
0x1bd5   :  { %9439 = vmatprep.subr.bf16.mxu1 %v9605_v51 }
0x1bd8   :  { %9440 = vmatpush3.bf16.msra.mxu1 %v9510_v62 }
0x1bd9   :  { %9441 = vmatprep.subr.bf16.mxu1 %v9605_v51 }
0x1bdc   :  { %9442 = vmatpush3.bf16.msra.mxu1 %v9511_v3 }
0x1bdd   :  { %9443 = vmatprep.subr.bf16.mxu1 %v9605_v51 }
0x1be0   :  { %9444 = vmatpush3.bf16.msra.mxu1 %v8627_v5 }
0x1bf2   :  { %v8411_v42 = vpop.f32.mrb[244].mxu0 }
0x1bf3   :  { %v8413_v53 = vpop.f32.mrb[245].mxu0  ;;  %v8412_v26 = vadd.f32 %v9578_v9, %v8411_v42 }
0x1bf4   :  { %v8414_v11 = vpop.f32.mrb[246].mxu0 }
0x1bf5   :  { %v8415_v22 = vpop.f32.mrb[247].mxu0  ;;  %v8417_v0 = vmax.f32 %v8412_v26, 0.0 }
0x1c46   :  { %v8200_v63 = vpop.f32.mrb[236].mxu1 }
0x1c47   :  { %v8206_v2 = vadd.f32 %v8200_v63, %v12881_v28  ;;  %v9421_v7 = vpop.f32.mrb[237].mxu1 }
0x1c48   :  { %v8203_v8 = vpop.f32.mrb[238].mxu1 }
0x1c49   :  { %v9422_v4 = vpop.f32.mrb[239].mxu1 }
0x1c6e   :  { %v8340_v44 = vpop.f32.mrb[240].mxu1 }
0x1c6f   :  { %v8341_v41 = vadd.f32 %v9578_v9, %v8340_v44  ;;  %v8342_v40 = vpop.f32.mrb[241].mxu1 }
0x1c70   :  { %v8343_v12 = vpop.f32.mrb[242].mxu1 }
0x1c71   :  { %v8346_v23 = vmax.f32 %v8341_v41, 0.0  ;;  %v8344_v34 = vpop.f32.mrb[243].mxu1 }
0x1c73   :  { %v8347_v13 = vmax.f32 %v8276_v6, %v8346_v23 }
0x1c96   :  { %v8481_v30 = vpop.f32.mrb[244].mxu1 }
0x1c97   :  { %v8482_v28 = vadd.f32 %v9578_v9, %v8481_v30  ;;  %v8483_v17 = vpop.f32.mrb[245].mxu1 }
0x1c98   :  { %v8484_v24 = vpop.f32.mrb[246].mxu1 }
0x1c99   :  { %v8487_v18 = vmax.f32 %v8482_v28, 0.0  ;;  %v8485_v14 = vpop.f32.mrb[247].mxu1 }
0x1c9b   :  { %v8488_v31 = vmax.f32 %v8417_v0, %v8487_v18 }
0x1c9d   :  { %v8489_v39 = vmax.f32 %v8347_v13, %v8488_v31 }
0x1c9f   :  { %v8490_v36 = vpack.c.bf16 %v8489_v39, %v8489_v39 }
0x1ca1   :  { %9426 = vmatmul.mubr.msk.bf16.vlgmr.msra.gmra.mrb[248].mxu0 %vm700_vm3, %v8490_v36 }
0x1ca2   :  { %9461 = vmatprep.mubr.msk.bf16.mxu0 %vm9606_vm2, %v9605_v51  ;;  %9450 = vmatpush3.bf16.msra.mxu0 %v9513_v32 }
0x1ca3   :  { %9451 = vmatprep.subr.bf16.mxu0 %v9605_v51 }
0x1ca6   :  { %9452 = vmatpush3.bf16.msra.mxu0 %v9514_v33 }
0x1ca7   :  { %9453 = vmatprep.subr.bf16.mxu0 %v9605_v51 }
0x1caa   :  { %9454 = vmatpush3.bf16.msra.mxu0 %v9515_v16 }
0x1cab   :  { %9455 = vmatprep.subr.bf16.mxu0 %v9605_v51 }
0x1cae   :  { %9456 = vmatpush3.bf16.msra.mxu0 %v9516_v47 }
0x1caf   :  { %9457 = vmatprep.subr.bf16.mxu0 %v9605_v51 }
0x1cb2   :  { %9458 = vmatpush3.bf16.msra.mxu0 %v9517_v56 }
0x1cb3   :  { %9459 = vmatprep.subr.bf16.mxu0 %v9605_v51  ;;  %v9205_v51 = vld [vmem:[%s13064_s8] ss:$0 sm:$0xff] }
0x1cb6   :  { %9460 = vmatpush3.bf16.msra.mxu0 %v8728_v37 }
0x1d74   :  { %v8537_v19 = vpop.f32.mrb[248].mxu0 }
0x1d75   :  { %v8543_v20 = vadd.f32 %v8537_v19, %v8206_v2  ;;  %v9427_v48 = vpop.f32.mrb[249].mxu0 }
0x1d76   :  { %v8540_v49 = vpop.f32.mrb[250].mxu0 }
0x1d77   :  { %v8551_v50 = vadd.f32 %v9194_v21, %v8543_v20  ;;  %v9428_v52 = vpop.f32.mrb[251].mxu0 }
0x1d79   :  { %v8552_v54 = vmax.f32 %v8551_v50, 0.0 }
0x1d7b   :  { %v8553_v55 = vpack.c.bf16 %v8552_v54, %v8552_v54 }
0x1d7d   :  { %9446 = vmatmul.mubr.msk.bf16.vlgmr.msra.gmra.mrb[248].mxu1 %vm8621_vm5, %v8553_v55 }
0x1e50   :  { %v8663_v35 = vpop.f32.mrb[248].mxu1 }
0x1e51   :  { %v8664_v57 = vadd.f32 %v9195_v61, %v8663_v35  ;;  %v9447_v58 = vpop.f32.mrb[249].mxu1 }
0x1e52   :  { %v8666_v59 = vpop.f32.mrb[250].mxu1 }
0x1e53   :  { %v8669_v60 = vmax.f32 %v8664_v57, 0.0  ;;  %v9448_v38 = vpop.f32.mrb[251].mxu1 }
0x1e55   :  { %v8670_v42 = vpack.c.bf16 %v8669_v60, %v8669_v60 }
0x1e57   :  { %9462 = vmatmul.mubr.msk.bf16.vlgmr.msra.gmra.mrb[252].mxu0 %vm8722_vm7, %v8670_v42 }
0x1f2a   :  { %v8764_v53 = vpop.f32.mrb[252].mxu0 }
0x1f2b   :  { %v8765_v11 = vadd.f32 %v9205_v51, %v8764_v53  ;;  %v9463_v22 = vpop.f32.mrb[253].mxu0 }
0x1f2c   :  { %v8767_v1 = vpop.f32.mrb[254].mxu0 }
0x1f2d   :  { %v9464_v15 = vpop.f32.mrb[255].mxu0  ;;  %8771 = vst.msk [vmem:[#allocation2] sm:$0x3] %vm8770_vm8, %v8765_v11 }
0x1f2e   :  { %9590 = shalt.err (!%p9587_p4)
}
0x1f2f   :  { %s9591_s8 = scalar_lea.hbm %s13065_s9, 32 }
0x1f30   :  { %p9592_p5 = scmp.ne.s32.totalorder %s13065_s9, %s9591_s8  ;;  %p9595_p6 = scmp.lt.u32.totalorder %s9591_s8, %s13065_s9 }
0x1f32   :  { %p9597_p7 = pnand %p9595_p6, %p9592_p5 }
0x1f34   :  { %9600 = shalt.err (!%p9597_p7)
}
0x1f35   :  { %8781 = dma.vmem_to_hbm [thread:$0]  %s8779_s26, 32, %s13065_s9, [#allocation3]  }
0x1f36   :  { %9601 = dma.done.wait [#allocation3], 32  }
0x1f37   :  { %9602 = vsyncadd [#allocation3], 4294967264 }
0x1f38   :  { %8785 = vsyncpa [#allocation3], 1 }

</bundles_post_ra>
